<compile_context>
chip_gen: v6e
topology: v6e:2x2x1
jax: 0.10.0
libtpu: 0.0.40
codegen_flags: <defaults>
</compile_context>

<pallas_src>
import functools

import jax
import jax.numpy as jnp
from jax.experimental import pallas as pl
from jax.experimental.pallas import tpu as pltpu


def _num_tensorcores_per_chip():
    """1 TensorCore per chip on v5e/v6e, 2 on v7x. Falls back to 1 if detection fails."""
    try:
        kind = jax.devices()[0].device_kind.lower().replace(" ", "")
    except Exception:
        return 1
    return 2 if ("v7" in kind or "tpu7" in kind) else 1


def _choose_block_b(B, hw, hw2, num_tc, cap=8):
    """Batch elements per grid step.

    Single-TC chips (v5e/v6e): largest valid block (fewest ~0.35us/step grid overheads).
    Multi-TC chips (v7x): largest valid block that still leaves a multiple of `num_tc`
    grid steps so every TensorCore gets work.
    `cap` bounds the unrolled in-kernel batch loop (code size / live VMEM values).
    """
    def valid(bb):
        if B % bb:
            return False
        if bb == B:            # full-array block: (8,128) rule satisfied by "equal full dims"
            return True
        # 2-D (bb*hw, C) input blocks: the second-to-last block dim must be divisible by 8.
        return (bb * hw) % 8 == 0 and (bb * hw2) % 8 == 0

    hi = min(B, cap)
    if num_tc > 1:
        for bb in range(hi, 0, -1):
            if valid(bb) and (B // bb) % num_tc == 0:
                return bb
    for bb in range(hi, 0, -1):
        if valid(bb):
            return bb
    return B


def _cross_attn_kernel(ego_ref, exo_ref,
                       wq_ref, bq_ref, wkv_ref, bkv_ref,
                       gamma_ref, beta_ref,
                       out_ref, *, bblk, hw, hw2, out_dim, eps, matmul_dtype):
    md = matmul_dtype
    wq = wq_ref[...]        # (C, D)  in matmul_dtype, softmax scale folded in
    wkv = wkv_ref[...]      # (C, 2D) in matmul_dtype: [Wk^T | Wv^T]
    bq = bq_ref[...]        # (1, D)  f32, scale folded in
    bkv = bkv_ref[...]      # (1, 2D) f32
    gamma = gamma_ref[...]  # (C, 1)  f32
    beta = beta_ref[...]    # (C, 1)  f32

    ego_blk = ego_ref[...]                      # (bblk*hw,  C)  input dtype
    exo_blk = exo_ref[...]                      # (bblk*hw2, C)

    # Hoisted projections: one MXU weight push + one bias pass per grid step
    # (instead of per batch element).  f32 accumulation, single cast to the matmul dtype.
    q_all = (jnp.dot(ego_blk.astype(md), wq,
                     preferred_element_type=jnp.float32) + bq).astype(md)     # (bblk*hw,  D)
    kv_all = (jnp.dot(exo_blk.astype(md), wkv,
                      preferred_element_type=jnp.float32) + bkv).astype(md)   # (bblk*hw2, 2D)

    # Fully unrolled per-batch loop (bblk small): cross-batch visibility lets the scheduler
    # overlap EUP exp of batch i with the MXU matmuls of batch i+1.
    for bi in range(bblk):
        r, r2 = bi * hw, bi * hw2
        q = q_all[r:r + hw, :]                  # (hw,  D)
        k = kv_all[r2:r2 + hw2, :out_dim]       # (hw2, D)
        v = kv_all[r2:r2 + hw2, out_dim:]       # (hw2, D)

        # Scores: contract the channel dim of both operands (A @ B^T on the MXU).
        s = jax.lax.dot_general(q, k, (((1,), (1,)), ((), ())),
                                preferred_element_type=jnp.float32)           # (hw, hw2)

        # Numerically-stable softmax; the row normalization is applied after P@V
        # (scales an (hw, C) tile instead of (hw, hw2)) with the EUP approx reciprocal.
        p = jnp.exp(s - jnp.max(s, axis=-1, keepdims=True))
        inv = pl.reciprocal(jnp.sum(p, axis=-1, keepdims=True), approx=True)
        out = jnp.dot(p.astype(md), v, preferred_element_type=jnp.float32) * inv  # (hw, C)

        # Residual in the natural layout, then ONE XLU transpose so LayerNorm and the
        # store run in the lane-dense (C, hw) layout (fewer vregs per elementwise pass,
        # and the channels-first store needs no further transpose).
        x = (out + ego_blk[r:r + hw, :]).T                                    # (C, hw) f32
        mean = jnp.mean(x, axis=0, keepdims=True)                             # (1, hw)
        var = jnp.mean(jnp.square(x - mean), axis=0, keepdims=True)           # (1, hw)
        y = (x - mean) * jax.lax.rsqrt(var + eps) * gamma + beta              # (C, hw)
        out_ref[bi] = y.astype(out_ref.dtype)


def cross_attention_pallas(ego, exo, params, *, eps=1e-5,
                           matmul_dtype=jnp.bfloat16, block_b=None,
                           num_tensorcores=None, use_core_parallel=False):
    """ego: (B, 196, C), exo: (B, hw2, C)  ->  (B, C, 14, 14).

    matmul_dtype=jnp.bfloat16 (default) feeds the MXU bf16 operands with f32 accumulation;
    this is native on v5e, v6e and v7x alike.  Pass jnp.float32 for bit-tighter validation.
    use_core_parallel=True requests CORE_PARALLEL grid semantics (for 2-TensorCore v7x).
    """
    B, hw, C = ego.shape
    hw2 = exo.shape[1]
    assert exo.shape[0] == B and exo.shape[2] == C, exo.shape
    assert hw == 14 * 14, "module's final .view(B, C, 14, 14) requires hw == 196"
    out_dim = params["wq"].shape[0]
    assert out_dim == C, "residual `out + ego` requires out_dim == in_dim"
    scale = float(out_dim) ** (-0.5)

    # PyTorch Linear stores (out_dim, in_dim); y = x @ W.T + b.
    # Fold the softmax scale into the Q projection, fuse the K and V weights, and pre-cast
    # the weights to the matmul dtype (zero in-kernel cast cost).
    wq_t = (params["wq"].T * scale).astype(matmul_dtype)                      # (C, D)
    bq = (params["bq"] * scale).reshape(1, out_dim).astype(jnp.float32)       # (1, D)
    wkv_t = jnp.concatenate([params["wk"].T, params["wv"].T], 1).astype(matmul_dtype)
    bkv = jnp.concatenate([params["bk"], params["bv"]]).reshape(1, 2 * out_dim).astype(jnp.float32)
    gamma = params["gamma"].reshape(C, 1).astype(jnp.float32)                 # (C, 1)
    beta = params["beta"].reshape(C, 1).astype(jnp.float32)                   # (C, 1)

    num_tc = _num_tensorcores_per_chip() if num_tensorcores is None else num_tensorcores
    if block_b is None:
        block_b = _choose_block_b(B, hw, hw2, num_tc)
    assert B % block_b == 0, (B, block_b)
    assert block_b == B or ((block_b * hw) % 8 == 0 and (block_b * hw2) % 8 == 0), \
        "block_b*hw must be a multiple of 8 (or block_b == B)"
    num_steps = B // block_b

    if use_core_parallel and num_tc > 1 and num_steps > 1 and num_steps % num_tc == 0:
        dim_sem = (pltpu.CORE_PARALLEL,)      # shard the batch grid across v7x's two TCs
    else:
        dim_sem = ("parallel",) if num_steps > 1 else ("arbitrary",)

    kernel = functools.partial(
        _cross_attn_kernel, bblk=block_b, hw=hw, hw2=hw2, out_dim=out_dim,
        eps=eps, matmul_dtype=matmul_dtype)

    def _full(arr):
        nd = arr.ndim
        return pl.BlockSpec(arr.shape, lambda b, _n=nd: (0,) * _n)

    # Feed ego/exo as 2-D (B*hw, C) slabs (free metadata reshape) so the kernel can run the
    # Q / fused-KV projections as one big 2-D MXU matmul per grid step.
    ego2 = ego.reshape(B * hw, C)
    exo2 = exo.reshape(B * hw2, C)

    out_bchw = pl.pallas_call(
        kernel,
        out_shape=jax.ShapeDtypeStruct((B, C, hw), ego.dtype),
        grid_spec=pltpu.PrefetchScalarGridSpec(
            num_scalar_prefetch=0,
            grid=(num_steps,),
            in_specs=[
                pl.BlockSpec((block_b * hw, C), lambda b: (b, 0)),    # ego slab
                pl.BlockSpec((block_b * hw2, C), lambda b: (b, 0)),   # exo slab
                _full(wq_t), _full(bq), _full(wkv_t), _full(bkv),
                _full(gamma), _full(beta),
            ],
            out_specs=pl.BlockSpec((block_b, C, hw), lambda b: (b, 0, 0)),
        ),
        compiler_params=pltpu.CompilerParams(dimension_semantics=dim_sem),
    )(ego2, exo2, wq_t, bq, wkv_t, bkv, gamma, beta)

    # The transpose to channels-first happened in-kernel; only a free reshape remains.
    # (The last dim could optionally be padded to 256 for unmasked stores — low priority
    #  at hw=196 / C=32.)
    return out_bchw.reshape(B, C, 14, 14)


def cross_attention_ref(ego, exo, params, *, eps=1e-5):
    """Pure-JAX reference mirroring the PyTorch forward."""
    B, hw, C = ego.shape
    q = ego @ params["wq"].T + params["bq"]
    k = exo @ params["wk"].T + params["bk"]
    v = exo @ params["wv"].T + params["bv"]
    scale = float(params["wq"].shape[0]) ** (-0.5)
    att = jnp.einsum("bqc,bkc->bqk", q, k) * scale
    att = jax.nn.softmax(att, axis=-1)
    out = jnp.einsum("bqk,bkc->bqc", att, v)
    x = out + ego
    mean = jnp.mean(x, axis=-1, keepdims=True)
    var = jnp.mean((x - mean) ** 2, axis=-1, keepdims=True)
    y = (x - mean) / jnp.sqrt(var + eps) * params["gamma"] + params["beta"]
    return y.transpose(0, 2, 1).reshape(B, C, 14, 14)


def init_params(key, in_dim, out_dim):
    ks = jax.random.split(key, 6)
    bound = 1.0 / (in_dim ** 0.5)

    def lin(kw, kb):
        w = jax.random.uniform(kw, (out_dim, in_dim), jnp.float32, -bound, bound)
        b = jax.random.uniform(kb, (out_dim,), jnp.float32, -bound, bound)
        return w, b

    wq, bq = lin(ks[0], ks[1])
    wk, bk = lin(ks[2], ks[3])
    wv, bv = lin(ks[4], ks[5])
    return {
        "wq": wq, "bq": bq,
        "wk": wk, "bk": bk,
        "wv": wv, "bv": bv,
        "gamma": jnp.ones((in_dim,), jnp.float32),
        "beta": jnp.zeros((in_dim,), jnp.float32),
    }


if __name__ == "__main__":
    key = jax.random.PRNGKey(0)
    B, C = 4, 32                # small batch / channels
    hw = 14 * 14                # forced by the module's final view(B, C, 14, 14)
    hw_exo = 14 * 14

    k_ego, k_exo, k_par = jax.random.split(key, 3)
    ego = jax.random.normal(k_ego, (B, hw, C), jnp.float32)
    exo = jax.random.normal(k_exo, (B, hw_exo, C), jnp.float32)
    params = init_params(k_par, in_dim=C, out_dim=C)

    ref = cross_attention_ref(ego, exo, params)

    # Default path: bf16 MXU inputs with f32 accumulation (valid on v5e/v6e/v7x alike).
    out_bf16 = jax.block_until_ready(cross_attention_pallas(ego, exo, params))
    assert out_bf16.shape == (B, C, 14, 14), out_bf16.shape
    err_bf16 = float(jnp.max(jnp.abs(out_bf16 - ref)))
    assert jnp.allclose(out_bf16, ref, rtol=5e-2, atol=7.5e-2), err_bf16

    # f32 matmul path for tight validation (only the EUP approx-reciprocal remains).
    out_f32 = jax.block_until_ready(
        cross_attention_pallas(ego, exo, params, matmul_dtype=jnp.float32))
    err_f32 = float(jnp.max(jnp.abs(out_f32 - ref)))
    assert jnp.allclose(out_f32, ref, rtol=2e-3, atol=2e-3), err_f32

    print("KERNEL_OK")
</pallas_src>

<mosaic_0001>
module attributes {stable_mosaic.version = 11 : i64} {
  func.func @_cross_attn_kernel(%arg0: i32, %arg1: memref<784x32xf32, #tpu.memory_space<vmem>>, %arg2: memref<784x32xf32, #tpu.memory_space<vmem>>, %arg3: memref<32x32xbf16, #tpu.memory_space<vmem>>, %arg4: memref<1x32xf32, #tpu.memory_space<vmem>>, %arg5: memref<32x64xbf16, #tpu.memory_space<vmem>>, %arg6: memref<1x64xf32, #tpu.memory_space<vmem>>, %arg7: memref<32x1xf32, #tpu.memory_space<vmem>>, %arg8: memref<32x1xf32, #tpu.memory_space<vmem>>, %arg9: memref<4x32x196xf32, #tpu.memory_space<vmem>>) attributes {dimension_semantics = [#tpu.dimension_semantics<arbitrary>], iteration_bounds = array<i64: 1>, scalar_prefetch = 0 : i64, scratch_operands = 0 : i64, tpu.core_type = #tpu.core_type<tc>, window_params = [{transform_indices = @transform_0, window_bounds = array<i64: 784, 32>}, {transform_indices = @transform_1, window_bounds = array<i64: 784, 32>}, {pipeline_mode = #tpu.pipeline_mode<synchronous>, transform_indices = @transform_2, window_bounds = array<i64: 32, 32>}, {pipeline_mode = #tpu.pipeline_mode<synchronous>, transform_indices = @transform_3, window_bounds = array<i64: 1, 32>}, {pipeline_mode = #tpu.pipeline_mode<synchronous>, transform_indices = @transform_4, window_bounds = array<i64: 32, 64>}, {pipeline_mode = #tpu.pipeline_mode<synchronous>, transform_indices = @transform_5, window_bounds = array<i64: 1, 64>}, {pipeline_mode = #tpu.pipeline_mode<synchronous>, transform_indices = @transform_6, window_bounds = array<i64: 32, 1>}, {pipeline_mode = #tpu.pipeline_mode<synchronous>, transform_indices = @transform_7, window_bounds = array<i64: 32, 1>}, {transform_indices = @transform_8, window_bounds = array<i64: 4, 32, 196>}]} {
    %c0 = arith.constant 0 : index
    %c0_0 = arith.constant 0 : index
    %0 = vector.load %arg3[%c0, %c0_0] : memref<32x32xbf16, #tpu.memory_space<vmem>>, vector<32x32xbf16>
    %c0_1 = arith.constant 0 : index
    %c0_2 = arith.constant 0 : index
    %1 = vector.load %arg5[%c0_1, %c0_2] : memref<32x64xbf16, #tpu.memory_space<vmem>>, vector<32x64xbf16>
    %c0_3 = arith.constant 0 : index
    %c0_4 = arith.constant 0 : index
    %2 = vector.load %arg4[%c0_3, %c0_4] : memref<1x32xf32, #tpu.memory_space<vmem>>, vector<1x32xf32>
    %c0_5 = arith.constant 0 : index
    %c0_6 = arith.constant 0 : index
    %3 = vector.load %arg6[%c0_5, %c0_6] : memref<1x64xf32, #tpu.memory_space<vmem>>, vector<1x64xf32>
    %c0_7 = arith.constant 0 : index
    %c0_8 = arith.constant 0 : index
    %4 = vector.load %arg7[%c0_7, %c0_8] : memref<32x1xf32, #tpu.memory_space<vmem>>, vector<32x1xf32>
    %c0_9 = arith.constant 0 : index
    %c0_10 = arith.constant 0 : index
    %5 = vector.load %arg8[%c0_9, %c0_10] : memref<32x1xf32, #tpu.memory_space<vmem>>, vector<32x1xf32>
    %c0_11 = arith.constant 0 : index
    %c0_12 = arith.constant 0 : index
    %6 = vector.load %arg1[%c0_11, %c0_12] : memref<784x32xf32, #tpu.memory_space<vmem>>, vector<784x32xf32>
    %c0_13 = arith.constant 0 : index
    %c0_14 = arith.constant 0 : index
    %7 = vector.load %arg2[%c0_13, %c0_14] : memref<784x32xf32, #tpu.memory_space<vmem>>, vector<784x32xf32>
    %8 = arith.truncf %6 : vector<784x32xf32> to vector<784x32xbf16>
    %cst = arith.constant dense<0.000000e+00> : vector<784x32xf32>
    %9 = tpu.matmul %8, %0, %cst {dimension_numbers = #tpu.dot_dimension_numbers<[1], [0], [0], [1], [0, 0, 1, 1], [], []>} : vector<784x32xbf16>, vector<32x32xbf16>, vector<784x32xf32> -> vector<784x32xf32>
    %10 = vector.broadcast %2 : vector<1x32xf32> to vector<784x32xf32>
    %11 = arith.addf %9, %10 : vector<784x32xf32>
    %12 = arith.truncf %11 : vector<784x32xf32> to vector<784x32xbf16>
    %13 = arith.truncf %7 : vector<784x32xf32> to vector<784x32xbf16>
    %cst_15 = arith.constant dense<0.000000e+00> : vector<784x64xf32>
    %14 = tpu.matmul %13, %1, %cst_15 {dimension_numbers = #tpu.dot_dimension_numbers<[1], [0], [0], [1], [0, 0, 1, 1], [], []>} : vector<784x32xbf16>, vector<32x64xbf16>, vector<784x64xf32> -> vector<784x64xf32>
    %15 = vector.broadcast %3 : vector<1x64xf32> to vector<784x64xf32>
    %16 = arith.addf %14, %15 : vector<784x64xf32>
    %17 = arith.truncf %16 : vector<784x64xf32> to vector<784x64xbf16>
    %18 = vector.extract_strided_slice %12 {offsets = [0, 0], sizes = [196, 32], strides = [1, 1]} : vector<784x32xbf16> to vector<196x32xbf16>
    %19 = vector.extract_strided_slice %17 {offsets = [0, 0], sizes = [196, 32], strides = [1, 1]} : vector<784x64xbf16> to vector<196x32xbf16>
    %20 = vector.extract_strided_slice %17 {offsets = [0, 32], sizes = [196, 32], strides = [1, 1]} : vector<784x64xbf16> to vector<196x32xbf16>
    %cst_16 = arith.constant dense<0.000000e+00> : vector<196x196xf32>
    %21 = tpu.matmul %18, %19, %cst_16 {dimension_numbers = #tpu.dot_dimension_numbers<[1], [1], [0], [0], [0, 0, 1, 0], [], []>} : vector<196x32xbf16>, vector<196x32xbf16>, vector<196x196xf32> -> vector<196x196xf32>
    %cst_17 = arith.constant dense<0xFF800000> : vector<196xf32>
    %22 = vector.multi_reduction <maximumf>, %21, %cst_17 [1] : vector<196x196xf32> to vector<196xf32>
    %23 = vector.shape_cast %22 : vector<196xf32> to vector<196x1xf32>
    %24 = vector.broadcast %23 : vector<196x1xf32> to vector<196x196xf32>
    %25 = arith.subf %21, %24 : vector<196x196xf32>
    %26 = math.exp %25 : vector<196x196xf32>
    %cst_18 = arith.constant dense<0.000000e+00> : vector<196xf32>
    %27 = vector.multi_reduction <add>, %26, %cst_18 [1] : vector<196x196xf32> to vector<196xf32>
    %28 = vector.shape_cast %27 : vector<196xf32> to vector<196x1xf32>
    %29 = tpu.reciprocal %28 {approx = true} : vector<196x1xf32> -> vector<196x1xf32>
    %30 = arith.truncf %26 : vector<196x196xf32> to vector<196x196xbf16>
    %cst_19 = arith.constant dense<0.000000e+00> : vector<196x32xf32>
    %31 = tpu.matmul %30, %20, %cst_19 {dimension_numbers = #tpu.dot_dimension_numbers<[1], [0], [0], [1], [0, 0, 1, 1], [], []>} : vector<196x196xbf16>, vector<196x32xbf16>, vector<196x32xf32> -> vector<196x32xf32>
    %32 = vector.broadcast %29 : vector<196x1xf32> to vector<196x32xf32>
    %33 = arith.mulf %31, %32 : vector<196x32xf32>
    %34 = vector.extract_strided_slice %6 {offsets = [0, 0], sizes = [196, 32], strides = [1, 1]} : vector<784x32xf32> to vector<196x32xf32>
    %35 = arith.addf %33, %34 : vector<196x32xf32>
    %36 = tpu.transpose %35, [1, 0] : vector<196x32xf32> -> vector<32x196xf32>
    %cst_20 = arith.constant dense<0.000000e+00> : vector<196xf32>
    %37 = vector.multi_reduction <add>, %36, %cst_20 [0] : vector<32x196xf32> to vector<196xf32>
    %38 = vector.shape_cast %37 : vector<196xf32> to vector<1x196xf32>
    %cst_21 = arith.constant 3.200000e+01 : f32
    %39 = vector.broadcast %cst_21 : f32 to vector<1x196xf32>
    %40 = arith.divf %38, %39 : vector<1x196xf32>
    %41 = vector.broadcast %40 : vector<1x196xf32> to vector<32x196xf32>
    %42 = arith.subf %36, %41 : vector<32x196xf32>
    %43 = arith.mulf %42, %42 : vector<32x196xf32>
    %cst_22 = arith.constant dense<0.000000e+00> : vector<196xf32>
    %44 = vector.multi_reduction <add>, %43, %cst_22 [0] : vector<32x196xf32> to vector<196xf32>
    %45 = vector.shape_cast %44 : vector<196xf32> to vector<1x196xf32>
    %cst_23 = arith.constant 3.200000e+01 : f32
    %46 = vector.broadcast %cst_23 : f32 to vector<1x196xf32>
    %47 = arith.divf %45, %46 : vector<1x196xf32>
    %48 = vector.broadcast %40 : vector<1x196xf32> to vector<32x196xf32>
    %49 = arith.subf %36, %48 : vector<32x196xf32>
    %cst_24 = arith.constant 9.99999974E-6 : f32
    %50 = vector.broadcast %cst_24 : f32 to vector<1x196xf32>
    %51 = arith.addf %47, %50 : vector<1x196xf32>
    %52 = math.rsqrt %51 : vector<1x196xf32>
    %53 = vector.broadcast %52 : vector<1x196xf32> to vector<32x196xf32>
    %54 = arith.mulf %49, %53 : vector<32x196xf32>
    %55 = vector.broadcast %4 : vector<32x1xf32> to vector<32x196xf32>
    %56 = arith.mulf %54, %55 : vector<32x196xf32>
    %57 = vector.broadcast %5 : vector<32x1xf32> to vector<32x196xf32>
    %58 = arith.addf %56, %57 : vector<32x196xf32>
    %c0_25 = arith.constant 0 : index
    %c0_26 = arith.constant 0 : index
    %c0_27 = arith.constant 0 : index
    %59 = vector.load %arg9[%c0_25, %c0_26, %c0_27] : memref<4x32x196xf32, #tpu.memory_space<vmem>>, vector<1x32x196xf32>
    %60 = vector.shape_cast %59 : vector<1x32x196xf32> to vector<32x196xf32>
    %61 = vector.shape_cast %58 : vector<32x196xf32> to vector<1x32x196xf32>
    tpu.vector_store %arg9[%c0_25, %c0_26, %c0_27], %61 {strides = array<i32>} : memref<4x32x196xf32, #tpu.memory_space<vmem>>, vector<1x32x196xf32>,
    %62 = vector.extract_strided_slice %12 {offsets = [196, 0], sizes = [196, 32], strides = [1, 1]} : vector<784x32xbf16> to vector<196x32xbf16>
    %63 = vector.extract_strided_slice %17 {offsets = [196, 0], sizes = [196, 32], strides = [1, 1]} : vector<784x64xbf16> to vector<196x32xbf16>
    %64 = vector.extract_strided_slice %17 {offsets = [196, 32], sizes = [196, 32], strides = [1, 1]} : vector<784x64xbf16> to vector<196x32xbf16>
    %cst_28 = arith.constant dense<0.000000e+00> : vector<196x196xf32>
    %65 = tpu.matmul %62, %63, %cst_28 {dimension_numbers = #tpu.dot_dimension_numbers<[1], [1], [0], [0], [0, 0, 1, 0], [], []>} : vector<196x32xbf16>, vector<196x32xbf16>, vector<196x196xf32> -> vector<196x196xf32>
    %cst_29 = arith.constant dense<0xFF800000> : vector<196xf32>
    %66 = vector.multi_reduction <maximumf>, %65, %cst_29 [1] : vector<196x196xf32> to vector<196xf32>
    %67 = vector.shape_cast %66 : vector<196xf32> to vector<196x1xf32>
    %68 = vector.broadcast %67 : vector<196x1xf32> to vector<196x196xf32>
    %69 = arith.subf %65, %68 : vector<196x196xf32>
    %70 = math.exp %69 : vector<196x196xf32>
    %cst_30 = arith.constant dense<0.000000e+00> : vector<196xf32>
    %71 = vector.multi_reduction <add>, %70, %cst_30 [1] : vector<196x196xf32> to vector<196xf32>
    %72 = vector.shape_cast %71 : vector<196xf32> to vector<196x1xf32>
    %73 = tpu.reciprocal %72 {approx = true} : vector<196x1xf32> -> vector<196x1xf32>
    %74 = arith.truncf %70 : vector<196x196xf32> to vector<196x196xbf16>
    %cst_31 = arith.constant dense<0.000000e+00> : vector<196x32xf32>
    %75 = tpu.matmul %74, %64, %cst_31 {dimension_numbers = #tpu.dot_dimension_numbers<[1], [0], [0], [1], [0, 0, 1, 1], [], []>} : vector<196x196xbf16>, vector<196x32xbf16>, vector<196x32xf32> -> vector<196x32xf32>
    %76 = vector.broadcast %73 : vector<196x1xf32> to vector<196x32xf32>
    %77 = arith.mulf %75, %76 : vector<196x32xf32>
    %78 = vector.extract_strided_slice %6 {offsets = [196, 0], sizes = [196, 32], strides = [1, 1]} : vector<784x32xf32> to vector<196x32xf32>
    %79 = arith.addf %77, %78 : vector<196x32xf32>
    %80 = tpu.transpose %79, [1, 0] : vector<196x32xf32> -> vector<32x196xf32>
    %cst_32 = arith.constant dense<0.000000e+00> : vector<196xf32>
    %81 = vector.multi_reduction <add>, %80, %cst_32 [0] : vector<32x196xf32> to vector<196xf32>
    %82 = vector.shape_cast %81 : vector<196xf32> to vector<1x196xf32>
    %cst_33 = arith.constant 3.200000e+01 : f32
    %83 = vector.broadcast %cst_33 : f32 to vector<1x196xf32>
    %84 = arith.divf %82, %83 : vector<1x196xf32>
    %85 = vector.broadcast %84 : vector<1x196xf32> to vector<32x196xf32>
    %86 = arith.subf %80, %85 : vector<32x196xf32>
    %87 = arith.mulf %86, %86 : vector<32x196xf32>
    %cst_34 = arith.constant dense<0.000000e+00> : vector<196xf32>
    %88 = vector.multi_reduction <add>, %87, %cst_34 [0] : vector<32x196xf32> to vector<196xf32>
    %89 = vector.shape_cast %88 : vector<196xf32> to vector<1x196xf32>
    %cst_35 = arith.constant 3.200000e+01 : f32
    %90 = vector.broadcast %cst_35 : f32 to vector<1x196xf32>
    %91 = arith.divf %89, %90 : vector<1x196xf32>
    %92 = vector.broadcast %84 : vector<1x196xf32> to vector<32x196xf32>
    %93 = arith.subf %80, %92 : vector<32x196xf32>
    %cst_36 = arith.constant 9.99999974E-6 : f32
    %94 = vector.broadcast %cst_36 : f32 to vector<1x196xf32>
    %95 = arith.addf %91, %94 : vector<1x196xf32>
    %96 = math.rsqrt %95 : vector<1x196xf32>
    %97 = vector.broadcast %96 : vector<1x196xf32> to vector<32x196xf32>
    %98 = arith.mulf %93, %97 : vector<32x196xf32>
    %99 = vector.broadcast %4 : vector<32x1xf32> to vector<32x196xf32>
    %100 = arith.mulf %98, %99 : vector<32x196xf32>
    %101 = vector.broadcast %5 : vector<32x1xf32> to vector<32x196xf32>
    %102 = arith.addf %100, %101 : vector<32x196xf32>
    %c1 = arith.constant 1 : index
    %c0_37 = arith.constant 0 : index
    %c0_38 = arith.constant 0 : index
    %103 = vector.load %arg9[%c1, %c0_37, %c0_38] : memref<4x32x196xf32, #tpu.memory_space<vmem>>, vector<1x32x196xf32>
    %104 = vector.shape_cast %103 : vector<1x32x196xf32> to vector<32x196xf32>
    %105 = vector.shape_cast %102 : vector<32x196xf32> to vector<1x32x196xf32>
    tpu.vector_store %arg9[%c1, %c0_37, %c0_38], %105 {strides = array<i32>} : memref<4x32x196xf32, #tpu.memory_space<vmem>>, vector<1x32x196xf32>,
    %106 = vector.extract_strided_slice %12 {offsets = [392, 0], sizes = [196, 32], strides = [1, 1]} : vector<784x32xbf16> to vector<196x32xbf16>
    %107 = vector.extract_strided_slice %17 {offsets = [392, 0], sizes = [196, 32], strides = [1, 1]} : vector<784x64xbf16> to vector<196x32xbf16>
    %108 = vector.extract_strided_slice %17 {offsets = [392, 32], sizes = [196, 32], strides = [1, 1]} : vector<784x64xbf16> to vector<196x32xbf16>
    %cst_39 = arith.constant dense<0.000000e+00> : vector<196x196xf32>
    %109 = tpu.matmul %106, %107, %cst_39 {dimension_numbers = #tpu.dot_dimension_numbers<[1], [1], [0], [0], [0, 0, 1, 0], [], []>} : vector<196x32xbf16>, vector<196x32xbf16>, vector<196x196xf32> -> vector<196x196xf32>
    %cst_40 = arith.constant dense<0xFF800000> : vector<196xf32>
    %110 = vector.multi_reduction <maximumf>, %109, %cst_40 [1] : vector<196x196xf32> to vector<196xf32>
    %111 = vector.shape_cast %110 : vector<196xf32> to vector<196x1xf32>
    %112 = vector.broadcast %111 : vector<196x1xf32> to vector<196x196xf32>
    %113 = arith.subf %109, %112 : vector<196x196xf32>
    %114 = math.exp %113 : vector<196x196xf32>
    %cst_41 = arith.constant dense<0.000000e+00> : vector<196xf32>
    %115 = vector.multi_reduction <add>, %114, %cst_41 [1] : vector<196x196xf32> to vector<196xf32>
    %116 = vector.shape_cast %115 : vector<196xf32> to vector<196x1xf32>
    %117 = tpu.reciprocal %116 {approx = true} : vector<196x1xf32> -> vector<196x1xf32>
    %118 = arith.truncf %114 : vector<196x196xf32> to vector<196x196xbf16>
    %cst_42 = arith.constant dense<0.000000e+00> : vector<196x32xf32>
    %119 = tpu.matmul %118, %108, %cst_42 {dimension_numbers = #tpu.dot_dimension_numbers<[1], [0], [0], [1], [0, 0, 1, 1], [], []>} : vector<196x196xbf16>, vector<196x32xbf16>, vector<196x32xf32> -> vector<196x32xf32>
    %120 = vector.broadcast %117 : vector<196x1xf32> to vector<196x32xf32>
    %121 = arith.mulf %119, %120 : vector<196x32xf32>
    %122 = vector.extract_strided_slice %6 {offsets = [392, 0], sizes = [196, 32], strides = [1, 1]} : vector<784x32xf32> to vector<196x32xf32>
    %123 = arith.addf %121, %122 : vector<196x32xf32>
    %124 = tpu.transpose %123, [1, 0] : vector<196x32xf32> -> vector<32x196xf32>
    %cst_43 = arith.constant dense<0.000000e+00> : vector<196xf32>
    %125 = vector.multi_reduction <add>, %124, %cst_43 [0] : vector<32x196xf32> to vector<196xf32>
    %126 = vector.shape_cast %125 : vector<196xf32> to vector<1x196xf32>
    %cst_44 = arith.constant 3.200000e+01 : f32
    %127 = vector.broadcast %cst_44 : f32 to vector<1x196xf32>
    %128 = arith.divf %126, %127 : vector<1x196xf32>
    %129 = vector.broadcast %128 : vector<1x196xf32> to vector<32x196xf32>
    %130 = arith.subf %124, %129 : vector<32x196xf32>
    %131 = arith.mulf %130, %130 : vector<32x196xf32>
    %cst_45 = arith.constant dense<0.000000e+00> : vector<196xf32>
    %132 = vector.multi_reduction <add>, %131, %cst_45 [0] : vector<32x196xf32> to vector<196xf32>
    %133 = vector.shape_cast %132 : vector<196xf32> to vector<1x196xf32>
    %cst_46 = arith.constant 3.200000e+01 : f32
    %134 = vector.broadcast %cst_46 : f32 to vector<1x196xf32>
    %135 = arith.divf %133, %134 : vector<1x196xf32>
    %136 = vector.broadcast %128 : vector<1x196xf32> to vector<32x196xf32>
    %137 = arith.subf %124, %136 : vector<32x196xf32>
    %cst_47 = arith.constant 9.99999974E-6 : f32
    %138 = vector.broadcast %cst_47 : f32 to vector<1x196xf32>
    %139 = arith.addf %135, %138 : vector<1x196xf32>
    %140 = math.rsqrt %139 : vector<1x196xf32>
    %141 = vector.broadcast %140 : vector<1x196xf32> to vector<32x196xf32>
    %142 = arith.mulf %137, %141 : vector<32x196xf32>
    %143 = vector.broadcast %4 : vector<32x1xf32> to vector<32x196xf32>
    %144 = arith.mulf %142, %143 : vector<32x196xf32>
    %145 = vector.broadcast %5 : vector<32x1xf32> to vector<32x196xf32>
    %146 = arith.addf %144, %145 : vector<32x196xf32>
    %c2 = arith.constant 2 : index
    %c0_48 = arith.constant 0 : index
    %c0_49 = arith.constant 0 : index
    %147 = vector.load %arg9[%c2, %c0_48, %c0_49] : memref<4x32x196xf32, #tpu.memory_space<vmem>>, vector<1x32x196xf32>
    %148 = vector.shape_cast %147 : vector<1x32x196xf32> to vector<32x196xf32>
    %149 = vector.shape_cast %146 : vector<32x196xf32> to vector<1x32x196xf32>
    tpu.vector_store %arg9[%c2, %c0_48, %c0_49], %149 {strides = array<i32>} : memref<4x32x196xf32, #tpu.memory_space<vmem>>, vector<1x32x196xf32>,
    %150 = vector.extract_strided_slice %12 {offsets = [588, 0], sizes = [196, 32], strides = [1, 1]} : vector<784x32xbf16> to vector<196x32xbf16>
    %151 = vector.extract_strided_slice %17 {offsets = [588, 0], sizes = [196, 32], strides = [1, 1]} : vector<784x64xbf16> to vector<196x32xbf16>
    %152 = vector.extract_strided_slice %17 {offsets = [588, 32], sizes = [196, 32], strides = [1, 1]} : vector<784x64xbf16> to vector<196x32xbf16>
    %cst_50 = arith.constant dense<0.000000e+00> : vector<196x196xf32>
    %153 = tpu.matmul %150, %151, %cst_50 {dimension_numbers = #tpu.dot_dimension_numbers<[1], [1], [0], [0], [0, 0, 1, 0], [], []>} : vector<196x32xbf16>, vector<196x32xbf16>, vector<196x196xf32> -> vector<196x196xf32>
    %cst_51 = arith.constant dense<0xFF800000> : vector<196xf32>
    %154 = vector.multi_reduction <maximumf>, %153, %cst_51 [1] : vector<196x196xf32> to vector<196xf32>
    %155 = vector.shape_cast %154 : vector<196xf32> to vector<196x1xf32>
    %156 = vector.broadcast %155 : vector<196x1xf32> to vector<196x196xf32>
    %157 = arith.subf %153, %156 : vector<196x196xf32>
    %158 = math.exp %157 : vector<196x196xf32>
    %cst_52 = arith.constant dense<0.000000e+00> : vector<196xf32>
    %159 = vector.multi_reduction <add>, %158, %cst_52 [1] : vector<196x196xf32> to vector<196xf32>
    %160 = vector.shape_cast %159 : vector<196xf32> to vector<196x1xf32>
    %161 = tpu.reciprocal %160 {approx = true} : vector<196x1xf32> -> vector<196x1xf32>
    %162 = arith.truncf %158 : vector<196x196xf32> to vector<196x196xbf16>
    %cst_53 = arith.constant dense<0.000000e+00> : vector<196x32xf32>
    %163 = tpu.matmul %162, %152, %cst_53 {dimension_numbers = #tpu.dot_dimension_numbers<[1], [0], [0], [1], [0, 0, 1, 1], [], []>} : vector<196x196xbf16>, vector<196x32xbf16>, vector<196x32xf32> -> vector<196x32xf32>
    %164 = vector.broadcast %161 : vector<196x1xf32> to vector<196x32xf32>
    %165 = arith.mulf %163, %164 : vector<196x32xf32>
    %166 = vector.extract_strided_slice %6 {offsets = [588, 0], sizes = [196, 32], strides = [1, 1]} : vector<784x32xf32> to vector<196x32xf32>
    %167 = arith.addf %165, %166 : vector<196x32xf32>
    %168 = tpu.transpose %167, [1, 0] : vector<196x32xf32> -> vector<32x196xf32>
    %cst_54 = arith.constant dense<0.000000e+00> : vector<196xf32>
    %169 = vector.multi_reduction <add>, %168, %cst_54 [0] : vector<32x196xf32> to vector<196xf32>
    %170 = vector.shape_cast %169 : vector<196xf32> to vector<1x196xf32>
    %cst_55 = arith.constant 3.200000e+01 : f32
    %171 = vector.broadcast %cst_55 : f32 to vector<1x196xf32>
    %172 = arith.divf %170, %171 : vector<1x196xf32>
    %173 = vector.broadcast %172 : vector<1x196xf32> to vector<32x196xf32>
    %174 = arith.subf %168, %173 : vector<32x196xf32>
    %175 = arith.mulf %174, %174 : vector<32x196xf32>
    %cst_56 = arith.constant dense<0.000000e+00> : vector<196xf32>
    %176 = vector.multi_reduction <add>, %175, %cst_56 [0] : vector<32x196xf32> to vector<196xf32>
    %177 = vector.shape_cast %176 : vector<196xf32> to vector<1x196xf32>
    %cst_57 = arith.constant 3.200000e+01 : f32
    %178 = vector.broadcast %cst_57 : f32 to vector<1x196xf32>
    %179 = arith.divf %177, %178 : vector<1x196xf32>
    %180 = vector.broadcast %172 : vector<1x196xf32> to vector<32x196xf32>
    %181 = arith.subf %168, %180 : vector<32x196xf32>
    %cst_58 = arith.constant 9.99999974E-6 : f32
    %182 = vector.broadcast %cst_58 : f32 to vector<1x196xf32>
    %183 = arith.addf %179, %182 : vector<1x196xf32>
    %184 = math.rsqrt %183 : vector<1x196xf32>
    %185 = vector.broadcast %184 : vector<1x196xf32> to vector<32x196xf32>
    %186 = arith.mulf %181, %185 : vector<32x196xf32>
    %187 = vector.broadcast %4 : vector<32x1xf32> to vector<32x196xf32>
    %188 = arith.mulf %186, %187 : vector<32x196xf32>
    %189 = vector.broadcast %5 : vector<32x1xf32> to vector<32x196xf32>
    %190 = arith.addf %188, %189 : vector<32x196xf32>
    %c3 = arith.constant 3 : index
    %c0_59 = arith.constant 0 : index
    %c0_60 = arith.constant 0 : index
    %191 = vector.load %arg9[%c3, %c0_59, %c0_60] : memref<4x32x196xf32, #tpu.memory_space<vmem>>, vector<1x32x196xf32>
    %192 = vector.shape_cast %191 : vector<1x32x196xf32> to vector<32x196xf32>
    %193 = vector.shape_cast %190 : vector<32x196xf32> to vector<1x32x196xf32>
    tpu.vector_store %arg9[%c3, %c0_59, %c0_60], %193 {strides = array<i32>} : memref<4x32x196xf32, #tpu.memory_space<vmem>>, vector<1x32x196xf32>,
    return
  }
  func.func @transform_0(%arg0: i32) -> (i32, i32) {
    %c0_i32 = arith.constant 0 : i32
    %c0_i32_0 = arith.constant 0 : i32
    return %arg0, %c0_i32 : i32, i32
  }
  func.func @transform_1(%arg0: i32) -> (i32, i32) {
    %c0_i32 = arith.constant 0 : i32
    %c0_i32_0 = arith.constant 0 : i32
    return %arg0, %c0_i32 : i32, i32
  }
  func.func @transform_2(%arg0: i32) -> (i32, i32) {
    %c0_i32 = arith.constant 0 : i32
    %c0_i32_0 = arith.constant 0 : i32
    %c0_i32_1 = arith.constant 0 : i32
    return %c0_i32, %c0_i32_0 : i32, i32
  }
  func.func @transform_3(%arg0: i32) -> (i32, i32) {
    %c0_i32 = arith.constant 0 : i32
    %c0_i32_0 = arith.constant 0 : i32
    %c0_i32_1 = arith.constant 0 : i32
    return %c0_i32, %c0_i32_0 : i32, i32
  }
  func.func @transform_4(%arg0: i32) -> (i32, i32) {
    %c0_i32 = arith.constant 0 : i32
    %c0_i32_0 = arith.constant 0 : i32
    %c0_i32_1 = arith.constant 0 : i32
    return %c0_i32, %c0_i32_0 : i32, i32
  }
  func.func @transform_5(%arg0: i32) -> (i32, i32) {
    %c0_i32 = arith.constant 0 : i32
    %c0_i32_0 = arith.constant 0 : i32
    %c0_i32_1 = arith.constant 0 : i32
    return %c0_i32, %c0_i32_0 : i32, i32
  }
  func.func @transform_6(%arg0: i32) -> (i32, i32) {
    %c0_i32 = arith.constant 0 : i32
    %c0_i32_0 = arith.constant 0 : i32
    %c0_i32_1 = arith.constant 0 : i32
    return %c0_i32, %c0_i32_0 : i32, i32
  }
  func.func @transform_7(%arg0: i32) -> (i32, i32) {
    %c0_i32 = arith.constant 0 : i32
    %c0_i32_0 = arith.constant 0 : i32
    %c0_i32_1 = arith.constant 0 : i32
    return %c0_i32, %c0_i32_0 : i32, i32
  }
  func.func @transform_8(%arg0: i32) -> (i32, i32, i32) {
    %c0_i32 = arith.constant 0 : i32
    %c0_i32_0 = arith.constant 0 : i32
    %c0_i32_1 = arith.constant 0 : i32
    return %arg0, %c0_i32, %c0_i32_0 : i32, i32, i32
  }
}

</mosaic_0001>

<bundles_post_ra>
// kernel: tpu_custom_call.1
= control target key start
LH: loop header
LB: loop body
LE: loop exit
PB: predicated region body
PF: predicated region fallthrough
CT: control target
= control target key end

     0   :  { %v12876_v1 = vmov 0.0   ;;  %vm7875_vm0 = vmmov 0   ;;  %vm312_vm1 = vcmask 261120   ;;  %s12865_s0 = inlined_call_operand.vmem [shape: f32[784,32], index: 0, kind: input, shape index: {}]   ;;  %s12866_s1 = inlined_call_operand.vmem [shape: f32[784,32], index: 1, kind: input, shape index: {}]   ;;  %s12867_s2 = inlined_call_operand.vmem [shape: bf16[32,32], index: 2, kind: input, shape index: {}]   ;;  %s12868_s3 = inlined_call_operand.vmem [shape: f32[1,32], index: 3, kind: input, shape index: {}]   ;;  %s12869_s4 = inlined_call_operand.vmem [shape: bf16[32,64], index: 4, kind: input, shape index: {}]   ;;  %s12870_s5 = inlined_call_operand.vmem [shape: f32[1,64], index: 5, kind: input, shape index: {}]   ;;  %s12871_s6 = inlined_call_operand.vmem [shape: f32[32,1], index: 6, kind: input, shape index: {}]   ;;  %s12872_s7 = inlined_call_operand.vmem [shape: f32[32,1], index: 7, kind: input, shape index: {}]   ;;  %s12873_s8 = inlined_call_operand.hbm [shape: f32[4,32,196], index: 8, kind: output, shape index: {}]  }
   0x1   :  { %v7130_v0 = vld [vmem:[%s12867_s2 + $0x8] sm:$0xff]   ;;  %6721 = vmatprep.subr.bf16.mxu0 %v12876_v1  ;;  %6921 = vmatprep.subr.bf16.mxu1 %v12876_v1  ;;  %v7132_v3 = vld [vmem:[%s12867_s2] sm:$0xff]   ;;  %v51_v11 = vld [vmem:[%s12865_s0 + $0x10] sm:$0xff] }
   0x2   :  { %v7131_v2 = vld [vmem:[%s12869_s4 + $0x8] sm:$0xff]   ;;  %6722 = vmatpush3.bf16.msra.mxu0 %v7130_v0  ;;  %6725 = vmatprep.mubr.msk.bf16.mxu0 %vm7875_vm0, %v12876_v1  ;;  %v7133_v4 = vld [vmem:[%s12869_s4] sm:$0xff]   ;;  %v52_v12 = vld [vmem:[%s12865_s0 + $0x18] sm:$0xff] }
   0x3   :  { %6922 = vmatpush3.bf16.msra.mxu1 %v7131_v2  ;;  %6723 = vmatprep.subr.bf16.mxu0 %v12876_v1  ;;  %v49_v5 = vld [vmem:[%s12865_s0] sm:$0xff]  ;;  %v50_v6 = vld [vmem:[%s12865_s0 + $0x8] sm:$0xff]  ;;  %v149_v13 = vld [vmem:[%s12866_s1 + $0x10] sm:$0xff]  ;;  %v246_v15 = vpack.c.bf16 %v52_v12, %v51_v11 }
   0x4   :  { %6923 = vmatprep.subr.bf16.mxu1 %v12876_v1  ;;  %6925 = vmatprep.mubr.msk.bf16.mxu1 %vm7875_vm0, %v12876_v1  ;;  %v147_v7 = vld [vmem:[%s12866_s1] sm:$0xff]  ;;  %v245_v8 = vpack.c.bf16 %v50_v6, %v49_v5  ;;  %v148_v9 = vld [vmem:[%s12866_s1 + $0x8] sm:$0xff]  ;;  %v150_v14 = vld [vmem:[%s12866_s1 + $0x18] sm:$0xff] }
   0x5   :  { %v934_v10 = vpack.c.bf16 %v148_v9, %v147_v7  ;;  %v935_v16 = vpack.c.bf16 %v150_v14, %v149_v13  ;;  %v53_v17 = vld [vmem:[%s12865_s0 + $0x20] sm:$0xff]  ;;  %v54_v18 = vld [vmem:[%s12865_s0 + $0x28] sm:$0xff]  ;;  %v55_v23 = vld [vmem:[%s12865_s0 + $0x30] sm:$0xff] }
   0x6   :  { %6724 = vmatpush3.bf16.msra.mxu0 %v7132_v3  ;;  %v151_v19 = vld [vmem:[%s12866_s1 + $0x20] sm:$0xff]  ;;  %v152_v20 = vld [vmem:[%s12866_s1 + $0x28] sm:$0xff]  ;;  %v247_v21 = vpack.c.bf16 %v54_v18, %v53_v17  ;;  %v56_v24 = vld [vmem:[%s12865_s0 + $0x38] sm:$0xff] }
   0x7   :  { %6924 = vmatpush3.bf16.msra.mxu1 %v7133_v4  ;;  %v936_v22 = vpack.c.bf16 %v152_v20, %v151_v19  ;;  %v153_v25 = vld [vmem:[%s12866_s1 + $0x30] sm:$0xff]  ;;  %v154_v26 = vld [vmem:[%s12866_s1 + $0x38] sm:$0xff]  ;;  %v248_v27 = vpack.c.bf16 %v56_v24, %v55_v23 }
   0x8   :  { %v937_v28 = vpack.c.bf16 %v154_v26, %v153_v25 }
   0x9   :  { %6726 = vmatmul.mubr.msk.bf16.vlgmr.msra.gmra.mxu0 %vm312_vm1, %v245_v8 }
   0xa   :  { %6926 = vmatmul.mubr.msk.bf16.vlgmr.msra.gmra.mxu1 %vm312_vm1, %v934_v10  ;;  %6729 = vmatprep.mubr.msk.bf16.mxu0 %vm7875_vm0, %v12876_v1 }
   0xb   :  { %6929 = vmatprep.mubr.msk.bf16.mxu1 %vm7875_vm0, %v12876_v1 }
  0x11   :  { %6730 = vmatmul.mubr.msk.bf16.gmra.mxu0 %vm312_vm1, %v246_v15 }
  0x12   :  { %6930 = vmatmul.mubr.msk.bf16.gmra.mxu1 %vm312_vm1, %v935_v16  ;;  %6733 = vmatprep.mubr.msk.bf16.mxu0 %vm7875_vm0, %v12876_v1 }
  0x13   :  { %6933 = vmatprep.mubr.msk.bf16.mxu1 %vm7875_vm0, %v12876_v1 }
  0x19   :  { %6734 = vmatmul.mubr.msk.bf16.gmra.mxu0 %vm312_vm1, %v247_v21 }
  0x1a   :  { %6934 = vmatmul.mubr.msk.bf16.gmra.mxu1 %vm312_vm1, %v936_v22  ;;  %6737 = vmatprep.mubr.msk.bf16.mxu0 %vm7875_vm0, %v12876_v1 }
  0x1b   :  { %6937 = vmatprep.mubr.msk.bf16.mxu1 %vm7875_vm0, %v12876_v1 }
  0x1c   :  { %13 = vsyncpa [#allocation3], 0  ;;  %v57_v29 = vld [vmem:[%s12865_s0 + $0x40] sm:$0xff]  ;;  %v58_v30 = vld [vmem:[%s12865_s0 + $0x48] sm:$0xff]  ;;  %s7877_s13 = smov 96   ;;  %vm2765_vm2 = vcmask 1045504  }
  0x1d   :  { %v155_v31 = vld [vmem:[%s12866_s1 + $0x40] sm:$0xff]  ;;  %v156_v32 = vld [vmem:[%s12866_s1 + $0x48] sm:$0xff]  ;;  %v249_v33 = vpack.c.bf16 %v58_v30, %v57_v29  ;;  %v59_v35 = vld [vmem:[%s12865_s0 + $0x50] sm:$0xff]  ;;  %vm1958_vm3 = vcmask 1043456   ;;  %vm2357_vm4 = vcmask 1041408   ;;  %vm1861_vm5 = vcmask 556032  }
  0x1e   :  { %v938_v34 = vpack.c.bf16 %v156_v32, %v155_v31  ;;  %v60_v36 = vld [vmem:[%s12865_s0 + $0x58] sm:$0xff]  ;;  %v157_v37 = vld [vmem:[%s12866_s1 + $0x50] sm:$0xff]  ;;  %v61_v41 = vld [vmem:[%s12865_s0 + $0x60] sm:$0xff]  ;;  %vm1960_vm6 = vcmask 551936  }
  0x1f   :  { %v158_v38 = vld [vmem:[%s12866_s1 + $0x58] sm:$0xff]  ;;  %v250_v39 = vpack.c.bf16 %v60_v36, %v59_v35  ;;  %v62_v42 = vld [vmem:[%s12865_s0 + $0x68] sm:$0xff]  ;;  %v159_v43 = vld [vmem:[%s12866_s1 + $0x60] sm:$0xff] }
  0x20   :  { %v939_v40 = vpack.c.bf16 %v158_v38, %v157_v37  ;;  %v160_v44 = vld [vmem:[%s12866_s1 + $0x68] sm:$0xff]  ;;  %v251_v45 = vpack.c.bf16 %v62_v42, %v61_v41  ;;  %v63_v47 = vld [vmem:[%s12865_s0 + $0x70] sm:$0xff]  ;;  %v64_v48 = vld [vmem:[%s12865_s0 + $0x78] sm:$0xff] }
  0x21   :  { %6738 = vmatmul.mubr.msk.bf16.gmra.mxu0 %vm312_vm1, %v248_v27  ;;  %v940_v46 = vpack.c.bf16 %v160_v44, %v159_v43  ;;  %v161_v49 = vld [vmem:[%s12866_s1 + $0x70] sm:$0xff]  ;;  %v162_v50 = vld [vmem:[%s12866_s1 + $0x78] sm:$0xff]  ;;  %v252_v51 = vpack.c.bf16 %v64_v48, %v63_v47  ;;  %v65_v53 = vld [vmem:[%s12865_s0 + $0x80] sm:$0xff]  ;;  %v12874_v48 = vmov 0  }
  0x22   :  { %6938 = vmatmul.mubr.msk.bf16.gmra.mxu1 %vm312_vm1, %v937_v28  ;;  %6741 = vmatprep.mubr.msk.bf16.mxu0 %vm7875_vm0, %v12876_v1  ;;  %v941_v52 = vpack.c.bf16 %v162_v50, %v161_v49  ;;  %v66_v54 = vld [vmem:[%s12865_s0 + $0x88] sm:$0xff]  ;;  %v163_v55 = vld [vmem:[%s12866_s1 + $0x80] sm:$0xff]  ;;  %v67_v59 = vld [vmem:[%s12865_s0 + $0x90] sm:$0xff] }
  0x23   :  { %6941 = vmatprep.mubr.msk.bf16.mxu1 %vm7875_vm0, %v12876_v1  ;;  %v164_v56 = vld [vmem:[%s12866_s1 + $0x88] sm:$0xff]  ;;  %v253_v57 = vpack.c.bf16 %v66_v54, %v65_v53  ;;  %v68_v60 = vld [vmem:[%s12865_s0 + $0x98] sm:$0xff]  ;;  %v165_v61 = vld [vmem:[%s12866_s1 + $0x90] sm:$0xff]  ;;  %1700 = vmatprep.subr.bf16.mxu0 %v12874_v48 }
  0x24   :  { %v942_v58 = vpack.c.bf16 %v164_v56, %v163_v55  ;;  %v166_v62 = vld [vmem:[%s12866_s1 + $0x98] sm:$0xff]  ;;  %v254_v63 = vpack.c.bf16 %v68_v60, %v67_v59  ;;  %v69_v2 = vld [vmem:[%s12865_s0 + $0xa0] sm:$0xff]  ;;  %v70_v3 = vld [vmem:[%s12865_s0 + $0xa8] sm:$0xff]  ;;  %2361 = vmatprep.subr.bf16.mxu1 %v12874_v48 }
  0x25   :  { %v943_v0 = vpack.c.bf16 %v166_v62, %v165_v61  ;;  %v167_v4 = vld [vmem:[%s12866_s1 + $0xa0] sm:$0xff]  ;;  %v168_v5 = vld [vmem:[%s12866_s1 + $0xa8] sm:$0xff]  ;;  %v255_v6 = vpack.c.bf16 %v70_v3, %v69_v2  ;;  %v71_v8 = vld [vmem:[%s12865_s0 + $0xb0] sm:$0xff] }
  0x26   :  { %v944_v7 = vpack.c.bf16 %v168_v5, %v167_v4  ;;  %v72_v9 = vld [vmem:[%s12865_s0 + $0xb8] sm:$0xff]  ;;  %v169_v10 = vld [vmem:[%s12866_s1 + $0xb0] sm:$0xff]  ;;  %v73_v14 = vld [vmem:[%s12865_s0 + $0xc0] sm:$0xff] }
  0x27   :  { %v170_v11 = vld [vmem:[%s12866_s1 + $0xb8] sm:$0xff]  ;;  %v256_v12 = vpack.c.bf16 %v72_v9, %v71_v8  ;;  %v74_v15 = vld [vmem:[%s12865_s0 + $0xc8] sm:$0xff]  ;;  %v171_v16 = vld [vmem:[%s12866_s1 + $0xc0] sm:$0xff] }
  0x28   :  { %v945_v13 = vpack.c.bf16 %v170_v11, %v169_v10  ;;  %v172_v17 = vld [vmem:[%s12866_s1 + $0xc8] sm:$0xff]  ;;  %v257_v18 = vpack.c.bf16 %v74_v15, %v73_v14  ;;  %v75_v20 = vld [vmem:[%s12865_s0 + $0xd0] sm:$0xff]  ;;  %v76_v21 = vld [vmem:[%s12865_s0 + $0xd8] sm:$0xff] }
  0x29   :  { %6742 = vmatmul.mubr.msk.bf16.gmra.mxu0 %vm312_vm1, %v249_v33  ;;  %v946_v19 = vpack.c.bf16 %v172_v17, %v171_v16  ;;  %v173_v22 = vld [vmem:[%s12866_s1 + $0xd0] sm:$0xff]  ;;  %v174_v23 = vld [vmem:[%s12866_s1 + $0xd8] sm:$0xff]  ;;  %v258_v24 = vpack.c.bf16 %v76_v21, %v75_v20  ;;  %v77_v26 = vld [vmem:[%s12865_s0 + $0xe0] sm:$0xff] }
  0x2a   :  { %6942 = vmatmul.mubr.msk.bf16.gmra.mxu1 %vm312_vm1, %v938_v34  ;;  %6745 = vmatprep.mubr.msk.bf16.mxu0 %vm7875_vm0, %v12876_v1  ;;  %v947_v25 = vpack.c.bf16 %v174_v23, %v173_v22  ;;  %v78_v27 = vld [vmem:[%s12865_s0 + $0xe8] sm:$0xff]  ;;  %v175_v28 = vld [vmem:[%s12866_s1 + $0xe0] sm:$0xff]  ;;  %v79_v32 = vld [vmem:[%s12865_s0 + $0xf0] sm:$0xff] }
  0x2b   :  { %6945 = vmatprep.mubr.msk.bf16.mxu1 %vm7875_vm0, %v12876_v1  ;;  %v176_v29 = vld [vmem:[%s12866_s1 + $0xe8] sm:$0xff]  ;;  %v259_v30 = vpack.c.bf16 %v78_v27, %v77_v26  ;;  %v80_v33 = vld [vmem:[%s12865_s0 + $0xf8] sm:$0xff]  ;;  %v177_v34 = vld [vmem:[%s12866_s1 + $0xf0] sm:$0xff] }
  0x2c   :  { %v948_v31 = vpack.c.bf16 %v176_v29, %v175_v28  ;;  %v178_v35 = vld [vmem:[%s12866_s1 + $0xf8] sm:$0xff]  ;;  %v260_v36 = vpack.c.bf16 %v80_v33, %v79_v32  ;;  %v81_v38 = vld [vmem:[%s12865_s0 + $0x100] sm:$0xff]  ;;  %v180_v41 = vld [vmem:[%s12866_s1 + $0x108] sm:$0xff] }
  0x2d   :  { %v949_v37 = vpack.c.bf16 %v178_v35, %v177_v34  ;;  %v83_v44 = vld [vmem:[%s12865_s0 + $0x110] sm:$0xff]  ;;  %v182_v47 = vld [vmem:[%s12866_s1 + $0x118] sm:$0xff]  ;;  %v183_v53 = vld [vmem:[%s12866_s1 + $0x120] sm:$0xff] }
  0x2e   :  { %v184_v54 = vld [vmem:[%s12866_s1 + $0x128] sm:$0xff]  ;;  %v185_v59 = vld [vmem:[%s12866_s1 + $0x130] sm:$0xff]  ;;  %v186_v60 = vld [vmem:[%s12866_s1 + $0x138] sm:$0xff] }
  0x2f   :  { %v952_v56 = vpack.c.bf16 %v184_v54, %v183_v53  ;;  %v953_v62 = vpack.c.bf16 %v186_v60, %v185_v59  ;;  %v187_v2 = vld [vmem:[%s12866_s1 + $0x140] sm:$0xff]  ;;  %v188_v3 = vld [vmem:[%s12866_s1 + $0x148] sm:$0xff]  ;;  %v189_v8 = vld [vmem:[%s12866_s1 + $0x150] sm:$0xff] }
  0x30   :  { %v954_v5 = vpack.c.bf16 %v188_v3, %v187_v2  ;;  %v190_v9 = vld [vmem:[%s12866_s1 + $0x158] sm:$0xff]  ;;  %v191_v14 = vld [vmem:[%s12866_s1 + $0x160] sm:$0xff]  ;;  %v192_v15 = vld [vmem:[%s12866_s1 + $0x168] sm:$0xff] }
  0x31   :  { %6746 = vmatmul.mubr.msk.bf16.gmra.mxu0 %vm312_vm1, %v250_v39  ;;  %v82_v39 = vld [vmem:[%s12865_s0 + $0x108] sm:$0xff]  ;;  %v955_v11 = vpack.c.bf16 %v190_v9, %v189_v8  ;;  %v956_v17 = vpack.c.bf16 %v192_v15, %v191_v14  ;;  %v193_v20 = vld [vmem:[%s12866_s1 + $0x170] sm:$0xff]  ;;  %v194_v21 = vld [vmem:[%s12866_s1 + $0x178] sm:$0xff] }
  0x32   :  { %6946 = vmatmul.mubr.msk.bf16.gmra.mxu1 %vm312_vm1, %v939_v40  ;;  %6749 = vmatprep.mubr.msk.bf16.mxu0 %vm7875_vm0, %v12876_v1  ;;  %v179_v40 = vld [vmem:[%s12866_s1 + $0x100] sm:$0xff]  ;;  %v261_v42 = vpack.c.bf16 %v82_v39, %v81_v38  ;;  %v957_v23 = vpack.c.bf16 %v194_v21, %v193_v20  ;;  %v196_v27 = vld [vmem:[%s12866_s1 + $0x188] sm:$0xff]  ;;  %v99_v33 = vld [vmem:[%s12865_s0 + $0x190] sm:$0xff] }
  0x33   :  { %6949 = vmatprep.mubr.msk.bf16.mxu1 %vm7875_vm0, %v12876_v1  ;;  %v950_v43 = vpack.c.bf16 %v180_v41, %v179_v40  ;;  %v195_v26 = vld [vmem:[%s12866_s1 + $0x180] sm:$0xff]  ;;  %v100_v34 = vld [vmem:[%s12865_s0 + $0x198] sm:$0xff]  ;;  %v200_v59 = vld [vmem:[%s12866_s1 + $0x1a8] sm:$0xff] }
  0x34   :  { %v958_v29 = vpack.c.bf16 %v196_v27, %v195_v26  ;;  %v8410_v35 = vld [vmem:[%s12868_s3] ss:$0 sm:$0xff]  ;;  %v198_v38 = vld [vmem:[%s12866_s1 + $0x198] sm:$0xff]  ;;  %v201_v15 = vld [vmem:[%s12866_s1 + $0x1b0] sm:$0xff] }
  0x39   :  { %6750 = vmatmul.mubr.msk.bf16.gmra.mxu0 %vm312_vm1, %v251_v45  ;;  %v84_v45 = vld [vmem:[%s12865_s0 + $0x118] sm:$0xff] }
  0x3a   :  { %6950 = vmatmul.mubr.msk.bf16.gmra.mxu1 %vm312_vm1, %v940_v46  ;;  %6753 = vmatprep.mubr.msk.bf16.mxu0 %vm7875_vm0, %v12876_v1  ;;  %v181_v46 = vld [vmem:[%s12866_s1 + $0x110] sm:$0xff]  ;;  %v262_v49 = vpack.c.bf16 %v84_v45, %v83_v44 }
  0x3b   :  { %6953 = vmatprep.mubr.msk.bf16.mxu1 %vm7875_vm0, %v12876_v1  ;;  %v951_v50 = vpack.c.bf16 %v182_v47, %v181_v46 }
  0x41   :  { %6754 = vmatmul.mubr.msk.bf16.gmra.mxu0 %vm312_vm1, %v252_v51  ;;  %v85_v51 = vld [vmem:[%s12865_s0 + $0x120] sm:$0xff] }
  0x42   :  { %6954 = vmatmul.mubr.msk.bf16.gmra.mxu1 %vm312_vm1, %v941_v52  ;;  %6757 = vmatprep.mubr.msk.bf16.mxu0 %vm7875_vm0, %v12876_v1  ;;  %v86_v52 = vld [vmem:[%s12865_s0 + $0x128] sm:$0xff] }
  0x43   :  { %6957 = vmatprep.mubr.msk.bf16.mxu1 %vm7875_vm0, %v12876_v1  ;;  %v263_v55 = vpack.c.bf16 %v86_v52, %v85_v51 }
  0x49   :  { %6758 = vmatmul.mubr.msk.bf16.gmra.mxu0 %vm312_vm1, %v253_v57  ;;  %v87_v57 = vld [vmem:[%s12865_s0 + $0x130] sm:$0xff] }
  0x4a   :  { %6958 = vmatmul.mubr.msk.bf16.gmra.mxu1 %vm312_vm1, %v942_v58  ;;  %6761 = vmatprep.mubr.msk.bf16.mxu0 %vm7875_vm0, %v12876_v1  ;;  %v88_v58 = vld [vmem:[%s12865_s0 + $0x138] sm:$0xff] }
  0x4b   :  { %6961 = vmatprep.mubr.msk.bf16.mxu1 %vm7875_vm0, %v12876_v1  ;;  %v264_v61 = vpack.c.bf16 %v88_v58, %v87_v57  ;;  %v199_v58 = vld [vmem:[%s12866_s1 + $0x1a0] sm:$0xff] }
  0x51   :  { %6762 = vmatmul.mubr.msk.bf16.gmra.mxu0 %vm312_vm1, %v254_v63  ;;  %v89_v63 = vld [vmem:[%s12865_s0 + $0x140] sm:$0xff] }
  0x52   :  { %6962 = vmatmul.mubr.msk.bf16.gmra.mxu1 %vm312_vm1, %v943_v0  ;;  %6765 = vmatprep.mubr.msk.bf16.mxu0 %vm7875_vm0, %v12876_v1  ;;  %v90_v0 = vld [vmem:[%s12865_s0 + $0x148] sm:$0xff] }
  0x53   :  { %6965 = vmatprep.mubr.msk.bf16.mxu1 %vm7875_vm0, %v12876_v1  ;;  %v265_v4 = vpack.c.bf16 %v90_v0, %v89_v63 }
  0x59   :  { %6766 = vmatmul.mubr.msk.bf16.gmra.mxu0 %vm312_vm1, %v255_v6  ;;  %v91_v6 = vld [vmem:[%s12865_s0 + $0x150] sm:$0xff] }
  0x5a   :  { %6966 = vmatmul.mubr.msk.bf16.gmra.mxu1 %vm312_vm1, %v944_v7  ;;  %6769 = vmatprep.mubr.msk.bf16.mxu0 %vm7875_vm0, %v12876_v1  ;;  %v92_v7 = vld [vmem:[%s12865_s0 + $0x158] sm:$0xff] }
  0x5b   :  { %6969 = vmatprep.mubr.msk.bf16.mxu1 %vm7875_vm0, %v12876_v1  ;;  %v266_v10 = vpack.c.bf16 %v92_v7, %v91_v6 }
  0x61   :  { %6770 = vmatmul.mubr.msk.bf16.gmra.mxu0 %vm312_vm1, %v256_v12  ;;  %v93_v12 = vld [vmem:[%s12865_s0 + $0x160] sm:$0xff] }
  0x62   :  { %6970 = vmatmul.mubr.msk.bf16.gmra.mxu1 %vm312_vm1, %v945_v13  ;;  %6773 = vmatprep.mubr.msk.bf16.mxu0 %vm7875_vm0, %v12876_v1  ;;  %v94_v13 = vld [vmem:[%s12865_s0 + $0x168] sm:$0xff] }
  0x63   :  { %6973 = vmatprep.mubr.msk.bf16.mxu1 %vm7875_vm0, %v12876_v1  ;;  %v267_v16 = vpack.c.bf16 %v94_v13, %v93_v12  ;;  %v103_v12 = vld [vmem:[%s12865_s0 + $0x1b0] sm:$0xff]  ;;  %v104_v13 = vld [vmem:[%s12865_s0 + $0x1b8] sm:$0xff] }
  0x64   :  { %v272_v20 = vpack.c.bf16 %v104_v13, %v103_v12 }
  0x69   :  { %6774 = vmatmul.mubr.msk.bf16.gmra.mxu0 %vm312_vm1, %v257_v18  ;;  %v95_v18 = vld [vmem:[%s12865_s0 + $0x170] sm:$0xff] }
  0x6a   :  { %6974 = vmatmul.mubr.msk.bf16.gmra.mxu1 %vm312_vm1, %v946_v19  ;;  %6777 = vmatprep.mubr.msk.bf16.mxu0 %vm7875_vm0, %v12876_v1  ;;  %v96_v19 = vld [vmem:[%s12865_s0 + $0x178] sm:$0xff] }
  0x6b   :  { %6977 = vmatprep.mubr.msk.bf16.mxu1 %vm7875_vm0, %v12876_v1  ;;  %v268_v22 = vpack.c.bf16 %v96_v19, %v95_v18 }
  0x71   :  { %6778 = vmatmul.mubr.msk.bf16.gmra.mxu0 %vm312_vm1, %v258_v24  ;;  %v97_v24 = vld [vmem:[%s12865_s0 + $0x180] sm:$0xff] }
  0x72   :  { %6978 = vmatmul.mubr.msk.bf16.gmra.mxu1 %vm312_vm1, %v947_v25  ;;  %6781 = vmatprep.mubr.msk.bf16.mxu0 %vm7875_vm0, %v12876_v1  ;;  %v98_v25 = vld [vmem:[%s12865_s0 + $0x188] sm:$0xff] }
  0x73   :  { %6981 = vmatprep.mubr.msk.bf16.mxu1 %vm7875_vm0, %v12876_v1  ;;  %v269_v28 = vpack.c.bf16 %v98_v25, %v97_v24 }
  0x79   :  { %6782 = vmatmul.mubr.msk.bf16.gmra.mxu0 %vm312_vm1, %v259_v30 }
  0x7a   :  { %6982 = vmatmul.mubr.msk.bf16.gmra.mxu1 %vm312_vm1, %v948_v31  ;;  %6785 = vmatprep.mubr.msk.bf16.mxu0 %vm7875_vm0, %v12876_v1  ;;  %v8396_v31 = vld [vmem:[%s12870_s5] ss:$0 sm:$0xff] }
  0x7b   :  { %6985 = vmatprep.mubr.msk.bf16.mxu1 %vm7875_vm0, %v12876_v1 }
  0x81   :  { %6786 = vmatmul.mubr.msk.bf16.gmra.mxu0 %vm312_vm1, %v260_v36 }
  0x82   :  { %6986 = vmatmul.mubr.msk.bf16.gmra.mxu1 %vm312_vm1, %v949_v37  ;;  %6789 = vmatprep.mubr.msk.bf16.mxu0 %vm7875_vm0, %v12876_v1  ;;  %v197_v37 = vld [vmem:[%s12866_s1 + $0x190] sm:$0xff] }
  0x83   :  { %6989 = vmatprep.mubr.msk.bf16.mxu1 %vm7875_vm0, %v12876_v1  ;;  %v959_v46 = vpack.c.bf16 %v198_v38, %v197_v37  ;;  %v203_v37 = vld [vmem:[%s12866_s1 + $0x1c0] sm:$0xff]  ;;  %v204_v38 = vld [vmem:[%s12866_s1 + $0x1c8] sm:$0xff] }
  0x89   :  { %6790 = vmatmul.mubr.msk.bf16.gmra.mxu0 %vm312_vm1, %v261_v42  ;;  %v270_v42 = vpack.c.bf16 %v100_v34, %v99_v33  ;;  %v105_v33 = vld [vmem:[%s12865_s0 + $0x1c0] sm:$0xff]  ;;  %v106_v34 = vld [vmem:[%s12865_s0 + $0x1c8] sm:$0xff] }
  0x8a   :  { %6990 = vmatmul.mubr.msk.bf16.gmra.mxu1 %vm312_vm1, %v950_v43  ;;  %6793 = vmatprep.mubr.msk.bf16.mxu0 %vm7875_vm0, %v12876_v1 }
  0x8b   :  { %6993 = vmatprep.mubr.msk.bf16.mxu1 %vm7875_vm0, %v12876_v1 }
  0x91   :  { %6794 = vmatmul.mubr.msk.bf16.gmra.mxu0 %vm312_vm1, %v262_v49 }
  0x92   :  { %6994 = vmatmul.mubr.msk.bf16.gmra.mxu1 %vm312_vm1, %v951_v50  ;;  %6797 = vmatprep.mubr.msk.bf16.mxu0 %vm7875_vm0, %v12876_v1 }
  0x93   :  { %6997 = vmatprep.mubr.msk.bf16.mxu1 %vm7875_vm0, %v12876_v1 }
  0x99   :  { %6798 = vmatmul.mubr.msk.bf16.gmra.mxu0 %vm312_vm1, %v263_v55  ;;  %v101_v55 = vld [vmem:[%s12865_s0 + $0x1a0] sm:$0xff] }
  0x9a   :  { %6998 = vmatmul.mubr.msk.bf16.gmra.mxu1 %vm312_vm1, %v952_v56  ;;  %6801 = vmatprep.mubr.msk.bf16.mxu0 %vm7875_vm0, %v12876_v1  ;;  %v102_v56 = vld [vmem:[%s12865_s0 + $0x1a8] sm:$0xff] }
  0x9b   :  { %7001 = vmatprep.mubr.msk.bf16.mxu1 %vm7875_vm0, %v12876_v1  ;;  %v271_v63 = vpack.c.bf16 %v102_v56, %v101_v55 }
  0xa1   :  { %6802 = vmatmul.mubr.msk.bf16.gmra.mxu0 %vm312_vm1, %v264_v61 }
  0xa2   :  { %7002 = vmatmul.mubr.msk.bf16.gmra.mxu1 %vm312_vm1, %v953_v62  ;;  %6805 = vmatprep.mubr.msk.bf16.mxu0 %vm7875_vm0, %v12876_v1 }
  0xa3   :  { %7005 = vmatprep.mubr.msk.bf16.mxu1 %vm7875_vm0, %v12876_v1 }
  0xa9   :  { %6806 = vmatmul.mubr.msk.bf16.gmra.mxu0 %vm312_vm1, %v265_v4  ;;  %v960_v4 = vpack.c.bf16 %v200_v59, %v199_v58  ;;  %v107_v59 = vld [vmem:[%s12865_s0 + $0x1d0] sm:$0xff] }
  0xaa   :  { %7006 = vmatmul.mubr.msk.bf16.gmra.mxu1 %vm312_vm1, %v954_v5  ;;  %6809 = vmatprep.mubr.msk.bf16.mxu0 %vm7875_vm0, %v12876_v1 }
  0xab   :  { %7009 = vmatprep.mubr.msk.bf16.mxu1 %vm7875_vm0, %v12876_v1 }
  0xb1   :  { %6810 = vmatmul.mubr.msk.bf16.gmra.mxu0 %vm312_vm1, %v266_v10 }
  0xb2   :  { %7010 = vmatmul.mubr.msk.bf16.gmra.mxu1 %vm312_vm1, %v955_v11  ;;  %6813 = vmatprep.mubr.msk.bf16.mxu0 %vm7875_vm0, %v12876_v1 }
  0xb3   :  { %7013 = vmatprep.mubr.msk.bf16.mxu1 %vm7875_vm0, %v12876_v1 }
  0xb9   :  { %6814 = vmatmul.mubr.msk.bf16.gmra.mxu0 %vm312_vm1, %v267_v16  ;;  %v202_v16 = vld [vmem:[%s12866_s1 + $0x1b8] sm:$0xff] }
  0xba   :  { %7014 = vmatmul.mubr.msk.bf16.gmra.mxu1 %vm312_vm1, %v956_v17  ;;  %6817 = vmatprep.mubr.msk.bf16.mxu0 %vm7875_vm0, %v12876_v1  ;;  %v961_v24 = vpack.c.bf16 %v202_v16, %v201_v15 }
  0xbb   :  { %7017 = vmatprep.mubr.msk.bf16.mxu1 %vm7875_vm0, %v12876_v1 }
  0xc1   :  { %6818 = vmatmul.mubr.msk.bf16.gmra.mxu0 %vm312_vm1, %v268_v22 }
  0xc2   :  { %7018 = vmatmul.mubr.msk.bf16.gmra.mxu1 %vm312_vm1, %v957_v23  ;;  %6821 = vmatprep.mubr.msk.bf16.mxu0 %vm7875_vm0, %v12876_v1 }
  0xc3   :  { %7021 = vmatprep.mubr.msk.bf16.mxu1 %vm7875_vm0, %v12876_v1 }
  0xc9   :  { %v494_v30 = vpop.f32.mrf.mxu0  ;;  %6822 = vmatmul.mubr.msk.bf16.gmra.mxu0 %vm312_vm1, %v269_v28 }
  0xca   :  { %v1182_v32 = vpop.f32.mrf.mxu1  ;;  %7022 = vmatmul.mubr.msk.bf16.gmra.mxu1 %vm312_vm1, %v958_v29  ;;  %6825 = vmatprep.mubr.msk.bf16.mxu0 %vm7875_vm0, %v12876_v1  ;;  %v8422_v43 = vadd.f32 %v8410_v35, %v494_v30 }
  0xcb   :  { %v6727_v36 = vpop.f32.mrf.mxu0  ;;  %7025 = vmatprep.mubr.msk.bf16.mxu1 %vm7875_vm0, %v12876_v1  ;;  %v1183_v40 = vadd.f32 %v8396_v31, %v1182_v32 }
  0xcc   :  { %v6927_v39 = vpop.f32.mrf.mxu1 }
  0xcd   :  { %v497_v41 = vpop.f32.mrf.mxu0 }
  0xce   :  { %v8425_v44 = vadd.f32 %v8410_v35, %v497_v41  ;;  %v1185_v45 = vpop.f32.mrf.mxu1 }
  0xcf   :  { %v1186_v47 = vadd.f32 %v8396_v31, %v1185_v45  ;;  %v6728_v49 = vpop.f32.mrf.mxu0 }
  0xd0   :  { %v6928_v51 = vpop.f32.mrf.mxu1  ;;  %v962_v49 = vpack.c.bf16 %v204_v38, %v203_v37 }
  0xd1   :  { %v502_v52 = vpop.f32.mrf.mxu0  ;;  %6826 = vmatmul.mubr.msk.bf16.gmra.mxu0 %vm312_vm1, %v270_v42  ;;  %v8431_v53 = vpack.c.bf16 %v1186_v47, %v1183_v40  ;;  %v273_v42 = vpack.c.bf16 %v106_v34, %v105_v33 }
  0xd2   :  { %v1190_v54 = vpop.f32.mrf.mxu1  ;;  %7026 = vmatmul.mubr.msk.bf16.gmra.mxu1 %vm312_vm1, %v959_v46  ;;  %6829 = vmatprep.mubr.msk.bf16.mxu0 %vm7875_vm0, %v12876_v1  ;;  %v8454_v0 = vadd.f32 %v8410_v35, %v502_v52 }
  0xd3   :  { %2280 = vrot.lane.b32.xlu1 %v8431_v53, %s7877_s13  ;;  %v6731_v57 = vpop.f32.mrf.mxu0  ;;  %7029 = vmatprep.mubr.msk.bf16.mxu1 %vm7875_vm0, %v12876_v1  ;;  %v1191_v61 = vadd.f32 %v8396_v31, %v1190_v54 }
  0xd4   :  { %v6931_v60 = vpop.f32.mrf.mxu1 }
  0xd5   :  { %v505_v62 = vpop.f32.mrf.mxu0  ;;  %v108_v60 = vld [vmem:[%s12865_s0 + $0x1d8] sm:$0xff] }
  0xd6   :  { %v8457_v2 = vadd.f32 %v8410_v35, %v505_v62  ;;  %v1193_v3 = vpop.f32.mrf.mxu1  ;;  %v205_v62 = vld [vmem:[%s12866_s1 + $0x1d0] sm:$0xff] }
  0xd7   :  { %v1194_v5 = vadd.f32 %v8396_v31, %v1193_v3  ;;  %v6732_v6 = vpop.f32.mrf.mxu0 }
  0xd8   :  { %v6932_v8 = vpop.f32.mrf.mxu1  ;;  %v274_v6 = vpack.c.bf16 %v108_v60, %v107_v59  ;;  %v210_v59 = vld [vmem:[%s12866_s1 + $0x1f8] sm:$0xff] }
  0xd9   :  { %v8462_v9 = vpack.c.bf16 %v1194_v5, %v1191_v61  ;;  %v510_v10 = vpop.f32.mrf.mxu0  ;;  %6830 = vmatmul.mubr.msk.bf16.gmra.mxu0 %vm312_vm1, %v271_v63  ;;  %v206_v63 = vld [vmem:[%s12866_s1 + $0x1d8] sm:$0xff] }
  0xda   :  { %v1198_v11 = vpop.f32.mrf.mxu1  ;;  %7030 = vmatmul.mubr.msk.bf16.gmra.mxu1 %vm312_vm1, %v960_v4  ;;  %6833 = vmatprep.mubr.msk.bf16.mxu0 %vm7875_vm0, %v12876_v1  ;;  %v8486_v21 = vadd.f32 %v8410_v35, %v510_v10  ;;  %v963_v12 = vpack.c.bf16 %v206_v63, %v205_v62 }
  0xdb   :  { %2282 = vrot.lane.b32.xlu1 %v8462_v9, %s7877_s13  ;;  %v6735_v14 = vpop.f32.mrf.mxu0  ;;  %7033 = vmatprep.mubr.msk.bf16.mxu1 %vm7875_vm0, %v12876_v1  ;;  %v1199_v18 = vadd.f32 %v8396_v31, %v1198_v11 }
  0xdc   :  { %v6935_v17 = vpop.f32.mrf.mxu1 }
  0xdd   :  { %v513_v19 = vpop.f32.mrf.mxu0 }
  0xde   :  { %v8489_v22 = vadd.f32 %v8410_v35, %v513_v19  ;;  %v1201_v23 = vpop.f32.mrf.mxu1 }
  0xdf   :  { %v1202_v25 = vadd.f32 %v8396_v31, %v1201_v23  ;;  %v6736_v26 = vpop.f32.mrf.mxu0  ;;  %v110_v23 = vld [vmem:[%s12865_s0 + $0x1e8] sm:$0xff] }
  0xe0   :  { %v6936_v28 = vpop.f32.mrf.mxu1  ;;  %v208_v26 = vld [vmem:[%s12866_s1 + $0x1e8] sm:$0xff] }
  0xe1   :  { %v8494_v29 = vpack.c.bf16 %v1202_v25, %v1199_v18  ;;  %v518_v30 = vpop.f32.mrf.mxu0  ;;  %6834 = vmatmul.mubr.msk.bf16.gmra.mxu0 %vm312_vm1, %v272_v20  ;;  %v109_v20 = vld [vmem:[%s12865_s0 + $0x1e0] sm:$0xff] }
  0xe2   :  { %v1206_v32 = vpop.f32.mrf.mxu1  ;;  %7034 = vmatmul.mubr.msk.bf16.gmra.mxu1 %vm312_vm1, %v961_v24  ;;  %6837 = vmatprep.mubr.msk.bf16.mxu0 %vm7875_vm0, %v12876_v1  ;;  %v8518_v45 = vadd.f32 %v8410_v35, %v518_v30  ;;  %v207_v25 = vld [vmem:[%s12866_s1 + $0x1e0] sm:$0xff]  ;;  %v275_v33 = vpack.c.bf16 %v110_v23, %v109_v20  ;;  %v114_v23 = vld [vmem:[%s12865_s0 + $0x208] sm:$0xff] }
  0xe3   :  { %2284 = vrot.lane.b32.xlu1 %v8494_v29, %s7877_s13  ;;  %v6739_v36 = vpop.f32.mrf.mxu0  ;;  %7037 = vmatprep.mubr.msk.bf16.mxu1 %vm7875_vm0, %v12876_v1  ;;  %v1207_v40 = vadd.f32 %v8396_v31, %v1206_v32  ;;  %v964_v38 = vpack.c.bf16 %v208_v26, %v207_v25  ;;  %v113_v20 = vld [vmem:[%s12865_s0 + $0x200] sm:$0xff]  ;;  %v212_v26 = vld [vmem:[%s12866_s1 + $0x208] sm:$0xff] }
  0xe4   :  { %v6939_v39 = vpop.f32.mrf.mxu1  ;;  %v211_v25 = vld [vmem:[%s12866_s1 + $0x200] sm:$0xff] }
  0xe5   :  { %v521_v41 = vpop.f32.mrf.mxu0 }
  0xe6   :  { %v8521_v46 = vadd.f32 %v8410_v35, %v521_v41  ;;  %v1209_v47 = vpop.f32.mrf.mxu1 }
  0xe7   :  { %v1210_v51 = vadd.f32 %v8396_v31, %v1209_v47  ;;  %v6740_v52 = vpop.f32.mrf.mxu0 }
  0xe8   :  { %v6940_v55 = vpop.f32.mrf.mxu1  ;;  %v111_v52 = vld [vmem:[%s12865_s0 + $0x1f0] sm:$0xff] }
  0xe9   :  { %v526_v56 = vpop.f32.mrf.mxu0  ;;  %6838 = vmatmul.mubr.msk.bf16.gmra.mxu0 %vm312_vm1, %v273_v42  ;;  %v8527_v57 = vpack.c.bf16 %v1210_v51, %v1207_v40  ;;  %v112_v55 = vld [vmem:[%s12865_s0 + $0x1f8] sm:$0xff] }
  0xea   :  { %v1214_v58 = vpop.f32.mrf.mxu1  ;;  %7038 = vmatmul.mubr.msk.bf16.gmra.mxu1 %vm312_vm1, %v962_v49  ;;  %6841 = vmatprep.mubr.msk.bf16.mxu0 %vm7875_vm0, %v12876_v1  ;;  %v8550_v8 = vadd.f32 %v8410_v35, %v526_v56  ;;  %v276_v63 = vpack.c.bf16 %v112_v55, %v111_v52 }
  0xeb   :  { %2286 = vrot.lane.b32.xlu0 %v8527_v57, %s7877_s13  ;;  %v6743_v61 = vpop.f32.mrf.mxu0  ;;  %7041 = vmatprep.mubr.msk.bf16.mxu1 %vm7875_vm0, %v12876_v1  ;;  %v1215_v4 = vadd.f32 %v8396_v31, %v1214_v58  ;;  %v209_v58 = vld [vmem:[%s12866_s1 + $0x1f0] sm:$0xff] }
  0xec   :  { %v6943_v3 = vpop.f32.mrf.mxu1 }
  0xed   :  { %v529_v5 = vpop.f32.mrf.mxu0 }
  0xee   :  { %v8553_v10 = vadd.f32 %v8410_v35, %v529_v5  ;;  %v1217_v11 = vpop.f32.mrf.mxu1 }
  0xef   :  { %v1218_v13 = vadd.f32 %v8396_v31, %v1217_v11  ;;  %v6744_v14 = vpop.f32.mrf.mxu0 }
  0xf0   :  { %v6944_v16 = vpop.f32.mrf.mxu1 }
  0xf1   :  { %v8558_v17 = vpack.c.bf16 %v1218_v13, %v1215_v4  ;;  %v534_v18 = vpop.f32.mrf.mxu0  ;;  %6842 = vmatmul.mubr.msk.bf16.gmra.mxu0 %vm312_vm1, %v274_v6  ;;  %v965_v6 = vpack.c.bf16 %v210_v59, %v209_v58  ;;  %v115_v59 = vld [vmem:[%s12865_s0 + $0x210] sm:$0xff] }
  0xf2   :  { %v1222_v19 = vpop.f32.mrf.mxu1  ;;  %7042 = vmatmul.mubr.msk.bf16.gmra.mxu1 %vm312_vm1, %v963_v12  ;;  %6845 = vmatprep.mubr.msk.bf16.mxu0 %vm7875_vm0, %v12876_v1  ;;  %v8582_v34 = vadd.f32 %v8410_v35, %v534_v18 }
  0xf3   :  { %2288 = vrot.lane.b32.xlu1 %v8558_v17, %s7877_s13  ;;  %v6747_v24 = vpop.f32.mrf.mxu0  ;;  %7045 = vmatprep.mubr.msk.bf16.mxu1 %vm7875_vm0, %v12876_v1  ;;  %v1223_v30 = vadd.f32 %v8396_v31, %v1222_v19 }
  0xf4   :  { %v6947_v28 = vpop.f32.mrf.mxu1 }
  0xf5   :  { %v537_v32 = vpop.f32.mrf.mxu0 }
  0xf6   :  { %v8585_v36 = vadd.f32 %v8410_v35, %v537_v32  ;;  %v1225_v37 = vpop.f32.mrf.mxu1 }
  0xf7   :  { %v1226_v39 = vadd.f32 %v8396_v31, %v1225_v37  ;;  %v6748_v40 = vpop.f32.mrf.mxu0 }
  0xf8   :  { %v6948_v42 = vpop.f32.mrf.mxu1  ;;  %v966_v40 = vpack.c.bf16 %v212_v26, %v211_v25 }
  0xf9   :  { %v8590_v47 = vpack.c.bf16 %v1226_v39, %v1223_v30  ;;  %v542_v49 = vpop.f32.mrf.mxu0  ;;  %6846 = vmatmul.mubr.msk.bf16.gmra.mxu0 %vm312_vm1, %v275_v33  ;;  %v277_v33 = vpack.c.bf16 %v114_v23, %v113_v20 }
  0xfa   :  { %v1230_v51 = vpop.f32.mrf.mxu1  ;;  %7046 = vmatmul.mubr.msk.bf16.gmra.mxu1 %vm312_vm1, %v964_v38  ;;  %6849 = vmatprep.mubr.msk.bf16.mxu0 %vm7875_vm0, %v12876_v1  ;;  %v8614_v3 = vadd.f32 %v8410_v35, %v542_v49 }
  0xfb   :  { %2290 = vrot.lane.b32.xlu1 %v8590_v47, %s7877_s13  ;;  %v6751_v56 = vpop.f32.mrf.mxu0  ;;  %7049 = vmatprep.mubr.msk.bf16.mxu1 %vm7875_vm0, %v12876_v1  ;;  %v1231_v61 = vadd.f32 %v8396_v31, %v1230_v51 }
  0xfc   :  { %v6951_v60 = vpop.f32.mrf.mxu1 }
  0xfd   :  { %v545_v62 = vpop.f32.mrf.mxu0  ;;  %v116_v60 = vld [vmem:[%s12865_s0 + $0x218] sm:$0xff] }
  0xfe   :  { %v8617_v4 = vadd.f32 %v8410_v35, %v545_v62  ;;  %v1233_v5 = vpop.f32.mrf.mxu1 }
  0xff   :  { %v1234_v11 = vadd.f32 %v8396_v31, %v1233_v5  ;;  %v6752_v12 = vpop.f32.mrf.mxu0  ;;  %v214_v5 = vld [vmem:[%s12866_s1 + $0x218] sm:$0xff] }
 0x100   :  { %v6952_v14 = vpop.f32.mrf.mxu1 }
 0x101   :  { %v1579_v16 = vpack.c.bf16 %v1234_v11, %v1231_v61  ;;  %v550_v18 = vpop.f32.mrf.mxu0  ;;  %6850 = vmatmul.mubr.msk.bf16.gmra.mxu0 %vm312_vm1, %v276_v63  ;;  %v213_v63 = vld [vmem:[%s12866_s1 + $0x210] sm:$0xff]  ;;  %v278_v14 = vpack.c.bf16 %v116_v60, %v115_v59 }
 0x102   :  { %v1238_v19 = vpop.f32.mrf.mxu1  ;;  %7050 = vmatmul.mubr.msk.bf16.gmra.mxu1 %vm312_vm1, %v965_v6  ;;  %6853 = vmatprep.mubr.msk.bf16.mxu0 %vm7875_vm0, %v12876_v1  ;;  %v8643_v37 = vadd.f32 %v8410_v35, %v550_v18  ;;  %v967_v23 = vpack.c.bf16 %v214_v5, %v213_v63 }
 0x103   :  { %2292 = vrot.lane.b32.xlu1 %v1579_v16, %s7877_s13  ;;  %v6755_v24 = vpop.f32.mrf.mxu0  ;;  %7053 = vmatprep.mubr.msk.bf16.mxu1 %vm7875_vm0, %v12876_v1  ;;  %v1239_v30 = vadd.f32 %v8396_v31, %v1238_v19 }
 0x104   :  { %v6955_v28 = vpop.f32.mrf.mxu1 }
 0x105   :  { %v553_v32 = vpop.f32.mrf.mxu0 }
 0x106   :  { %v8646_v38 = vadd.f32 %v8410_v35, %v553_v32  ;;  %v1241_v39 = vpop.f32.mrf.mxu1 }
 0x107   :  { %v1242_v42 = vadd.f32 %v8396_v31, %v1241_v39  ;;  %v6756_v49 = vpop.f32.mrf.mxu0 }
 0x108   :  { %v6956_v52 = vpop.f32.mrf.mxu1 }
 0x109   :  { %v1580_v55 = vpack.c.bf16 %v1242_v42, %v1239_v30  ;;  %v558_v56 = vpop.f32.mrf.mxu0  ;;  %6854 = vmatmul.mubr.msk.bf16.gmra.mxu0 %vm312_vm1, %v277_v33  ;;  %v1680_v33 = vsel %vm312_vm1, %v1579_v16, 0  ;;  %v118_v42 = vld [vmem:[%s12865_s0 + $0x228] sm:$0xff]  ;;  %v215_v16 = vld [vmem:[%s12866_s1 + $0x220] sm:$0xff] }
 0x10a   :  { %v1246_v58 = vpop.f32.mrf.mxu1  ;;  %7054 = vmatmul.mubr.msk.bf16.gmra.mxu1 %vm312_vm1, %v966_v40  ;;  %6857 = vmatprep.mubr.msk.bf16.mxu0 %vm7875_vm0, %v12876_v1  ;;  %v8674_v18 = vadd.f32 %v8410_v35, %v558_v56  ;;  %v117_v40 = vld [vmem:[%s12865_s0 + $0x220] sm:$0xff]  ;;  %v216_v52 = vld [vmem:[%s12866_s1 + $0x228] sm:$0xff] }
 0x10b   :  { %2294 = vrot.lane.b32.xlu0 %v1580_v55, %s7877_s13  ;;  %v6759_v61 = vpop.f32.mrf.mxu0  ;;  %v1683_v62 = vsel %vm312_vm1, %v1580_v55, 0  ;;  %7057 = vmatprep.mubr.msk.bf16.mxu1 %vm7875_vm0, %v12876_v1  ;;  %v1247_v11 = vadd.f32 %v8396_v31, %v1246_v58  ;;  %v279_v59 = vpack.c.bf16 %v118_v42, %v117_v40  ;;  %v968_v63 = vpack.c.bf16 %v216_v52, %v215_v16 }
 0x10c   :  { %1701 = vmatpush1.bf16.xpose.msra.mxu0 %v1683_v62  ;;  %v6959_v6 = vpop.f32.mrf.mxu1 }
 0x10d   :  { %v561_v12 = vpop.f32.mrf.mxu0  ;;  %1702 = vmatprep.subr.bf16.mxu0 %v12874_v48 }
 0x10e   :  { %v8677_v19 = vadd.f32 %v8410_v35, %v561_v12  ;;  %v1249_v20 = vpop.f32.mrf.mxu1 }
 0x10f   :  { %v6760_v24 = vpop.f32.mrf.mxu0  ;;  %v1250_v25 = vadd.f32 %v8396_v31, %v1249_v20 }
 0x110   :  { %v6960_v28 = vpop.f32.mrf.mxu1  ;;  %v119_v24 = vld [vmem:[%s12865_s0 + $0x230] sm:$0xff] }
 0x111   :  { %v8682_v30 = vpack.c.bf16 %v1250_v25, %v1247_v11  ;;  %v566_v32 = vpop.f32.mrf.mxu0  ;;  %6858 = vmatmul.mubr.msk.bf16.gmra.mxu0 %vm312_vm1, %v278_v14  ;;  %v120_v25 = vld [vmem:[%s12865_s0 + $0x238] sm:$0xff] }
 0x112   :  { %v1254_v39 = vpop.f32.mrf.mxu1  ;;  %7058 = vmatmul.mubr.msk.bf16.gmra.mxu1 %vm312_vm1, %v967_v23  ;;  %6861 = vmatprep.mubr.msk.bf16.mxu0 %vm7875_vm0, %v12876_v1  ;;  %v8708_v60 = vadd.f32 %v8410_v35, %v566_v32  ;;  %v1677_v32 = vsel %vm312_vm1, %v8590_v47, 0  ;;  %v280_v47 = vpack.c.bf16 %v120_v25, %v119_v24  ;;  %v1674_v25 = vsel %vm312_vm1, %v8558_v17, 0 }
 0x113   :  { %v6763_v49 = vpop.f32.mrf.mxu0  ;;  %7061 = vmatprep.mubr.msk.bf16.mxu1 %vm7875_vm0, %v12876_v1  ;;  %2296 = vrot.lane.b32.xlu1 %v8682_v30, %s7877_s13  ;;  %v1255_v56 = vadd.f32 %v8396_v31, %v1254_v39  ;;  %v218_v39 = vld [vmem:[%s12866_s1 + $0x238] sm:$0xff] }
 0x114   :  { %1703 = vmatpush1.bf16.xpose.msra.mxu0 %v1680_v33  ;;  %v6963_v55 = vpop.f32.mrf.mxu1  ;;  %v217_v33 = vld [vmem:[%s12866_s1 + $0x230] sm:$0xff] }
 0x115   :  { %v569_v58 = vpop.f32.mrf.mxu0  ;;  %1704 = vmatprep.subr.bf16.mxu0 %v12874_v48 }
 0x116   :  { %v8711_v61 = vadd.f32 %v8410_v35, %v569_v58  ;;  %v1257_v62 = vpop.f32.mrf.mxu1 }
 0x117   :  { %v6764_v5 = vpop.f32.mrf.mxu0  ;;  %v1258_v6 = vadd.f32 %v8396_v31, %v1257_v62 }
 0x118   :  { %v6964_v12 = vpop.f32.mrf.mxu1 }
 0x119   :  { %v8716_v14 = vpack.c.bf16 %v1258_v6, %v1255_v56  ;;  %v574_v20 = vpop.f32.mrf.mxu0  ;;  %6862 = vmatmul.mubr.msk.bf16.gmra.mxu0 %vm312_vm1, %v279_v59  ;;  %v969_v56 = vpack.c.bf16 %v218_v39, %v217_v33 }
 0x11a   :  { %v1262_v23 = vpop.f32.mrf.mxu1  ;;  %7062 = vmatmul.mubr.msk.bf16.gmra.mxu1 %vm312_vm1, %v968_v63  ;;  %6865 = vmatprep.mubr.msk.bf16.mxu0 %vm7875_vm0, %v12876_v1  ;;  %v8743_v16 = vadd.f32 %v8410_v35, %v574_v20  ;;  %v121_v20 = vld [vmem:[%s12865_s0 + $0x240] sm:$0xff] }
 0x11b   :  { %v6767_v28 = vpop.f32.mrf.mxu0  ;;  %7065 = vmatprep.mubr.msk.bf16.mxu1 %vm7875_vm0, %v12876_v1  ;;  %2298 = vrot.lane.b32.xlu1 %v8716_v14, %s7877_s13  ;;  %v1263_v42 = vadd.f32 %v8396_v31, %v1262_v23  ;;  %v122_v23 = vld [vmem:[%s12865_s0 + $0x248] sm:$0xff] }
 0x11c   :  { %1705 = vmatpush1.bf16.xpose.msra.mxu0 %v1677_v32  ;;  %v6967_v40 = vpop.f32.mrf.mxu1  ;;  %v219_v28 = vld [vmem:[%s12866_s1 + $0x240] sm:$0xff]  ;;  %v220_v32 = vld [vmem:[%s12866_s1 + $0x248] sm:$0xff]  ;;  %v281_v17 = vpack.c.bf16 %v122_v23, %v121_v20 }
 0x11d   :  { %v577_v49 = vpop.f32.mrf.mxu0  ;;  %1706 = vmatprep.subr.bf16.mxu0 %v12874_v48 }
 0x11e   :  { %v8746_v52 = vadd.f32 %v8410_v35, %v577_v49  ;;  %v1265_v55 = vpop.f32.mrf.mxu1 }
 0x11f   :  { %v6768_v58 = vpop.f32.mrf.mxu0  ;;  %v1266_v59 = vadd.f32 %v8396_v31, %v1265_v55  ;;  %v970_v55 = vpack.c.bf16 %v220_v32, %v219_v28  ;;  %v1671_v28 = vsel %vm312_vm1, %v8527_v57, 0  ;;  %v221_v32 = vld [vmem:[%s12866_s1 + $0x250] sm:$0xff] }
 0x120   :  { %v6968_v63 = vpop.f32.mrf.mxu1 }
 0x121   :  { %v8751_v5 = vpack.c.bf16 %v1266_v59, %v1263_v42  ;;  %v582_v6 = vpop.f32.mrf.mxu0  ;;  %6866 = vmatmul.mubr.msk.bf16.gmra.mxu0 %vm312_vm1, %v280_v47 }
 0x122   :  { %v1270_v12 = vpop.f32.mrf.mxu1  ;;  %7066 = vmatmul.mubr.msk.bf16.gmra.mxu1 %vm312_vm1, %v969_v56  ;;  %6869 = vmatprep.mubr.msk.bf16.mxu0 %vm7875_vm0, %v12876_v1  ;;  %v8778_v42 = vadd.f32 %v8410_v35, %v582_v6  ;;  %v123_v6 = vld [vmem:[%s12865_s0 + $0x250] sm:$0xff] }
 0x123   :  { %v6771_v24 = vpop.f32.mrf.mxu0  ;;  %7069 = vmatprep.mubr.msk.bf16.mxu1 %vm7875_vm0, %v12876_v1  ;;  %2300 = vrot.lane.b32.xlu1 %v8751_v5, %s7877_s13  ;;  %v1271_v39 = vadd.f32 %v8396_v31, %v1270_v12 }
 0x124   :  { %1707 = vmatpush1.bf16.xpose.msra.mxu0 %v1674_v25  ;;  %v6971_v33 = vpop.f32.mrf.mxu1  ;;  %v124_v24 = vld [vmem:[%s12865_s0 + $0x258] sm:$0xff] }
 0x125   :  { %v585_v40 = vpop.f32.mrf.mxu0  ;;  %1708 = vmatprep.subr.bf16.mxu0 %v12874_v48  ;;  %v222_v33 = vld [vmem:[%s12866_s1 + $0x258] sm:$0xff]  ;;  %v282_v57 = vpack.c.bf16 %v124_v24, %v123_v6  ;;  %v126_v6 = vld [vmem:[%s12865_s0 + $0x268] sm:$0xff]  ;;  %v1668_v24 = vsel %vm312_vm1, %v8494_v29, 0 }
 0x126   :  { %v8781_v49 = vadd.f32 %v8410_v35, %v585_v40  ;;  %v1273_v47 = vpop.f32.mrf.mxu1 }
 0x127   :  { %v6772_v56 = vpop.f32.mrf.mxu0  ;;  %v1274_v58 = vadd.f32 %v8396_v31, %v1273_v47 }
 0x128   :  { %v6972_v63 = vpop.f32.mrf.mxu1 }
 0x129   :  { %v8786_v12 = vpack.c.bf16 %v1274_v58, %v1271_v39  ;;  %v590_v20 = vpop.f32.mrf.mxu0  ;;  %6870 = vmatmul.mubr.msk.bf16.gmra.mxu0 %vm312_vm1, %v281_v17  ;;  %v971_v58 = vpack.c.bf16 %v222_v33, %v221_v32  ;;  %v223_v32 = vld [vmem:[%s12866_s1 + $0x260] sm:$0xff]  ;;  %v224_v33 = vld [vmem:[%s12866_s1 + $0x268] sm:$0xff] }
 0x12a   :  { %v1278_v23 = vpop.f32.mrf.mxu1  ;;  %7070 = vmatmul.mubr.msk.bf16.gmra.mxu1 %vm312_vm1, %v970_v55  ;;  %6873 = vmatprep.mubr.msk.bf16.mxu0 %vm7875_vm0, %v12876_v1  ;;  %v591_v47 = vadd.f32 %v8410_v35, %v590_v20  ;;  %v125_v20 = vld [vmem:[%s12865_s0 + $0x260] sm:$0xff] }
 0x12b   :  { %v6775_v25 = vpop.f32.mrf.mxu0  ;;  %7073 = vmatprep.mubr.msk.bf16.mxu1 %vm7875_vm0, %v12876_v1  ;;  %2302 = vrot.lane.b32.xlu1 %v8786_v12, %s7877_s13  ;;  %v1279_v40 = vadd.f32 %v8396_v31, %v1278_v23  ;;  %v283_v29 = vpack.c.bf16 %v126_v6, %v125_v20 }
 0x12c   :  { %1709 = vmatpush1.bf16.xpose.msra.mxu0 %v1671_v28  ;;  %v6975_v39 = vpop.f32.mrf.mxu1 }
 0x12d   :  { %v593_v17 = vpop.f32.mrf.mxu0  ;;  %1710 = vmatprep.subr.bf16.mxu0 %v12874_v48 }
 0x12e   :  { %v594_v55 = vadd.f32 %v8410_v35, %v593_v17  ;;  %v1281_v56 = vpop.f32.mrf.mxu1 }
 0x12f   :  { %v6776_v63 = vpop.f32.mrf.mxu0  ;;  %v1282_v25 = vadd.f32 %v8396_v31, %v1281_v56 }
 0x130   :  { %v8815_v59 = vpack.c.bf16 %v594_v55, %v591_v47  ;;  %v6976_v62 = vpop.f32.mrf.mxu1 }
 0x131   :  { %v8817_v28 = vpack.c.bf16 %v1282_v25, %v1279_v40  ;;  %v598_v39 = vpop.f32.mrf.mxu0  ;;  %6874 = vmatmul.mubr.msk.bf16.gmra.mxu0 %vm312_vm1, %v282_v57 }
 0x132   :  { %v1286_v23 = vpop.f32.mrf.mxu1  ;;  %7074 = vmatmul.mubr.msk.bf16.gmra.mxu1 %vm312_vm1, %v971_v58  ;;  %6877 = vmatprep.mubr.msk.bf16.mxu0 %vm7875_vm0, %v12876_v1  ;;  %v599_v47 = vadd.f32 %v8410_v35, %v598_v39  ;;  %v972_v58 = vpack.c.bf16 %v224_v33, %v223_v32  ;;  %v2766_v20 = vrot.slane %v8815_v59, 2  ;;  %v128_v32 = vld [vmem:[%s12865_s0 + $0x278] sm:$0xff] }
 0x133   :  { %v6779_v62 = vpop.f32.mrf.mxu0  ;;  %7077 = vmatprep.mubr.msk.bf16.mxu1 %vm7875_vm0, %v12876_v1  ;;  %2304 = vrot.lane.b32.xlu1 %v8817_v28, %s7877_s13  ;;  %v1287_v17 = vadd.f32 %v8396_v31, %v1286_v23 }
 0x134   :  { %1711 = vmatpush1.bf16.xpose.msra.mxu0 %v1668_v24  ;;  %v6979_v40 = vpop.f32.mrf.mxu1  ;;  %v2803_v24 = vrot.slane %v8817_v28, 2 }
 0x135   :  { %v601_v57 = vpop.f32.mrf.mxu0  ;;  %1712 = vmatprep.subr.bf16.mxu0 %v12874_v48 }
 0x136   :  { %v602_v55 = vadd.f32 %v8410_v35, %v601_v57  ;;  %v1289_v56 = vpop.f32.mrf.mxu1  ;;  %v1665_v57 = vsel %vm312_vm1, %v8462_v9, 0 }
 0x137   :  { %v6780_v63 = vpop.f32.mrf.mxu0  ;;  %v1290_v25 = vadd.f32 %v8396_v31, %v1289_v56 }
 0x138   :  { %v898_v62 = vpack.c.bf16 %v602_v55, %v599_v47  ;;  %v6980_v11 = vpop.f32.mrf.mxu1  ;;  %v226_v47 = vld [vmem:[%s12866_s1 + $0x278] sm:$0xff] }
 0x139   :  { %v1586_v40 = vpack.c.bf16 %v1290_v25, %v1287_v17  ;;  %v606_v23 = vpop.f32.mrf.mxu0  ;;  %6878 = vmatmul.mubr.msk.bf16.gmra.mxu0 %vm312_vm1, %v283_v29  ;;  %v127_v11 = vld [vmem:[%s12865_s0 + $0x270] sm:$0xff] }
 0x13a   :  { %v2767_v6 = vrot.slane %v898_v62, 2  ;;  %v1294_v39 = vpop.f32.mrf.mxu1  ;;  %7078 = vmatmul.mubr.msk.bf16.gmra.mxu1 %vm312_vm1, %v972_v58  ;;  %6881 = vmatprep.mubr.msk.bf16.mxu0 %vm7875_vm0, %v12876_v1  ;;  %v225_v29 = vld [vmem:[%s12866_s1 + $0x270] sm:$0xff]  ;;  %v284_v9 = vpack.c.bf16 %v128_v32, %v127_v11  ;;  %v607_v62 = vadd.f32 %v8410_v35, %v606_v23  ;;  %v129_v23 = vld [vmem:[%s12865_s0 + $0x280] sm:$0xff] }
 0x13b   :  { %v2804_v33 = vrot.slane %v1586_v40, 2  ;;  %v6783_v17 = vpop.f32.mrf.mxu0  ;;  %7081 = vmatprep.mubr.msk.bf16.mxu1 %vm7875_vm0, %v12876_v1  ;;  %v1295_v58 = vadd.f32 %v8396_v31, %v1294_v39  ;;  %v973_v26 = vpack.c.bf16 %v226_v47, %v225_v29  ;;  %v130_v29 = vld [vmem:[%s12865_s0 + $0x288] sm:$0xff] }
 0x13c   :  { %v8869_v55 = vsel %vm2765_vm2, %v2766_v20, %v2767_v6  ;;  %1713 = vmatpush1.bf16.xpose.msra.mxu0 %v1665_v57  ;;  %v6983_v56 = vpop.f32.mrf.mxu1 }
 0x13d   :  { %12980 = vst [vmem:[#allocation5_spill] sm:$0xff] %v8869_v55  ;;  %v609_v63 = vpop.f32.mrf.mxu0  ;;  %1714 = vmatprep.subr.bf16.mxu0 %v12874_v48  ;;  %v8874_v25 = vsel %vm2765_vm2, %v2803_v24, %v2804_v33 }
 0x13e   :  { %v610_v40 = vadd.f32 %v8410_v35, %v609_v63  ;;  %v1297_v17 = vpop.f32.mrf.mxu1  ;;  %3470 = vrot.lane.b32.xlu1 %v8874_v25, %s7877_s13  ;;  %v1662_v63 = vsel %vm312_vm1, %v8431_v53, 0  ;;  %v285_v53 = vpack.c.bf16 %v130_v29, %v129_v23 }
 0x13f   :  { %v6784_v20 = vpop.f32.mrf.mxu0  ;;  %v1298_v57 = vadd.f32 %v8396_v31, %v1297_v17 }
 0x140   :  { %v899_v39 = vpack.c.bf16 %v610_v40, %v607_v62  ;;  %v6984_v56 = vpop.f32.mrf.mxu1 }
 0x141   :  { %v1587_v11 = vpack.c.bf16 %v1298_v57, %v1295_v58  ;;  %v614_v32 = vpop.f32.mrf.mxu0  ;;  %6882 = vmatmul.mubr.msk.bf16.gmra.mxu0 %vm312_vm1, %v284_v9  ;;  %v228_v9 = vld [vmem:[%s12866_s1 + $0x288] sm:$0xff] }
 0x142   :  { %v2769_v24 = vrot.slane %v899_v39, 2  ;;  %v1302_v51 = vpop.f32.mrf.mxu1  ;;  %7082 = vmatmul.mubr.msk.bf16.gmra.mxu1 %vm312_vm1, %v973_v26  ;;  %6885 = vmatprep.mubr.msk.bf16.mxu0 %vm7875_vm0, %v12876_v1  ;;  %v227_v26 = vld [vmem:[%s12866_s1 + $0x280] sm:$0xff]  ;;  %v615_v39 = vadd.f32 %v8410_v35, %v614_v32 }
 0x143   :  { %v2806_v47 = vrot.slane %v1587_v11, 2  ;;  %v6787_v58 = vpop.f32.mrf.mxu0  ;;  %7085 = vmatprep.mubr.msk.bf16.mxu1 %vm7875_vm0, %v12876_v1  ;;  %v1303_v17 = vadd.f32 %v8396_v31, %v1302_v51 }
 0x144   :  { %1715 = vmatpush1.bf16.xpose.msra.mxu0 %v1662_v63  ;;  %v6987_v62 = vpop.f32.mrf.mxu1  ;;  %v8902_v40 = vsel %vm2765_vm2, %v2767_v6, %v2769_v24  ;;  %v974_v58 = vpack.c.bf16 %v228_v9, %v227_v26  ;;  %v131_v26 = vld [vmem:[%s12865_s0 + $0x290] sm:$0xff]  ;;  %v132_v9 = vld [vmem:[%s12865_s0 + $0x298] sm:$0xff] }
 0x145   :  { %12981 = vst [vmem:[#allocation6_spill] sm:$0xff] %v8902_v40  ;;  %v617_v20 = vpop.f32.mrf.mxu0  ;;  %1722 = vmatprep.subr.bf16.mxu0 %v12874_v48  ;;  %v8907_v57 = vsel %vm2765_vm2, %v2804_v33, %v2806_v47  ;;  %v1698_v33 = vsel %vm312_vm1, %v8817_v28, 0  ;;  %v229_v28 = vld [vmem:[%s12866_s1 + $0x290] sm:$0xff]  ;;  %v12990_v40 = vmov 0  }
 0x146   :  { %v618_v56 = vadd.f32 %v8410_v35, %v617_v20  ;;  %v1305_v11 = vpop.f32.mrf.mxu1  ;;  %3472 = vrot.lane.b32.xlu1 %v8907_v57, %s7877_s13 }
 0x147   :  { %v6788_v6 = vpop.f32.mrf.mxu0  ;;  %v1306_v63 = vadd.f32 %v8396_v31, %v1305_v11 }
 0x148   :  { %v900_v51 = vpack.c.bf16 %v618_v56, %v615_v39  ;;  %v6988_v62 = vpop.f32.mrf.mxu1  ;;  %v286_v6 = vpack.c.bf16 %v132_v9, %v131_v26 }
 0x149   :  { %v1588_v23 = vpack.c.bf16 %v1306_v63, %v1303_v17  ;;  %v622_v29 = vpop.f32.mrf.mxu0  ;;  %6886 = vmatmul.mubr.msk.bf16.gmra.mxu0 %vm312_vm1, %v285_v53  ;;  %v230_v53 = vld [vmem:[%s12866_s1 + $0x298] sm:$0xff] }
 0x14a   :  { %v2771_v32 = vrot.slane %v900_v51, 2  ;;  %v1310_v13 = vpop.f32.mrf.mxu1  ;;  %7086 = vmatmul.mubr.msk.bf16.gmra.mxu1 %vm312_vm1, %v974_v58  ;;  %6889 = vmatprep.mubr.msk.bf16.mxu0 %vm7875_vm0, %v12876_v1  ;;  %v623_v51 = vadd.f32 %v8410_v35, %v622_v29  ;;  %v133_v29 = vld [vmem:[%s12865_s0 + $0x2a0] sm:$0xff] }
 0x14b   :  { %v2808_v17 = vrot.slane %v1588_v23, 2  ;;  %v6791_v20 = vpop.f32.mrf.mxu0  ;;  %7089 = vmatprep.mubr.msk.bf16.mxu1 %vm7875_vm0, %v12876_v1  ;;  %v1311_v11 = vadd.f32 %v8396_v31, %v1310_v13 }
 0x14c   :  { %v6991_v39 = vpop.f32.mrf.mxu1  ;;  %1723 = vmatpush2.bf16.xpose.msra.mxu0 %v1698_v33  ;;  %v8935_v56 = vsel %vm2765_vm2, %v2769_v24, %v2771_v32  ;;  %v975_v20 = vpack.c.bf16 %v230_v53, %v229_v28  ;;  %v134_v28 = vld [vmem:[%s12865_s0 + $0x2a8] sm:$0xff] }
 0x14d   :  { %12982 = vst [vmem:[#allocation7_spill] sm:$0xff] %v8935_v56  ;;  %v625_v58 = vpop.f32.mrf.mxu0  ;;  %1724 = vmatprep.subr.bf16.mxu0 %v12874_v48  ;;  %v8940_v63 = vsel %vm2765_vm2, %v2806_v47, %v2808_v17 }
 0x14e   :  { %v626_v62 = vadd.f32 %v8410_v35, %v625_v58  ;;  %v1313_v23 = vpop.f32.mrf.mxu1  ;;  %3474 = vrot.lane.b32.xlu1 %v8940_v63, %s7877_s13  ;;  %v231_v58 = vld [vmem:[%s12866_s1 + $0x2a0] sm:$0xff] }
 0x14f   :  { %v6792_v24 = vpop.f32.mrf.mxu0  ;;  %v1314_v33 = vadd.f32 %v8396_v31, %v1313_v23 }
 0x150   :  { %v901_v13 = vpack.c.bf16 %v626_v62, %v623_v51  ;;  %v6992_v39 = vpop.f32.mrf.mxu1  ;;  %v1695_v51 = vsel %vm312_vm1, %v8786_v12, 0 }
 0x151   :  { %v1589_v26 = vpack.c.bf16 %v1314_v33, %v1311_v11  ;;  %v630_v9 = vpop.f32.mrf.mxu0  ;;  %6890 = vmatmul.mubr.msk.bf16.gmra.mxu0 %vm312_vm1, %v286_v6  ;;  %v232_v6 = vld [vmem:[%s12866_s1 + $0x2a8] sm:$0xff]  ;;  %v287_v33 = vpack.c.bf16 %v134_v28, %v133_v29 }
 0x152   :  { %v2773_v47 = vrot.slane %v901_v13, 2  ;;  %v1318_v41 = vpop.f32.mrf.mxu1  ;;  %7090 = vmatmul.mubr.msk.bf16.gmra.mxu1 %vm312_vm1, %v975_v20  ;;  %6893 = vmatprep.mubr.msk.bf16.mxu0 %vm7875_vm0, %v12876_v1  ;;  %v631_v39 = vadd.f32 %v8410_v35, %v630_v9  ;;  %v976_v12 = vpack.c.bf16 %v232_v6, %v231_v58  ;;  %v233_v6 = vld [vmem:[%s12866_s1 + $0x2b0] sm:$0xff] }
 0x153   :  { %v2810_v53 = vrot.slane %v1589_v26, 2  ;;  %v6795_v11 = vpop.f32.mrf.mxu0  ;;  %7093 = vmatprep.mubr.msk.bf16.mxu1 %vm7875_vm0, %v12876_v1  ;;  %v1319_v20 = vadd.f32 %v8396_v31, %v1318_v41 }
 0x154   :  { %v6995_v62 = vpop.f32.mrf.mxu1  ;;  %1725 = vmatpush2.bf16.xpose.msra.mxu0 %v1695_v51  ;;  %v8968_v23 = vsel %vm2765_vm2, %v2771_v32, %v2773_v47 }
 0x155   :  { %12983 = vst [vmem:[#allocation8_spill] sm:$0xff] %v8968_v23  ;;  %v633_v24 = vpop.f32.mrf.mxu0  ;;  %1726 = vmatprep.subr.bf16.mxu0 %v12874_v48  ;;  %v8973_v13 = vsel %vm2765_vm2, %v2808_v17, %v2810_v53 }
 0x156   :  { %v634_v26 = vadd.f32 %v8410_v35, %v633_v24  ;;  %v1321_v11 = vpop.f32.mrf.mxu1  ;;  %3476 = vrot.lane.b32.xlu1 %v8973_v13, %s7877_s13  ;;  %v135_v35 = vld [vmem:[%s12865_s0 + $0x2b0] sm:$0xff]  ;;  %v1692_v24 = vsel %vm312_vm1, %v8751_v5, 0  ;;  %v9016_v5 = vld [vmem:[%s12868_s3] ss:$0 sm:$0xff] }
 0x157   :  { %v6796_v32 = vpop.f32.mrf.mxu0  ;;  %v1322_v51 = vadd.f32 %v8396_v31, %v1321_v11  ;;  %v136_v31 = vld [vmem:[%s12865_s0 + $0x2b8] sm:$0xff] }
 0x158   :  { %v902_v41 = vpack.c.bf16 %v634_v26, %v631_v39  ;;  %v6996_v62 = vpop.f32.mrf.mxu1  ;;  %v9006_v26 = vld [vmem:[%s12870_s5] ss:$0 sm:$0xff]  ;;  %v288_v32 = vpack.c.bf16 %v136_v31, %v135_v35 }
 0x159   :  { %v1590_v29 = vpack.c.bf16 %v1322_v51, %v1319_v20  ;;  %v638_v28 = vpop.f32.mrf.mxu0  ;;  %6894 = vmatmul.mubr.msk.bf16.gmra.mxu0 %vm312_vm1, %v287_v33  ;;  %v234_v20 = vld [vmem:[%s12866_s1 + $0x2b8] sm:$0xff] }
 0x15a   :  { %v2775_v17 = vrot.slane %v902_v41, 2  ;;  %v1326_v15 = vpop.f32.mrf.mxu1  ;;  %7094 = vmatmul.mubr.msk.bf16.gmra.mxu1 %vm312_vm1, %v976_v12  ;;  %6897 = vmatprep.mubr.msk.bf16.mxu0 %vm7875_vm0, %v12876_v1 }
 0x15b   :  { %v2812_v9 = vrot.slane %v1590_v29, 2  ;;  %v6799_v58 = vpop.f32.mrf.mxu0  ;;  %7097 = vmatprep.mubr.msk.bf16.mxu1 %vm7875_vm0, %v12876_v1  ;;  %v1327_v11 = vadd.f32 %v9006_v26, %v1326_v15  ;;  %v977_v29 = vpack.c.bf16 %v234_v20, %v233_v6  ;;  %v138_v6 = vld [vmem:[%s12865_s0 + $0x2c8] sm:$0xff] }
 0x15c   :  { %v6999_v33 = vpop.f32.mrf.mxu1  ;;  %1727 = vmatpush2.bf16.xpose.msra.mxu0 %v1692_v24  ;;  %v9001_v39 = vsel %vm2765_vm2, %v2773_v47, %v2775_v17  ;;  %v639_v47 = vadd.f32 %v9016_v5, %v638_v28  ;;  %v137_v28 = vld [vmem:[%s12865_s0 + $0x2c0] sm:$0xff] }
 0x15d   :  { %12984 = vst [vmem:[#allocation9_spill] sm:$0xff] %v9001_v39  ;;  %v641_v12 = vpop.f32.mrf.mxu0  ;;  %1728 = vmatprep.subr.bf16.mxu0 %v12874_v48  ;;  %v9011_v51 = vsel %vm2765_vm2, %v2810_v53, %v2812_v9 }
 0x15e   :  { %v642_v41 = vadd.f32 %v9016_v5, %v641_v12  ;;  %v1329_v62 = vpop.f32.mrf.mxu1  ;;  %3478 = vrot.lane.b32.xlu1 %v9011_v51, %s7877_s13  ;;  %v235_v12 = vld [vmem:[%s12866_s1 + $0x2c0] sm:$0xff] }
 0x15f   :  { %v6800_v15 = vpop.f32.mrf.mxu0  ;;  %v1330_v35 = vadd.f32 %v9006_v26, %v1329_v62 }
 0x160   :  { %v903_v31 = vpack.c.bf16 %v642_v41, %v639_v47  ;;  %v7000_v53 = vpop.f32.mrf.mxu1  ;;  %v1689_v47 = vsel %vm312_vm1, %v8716_v14, 0 }
 0x161   :  { %v1591_v58 = vpack.c.bf16 %v1330_v35, %v1327_v11  ;;  %v646_v24 = vpop.f32.mrf.mxu0  ;;  %6898 = vmatmul.mubr.msk.bf16.gmra.mxu0 %vm312_vm1, %v288_v32  ;;  %v236_v32 = vld [vmem:[%s12866_s1 + $0x2c8] sm:$0xff]  ;;  %v289_v35 = vpack.c.bf16 %v138_v6, %v137_v28 }
 0x162   :  { %v2777_v33 = vrot.slane %v903_v31, 2  ;;  %v1334_v54 = vpop.f32.mrf.mxu1  ;;  %7098 = vmatmul.mubr.msk.bf16.gmra.mxu1 %vm312_vm1, %v977_v29  ;;  %6901 = vmatprep.mubr.msk.bf16.mxu0 %vm7875_vm0, %v12876_v1  ;;  %v647_v53 = vadd.f32 %v9016_v5, %v646_v24  ;;  %v978_v14 = vpack.c.bf16 %v236_v32, %v235_v12  ;;  %v139_v12 = vld [vmem:[%s12865_s0 + $0x2d0] sm:$0xff]  ;;  %v140_v32 = vld [vmem:[%s12865_s0 + $0x2d8] sm:$0xff] }
 0x163   :  { %v2814_v20 = vrot.slane %v1591_v58, 2  ;;  %v6803_v11 = vpop.f32.mrf.mxu0  ;;  %7101 = vmatprep.mubr.msk.bf16.mxu1 %vm7875_vm0, %v12876_v1  ;;  %v1335_v29 = vadd.f32 %v9006_v26, %v1334_v54 }
 0x164   :  { %v7003_v41 = vpop.f32.mrf.mxu1  ;;  %1729 = vmatpush2.bf16.xpose.msra.mxu0 %v1689_v47  ;;  %v9044_v62 = vsel %vm2765_vm2, %v2775_v17, %v2777_v33  ;;  %v9055_v17 = vpop.permute.xlu1 %2280 }
 0x165   :  { %12985 = vst [vmem:[#allocation10_spill] sm:$0xff] %v9044_v62  ;;  %v649_v15 = vpop.f32.mrf.mxu0  ;;  %1730 = vmatprep.subr.bf16.mxu0 %v12874_v48  ;;  %v9049_v31 = vsel %vm2765_vm2, %v2812_v9, %v2814_v20 }
 0x166   :  { %v650_v58 = vadd.f32 %v9016_v5, %v649_v15  ;;  %v1337_v11 = vpop.f32.mrf.mxu1  ;;  %3480 = vrot.lane.b32.xlu1 %v9049_v31, %s7877_s13 }
 0x167   :  { %v6804_v47 = vpop.f32.mrf.mxu0  ;;  %v1338_v54 = vadd.f32 %v9006_v26, %v1337_v11  ;;  %v238_v11 = vld [vmem:[%s12866_s1 + $0x2d8] sm:$0xff] }
 0x168   :  { %v904_v28 = vpack.c.bf16 %v650_v58, %v647_v53  ;;  %v7004_v6 = vpop.f32.mrf.mxu1  ;;  %v9068_v15 = vpop.permute.xlu1 %2282  ;;  %v237_v58 = vld [vmem:[%s12866_s1 + $0x2d0] sm:$0xff] }
 0x169   :  { %v1592_v41 = vpack.c.bf16 %v1338_v54, %v1335_v29  ;;  %v654_v27 = vpop.f32.mrf.mxu0  ;;  %6902 = vmatmul.mubr.msk.bf16.gmra.mxu0 %vm312_vm1, %v289_v35  ;;  %v1686_v35 = vsel %vm312_vm1, %v8682_v30, 0  ;;  %v290_v30 = vpack.c.bf16 %v140_v32, %v139_v12  ;;  %v979_v50 = vpack.c.bf16 %v238_v11, %v237_v58  ;;  %v141_v58 = vld [vmem:[%s12865_s0 + $0x2e0] sm:$0xff]  ;;  %v142_v11 = vld [vmem:[%s12865_s0 + $0x2e8] sm:$0xff] }
 0x16a   :  { %v2779_v9 = vrot.slane %v904_v28, 2  ;;  %v1342_v24 = vpop.f32.mrf.mxu1  ;;  %7102 = vmatmul.mubr.msk.bf16.gmra.mxu1 %vm312_vm1, %v978_v14  ;;  %6905 = vmatprep.mubr.msk.bf16.mxu0 %vm7875_vm0, %v12876_v1 }
 0x16b   :  { %v2816_v29 = vrot.slane %v1592_v41, 2  ;;  %v6807_v53 = vpop.f32.mrf.mxu0  ;;  %7105 = vmatprep.mubr.msk.bf16.mxu1 %vm7875_vm0, %v12876_v1  ;;  %v1343_v54 = vadd.f32 %v9006_v26, %v1342_v24  ;;  %v655_v41 = vadd.f32 %v9016_v5, %v654_v27 }
 0x16c   :  { %v7007_v14 = vpop.f32.mrf.mxu1  ;;  %1731 = vmatpush2.bf16.xpose.msra.mxu0 %v1686_v35  ;;  %v9081_v47 = vsel %vm2765_vm2, %v2777_v33, %v2779_v9  ;;  %v9092_v33 = vpop.permute.xlu1 %2284 }
 0x16d   :  { %12986 = vst [vmem:[#allocation11_spill] sm:$0xff] %v9081_v47  ;;  %v657_v28 = vpop.f32.mrf.mxu0  ;;  %2906 = vmatprep.subr.bf16.mxu0 %v12874_v48  ;;  %v9086_v6 = vsel %vm2765_vm2, %v2814_v20, %v2816_v29 }
 0x16e   :  { %v658_v53 = vadd.f32 %v9016_v5, %v657_v28  ;;  %v1345_v7 = vpop.f32.mrf.mxu1  ;;  %3482 = vrot.lane.b32.xlu1 %v9086_v6, %s7877_s13 }
 0x16f   :  { %v6808_v35 = vpop.f32.mrf.mxu0  ;;  %v1346_v24 = vadd.f32 %v9006_v26, %v1345_v7 }
 0x170   :  { %v905_v12 = vpack.c.bf16 %v658_v53, %v655_v41  ;;  %v7008_v32 = vpop.f32.mrf.mxu1  ;;  %v9105_v7 = vpop.permute.xlu1 %2288  ;;  %v240_v41 = vld [vmem:[%s12866_s1 + $0x2e8] sm:$0xff] }
 0x171   :  { %v1593_v14 = vpack.c.bf16 %v1346_v24, %v1343_v54  ;;  %v662_v48 = vpop.f32.mrf.mxu0  ;;  %6906 = vmatmul.mubr.msk.bf16.gmra.mxu0 %vm312_vm1, %v290_v30  ;;  %v239_v30 = vld [vmem:[%s12866_s1 + $0x2e0] sm:$0xff] }
 0x172   :  { %v2781_v20 = vrot.slane %v905_v12, 2  ;;  %v1350_v27 = vpop.f32.mrf.mxu1  ;;  %6909 = vmatprep.mubr.msk.bf16.mxu0 %vm7875_vm0, %v12876_v1  ;;  %7106 = vmatmul.mubr.msk.bf16.gmra.mxu1 %vm312_vm1, %v979_v50  ;;  %v291_v12 = vpack.c.bf16 %v142_v11, %v141_v58  ;;  %v980_v47 = vpack.c.bf16 %v240_v41, %v239_v30  ;;  %v143_v30 = vld [vmem:[%s12865_s0 + $0x2f0] sm:$0xff] }
 0x173   :  { %v2818_v54 = vrot.slane %v1593_v14, 2  ;;  %v6811_v28 = vpop.f32.mrf.mxu0  ;;  %7109 = vmatprep.mubr.msk.bf16.mxu1 %vm7875_vm0, %v12876_v1  ;;  %v1351_v50 = vadd.f32 %v9006_v26, %v1350_v27  ;;  %v663_v14 = vadd.f32 %v9016_v5, %v662_v48 }
 0x174   :  { %v7011_v53 = vpop.f32.mrf.mxu1  ;;  %v9116_v35 = vsel %vm2765_vm2, %v2779_v9, %v2781_v20  ;;  %v2291_v58 = vpop.permute.xlu1 %2290 }
 0x175   :  { %12987 = vst [vmem:[#allocation12_spill] sm:$0xff] %v9116_v35  ;;  %v665_v24 = vpop.f32.mrf.mxu0  ;;  %v9120_v32 = vsel %vm2765_vm2, %v2816_v29, %v2818_v54  ;;  %v9127_v35 = vpop.permute.xlu0 %2286 }
 0x176   :  { %v666_v28 = vadd.f32 %v9016_v5, %v665_v24  ;;  %v1353_v1 = vpop.f32.mrf.mxu1  ;;  %3484 = vrot.lane.b32.xlu1 %v9120_v32, %s7877_s13  ;;  %v12988_v24 = vmov 0.0  }
 0x177   :  { %v6812_v53 = vpop.f32.mrf.mxu0  ;;  %v1354_v9 = vadd.f32 %v9006_v26, %v1353_v1  ;;  %v144_v1 = vld [vmem:[%s12865_s0 + $0x2f8] sm:$0xff] }
 0x178   :  { %v906_v27 = vpack.c.bf16 %v666_v28, %v663_v14  ;;  %v7012_v62 = vpop.f32.mrf.mxu1  ;;  %v242_v14 = vld [vmem:[%s12866_s1 + $0x2f8] sm:$0xff]  ;;  %v2293_v56 = vpop.permute.xlu1 %2292 }
 0x179   :  { %v1594_v11 = vpack.c.bf16 %v1354_v9, %v1351_v50  ;;  %v670_v29 = vpop.f32.mrf.mxu0  ;;  %6910 = vmatmul.mubr.msk.bf16.gmra.mxu0 %vm312_vm1, %v291_v12  ;;  %v241_v12 = vld [vmem:[%s12866_s1 + $0x2f0] sm:$0xff] }
 0x17a   :  { %v2783_v48 = vrot.slane %v906_v27, 2  ;;  %v1358_v39 = vpop.f32.mrf.mxu1  ;;  %6913 = vmatprep.mubr.msk.bf16.mxu0 %vm7875_vm0, %v12988_v24  ;;  %7110 = vmatmul.mubr.msk.bf16.gmra.mxu1 %vm312_vm1, %v980_v47  ;;  %v292_v27 = vpack.c.bf16 %v144_v1, %v143_v30 }
 0x17b   :  { %v2820_v62 = vrot.slane %v1594_v11, 2  ;;  %v6815_v41 = vpop.f32.mrf.mxu0  ;;  %7113 = vmatprep.mubr.msk.bf16.mxu1 %vm7875_vm0, %v12988_v24  ;;  %v1359_v47 = vadd.f32 %v9006_v26, %v1358_v39  ;;  %v981_v39 = vpack.c.bf16 %v242_v14, %v241_v12 }
 0x17c   :  { %v7015_v50 = vpop.f32.mrf.mxu1  ;;  %v9148_v28 = vsel %vm2765_vm2, %v2781_v20, %v2783_v48  ;;  %v671_v41 = vadd.f32 %v9016_v5, %v670_v29 }
 0x17d   :  { %12989 = vst [vmem:[#allocation13_spill] sm:$0xff] %v9148_v28  ;;  %v2295_v53 = vpop.permute.xlu0 %2294  ;;  %v673_v9 = vpop.f32.mrf.mxu0  ;;  %v9152_v11 = vsel %vm2765_vm2, %v2818_v54, %v2820_v62 }
 0x17e   :  { %v674_v50 = vadd.f32 %v9016_v5, %v673_v9  ;;  %2362 = vmatpush1.bf16.msra.mxu1 %v2295_v53  ;;  %v1361_v23 = vpop.f32.mrf.mxu1  ;;  %3486 = vrot.lane.b32.xlu0 %v9152_v11, %s7877_s13  ;;  %v145_v9 = vld [vmem:[%s12865_s0 + $0x300] sm:$0xff] }
 0x17f   :  { %v6816_v20 = vpop.f32.mrf.mxu0  ;;  %v1362_v28 = vadd.f32 %v9006_v26, %v1361_v23  ;;  %2363 = vmatprep.subr.bf16.mxu1 %v12990_v40  ;;  %v146_v23 = vld [vmem:[%s12865_s0 + $0x308] sm:$0xff] }
 0x180   :  { %v907_v30 = vpack.c.bf16 %v674_v50, %v671_v41  ;;  %v7016_v1 = vpop.f32.mrf.mxu1  ;;  %v293_v20 = vpack.c.bf16 %v146_v23, %v145_v9 }
 0x181   :  { %v1595_v54 = vpack.c.bf16 %v1362_v28, %v1359_v47  ;;  %v678_v55 = vpop.f32.mrf.mxu0  ;;  %6914 = vmatmul.mubr.msk.bf16.gmra.mxu0 %vm312_vm1, %v292_v27  ;;  %v244_v47 = vld [vmem:[%s12866_s1 + $0x308] sm:$0xff] }
 0x182   :  { %v2785_v29 = vrot.slane %v907_v30, 2  ;;  %2364 = vmatpush1.bf16.msra.mxu1 %v2293_v56  ;;  %v1366_v53 = vpop.f32.mrf.mxu1  ;;  %6917 = vmatprep.mubr.msk.bf16.mxu0 %vm7875_vm0, %v12988_v24  ;;  %v243_v56 = vld [vmem:[%s12866_s1 + $0x300] sm:$0xff] }
 0x183   :  { %v2822_v12 = vrot.slane %v1595_v54, 2  ;;  %v6819_v14 = vpop.f32.mrf.mxu0  ;;  %2365 = vmatprep.subr.bf16.mxu1 %v12990_v40  ;;  %7114 = vmatmul.mubr.msk.bf16.gmra.mxu1 %vm312_vm1, %v981_v39  ;;  %v1367_v41 = vadd.f32 %v9006_v26, %v1366_v53  ;;  %v982_v53 = vpack.c.bf16 %v244_v47, %v243_v56 }
 0x184   :  { %v7019_v28 = vpop.f32.mrf.mxu1  ;;  %7117 = vmatprep.mubr.msk.bf16.mxu1 %vm7875_vm0, %v12988_v24  ;;  %v9180_v27 = vsel %vm2765_vm2, %v2783_v48, %v2785_v29  ;;  %v679_v24 = vadd.f32 %v9016_v5, %v678_v55 }
 0x185   :  { %v681_v50 = vpop.f32.mrf.mxu0  ;;  %v9184_v39 = vsel %vm2765_vm2, %v2820_v62, %v2822_v12 }
 0x186   :  { %v682_v30 = vadd.f32 %v9016_v5, %v681_v50  ;;  %2366 = vmatpush1.bf16.msra.mxu1 %v2291_v58  ;;  %v1369_v1 = vpop.f32.mrf.mxu1  ;;  %3488 = vrot.lane.b32.xlu1 %v9184_v39, %s7877_s13 }
 0x187   :  { %v6820_v54 = vpop.f32.mrf.mxu0  ;;  %v1370_v48 = vadd.f32 %v9006_v26, %v1369_v1  ;;  %2367 = vmatprep.subr.bf16.mxu1 %v12990_v40 }
 0x188   :  { %v908_v14 = vpack.c.bf16 %v682_v30, %v679_v24  ;;  %v7020_v9 = vpop.f32.mrf.mxu1 }
 0x189   :  { %v1596_v23 = vpack.c.bf16 %v1370_v48, %v1367_v41  ;;  %v686_v62 = vpop.f32.mrf.mxu0  ;;  %6918 = vmatmul.mubr.msk.bf16.gmra.mxu0 %vm312_vm1, %v293_v20 }
 0x18a   :  { %v2787_v55 = vrot.slane %v908_v14, 2  ;;  %2368 = vmatpush1.bf16.msra.mxu1 %v9105_v7  ;;  %v1374_v58 = vpop.f32.mrf.mxu1  ;;  %1732 = vmatprep.mubr.bf16.mxu0 %v12990_v40  ;;  %v9204_v7 = vpop.permute.xlu1 %2296  ;;  %v687_v24 = vadd.f32 %v9016_v5, %v686_v62 }
 0x18b   :  { %v2824_v28 = vrot.slane %v1596_v23, 2  ;;  %v6823_v50 = vpop.f32.mrf.mxu0  ;;  %2369 = vmatprep.subr.bf16.mxu1 %v12990_v40  ;;  %7118 = vmatmul.mubr.msk.bf16.gmra.mxu1 %vm312_vm1, %v982_v53  ;;  %v1375_v47 = vadd.f32 %v9006_v26, %v1374_v58  ;;  %v12991_v23 = vpack.c.bf16 %v8425_v44, %v8422_v43 }
 0x18c   :  { %v7023_v1 = vpop.f32.mrf.mxu1  ;;  %v9198_v56 = vsel %vm2765_vm2, %v2785_v29, %v2787_v55 }
 0x18d   :  { %v689_v41 = vpop.f32.mrf.mxu0  ;;  %v9202_v20 = vsel %vm2765_vm2, %v2822_v12, %v2824_v28 }
 0x18e   :  { %v690_v30 = vadd.f32 %v9016_v5, %v689_v41  ;;  %2370 = vmatpush1.bf16.msra.mxu1 %v9127_v35  ;;  %v1377_v54 = vpop.f32.mrf.mxu1  ;;  %3490 = vrot.lane.b32.xlu0 %v9202_v20, %s7877_s13  ;;  %v2889_v35 = vsel %vm312_vm1, %v9120_v32, 0 }
 0x18f   :  { %v6824_v29 = vpop.f32.mrf.mxu0  ;;  %v1378_v48 = vadd.f32 %v9006_v26, %v1377_v54  ;;  %2371 = vmatprep.subr.bf16.mxu1 %v12990_v40 }
 0x190   :  { %v9213_v53 = vpack.c.bf16 %v690_v30, %v687_v24  ;;  %v7024_v12 = vpop.f32.mrf.mxu1 }
 0x191   :  { %v1597_v14 = vpack.c.bf16 %v1378_v48, %v1375_v47  ;;  %v694_v9 = vpop.f32.mrf.mxu0  ;;  %6515 = vmatmul.mubr.msk.bf16.vlgmr.msra.gmra.mxu0 %vm312_vm1, %v12991_v23  ;;  %v9227_v47 = vpop.permute.xlu1 %2298 }
 0x192   :  { %v2789_v62 = vrot.slane %v9213_v53, 2  ;;  %2372 = vmatpush1.bf16.msra.mxu1 %v9092_v33  ;;  %2907 = vmatpush1.bf16.xpose.msra.mxu0 %v2889_v35  ;;  %v1382_v58 = vpop.f32.mrf.mxu1  ;;  %v695_v24 = vadd.f32 %v9016_v5, %v694_v9  ;;  %v12992_v9 = vpack.c.bf16 %v8457_v2, %v8454_v0 }
 0x193   :  { %v9223_v50 = vrot.slane %v1597_v14, 2  ;;  %v6827_v1 = vpop.f32.mrf.mxu0  ;;  %2373 = vmatprep.subr.bf16.mxu1 %v12990_v40  ;;  %1742 = vmatprep.mubr.bf16.mxu0 %v12990_v40  ;;  %v1383_v33 = vadd.f32 %v9006_v26, %v1382_v58  ;;  %v4050_v12 = vrot.slane %v1597_v14, 4 }
 0x194   :  { %v7027_v43 = vpop.f32.mrf.mxu1  ;;  %2908 = vmatprep.subr.bf16.mxu0 %v12990_v40  ;;  %v9233_v44 = vsel %vm2765_vm2, %v2787_v55, %v2789_v62  ;;  %v4013_v1 = vrot.slane %v9213_v53, 4 }
 0x195   :  { %v697_v32 = vpop.f32.mrf.mxu0  ;;  %v9238_v41 = vsel %vm2765_vm2, %v2824_v28, %v9223_v50  ;;  %3494 = vrot.lane.b32.xlu0 %v9223_v50, %s7877_s13  ;;  %v9255_v58 = vpop.permute.xlu1 %2300 }
 0x196   :  { %v698_v30 = vadd.f32 %v9016_v5, %v697_v32  ;;  %2374 = vmatpush1.bf16.msra.mxu1 %v9068_v15  ;;  %v1385_v54 = vpop.f32.mrf.mxu1  ;;  %3492 = vrot.lane.b32.xlu1 %v9238_v41, %s7877_s13  ;;  %v2886_v15 = vsel %vm312_vm1, %v9086_v6, 0 }
 0x197   :  { %v6828_v55 = vpop.f32.mrf.mxu0  ;;  %v1386_v29 = vadd.f32 %v9006_v26, %v1385_v54  ;;  %2375 = vmatprep.subr.bf16.mxu1 %v12990_v40 }
 0x198   :  { %v910_v28 = vpack.c.bf16 %v698_v30, %v695_v24  ;;  %v7028_v48 = vpop.f32.mrf.mxu1 }
 0x199   :  { %v1598_v23 = vpack.c.bf16 %v1386_v29, %v1383_v33  ;;  %v702_v35 = vpop.f32.mrf.mxu0  ;;  %6516 = vmatmul.mubr.msk.bf16.gmra.mxu0 %vm312_vm1, %v12992_v9 }
 0x19a   :  { %v4014_v43 = vrot.slane %v910_v28, 4  ;;  %2376 = vmatpush1.bf16.msra.mxu1 %v9055_v17  ;;  %2909 = vmatpush1.bf16.xpose.msra.mxu0 %v2886_v15  ;;  %v1390_v14 = vpop.f32.mrf.mxu1  ;;  %v703_v17 = vadd.f32 %v9016_v5, %v702_v35  ;;  %v2883_v35 = vsel %vm312_vm1, %v9049_v31, 0 }
 0x19b   :  { %v4051_v32 = vrot.slane %v1598_v23, 4  ;;  %v6831_v33 = vpop.f32.mrf.mxu0  ;;  %1752 = vmatprep.mubr.bf16.mxu0 %v12990_v40  ;;  %2910 = vmatprep.subr.bf16.mxu0 %v12990_v40  ;;  %v1391_v6 = vadd.f32 %v9006_v26, %v1390_v14 }
 0x19c   :  { %v9262_v0 = vsel %vm1958_vm3, %v4013_v1, %v4014_v43  ;;  %v7031_v2 = vpop.f32.mrf.mxu1  ;;  %2383 = vmatprep.subr.bf16.mxu1 %v12990_v40 }
 0x19d   :  { %v705_v24 = vpop.f32.mrf.mxu0  ;;  %v9267_v30 = vsel %vm1958_vm3, %v4050_v12, %v4051_v32  ;;  %v2303_v48 = vpop.permute.xlu1 %2302  ;;  %v12993_v12 = vpack.c.bf16 %v8489_v22, %v8486_v21 }
 0x19e   :  { %v706_v54 = vadd.f32 %v9016_v5, %v705_v24  ;;  %v1393_v55 = vpop.f32.mrf.mxu1  ;;  %4717 = vrot.lane.b32.xlu0 %v9267_v30, %s7877_s13 }
 0x19f   :  { %v6832_v29 = vpop.f32.mrf.mxu0  ;;  %v1394_v28 = vadd.f32 %v9006_v26, %v1393_v55 }
 0x1a0   :  { %v911_v23 = vpack.c.bf16 %v706_v54, %v703_v17  ;;  %v7032_v9 = vpop.f32.mrf.mxu1 }
 0x1a1   :  { %v1599_v15 = vpack.c.bf16 %v1394_v28, %v1391_v6  ;;  %v710_v1 = vpop.f32.mrf.mxu0  ;;  %6517 = vmatmul.mubr.msk.bf16.gmra.mxu0 %vm312_vm1, %v12993_v12 }
 0x1a2   :  { %v4016_v14 = vrot.slane %v911_v23, 4  ;;  %2911 = vmatpush1.bf16.xpose.msra.mxu0 %v2883_v35  ;;  %v1398_v33 = vpop.f32.mrf.mxu1  ;;  %1762 = vmatprep.mubr.bf16.mxu0 %v12990_v40  ;;  %v711_v55 = vadd.f32 %v9016_v5, %v710_v1  ;;  %v12994_v1 = vpack.c.bf16 %v8521_v46, %v8518_v45 }
 0x1a3   :  { %v4053_v2 = vrot.slane %v1599_v15, 4  ;;  %v6835_v24 = vpop.f32.mrf.mxu0  ;;  %2912 = vmatprep.subr.bf16.mxu0 %v12990_v40  ;;  %v1399_v21 = vadd.f32 %v9006_v26, %v1398_v33  ;;  %v2880_v33 = vsel %vm312_vm1, %v9011_v51, 0 }
 0x1a4   :  { %v7035_v6 = vpop.f32.mrf.mxu1  ;;  %v9283_v17 = vsel %vm1958_vm3, %v4014_v43, %v4016_v14 }
 0x1a5   :  { %v713_v22 = vpop.f32.mrf.mxu0  ;;  %v9287_v54 = vsel %vm1958_vm3, %v4051_v32, %v4053_v2  ;;  %v2305_v31 = vpop.permute.xlu1 %2304 }
 0x1a6   :  { %v714_v29 = vadd.f32 %v9016_v5, %v713_v22  ;;  %v1401_v28 = vpop.f32.mrf.mxu1  ;;  %4719 = vrot.lane.b32.xlu1 %v9287_v54, %s7877_s13  ;;  %v2359_v23 = vsel %vm2357_vm4, %v2305_v31, 0 }
 0x1a7   :  { %v6836_v9 = vpop.f32.mrf.mxu0  ;;  %v1402_v43 = vadd.f32 %v9006_v26, %v1401_v28  ;;  %2384 = vmatpush2.bf16.msra.mxu1 %v2359_v23 }
 0x1a8   :  { %v912_v15 = vpack.c.bf16 %v714_v29, %v711_v55  ;;  %v7036_v12 = vpop.f32.mrf.mxu1  ;;  %2385 = vmatprep.subr.bf16.mxu1 %v12990_v40 }
 0x1a9   :  { %v1600_v32 = vpack.c.bf16 %v1402_v43, %v1399_v21  ;;  %v718_v35 = vpop.f32.mrf.mxu0  ;;  %6518 = vmatmul.mubr.msk.bf16.gmra.mxu0 %vm312_vm1, %v12994_v1  ;;  %v12995_v12 = vpack.c.bf16 %v8553_v10, %v8550_v8 }
 0x1aa   :  { %v4018_v24 = vrot.slane %v912_v15, 4  ;;  %2913 = vmatpush1.bf16.xpose.msra.mxu0 %v2880_v33  ;;  %v1406_v6 = vpop.f32.mrf.mxu1  ;;  %1772 = vmatprep.mubr.bf16.mxu0 %v12990_v40  ;;  %v719_v29 = vadd.f32 %v9016_v5, %v718_v35 }
 0x1ab   :  { %v4055_v22 = vrot.slane %v1600_v32, 4  ;;  %v6839_v31 = vpop.f32.mrf.mxu0  ;;  %2914 = vmatprep.subr.bf16.mxu0 %v12990_v40  ;;  %2386 = vmatpush2.bf16.msra.mxu1 %v2303_v48  ;;  %v1407_v46 = vadd.f32 %v9006_v26, %v1406_v6  ;;  %v2877_v32 = vsel %vm312_vm1, %v8973_v13, 0 }
 0x1ac   :  { %v7039_v21 = vpop.f32.mrf.mxu1  ;;  %2387 = vmatprep.subr.bf16.mxu1 %v12990_v40  ;;  %v9306_v45 = vsel %vm1958_vm3, %v4016_v14, %v4018_v24 }
 0x1ad   :  { %v721_v55 = vpop.f32.mrf.mxu0  ;;  %v9310_v51 = vsel %vm1958_vm3, %v4053_v2, %v4055_v22 }
 0x1ae   :  { %v722_v28 = vadd.f32 %v9016_v5, %v721_v55  ;;  %v1409_v23 = vpop.f32.mrf.mxu1  ;;  %4721 = vrot.lane.b32.xlu0 %v9310_v51, %s7877_s13 }
 0x1af   :  { %v6840_v48 = vpop.f32.mrf.mxu0  ;;  %v1410_v9 = vadd.f32 %v9006_v26, %v1409_v23  ;;  %2388 = vmatpush2.bf16.msra.mxu1 %v9255_v58 }
 0x1b0   :  { %v913_v14 = vpack.c.bf16 %v722_v28, %v719_v29  ;;  %v7040_v43 = vpop.f32.mrf.mxu1  ;;  %2389 = vmatprep.subr.bf16.mxu1 %v12990_v40  ;;  %v12996_v48 = vpack.c.bf16 %v8585_v36, %v8582_v34 }
 0x1b1   :  { %v1601_v15 = vpack.c.bf16 %v1410_v9, %v1407_v46  ;;  %v726_v2 = vpop.f32.mrf.mxu0  ;;  %6519 = vmatmul.mubr.msk.bf16.gmra.mxu0 %vm312_vm1, %v12995_v12  ;;  %v2874_v9 = vsel %vm312_vm1, %v8940_v63, 0 }
 0x1b2   :  { %v4020_v35 = vrot.slane %v913_v14, 4  ;;  %2915 = vmatpush1.bf16.xpose.msra.mxu0 %v2877_v32  ;;  %v1414_v1 = vpop.f32.mrf.mxu1  ;;  %1782 = vmatprep.mubr.bf16.mxu0 %v12990_v40  ;;  %v727_v21 = vadd.f32 %v9016_v5, %v726_v2 }
 0x1b3   :  { %v4057_v58 = vrot.slane %v1601_v15, 4  ;;  %v6843_v33 = vpop.f32.mrf.mxu0  ;;  %2916 = vmatprep.subr.bf16.mxu0 %v12990_v40  ;;  %2390 = vmatpush2.bf16.msra.mxu1 %v9227_v47  ;;  %v1415_v10 = vadd.f32 %v9006_v26, %v1414_v1 }
 0x1b4   :  { %v7043_v6 = vpop.f32.mrf.mxu1  ;;  %2391 = vmatprep.subr.bf16.mxu1 %v12990_v40  ;;  %v9330_v8 = vsel %vm1958_vm3, %v4018_v24, %v4020_v35 }
 0x1b5   :  { %v729_v13 = vpop.f32.mrf.mxu0  ;;  %v9334_v31 = vsel %vm1958_vm3, %v4055_v22, %v4057_v58 }
 0x1b6   :  { %v730_v46 = vadd.f32 %v9016_v5, %v729_v13  ;;  %v1417_v55 = vpop.f32.mrf.mxu1  ;;  %4723 = vrot.lane.b32.xlu0 %v9334_v31, %s7877_s13 }
 0x1b7   :  { %v6844_v47 = vpop.f32.mrf.mxu0  ;;  %v1418_v29 = vadd.f32 %v9006_v26, %v1417_v55  ;;  %2392 = vmatpush2.bf16.msra.mxu1 %v9204_v7  ;;  %v12997_v55 = vpack.c.bf16 %v8617_v4, %v8614_v3 }
 0x1b8   :  { %v914_v24 = vpack.c.bf16 %v730_v46, %v727_v21  ;;  %v7044_v28 = vpop.f32.mrf.mxu1  ;;  %3550 = vmatprep.subr.bf16.mxu1 %v12990_v40 }
 0x1b9   :  { %v1602_v23 = vpack.c.bf16 %v1418_v29, %v1415_v10  ;;  %v734_v22 = vpop.f32.mrf.mxu0  ;;  %6520 = vmatmul.mubr.msk.bf16.gmra.mxu0 %vm312_vm1, %v12996_v48 }
 0x1ba   :  { %v4022_v14 = vrot.slane %v914_v24, 4  ;;  %2917 = vmatpush1.bf16.xpose.msra.mxu0 %v2874_v9  ;;  %v1422_v43 = vpop.f32.mrf.mxu1  ;;  %1792 = vmatprep.mubr.bf16.mxu0 %v12990_v40  ;;  %v735_v63 = vadd.f32 %v9016_v5, %v734_v22 }
 0x1bb   :  { %v4059_v7 = vrot.slane %v1602_v23, 4  ;;  %v6847_v15 = vpop.f32.mrf.mxu0  ;;  %2918 = vmatprep.subr.bf16.mxu0 %v12990_v40  ;;  %v1423_v34 = vadd.f32 %v9006_v26, %v1422_v43 }
 0x1bc   :  { %v7047_v2 = vpop.f32.mrf.mxu1  ;;  %v9352_v12 = vsel %vm1958_vm3, %v4020_v35, %v4022_v14 }
 0x1bd   :  { %v737_v36 = vpop.f32.mrf.mxu0  ;;  %v9356_v32 = vsel %vm1958_vm3, %v4057_v58, %v4059_v7  ;;  %v2871_v58 = vsel %vm312_vm1, %v8907_v57, 0 }
 0x1be   :  { %v738_v1 = vadd.f32 %v9016_v5, %v737_v36  ;;  %v1425_v33 = vpop.f32.mrf.mxu1  ;;  %4725 = vrot.lane.b32.xlu0 %v9356_v32, %s7877_s13 }
 0x1bf   :  { %v6848_v6 = vpop.f32.mrf.mxu0  ;;  %v1426_v10 = vadd.f32 %v9006_v26, %v1425_v33 }
 0x1c0   :  { %v915_v13 = vpack.c.bf16 %v738_v1, %v735_v63  ;;  %v7048_v35 = vpop.f32.mrf.mxu1  ;;  %v12998_v1 = vpack.c.bf16 %v8646_v38, %v8643_v37 }
 0x1c1   :  { %v1603_v21 = vpack.c.bf16 %v1426_v10, %v1423_v34  ;;  %v742_v46 = vpop.f32.mrf.mxu0  ;;  %6521 = vmatmul.mubr.msk.bf16.gmra.mxu0 %vm312_vm1, %v12997_v55 }
 0x1c2   :  { %v4024_v47 = vrot.slane %v915_v13, 4  ;;  %2919 = vmatpush1.bf16.xpose.msra.mxu0 %v2871_v58  ;;  %v1430_v29 = vpop.f32.mrf.mxu1  ;;  %1802 = vmatprep.mubr.bf16.mxu0 %v12990_v40  ;;  %v743_v57 = vadd.f32 %v9016_v5, %v742_v46 }
 0x1c3   :  { %v4061_v24 = vrot.slane %v1603_v21, 4  ;;  %v6851_v28 = vpop.f32.mrf.mxu0  ;;  %2920 = vmatprep.subr.bf16.mxu0 %v12990_v40  ;;  %v1431_v3 = vadd.f32 %v9006_v26, %v1430_v29 }
 0x1c4   :  { %v7051_v23 = vpop.f32.mrf.mxu1  ;;  %v9372_v22 = vsel %vm1958_vm3, %v4022_v14, %v4024_v47 }
 0x1c5   :  { %v745_v4 = vpop.f32.mrf.mxu0  ;;  %v9376_v48 = vsel %vm1958_vm3, %v4059_v7, %v4061_v24  ;;  %v2868_v7 = vsel %vm312_vm1, %v8874_v25, 0 }
 0x1c6   :  { %v746_v9 = vadd.f32 %v9016_v5, %v745_v4  ;;  %v1433_v43 = vpop.f32.mrf.mxu1  ;;  %4727 = vrot.lane.b32.xlu0 %v9376_v48, %s7877_s13 }
 0x1c7   :  { %v6852_v15 = vpop.f32.mrf.mxu0  ;;  %v1434_v2 = vadd.f32 %v9006_v26, %v1433_v43 }
 0x1c8   :  { %v916_v34 = vpack.c.bf16 %v746_v9, %v743_v57  ;;  %v7052_v14 = vpop.f32.mrf.mxu1  ;;  %v12999_v57 = vpack.c.bf16 %v8677_v19, %v8674_v18 }
 0x1c9   :  { %v1604_v36 = vpack.c.bf16 %v1434_v2, %v1431_v3  ;;  %v750_v63 = vpop.f32.mrf.mxu0  ;;  %6522 = vmatmul.mubr.msk.bf16.gmra.mxu0 %vm312_vm1, %v12998_v1 }
 0x1ca   :  { %v4026_v33 = vrot.slane %v916_v34, 4  ;;  %2921 = vmatpush1.bf16.xpose.msra.mxu0 %v2868_v7  ;;  %v1438_v6 = vpop.f32.mrf.mxu1  ;;  %1812 = vmatprep.mubr.bf16.mxu0 %v12990_v40  ;;  %v751_v25 = vadd.f32 %v9016_v5, %v750_v63 }
 0x1cb   :  { %v4063_v10 = vrot.slane %v1604_v36, 4  ;;  %v6855_v13 = vpop.f32.mrf.mxu0  ;;  %2928 = vmatprep.subr.bf16.mxu0 %v12990_v40  ;;  %v1439_v37 = vadd.f32 %v9006_v26, %v1438_v6 }
 0x1cc   :  { %v7055_v35 = vpop.f32.mrf.mxu1  ;;  %v9392_v21 = vsel %vm1958_vm3, %v4024_v47, %v4026_v33 }
 0x1cd   :  { %v753_v38 = vpop.f32.mrf.mxu0  ;;  %v9396_v46 = vsel %vm1958_vm3, %v4061_v24, %v4063_v10  ;;  %v2904_v24 = vsel %vm312_vm1, %v9223_v50, 0 }
 0x1ce   :  { %v754_v55 = vadd.f32 %v9016_v5, %v753_v38  ;;  %v1441_v58 = vpop.f32.mrf.mxu1  ;;  %4729 = vrot.lane.b32.xlu1 %v9396_v46, %s7877_s13  ;;  %v13000_v38 = vpack.c.bf16 %v8711_v61, %v8708_v60 }
 0x1cf   :  { %v6856_v29 = vpop.f32.mrf.mxu0  ;;  %v1442_v28 = vadd.f32 %v9006_v26, %v1441_v58 }
 0x1d0   :  { %v917_v23 = vpack.c.bf16 %v754_v55, %v751_v25  ;;  %v7056_v47 = vpop.f32.mrf.mxu1 }
 0x1d1   :  { %v1605_v3 = vpack.c.bf16 %v1442_v28, %v1439_v37  ;;  %v758_v4 = vpop.f32.mrf.mxu0  ;;  %6523 = vmatmul.mubr.msk.bf16.gmra.mxu0 %vm312_vm1, %v12999_v57 }
 0x1d2   :  { %v4028_v9 = vrot.slane %v917_v23, 4  ;;  %2929 = vmatpush2.bf16.xpose.msra.mxu0 %v2904_v24  ;;  %v1446_v43 = vpop.f32.mrf.mxu1  ;;  %1822 = vmatprep.mubr.bf16.mxu0 %v12990_v40  ;;  %v759_v50 = vadd.f32 %v9016_v5, %v758_v4 }
 0x1d3   :  { %v4065_v15 = vrot.slane %v1605_v3, 4  ;;  %v6859_v2 = vpop.f32.mrf.mxu0  ;;  %2930 = vmatprep.subr.bf16.mxu0 %v12990_v40  ;;  %v1447_v18 = vadd.f32 %v9006_v26, %v1446_v43 }
 0x1d4   :  { %v7059_v34 = vpop.f32.mrf.mxu1  ;;  %v9412_v14 = vsel %vm1958_vm3, %v4026_v33, %v4028_v9 }
 0x1d5   :  { %v761_v19 = vpop.f32.mrf.mxu0  ;;  %v9416_v36 = vsel %vm1958_vm3, %v4063_v10, %v4065_v15  ;;  %v2901_v10 = vsel %vm312_vm1, %v9238_v41, 0 }
 0x1d6   :  { %v762_v63 = vadd.f32 %v9016_v5, %v761_v19  ;;  %v1449_v1 = vpop.f32.mrf.mxu1  ;;  %4731 = vrot.lane.b32.xlu0 %v9416_v36, %s7877_s13 }
 0x1d7   :  { %v6860_v7 = vpop.f32.mrf.mxu0  ;;  %v1450_v6 = vadd.f32 %v9006_v26, %v1449_v1 }
 0x1d8   :  { %v918_v13 = vpack.c.bf16 %v762_v63, %v759_v50  ;;  %v7060_v33 = vpop.f32.mrf.mxu1 }
 0x1d9   :  { %v1606_v35 = vpack.c.bf16 %v1450_v6, %v1447_v18  ;;  %v766_v37 = vpop.f32.mrf.mxu0  ;;  %6524 = vmatmul.mubr.msk.bf16.gmra.mxu0 %vm312_vm1, %v13000_v38  ;;  %v13001_v18 = vpack.c.bf16 %v8746_v52, %v8743_v16 }
 0x1da   :  { %v4030_v25 = vrot.slane %v918_v13, 4  ;;  %2931 = vmatpush2.bf16.xpose.msra.mxu0 %v2901_v10  ;;  %v1454_v55 = vpop.f32.mrf.mxu1  ;;  %1832 = vmatprep.mubr.bf16.mxu0 %v12990_v40  ;;  %v767_v41 = vadd.f32 %v9016_v5, %v766_v37 }
 0x1db   :  { %v4067_v58 = vrot.slane %v1606_v35, 4  ;;  %v6863_v29 = vpop.f32.mrf.mxu0  ;;  %2932 = vmatprep.subr.bf16.mxu0 %v12990_v40  ;;  %v1455_v60 = vadd.f32 %v9006_v26, %v1454_v55 }
 0x1dc   :  { %v7063_v28 = vpop.f32.mrf.mxu1  ;;  %v9432_v23 = vsel %vm1958_vm3, %v4028_v9, %v4030_v25 }
 0x1dd   :  { %v769_v61 = vpop.f32.mrf.mxu0  ;;  %v9436_v47 = vsel %vm1958_vm3, %v4065_v15, %v4067_v58  ;;  %v2898_v15 = vsel %vm312_vm1, %v9202_v20, 0  ;;  %v13002_v28 = vpack.c.bf16 %v8781_v49, %v8778_v42 }
 0x1de   :  { %v770_v3 = vadd.f32 %v9016_v5, %v769_v61  ;;  %v1457_v4 = vpop.f32.mrf.mxu1  ;;  %4733 = vrot.lane.b32.xlu1 %v9436_v47, %s7877_s13 }
 0x1df   :  { %v6864_v57 = vpop.f32.mrf.mxu0  ;;  %v1458_v24 = vadd.f32 %v9006_v26, %v1457_v4 }
 0x1e0   :  { %v919_v43 = vpack.c.bf16 %v770_v3, %v767_v41  ;;  %v7064_v9 = vpop.f32.mrf.mxu1 }
 0x1e1   :  { %v1607_v2 = vpack.c.bf16 %v1458_v24, %v1455_v60  ;;  %v774_v34 = vpop.f32.mrf.mxu0  ;;  %6525 = vmatmul.mubr.msk.bf16.gmra.mxu0 %vm312_vm1, %v13001_v18 }
 0x1e2   :  { %v4032_v19 = vrot.slane %v919_v43, 4  ;;  %2933 = vmatpush2.bf16.xpose.msra.mxu0 %v2898_v15  ;;  %v1462_v50 = vpop.f32.mrf.mxu1  ;;  %1842 = vmatprep.mubr.bf16.mxu0 %v12990_v40  ;;  %v775_v20 = vadd.f32 %v9016_v5, %v774_v34  ;;  %v9485_v34 = vld [vmem:[%s12870_s5] ss:$0 sm:$0xff] }
 0x1e3   :  { %v4069_v63 = vrot.slane %v1607_v2, 4  ;;  %v6867_v1 = vpop.f32.mrf.mxu0  ;;  %2934 = vmatprep.subr.bf16.mxu0 %v12990_v40  ;;  %v1463_v16 = vadd.f32 %v9006_v26, %v1462_v50 }
 0x1e4   :  { %v7067_v7 = vpop.f32.mrf.mxu1  ;;  %v9452_v6 = vsel %vm1958_vm3, %v4030_v25, %v4032_v19 }
 0x1e5   :  { %v777_v52 = vpop.f32.mrf.mxu0  ;;  %v9456_v13 = vsel %vm1958_vm3, %v4067_v58, %v4069_v63  ;;  %v2895_v58 = vsel %vm312_vm1, %v9184_v39, 0 }
 0x1e6   :  { %v778_v33 = vadd.f32 %v9016_v5, %v777_v52  ;;  %v1465_v35 = vpop.f32.mrf.mxu1  ;;  %4735 = vrot.lane.b32.xlu0 %v9456_v13, %s7877_s13 }
 0x1e7   :  { %v6868_v37 = vpop.f32.mrf.mxu0  ;;  %v1466_v38 = vadd.f32 %v9006_v26, %v1465_v35  ;;  %v9514_v35 = vld [vmem:[%s12868_s3] ss:$0 sm:$0xff] }
 0x1e8   :  { %v920_v10 = vpack.c.bf16 %v778_v33, %v775_v20  ;;  %v7068_v25 = vpop.f32.mrf.mxu1 }
 0x1e9   :  { %v1608_v55 = vpack.c.bf16 %v1466_v38, %v1463_v16  ;;  %v782_v29 = vpop.f32.mrf.mxu0  ;;  %6526 = vmatmul.mubr.msk.bf16.gmra.mxu0 %vm312_vm1, %v13002_v28 }
 0x1ea   :  { %v4034_v60 = vrot.slane %v920_v10, 4  ;;  %2935 = vmatpush2.bf16.xpose.msra.mxu0 %v2895_v58  ;;  %v1470_v61 = vpop.f32.mrf.mxu1  ;;  %1852 = vmatprep.mubr.bf16.mxu0 %v12990_v40  ;;  %v783_v39 = vadd.f32 %v9016_v5, %v782_v29 }
 0x1eb   :  { %v4071_v41 = vrot.slane %v1608_v55, 4  ;;  %v6871_v3 = vpop.f32.mrf.mxu0  ;;  %2936 = vmatprep.subr.bf16.mxu0 %v12990_v40  ;;  %v1471_v42 = vadd.f32 %v9006_v26, %v1470_v61 }
 0x1ec   :  { %v7071_v4 = vpop.f32.mrf.mxu1  ;;  %v9472_v57 = vsel %vm1958_vm3, %v4032_v19, %v4034_v60  ;;  %v4136_v3 = vsel %vm312_vm1, %v9416_v36, 0 }
 0x1ed   :  { %v785_v49 = vpop.f32.mrf.mxu0  ;;  %v9476_v24 = vsel %vm1958_vm3, %v4069_v63, %v4071_v41 }
 0x1ee   :  { %v786_v43 = vadd.f32 %v9016_v5, %v785_v49  ;;  %v1473_v9 = vpop.f32.mrf.mxu1  ;;  %4737 = vrot.lane.b32.xlu1 %v9476_v24, %s7877_s13  ;;  %v2892_v5 = vsel %vm312_vm1, %v9152_v11, 0 }
 0x1ef   :  { %v6872_v2 = vpop.f32.mrf.mxu0  ;;  %v1474_v26 = vadd.f32 %v9485_v34, %v1473_v9 }
 0x1f0   :  { %v9488_v18 = vpack.c.bf16 %v786_v43, %v783_v39  ;;  %v7072_v15 = vpop.f32.mrf.mxu1 }
 0x1f1   :  { %v1609_v19 = vpack.c.bf16 %v1474_v26, %v1471_v42  ;;  %v790_v50 = vpop.f32.mrf.mxu0  ;;  %6527 = vmatmul.mubr.msk.bf16.gmra.mxu0 %vm312_vm1, %v8815_v59 }
 0x1f2   :  { %v12878_v63 = vrot.slane %v9488_v18, 4  ;;  %2937 = vmatpush2.bf16.xpose.msra.mxu0 %v2892_v5  ;;  %v1478_v1 = vpop.f32.mrf.mxu1  ;;  %2938 = vmatprep.mubr.bf16.mxu0 %v12990_v40  ;;  %v791_v37 = vadd.f32 %v9514_v35, %v790_v50  ;;  %v5161_v4 = vrot.slane %v9488_v18, 6 }
 0x1f3   :  { %v9496_v7 = vrot.slane %v1609_v19, 4  ;;  %v6875_v16 = vpop.f32.mrf.mxu0  ;;  %4153 = vmatprep.subr.bf16.mxu0 %v12990_v40  ;;  %v1479_v59 = vadd.f32 %v9485_v34, %v1478_v1  ;;  %v5198_v58 = vrot.slane %v1609_v19, 6 }
 0x1f4   :  { %v7075_v52 = vpop.f32.mrf.mxu1  ;;  %v9502_v20 = vsel %vm1958_vm3, %v4034_v60, %v12878_v63 }
 0x1f5   :  { %v793_v11 = vpop.f32.mrf.mxu0  ;;  %v9507_v33 = vsel %vm1958_vm3, %v4071_v41, %v9496_v7  ;;  %4741 = vrot.lane.b32.xlu1 %v9496_v7, %s7877_s13  ;;  %v13003_v41 = vld [vmem:[#allocation5_spill] sm:$0xff] }
 0x1f6   :  { %v794_v38 = vadd.f32 %v9514_v35, %v793_v11  ;;  %v1481_v10 = vpop.f32.mrf.mxu1  ;;  %4739 = vrot.lane.b32.xlu0 %v9507_v33, %s7877_s13 }
 0x1f7   :  { %v6876_v25 = vpop.f32.mrf.mxu0  ;;  %v1482_v55 = vadd.f32 %v9485_v34, %v1481_v10  ;;  %v4133_v10 = vsel %vm312_vm1, %v9396_v46, 0 }
 0x1f8   :  { %v922_v29 = vpack.c.bf16 %v794_v38, %v791_v37  ;;  %v7076_v28 = vpop.f32.mrf.mxu1  ;;  %v13004_v38 = vld [vmem:[#allocation6_spill] sm:$0xff] }
 0x1f9   :  { %v1610_v60 = vpack.c.bf16 %v1482_v55, %v1479_v59  ;;  %v798_v61 = vpop.f32.mrf.mxu0  ;;  %6541 = vmatmul.mubr.msk.bf16.vlgmr.msra.gmra.mxu0 %vm312_vm1, %v13003_v41 }
 0x1fa   :  { %v5162_v42 = vrot.slane %v922_v29, 6  ;;  %4154 = vmatpush1.bf16.xpose.msra.mxu0 %v4136_v3  ;;  %v1486_v49 = vpop.f32.mrf.mxu1  ;;  %2948 = vmatprep.mubr.bf16.mxu0 %v12990_v40  ;;  %v799_v19 = vadd.f32 %v9514_v35, %v798_v61 }
 0x1fb   :  { %v5199_v39 = vrot.slane %v1610_v60, 6  ;;  %v6879_v43 = vpop.f32.mrf.mxu0  ;;  %4155 = vmatprep.subr.bf16.mxu0 %v12990_v40  ;;  %v1487_v26 = vadd.f32 %v9485_v34, %v1486_v49 }
 0x1fc   :  { %v9529_v9 = vsel %vm2357_vm4, %v5161_v4, %v5162_v42  ;;  %v7079_v2 = vpop.f32.mrf.mxu1 }
 0x1fd   :  { %v801_v15 = vpop.f32.mrf.mxu0  ;;  %v9533_v36 = vsel %vm2357_vm4, %v5198_v58, %v5199_v39 }
 0x1fe   :  { %v802_v50 = vadd.f32 %v9514_v35, %v801_v15  ;;  %v1489_v5 = vpop.f32.mrf.mxu1  ;;  %5865 = vrot.lane.b32.xlu0 %v9533_v36, %s7877_s13 }
 0x1ff   :  { %v6880_v1 = vpop.f32.mrf.mxu0  ;;  %v1490_v16 = vadd.f32 %v9485_v34, %v1489_v5 }
 0x200   :  { %v923_v52 = vpack.c.bf16 %v802_v50, %v799_v19  ;;  %v7080_v59 = vpop.f32.mrf.mxu1  ;;  %v13005_v50 = vld [vmem:[#allocation7_spill] sm:$0xff] }
 0x201   :  { %v1611_v11 = vpack.c.bf16 %v1490_v16, %v1487_v26  ;;  %v806_v37 = vpop.f32.mrf.mxu0  ;;  %6542 = vmatmul.mubr.msk.bf16.gmra.mxu0 %vm312_vm1, %v13004_v38 }
 0x202   :  { %v5164_v25 = vrot.slane %v923_v52, 6  ;;  %4156 = vmatpush1.bf16.xpose.msra.mxu0 %v4133_v10  ;;  %v1494_v55 = vpop.f32.mrf.mxu1  ;;  %2958 = vmatprep.mubr.bf16.mxu0 %v12990_v40  ;;  %v807_v46 = vadd.f32 %v9514_v35, %v806_v37 }
 0x203   :  { %v5201_v29 = vrot.slane %v1611_v11, 6  ;;  %v6883_v28 = vpop.f32.mrf.mxu0  ;;  %4157 = vmatprep.subr.bf16.mxu0 %v12990_v40  ;;  %v1495_v61 = vadd.f32 %v9485_v34, %v1494_v55 }
 0x204   :  { %v7083_v58 = vpop.f32.mrf.mxu1  ;;  %v9547_v60 = vsel %vm2357_vm4, %v5162_v42, %v5164_v25 }
 0x205   :  { %v809_v41 = vpop.f32.mrf.mxu0  ;;  %v9551_v3 = vsel %vm2357_vm4, %v5199_v39, %v5201_v29  ;;  %v4130_v39 = vsel %vm312_vm1, %v9376_v48, 0 }
 0x206   :  { %v810_v4 = vadd.f32 %v9514_v35, %v809_v41  ;;  %v1497_v49 = vpop.f32.mrf.mxu1  ;;  %5867 = vrot.lane.b32.xlu1 %v9551_v3, %s7877_s13 }
 0x207   :  { %v6884_v43 = vpop.f32.mrf.mxu0  ;;  %v1498_v2 = vadd.f32 %v9485_v34, %v1497_v49 }
 0x208   :  { %v924_v26 = vpack.c.bf16 %v810_v4, %v807_v46  ;;  %v7084_v42 = vpop.f32.mrf.mxu1  ;;  %v4127_v46 = vsel %vm312_vm1, %v9356_v32, 0 }
 0x209   :  { %v1612_v15 = vpack.c.bf16 %v1498_v2, %v1495_v61  ;;  %v814_v19 = vpop.f32.mrf.mxu0  ;;  %6543 = vmatmul.mubr.msk.bf16.gmra.mxu0 %vm312_vm1, %v13005_v50 }
 0x20a   :  { %v5166_v5 = vrot.slane %v924_v26, 6  ;;  %4158 = vmatpush1.bf16.xpose.msra.mxu0 %v4130_v39  ;;  %v1502_v1 = vpop.f32.mrf.mxu1  ;;  %2968 = vmatprep.mubr.bf16.mxu0 %v12990_v40  ;;  %v815_v48 = vadd.f32 %v9514_v35, %v814_v19 }
 0x20b   :  { %v5203_v16 = vrot.slane %v1612_v15, 6  ;;  %v6887_v52 = vpop.f32.mrf.mxu0  ;;  %4159 = vmatprep.subr.bf16.mxu0 %v12990_v40  ;;  %v1503_v37 = vadd.f32 %v9485_v34, %v1502_v1 }
 0x20c   :  { %v7087_v59 = vpop.f32.mrf.mxu1  ;;  %v9565_v11 = vsel %vm2357_vm4, %v5164_v25, %v5166_v5 }
 0x20d   :  { %v817_v38 = vpop.f32.mrf.mxu0  ;;  %v9569_v10 = vsel %vm2357_vm4, %v5201_v29, %v5203_v16  ;;  %v13006_v29 = vld [vmem:[#allocation8_spill] sm:$0xff] }
 0x20e   :  { %v818_v55 = vadd.f32 %v9514_v35, %v817_v38  ;;  %v1505_v28 = vpop.f32.mrf.mxu1  ;;  %5869 = vrot.lane.b32.xlu0 %v9569_v10, %s7877_s13 }
 0x20f   :  { %v6888_v58 = vpop.f32.mrf.mxu0  ;;  %v1506_v61 = vadd.f32 %v9485_v34, %v1505_v28 }
 0x210   :  { %v925_v41 = vpack.c.bf16 %v818_v55, %v815_v48  ;;  %v7088_v25 = vpop.f32.mrf.mxu1  ;;  %v4124_v55 = vsel %vm312_vm1, %v9334_v31, 0 }
 0x211   :  { %v1613_v4 = vpack.c.bf16 %v1506_v61, %v1503_v37  ;;  %v822_v49 = vpop.f32.mrf.mxu0  ;;  %6544 = vmatmul.mubr.msk.bf16.gmra.mxu0 %vm312_vm1, %v13006_v29 }
 0x212   :  { %v5168_v43 = vrot.slane %v925_v41, 6  ;;  %4160 = vmatpush1.bf16.xpose.msra.mxu0 %v4127_v46  ;;  %v1510_v2 = vpop.f32.mrf.mxu1  ;;  %2978 = vmatprep.mubr.bf16.mxu0 %v12990_v40  ;;  %v823_v1 = vadd.f32 %v9514_v35, %v822_v49 }
 0x213   :  { %v5205_v26 = vrot.slane %v1613_v4, 6  ;;  %v6891_v42 = vpop.f32.mrf.mxu0  ;;  %4161 = vmatprep.subr.bf16.mxu0 %v12990_v40  ;;  %v1511_v32 = vadd.f32 %v9485_v34, %v1510_v2 }
 0x214   :  { %v7091_v15 = vpop.f32.mrf.mxu1  ;;  %v9583_v19 = vsel %vm2357_vm4, %v5166_v5, %v5168_v43 }
 0x215   :  { %v825_v50 = vpop.f32.mrf.mxu0  ;;  %v9587_v39 = vsel %vm2357_vm4, %v5203_v16, %v5205_v26  ;;  %v13007_v16 = vld [vmem:[#allocation9_spill] sm:$0xff] }
 0x216   :  { %v826_v52 = vadd.f32 %v9514_v35, %v825_v50  ;;  %v1513_v59 = vpop.f32.mrf.mxu1  ;;  %5871 = vrot.lane.b32.xlu0 %v9587_v39, %s7877_s13 }
 0x217   :  { %v6892_v37 = vpop.f32.mrf.mxu0  ;;  %v1514_v38 = vadd.f32 %v9485_v34, %v1513_v59  ;;  %v4121_v59 = vsel %vm312_vm1, %v9310_v51, 0 }
 0x218   :  { %v926_v48 = vpack.c.bf16 %v826_v52, %v823_v1  ;;  %v7092_v5 = vpop.f32.mrf.mxu1 }
 0x219   :  { %v1614_v28 = vpack.c.bf16 %v1514_v38, %v1511_v32  ;;  %v830_v58 = vpop.f32.mrf.mxu0  ;;  %6545 = vmatmul.mubr.msk.bf16.gmra.mxu0 %vm312_vm1, %v13007_v16 }
 0x21a   :  { %v5170_v61 = vrot.slane %v926_v48, 6  ;;  %4162 = vmatpush1.bf16.xpose.msra.mxu0 %v4124_v55  ;;  %v1518_v41 = vpop.f32.mrf.mxu1  ;;  %2988 = vmatprep.mubr.bf16.mxu0 %v12990_v40  ;;  %v831_v42 = vadd.f32 %v9514_v35, %v830_v58 }
 0x21b   :  { %v5207_v25 = vrot.slane %v1614_v28, 6  ;;  %v6895_v46 = vpop.f32.mrf.mxu0  ;;  %4163 = vmatprep.subr.bf16.mxu0 %v12990_v40  ;;  %v1519_v31 = vadd.f32 %v9485_v34, %v1518_v41 }
 0x21c   :  { %v7095_v4 = vpop.f32.mrf.mxu1  ;;  %v9601_v49 = vsel %vm2357_vm4, %v5168_v43, %v5170_v61 }
 0x21d   :  { %v833_v29 = vpop.f32.mrf.mxu0  ;;  %v9605_v2 = vsel %vm2357_vm4, %v5205_v26, %v5207_v25  ;;  %v13008_v26 = vld [vmem:[#allocation10_spill] sm:$0xff] }
 0x21e   :  { %v834_v15 = vadd.f32 %v9514_v35, %v833_v29  ;;  %v1521_v32 = vpop.f32.mrf.mxu1  ;;  %5873 = vrot.lane.b32.xlu0 %v9605_v2, %s7877_s13 }
 0x21f   :  { %v6896_v50 = vpop.f32.mrf.mxu0  ;;  %v1522_v1 = vadd.f32 %v9485_v34, %v1521_v32 }
 0x220   :  { %v927_v52 = vpack.c.bf16 %v834_v15, %v831_v42  ;;  %v7096_v43 = vpop.f32.mrf.mxu1  ;;  %v4118_v50 = vsel %vm312_vm1, %v9287_v54, 0 }
 0x221   :  { %v1615_v37 = vpack.c.bf16 %v1522_v1, %v1519_v31  ;;  %v838_v38 = vpop.f32.mrf.mxu0  ;;  %6546 = vmatmul.mubr.msk.bf16.gmra.mxu0 %vm312_vm1, %v13008_v26 }
 0x222   :  { %v5172_v48 = vrot.slane %v927_v52, 6  ;;  %4164 = vmatpush1.bf16.xpose.msra.mxu0 %v4121_v59  ;;  %v1526_v5 = vpop.f32.mrf.mxu1  ;;  %2998 = vmatprep.mubr.bf16.mxu0 %v12990_v40  ;;  %v839_v4 = vadd.f32 %v9514_v35, %v838_v38 }
 0x223   :  { %v5209_v55 = vrot.slane %v1615_v37, 6  ;;  %v6899_v28 = vpop.f32.mrf.mxu0  ;;  %4165 = vmatprep.subr.bf16.mxu0 %v12990_v40  ;;  %v1527_v51 = vadd.f32 %v9485_v34, %v1526_v5 }
 0x224   :  { %v7099_v58 = vpop.f32.mrf.mxu1  ;;  %v9619_v16 = vsel %vm2357_vm4, %v5170_v61, %v5172_v48 }
 0x225   :  { %v841_v41 = vpop.f32.mrf.mxu0  ;;  %v9623_v46 = vsel %vm2357_vm4, %v5207_v25, %v5209_v55  ;;  %v13009_v25 = vld [vmem:[#allocation11_spill] sm:$0xff] }
 0x226   :  { %v842_v31 = vadd.f32 %v9514_v35, %v841_v41  ;;  %v1529_v29 = vpop.f32.mrf.mxu1  ;;  %5875 = vrot.lane.b32.xlu0 %v9623_v46, %s7877_s13 }
 0x227   :  { %v6900_v42 = vpop.f32.mrf.mxu0  ;;  %v1530_v15 = vadd.f32 %v9485_v34, %v1529_v29 }
 0x228   :  { %v928_v32 = vpack.c.bf16 %v842_v31, %v839_v4  ;;  %v7100_v61 = vpop.f32.mrf.mxu1 }
 0x229   :  { %v1616_v1 = vpack.c.bf16 %v1530_v15, %v1527_v51  ;;  %v846_v52 = vpop.f32.mrf.mxu0  ;;  %6547 = vmatmul.mubr.msk.bf16.gmra.mxu0 %vm312_vm1, %v13009_v25  ;;  %v4115_v15 = vsel %vm312_vm1, %v9267_v30, 0 }
 0x22a   :  { %v5174_v43 = vrot.slane %v928_v32, 6  ;;  %4166 = vmatpush1.bf16.xpose.msra.mxu0 %v4118_v50  ;;  %v1534_v59 = vpop.f32.mrf.mxu1  ;;  %3008 = vmatprep.mubr.bf16.mxu0 %v12990_v40  ;;  %v847_v51 = vadd.f32 %v9514_v35, %v846_v52 }
 0x22b   :  { %v5211_v37 = vrot.slane %v1616_v1, 6  ;;  %v6903_v38 = vpop.f32.mrf.mxu0  ;;  %4167 = vmatprep.subr.bf16.mxu0 %v12990_v40  ;;  %v1535_v54 = vadd.f32 %v9485_v34, %v1534_v59 }
 0x22c   :  { %v7103_v26 = vpop.f32.mrf.mxu1  ;;  %v9637_v5 = vsel %vm2357_vm4, %v5172_v48, %v5174_v43 }
 0x22d   :  { %v849_v28 = vpop.f32.mrf.mxu0  ;;  %v9641_v58 = vsel %vm2357_vm4, %v5209_v55, %v5211_v37  ;;  %v13010_v55 = vld [vmem:[#allocation12_spill] sm:$0xff] }
 0x22e   :  { %v850_v41 = vadd.f32 %v9514_v35, %v849_v28  ;;  %v1537_v4 = vpop.f32.mrf.mxu1  ;;  %5877 = vrot.lane.b32.xlu1 %v9641_v58, %s7877_s13 }
 0x22f   :  { %v6904_v31 = vpop.f32.mrf.mxu0  ;;  %v1538_v29 = vadd.f32 %v9485_v34, %v1537_v4 }
 0x230   :  { %v929_v42 = vpack.c.bf16 %v850_v41, %v847_v51  ;;  %v7104_v48 = vpop.f32.mrf.mxu1 }
 0x231   :  { %v1617_v32 = vpack.c.bf16 %v1538_v29, %v1535_v54  ;;  %v854_v61 = vpop.f32.mrf.mxu0  ;;  %6548 = vmatmul.mubr.msk.bf16.gmra.mxu0 %vm312_vm1, %v13010_v55  ;;  %v13011_v48 = vld [vmem:[#allocation13_spill] sm:$0xff] }
 0x232   :  { %v5176_v50 = vrot.slane %v929_v42, 6  ;;  %4168 = vmatpush1.bf16.xpose.msra.mxu0 %v4115_v15  ;;  %3018 = vmatprep.mubr.bf16.mxu0 %v12990_v40  ;;  %v1542_v1 = vpop.f32.mrf.mxu1  ;;  %v855_v28 = vadd.f32 %v9514_v35, %v854_v61 }
 0x233   :  { %v5213_v52 = vrot.slane %v1617_v32, 6  ;;  %v6907_v25 = vpop.f32.mrf.mxu0  ;;  %4175 = vmatprep.subr.bf16.mxu0 %v12990_v40  ;;  %v1543_v54 = vadd.f32 %v9485_v34, %v1542_v1 }
 0x234   :  { %v7107_v59 = vpop.f32.mrf.mxu1  ;;  %v9655_v38 = vsel %vm2357_vm4, %v5174_v43, %v5176_v50 }
 0x235   :  { %v857_v26 = vpop.f32.mrf.mxu0  ;;  %v9658_v30 = vsel %vm2357_vm4, %v5211_v37, %v5213_v52  ;;  %v4151_v37 = vsel %vm312_vm1, %v9496_v7, 0 }
 0x236   :  { %v858_v51 = vadd.f32 %v9514_v35, %v857_v26  ;;  %5879 = vrot.lane.b32.xlu0 %v9658_v30, %s7877_s13  ;;  %v1545_v41 = vpop.f32.mrf.mxu1 }
 0x237   :  { %v6908_v4 = vpop.f32.mrf.mxu0  ;;  %v1546_v31 = vadd.f32 %v9485_v34, %v1545_v41 }
 0x238   :  { %v930_v29 = vpack.c.bf16 %v858_v51, %v855_v28  ;;  %v7108_v43 = vpop.f32.mrf.mxu1 }
 0x239   :  { %v862_v42 = vpop.f32.mrf.mxu0  ;;  %6549 = vmatmul.mubr.msk.bf16.gmra.mxu0 %vm312_vm1, %v13011_v48  ;;  %v1618_v15 = vpack.c.bf16 %v1546_v31, %v1543_v54 }
 0x23a   :  { %v5178_v32 = vrot.slane %v930_v29, 6  ;;  %4176 = vmatpush2.bf16.xpose.msra.mxu0 %v4151_v37  ;;  %3028 = vmatprep.mubr.bf16.mxu0 %v12990_v40  ;;  %v1550_v61 = vpop.f32.mrf.mxu1  ;;  %v863_v7 = vadd.f32 %v9514_v35, %v862_v42 }
 0x23b   :  { %v6911_v55 = vpop.f32.mrf.mxu0  ;;  %4177 = vmatprep.subr.bf16.mxu0 %v12990_v40  ;;  %v5215_v1 = vrot.slane %v1618_v15, 6  ;;  %v1551_v28 = vadd.f32 %v9485_v34, %v1550_v61 }
 0x23c   :  { %v7111_v25 = vpop.f32.mrf.mxu1  ;;  %v9673_v59 = vsel %vm2357_vm4, %v5176_v50, %v5178_v32  ;;  %v4148_v50 = vsel %vm312_vm1, %v9507_v33, 0 }
 0x23d   :  { %v865_v26 = vpop.f32.mrf.mxu0  ;;  %v9677_v51 = vsel %vm2357_vm4, %v5213_v52, %v5215_v1 }
 0x23e   :  { %13012 = vst [vmem:[#allocation5_spill] sm:$0xff] %v9677_v51  ;;  %v866_v54 = vadd.f32 %v9514_v35, %v865_v26  ;;  %v1553_v41 = vpop.f32.mrf.mxu1 }
 0x23f   :  { %v6912_v4 = vpop.f32.mrf.mxu0  ;;  %v1554_v31 = vadd.f32 %v9485_v34, %v1553_v41 }
 0x240   :  { %v931_v29 = vpack.c.bf16 %v866_v54, %v863_v7  ;;  %v7112_v43 = vpop.f32.mrf.mxu1 }
 0x241   :  { %v870_v48 = vpop.f32.mrf.mxu0  ;;  %6550 = vmatmul.mubr.msk.bf16.gmra.mxu0 %vm312_vm1, %v9180_v27  ;;  %v1619_v37 = vpack.c.bf16 %v1554_v31, %v1551_v28 }
 0x242   :  { %v5180_v52 = vrot.slane %v931_v29, 6  ;;  %4178 = vmatpush2.bf16.xpose.msra.mxu0 %v4148_v50  ;;  %3038 = vmatprep.mubr.bf16.mxu0 %v12990_v40  ;;  %v871_v27 = vadd.f32 %v9514_v35, %v870_v48 }
 0x243   :  { %v6915_v42 = vpop.f32.mrf.mxu0  ;;  %4179 = vmatprep.subr.bf16.mxu0 %v12990_v40  ;;  %v5217_v15 = vrot.slane %v1619_v37, 6  ;;  %v1558_v61 = vpop.f32.mrf.mxu1 }
 0x244   :  { %v9689_v55 = vsel %vm2357_vm4, %v5178_v32, %v5180_v52  ;;  %v1559_v7 = vadd.f32 %v9485_v34, %v1558_v61  ;;  %v4145_v32 = vsel %vm312_vm1, %v9476_v24, 0 }
 0x245   :  { %v873_v25 = vpop.f32.mrf.mxu0  ;;  %v7115_v26 = vpop.f32.mrf.mxu1  ;;  %v9692_v33 = vsel %vm2357_vm4, %v5215_v1, %v5217_v15 }
 0x246   :  { %13013 = vst [vmem:[#allocation6_spill] sm:$0xff] %v9692_v33  ;;  %v874_v28 = vadd.f32 %v9514_v35, %v873_v25 }
 0x247   :  { %v6916_v54 = vpop.f32.mrf.mxu0  ;;  %v1561_v41 = vpop.f32.mrf.mxu1 }
 0x248   :  { %v932_v4 = vpack.c.bf16 %v874_v28, %v871_v27  ;;  %v1562_v31 = vadd.f32 %v9485_v34, %v1561_v41 }
 0x249   :  { %v878_v29 = vpop.f32.mrf.mxu0  ;;  %6551 = vmatmul.mubr.msk.bf16.gmra.mxu0 %vm312_vm1, %v9198_v56  ;;  %v7116_v1 = vpop.f32.mrf.mxu1 }
 0x24a   :  { %v5182_v43 = vrot.slane %v932_v4, 6  ;;  %4180 = vmatpush2.bf16.xpose.msra.mxu0 %v4145_v32  ;;  %3048 = vmatprep.mubr.bf16.mxu0 %v12990_v40  ;;  %v1620_v50 = vpack.c.bf16 %v1562_v31, %v1559_v7  ;;  %v879_v26 = vadd.f32 %v9514_v35, %v878_v29 }
 0x24b   :  { %v6919_v48 = vpop.f32.mrf.mxu0  ;;  %4181 = vmatprep.subr.bf16.mxu0 %v12990_v40  ;;  %v1566_v37 = vpop.f32.mrf.mxu1 }
 0x24c   :  { %v9704_v42 = vrot.slane %v1620_v50, 6  ;;  %v9707_v61 = vsel %vm2357_vm4, %v5180_v52, %v5182_v43  ;;  %v9712_v27 = vadd.f32 %v9485_v34, %v1566_v37  ;;  %v4142_v52 = vsel %vm312_vm1, %v9456_v13, 0 }
 0x24d   :  { %13014 = vst [vmem:[#allocation7_spill] sm:$0xff] %v9707_v61  ;;  %v881_v24 = vpop.f32.mrf.mxu0  ;;  %v7119_v25 = vpop.f32.mrf.mxu1  ;;  %v4139_v37 = vsel %vm312_vm1, %v9436_v47, 0 }
 0x24e   :  { %v882_v56 = vadd.f32 %v9514_v35, %v881_v24  ;;  %v9716_v28 = vsel %vm2357_vm4, %v5217_v15, %v9704_v42 }
 0x24f   :  { %13015 = vst [vmem:[#allocation8_spill] sm:$0xff] %v9716_v28  ;;  %v6920_v7 = vpop.f32.mrf.mxu0  ;;  %v1569_v54 = vpop.f32.mrf.mxu1 }
 0x250   :  { %v933_v41 = vpack.c.bf16 %v882_v56, %v879_v26  ;;  %v9719_v4 = vadd.f32 %v9485_v34, %v1569_v54  ;;  %v5284_v7 = vsel %vm312_vm1, %v9658_v30, 0 }
 0x251   :  { %v9723_v31 = vpop.f32.mrf.mxu0  ;;  %6552 = vmatmul.mubr.msk.bf16.gmra.mxu0 %vm312_vm1, %v9233_v44  ;;  %v7120_v35 = vpop.f32.mrf.mxu1 }
 0x252   :  { %v9727_v32 = vrot.slane %v933_v41, 6  ;;  %4182 = vmatpush2.bf16.xpose.msra.mxu0 %v4142_v52  ;;  %3058 = vmatprep.mubr.bf16.mxu0 %v12990_v40 }
 0x253   :  { %v9732_v34 = vpop.f32.mrf.mxu0  ;;  %4183 = vmatprep.subr.bf16.mxu0 %v12990_v40 }
 0x254   :  { %13016 = vst [vmem:[#allocation9_spill] sm:$0xff] %v9727_v32  ;;  %v1862_v13 = vsel %vm1861_vm5, %v9732_v34, -inf  ;;  %v9739_v44 = vsel %vm2357_vm4, %v5182_v43, %v9727_v32 }
 0x255   :  { %13017 = vst [vmem:[#allocation10_spill] sm:$0xff] %v9739_v44  ;;  %v9741_v29 = vpop.f32.mrf.mxu0  ;;  %v1863_v1 = vmax.f32 %v9723_v31, %v1862_v13 }
 0x257   :  { %1864 = vmax.xlane.f32.xlu0 %v1863_v1  ;;  %v9744_v50 = vpop.f32.mrf.mxu0 }
 0x258   :  { %v1866_v48 = vsel %vm1861_vm5, %v9744_v50, -inf }
 0x259   :  { %v9750_v24 = vpop.f32.mrf.mxu0  ;;  %6553 = vmatmul.mubr.msk.bf16.gmra.mxu0 %vm312_vm1, %v2789_v62  ;;  %v1867_v43 = vmax.f32 %v9741_v29, %v1866_v48  ;;  %v5281_v48 = vsel %vm312_vm1, %v9641_v58, 0 }
 0x25a   :  { %4184 = vmatpush2.bf16.xpose.msra.mxu0 %v4139_v37  ;;  %4185 = vmatprep.mubr.bf16.mxu0 %v12990_v40 }
 0x25b   :  { %1868 = vmax.xlane.f32.xlu0 %v1867_v43  ;;  %v9757_v25 = vpop.f32.mrf.mxu0  ;;  %5301 = vmatprep.subr.bf16.mxu0 %v12990_v40 }
 0x25c   :  { %v1870_v26 = vsel %vm1861_vm5, %v9757_v25, -inf }
 0x25d   :  { %v9762_v47 = vpop.f32.mrf.mxu0  ;;  %v1871_v56 = vmax.f32 %v9750_v24, %v1870_v26 }
 0x25f   :  { %1872 = vmax.xlane.f32.xlu1 %v1871_v56  ;;  %v9765_v53 = vpop.f32.mrf.mxu0 }
 0x260   :  { %v1874_v62 = vsel %vm1861_vm5, %v9765_v53, -inf }
 0x261   :  { %v9771_v54 = vpop.f32.mrf.mxu0  ;;  %6567 = vmatmul.mubr.msk.bf16.vlgmr.msra.gmra.mxu0 %vm312_vm1, %v9262_v0  ;;  %v1875_v41 = vmax.f32 %v9762_v47, %v1874_v62 }
 0x262   :  { %5302 = vmatpush1.bf16.xpose.msra.mxu0 %v5284_v7  ;;  %4195 = vmatprep.mubr.bf16.mxu0 %v12990_v40 }
 0x263   :  { %1876 = vmax.xlane.f32.xlu1 %v1875_v41  ;;  %v9777_v52 = vpop.f32.mrf.mxu0  ;;  %5303 = vmatprep.subr.bf16.mxu0 %v12990_v40  ;;  %v5278_v41 = vsel %vm312_vm1, %v9623_v46, 0 }
 0x264   :  { %v1878_v35 = vsel %vm1861_vm5, %v9777_v52, -inf }
 0x265   :  { %v9782_v13 = vpop.f32.mrf.mxu0  ;;  %v1879_v30 = vmax.f32 %v9771_v54, %v1878_v35 }
 0x267   :  { %1880 = vmax.xlane.f32.xlu0 %v1879_v30  ;;  %v9785_v1 = vpop.f32.mrf.mxu0 }
 0x268   :  { %v1882_v0 = vsel %vm1861_vm5, %v9785_v1, -inf }
 0x269   :  { %v9791_v37 = vpop.f32.mrf.mxu0  ;;  %6568 = vmatmul.mubr.msk.bf16.gmra.mxu0 %vm312_vm1, %v9283_v17  ;;  %v1883_v43 = vmax.f32 %v9782_v13, %v1882_v0 }
 0x26a   :  { %5304 = vmatpush1.bf16.xpose.msra.mxu0 %v5281_v48  ;;  %4205 = vmatprep.mubr.bf16.mxu0 %v12990_v40 }
 0x26b   :  { %1884 = vmax.xlane.f32.xlu1 %v1883_v43  ;;  %v9797_v26 = vpop.f32.mrf.mxu0  ;;  %5305 = vmatprep.subr.bf16.mxu0 %v12990_v40 }
 0x26c   :  { %v1886_v56 = vsel %vm1861_vm5, %v9797_v26, -inf }
 0x26d   :  { %v9802_v62 = vpop.f32.mrf.mxu0  ;;  %v1887_v58 = vmax.f32 %v9791_v37, %v1886_v56 }
 0x26f   :  { %1888 = vmax.xlane.f32.xlu0 %v1887_v58  ;;  %v9805_v7 = vpop.f32.mrf.mxu0  ;;  %v5275_v58 = vsel %vm312_vm1, %v9605_v2, 0 }
 0x270   :  { %v1890_v17 = vsel %vm1861_vm5, %v9805_v7, -inf }
 0x271   :  { %v9811_v35 = vpop.f32.mrf.mxu0  ;;  %6569 = vmatmul.mubr.msk.bf16.gmra.mxu0 %vm312_vm1, %v9306_v45  ;;  %v1891_v30 = vmax.f32 %v9802_v62, %v1890_v17 }
 0x272   :  { %5306 = vmatpush1.bf16.xpose.msra.mxu0 %v5278_v41  ;;  %4215 = vmatprep.mubr.bf16.mxu0 %v12990_v40 }
 0x273   :  { %1892 = vmax.xlane.f32.xlu1 %v1891_v30  ;;  %v9817_v0 = vpop.f32.mrf.mxu0  ;;  %5307 = vmatprep.subr.bf16.mxu0 %v12990_v40 }
 0x274   :  { %v1894_v48 = vsel %vm1861_vm5, %v9817_v0, -inf }
 0x275   :  { %v9822_v43 = vpop.f32.mrf.mxu0  ;;  %v1895_v46 = vmax.f32 %v9811_v35, %v1894_v48 }
 0x277   :  { %1896 = vmax.xlane.f32.xlu0 %v1895_v46  ;;  %v9825_v56 = vpop.f32.mrf.mxu0 }
 0x278   :  { %v1898_v45 = vsel %vm1861_vm5, %v9825_v56, -inf }
 0x279   :  { %v9831_v17 = vpop.f32.mrf.mxu0  ;;  %6570 = vmatmul.mubr.msk.bf16.gmra.mxu0 %vm312_vm1, %v9330_v8  ;;  %v1899_v41 = vmax.f32 %v9822_v43, %v1898_v45  ;;  %v5272_v45 = vsel %vm312_vm1, %v9587_v39, 0 }
 0x27a   :  { %5308 = vmatpush1.bf16.xpose.msra.mxu0 %v5275_v58  ;;  %4225 = vmatprep.mubr.bf16.mxu0 %v12990_v40 }
 0x27b   :  { %1900 = vmax.xlane.f32.xlu1 %v1899_v41  ;;  %v9837_v30 = vpop.f32.mrf.mxu0  ;;  %5309 = vmatprep.subr.bf16.mxu0 %v12990_v40 }
 0x27c   :  { %v1902_v48 = vsel %vm1861_vm5, %v9837_v30, -inf }
 0x27d   :  { %v9842_v46 = vpop.f32.mrf.mxu0  ;;  %v1903_v2 = vmax.f32 %v9831_v17, %v1902_v48 }
 0x27f   :  { %1904 = vmax.xlane.f32.xlu0 %v1903_v2  ;;  %v9845_v63 = vpop.f32.mrf.mxu0 }
 0x280   :  { %v1906_v8 = vsel %vm1861_vm5, %v9845_v63, -inf }
 0x281   :  { %v9851_v58 = vpop.f32.mrf.mxu0  ;;  %6571 = vmatmul.mubr.msk.bf16.gmra.mxu0 %vm312_vm1, %v9352_v12  ;;  %v1907_v41 = vmax.f32 %v9842_v46, %v1906_v8  ;;  %v5269_v8 = vsel %vm312_vm1, %v9569_v10, 0 }
 0x282   :  { %5310 = vmatpush1.bf16.xpose.msra.mxu0 %v5272_v45  ;;  %4235 = vmatprep.mubr.bf16.mxu0 %v12990_v40 }
 0x283   :  { %1908 = vmax.xlane.f32.xlu1 %v1907_v41  ;;  %v9857_v48 = vpop.f32.mrf.mxu0  ;;  %5311 = vmatprep.subr.bf16.mxu0 %v12990_v40 }
 0x284   :  { %v1910_v2 = vsel %vm1861_vm5, %v9857_v48, -inf }
 0x285   :  { %v9862_v15 = vpop.f32.mrf.mxu0  ;;  %v1911_v39 = vmax.f32 %v9851_v58, %v1910_v2 }
 0x287   :  { %1912 = vmax.xlane.f32.xlu0 %v1911_v39  ;;  %v9865_v32 = vpop.f32.mrf.mxu0 }
 0x288   :  { %v1914_v12 = vsel %vm1861_vm5, %v9865_v32, -inf }
 0x289   :  { %v9871_v45 = vpop.f32.mrf.mxu0  ;;  %6572 = vmatmul.mubr.msk.bf16.gmra.mxu0 %vm312_vm1, %v9372_v22  ;;  %v1915_v41 = vmax.f32 %v9862_v15, %v1914_v12  ;;  %v5266_v12 = vsel %vm312_vm1, %v9551_v3, 0 }
 0x28a   :  { %5312 = vmatpush1.bf16.xpose.msra.mxu0 %v5269_v8  ;;  %4245 = vmatprep.mubr.bf16.mxu0 %v12990_v40 }
 0x28b   :  { %1916 = vmax.xlane.f32.xlu1 %v1915_v41  ;;  %v9877_v2 = vpop.f32.mrf.mxu0  ;;  %5313 = vmatprep.subr.bf16.mxu0 %v12990_v40 }
 0x28c   :  { %13018 = vst [vmem:[#allocation11_spill] sm:$0xff] %v9877_v2  ;;  %v1918_v39 = vsel %vm1861_vm5, %v9877_v2, -inf }
 0x28d   :  { %v9882_v44 = vpop.f32.mrf.mxu0  ;;  %v1919_v10 = vmax.f32 %v9871_v45, %v1918_v39 }
 0x28f   :  { %1920 = vmax.xlane.f32.xlu0 %v1919_v10  ;;  %v9885_v61 = vpop.f32.mrf.mxu0 }
 0x290   :  { %13019 = vst [vmem:[#allocation12_spill] sm:$0xff] %v9885_v61  ;;  %v1922_v22 = vsel %vm1861_vm5, %v9885_v61, -inf }
 0x291   :  { %v9891_v8 = vpop.f32.mrf.mxu0  ;;  %6573 = vmatmul.mubr.msk.bf16.gmra.mxu0 %vm312_vm1, %v9392_v21  ;;  %v1923_v41 = vmax.f32 %v9882_v44, %v1922_v22  ;;  %v5263_v22 = vsel %vm312_vm1, %v9533_v36, 0 }
 0x292   :  { %5314 = vmatpush1.bf16.xpose.msra.mxu0 %v5266_v12  ;;  %4255 = vmatprep.mubr.bf16.mxu0 %v12990_v40 }
 0x293   :  { %1924 = vmax.xlane.f32.xlu1 %v1923_v41  ;;  %v9897_v39 = vpop.f32.mrf.mxu0  ;;  %5315 = vmatprep.subr.bf16.mxu0 %v12990_v40 }
 0x294   :  { %13020 = vst [vmem:[#allocation13_spill] sm:$0xff] %v9897_v39  ;;  %v1926_v10 = vsel %vm1861_vm5, %v9897_v39, -inf  ;;  %v9916_v39 = vpop.permute.xlu0 %3486 }
 0x295   :  { %v9902_v61 = vpop.f32.mrf.mxu0  ;;  %v1927_v3 = vmax.f32 %v9891_v8, %v1926_v10  ;;  %13024 = vst [vmem:[#allocation17_spill] sm:$0xff] %v9916_v39 }
 0x296   :  { %13021 = vst [vmem:[#allocation14_spill] sm:$0xff] %v9902_v61 }
 0x297   :  { %1928 = vmax.xlane.f32.xlu0 %v1927_v3  ;;  %v9905_v2 = vpop.f32.mrf.mxu0 }
 0x298   :  { %13022 = vst [vmem:[#allocation15_spill] sm:$0xff] %v9905_v2  ;;  %v1930_v21 = vsel %vm1861_vm5, %v9905_v2, -inf }
 0x299   :  { %v9911_v12 = vpop.f32.mrf.mxu0  ;;  %6574 = vmatmul.mubr.msk.bf16.gmra.mxu0 %vm312_vm1, %v9412_v14  ;;  %v1931_v41 = vmax.f32 %v9902_v61, %v1930_v21  ;;  %v9927_v14 = vpop.permute.xlu0 %3490  ;;  %v13027_v21 = vpack.c.bf16 %v9719_v4, %v9712_v27 }
 0x29a   :  { %13023 = vst [vmem:[#allocation16_spill] sm:$0xff] %v9911_v12  ;;  %5316 = vmatpush1.bf16.xpose.msra.mxu0 %v5263_v22  ;;  %4265 = vmatprep.mubr.bf16.mxu0 %v12990_v40 }
 0x29b   :  { %1932 = vmax.xlane.f32.xlu1 %v1931_v41  ;;  %v9919_v10 = vpop.f32.mrf.mxu0  ;;  %5323 = vmatprep.subr.bf16.mxu0 %v12990_v40  ;;  %v9932_v22 = vrot.slane %v13027_v21, 6 }
 0x29c   :  { %13025 = vst [vmem:[#allocation18_spill] sm:$0xff] %v9919_v10  ;;  %v1934_v36 = vsel %vm1861_vm5, %v9919_v10, -inf }
 0x29d   :  { %v9924_v3 = vpop.f32.mrf.mxu0  ;;  %v1935_v2 = vmax.f32 %v9911_v12, %v1934_v36  ;;  %13028 = vst [vmem:[#allocation20_spill] sm:$0xff] %v9932_v22  ;;  %v5299_v36 = vsel %vm312_vm1, %v9932_v22, 0  ;;  %v9945_v27 = vpop.permute.xlu0 %3494 }
 0x29e   :  { %13026 = vst [vmem:[#allocation19_spill] sm:$0xff] %v9924_v3 }
 0x29f   :  { %1936 = vmax.xlane.f32.xlu0 %v1935_v2  ;;  %v9934_v41 = vpop.f32.mrf.mxu0  ;;  %v9951_v2 = vpop.permute.xlu1 %3470 }
 0x2a0   :  { %13029 = vst [vmem:[#allocation21_spill] sm:$0xff] %v9934_v41  ;;  %v1938_v39 = vsel %vm1861_vm5, %v9934_v41, -inf }
 0x2a1   :  { %v9938_v61 = vpop.f32.mrf.mxu0  ;;  %6575 = vmatmul.mubr.msk.bf16.gmra.mxu0 %vm312_vm1, %v9432_v23  ;;  %v1939_v10 = vmax.f32 %v9924_v3, %v1938_v39  ;;  %v9961_v39 = vsel %vm2357_vm4, %v9704_v42, %v9932_v22  ;;  %v9967_v3 = vpop.permute.xlu0 %4717 }
 0x2a2   :  { %13030 = vst [vmem:[#allocation22_spill] sm:$0xff] %v9938_v61  ;;  %5324 = vmatpush2.bf16.xpose.msra.mxu0 %v5299_v36  ;;  %4275 = vmatprep.mubr.bf16.mxu0 %v12990_v40  ;;  %13033 = vst [vmem:[#allocation25_spill] sm:$0xff] %v9961_v39 }
 0x2a3   :  { %1940 = vmax.xlane.f32.xlu1 %v1939_v10  ;;  %v9948_v4 = vpop.f32.mrf.mxu0  ;;  %5325 = vmatprep.subr.bf16.mxu0 %v12990_v40  ;;  %v9965_v36 = vpop.permute.xlu1 %3472  ;;  %13035 = vst [vmem:[#allocation27_spill] sm:$0xff] %v9967_v3 }
 0x2a4   :  { %13031 = vst [vmem:[#allocation23_spill] sm:$0xff] %v9948_v4  ;;  %v1942_v23 = vsel %vm1861_vm5, %v9948_v4, -inf }
 0x2a5   :  { %v9955_v21 = vpop.f32.mrf.mxu0  ;;  %v1943_v41 = vmax.f32 %v9938_v61, %v1942_v23  ;;  %v5296_v23 = vsel %vm312_vm1, %v9961_v39, 0 }
 0x2a6   :  { %13032 = vst [vmem:[#allocation24_spill] sm:$0xff] %v9955_v21 }
 0x2a7   :  { %1944 = vmax.xlane.f32.xlu0 %v1943_v41  ;;  %v9963_v10 = vpop.f32.mrf.mxu0  ;;  %v9984_v3 = vpop.permute.xlu1 %3474 }
 0x2a8   :  { %13034 = vst [vmem:[#allocation26_spill] sm:$0xff] %v9963_v10  ;;  %v1946_v12 = vsel %vm1861_vm5, %v9963_v10, -inf  ;;  %v9986_v10 = vpop.permute.xlu0 %4721 }
 0x2a9   :  { %v9971_v4 = vpop.f32.mrf.mxu0  ;;  %6576 = vmatmul.mubr.msk.bf16.gmra.mxu0 %vm312_vm1, %v9452_v6  ;;  %v1947_v42 = vmax.f32 %v9955_v21, %v1946_v12  ;;  %13038 = vst [vmem:[#allocation30_spill] sm:$0xff] %v9986_v10  ;;  %v5293_v10 = vsel %vm312_vm1, %v9716_v28, 0 }
 0x2aa   :  { %13036 = vst [vmem:[#allocation28_spill] sm:$0xff] %v9971_v4  ;;  %5326 = vmatpush2.bf16.xpose.msra.mxu0 %v5296_v23  ;;  %4285 = vmatprep.mubr.bf16.mxu0 %v12990_v40 }
 0x2ab   :  { %1948 = vmax.xlane.f32.xlu1 %v1947_v42  ;;  %v9979_v41 = vpop.f32.mrf.mxu0  ;;  %5327 = vmatprep.subr.bf16.mxu0 %v12990_v40  ;;  %v9993_v23 = vpop.permute.xlu1 %3476 }
 0x2ac   :  { %13037 = vst [vmem:[#allocation29_spill] sm:$0xff] %v9979_v41  ;;  %v1950_v22 = vsel %vm1861_vm5, %v9979_v41, -inf  ;;  %v9995_v42 = vpop.permute.xlu0 %4723 }
 0x2ad   :  { %v9988_v6 = vpop.f32.mrf.mxu0  ;;  %v1951_v39 = vmax.f32 %v9971_v4, %v1950_v22  ;;  %13041 = vst [vmem:[#allocation33_spill] sm:$0xff] %v9995_v42 }
 0x2ae   :  { %13039 = vst [vmem:[#allocation31_spill] sm:$0xff] %v9988_v6 }
 0x2af   :  { %1952 = vmax.xlane.f32.xlu0 %v1951_v39  ;;  %v9991_v12 = vpop.f32.mrf.mxu0 }
 0x2b0   :  { %13040 = vst [vmem:[#allocation32_spill] sm:$0xff] %v9991_v12  ;;  %v1954_v21 = vsel %vm1861_vm5, %v9991_v12, -inf  ;;  %v10014_v12 = vpop.permute.xlu1 %3478  ;;  %v10016_v28 = vpop.permute.xlu0 %4725 }
 0x2b1   :  { %v9999_v61 = vpop.f32.mrf.mxu0  ;;  %6577 = vmatmul.mubr.msk.bf16.gmra.mxu0 %vm312_vm1, %v9472_v57  ;;  %v1955_v22 = vmax.f32 %v9988_v6, %v1954_v21  ;;  %13044 = vst [vmem:[#allocation36_spill] sm:$0xff] %v10016_v28 }
 0x2b2   :  { %13042 = vst [vmem:[#allocation34_spill] sm:$0xff] %v9999_v61  ;;  %5328 = vmatpush2.bf16.xpose.msra.mxu0 %v5293_v10  ;;  %4295 = vmatprep.mubr.bf16.mxu0 %v12990_v40  ;;  %v1959_v42 = vsel %vm1958_vm3, %v9999_v61, -inf }
 0x2b3   :  { %1956 = vmax.xlane.f32.xlu1 %v1955_v22  ;;  %v10007_v39 = vpop.f32.mrf.mxu0  ;;  %5329 = vmatprep.subr.bf16.mxu0 %v12990_v40 }
 0x2b4   :  { %13043 = vst [vmem:[#allocation35_spill] sm:$0xff] %v10007_v39  ;;  %v1961_v57 = vsel %vm1960_vm6, %v10007_v39, -inf  ;;  %v10018_v41 = vpop.permute.xlu1 %3480  ;;  %v10020_v22 = vpop.permute.xlu0 %4727  ;;  %v5290_v39 = vsel %vm312_vm1, %v9692_v33, 0 }
 0x2b5   :  { %v1858_v21 = vpop.f32.mrf.mxu0  ;;  %v1962_v6 = vmax.f32 %v1959_v42, %v1961_v57  ;;  %13045 = vst [vmem:[#allocation37_spill] sm:$0xff] %v10020_v22 }
 0x2b7   :  { %1963 = vmax.xlane.f32.xlu0 %v1962_v6  ;;  %v1859_v10 = vpop.f32.mrf.mxu0 }
 0x2b8   :  { %v10034_v42 = vpop.permute.xlu1 %3482  ;;  %v10036_v57 = vpop.permute.xlu0 %4731 }
 0x2b9   :  { %v10022_v4 = vpop.f32.mrf.mxu0  ;;  %6578 = vmatmul.mubr.msk.bf16.gmra.mxu0 %vm312_vm1, %v9502_v20  ;;  %13048 = vst [vmem:[#allocation40_spill] sm:$0xff] %v10036_v57  ;;  %v5287_v57 = vsel %vm312_vm1, %v9677_v51, 0 }
 0x2ba   :  { %13046 = vst [vmem:[#allocation38_spill] sm:$0xff] %v10022_v4  ;;  %5330 = vmatpush2.bf16.xpose.msra.mxu0 %v5290_v39  ;;  %4305 = vmatprep.mubr.bf16.mxu0 %v12990_v40 }
 0x2bb   :  { %v10029_v28 = vpop.f32.mrf.mxu0  ;;  %5331 = vmatprep.subr.bf16.mxu0 %v12990_v40 }
 0x2bc   :  { %13047 = vst [vmem:[#allocation39_spill] sm:$0xff] %v10029_v28  ;;  %v3067_v6 = vsel %vm1861_vm5, %v10029_v28, -inf  ;;  %v10043_v39 = vpop.permute.xlu1 %3484  ;;  %v10045_v33 = vpop.permute.xlu0 %4735  ;;  %v13053_v28 = vrot.slane %v9488_v18, 4 }
 0x2bd   :  { %v10038_v21 = vpop.f32.mrf.mxu0  ;;  %v3068_v20 = vmax.f32 %v10022_v4, %v3067_v6  ;;  %13051 = vst [vmem:[#allocation43_spill] sm:$0xff] %v10045_v33 }
 0x2be   :  { %13049 = vst [vmem:[#allocation41_spill] sm:$0xff] %v10038_v21 }
 0x2bf   :  { %3069 = vmax.xlane.f32.xlu1 %v3068_v20  ;;  %v10041_v10 = vpop.f32.mrf.mxu0 }
 0x2c0   :  { %13050 = vst [vmem:[#allocation42_spill] sm:$0xff] %v10041_v10  ;;  %v3071_v22 = vsel %vm1861_vm5, %v10041_v10, -inf  ;;  %v10062_v10 = vpop.permute.xlu1 %3488  ;;  %v10064_v4 = vpop.permute.xlu0 %4739 }
 0x2c1   :  { %v10049_v61 = vpop.f32.mrf.mxu0  ;;  %6579 = vmatmul.mubr.msk.bf16.gmra.mxu0 %vm312_vm1, %v13053_v28  ;;  %v3072_v6 = vmax.f32 %v10038_v21, %v3071_v22  ;;  %13055 = vst [vmem:[#allocation46_spill] sm:$0xff] %v10062_v10  ;;  %13056 = vst [vmem:[#allocation47_spill] sm:$0xff] %v10064_v4 }
 0x2c2   :  { %13052 = vst [vmem:[#allocation44_spill] sm:$0xff] %v10049_v61  ;;  %5332 = vmatpush2.bf16.xpose.msra.mxu0 %v5287_v57  ;;  %5333 = vmatprep.mubr.bf16.mxu0 %v12990_v40 }
 0x2c3   :  { %3073 = vmax.xlane.f32.xlu1 %v3072_v6  ;;  %v10058_v20 = vpop.f32.mrf.mxu0 }
 0x2c4   :  { %13054 = vst [vmem:[#allocation45_spill] sm:$0xff] %v10058_v20  ;;  %v3075_v33 = vsel %vm1861_vm5, %v10058_v20, -inf  ;;  %v10071_v22 = vpop.permute.xlu1 %3492  ;;  %v10073_v57 = vpop.permute.xlu0 %5865 }
 0x2c5   :  { %v10066_v18 = vpop.f32.mrf.mxu0  ;;  %v3076_v28 = vmax.f32 %v10049_v61, %v3075_v33  ;;  %13059 = vst [vmem:[#allocation50_spill] sm:$0xff] %v10073_v57 }
 0x2c6   :  { %13057 = vst [vmem:[#allocation48_spill] sm:$0xff] %v10066_v18 }
 0x2c7   :  { %3077 = vmax.xlane.f32.xlu1 %v3076_v28  ;;  %v10069_v51 = vpop.f32.mrf.mxu0 }
 0x2c8   :  { %13058 = vst [vmem:[#allocation49_spill] sm:$0xff] %v10069_v51  ;;  %v3079_v6 = vsel %vm1861_vm5, %v10069_v51, -inf  ;;  %v10087_v20 = vpop.permute.xlu1 %4719  ;;  %v10089_v57 = vpop.permute.xlu0 %5869 }
 0x2c9   :  { %v10077_v21 = vpop.f32.mrf.mxu0  ;;  %6593 = vmatmul.mubr.msk.bf16.vlgmr.msra.gmra.mxu0 %vm312_vm1, %v9529_v9  ;;  %v3080_v4 = vmax.f32 %v10066_v18, %v3079_v6  ;;  %13061 = vst [vmem:[#allocation52_spill] sm:$0xff] %v10087_v20  ;;  %13062 = vst [vmem:[#allocation53_spill] sm:$0xff] %v10089_v57 }
 0x2ca   :  { %5343 = vmatprep.mubr.bf16.mxu0 %v12990_v40 }
 0x2cb   :  { %3081 = vmax.xlane.f32.xlu0 %v3080_v4  ;;  %v10083_v33 = vpop.f32.mrf.mxu0 }
 0x2cc   :  { %13060 = vst [vmem:[#allocation51_spill] sm:$0xff] %v10083_v33  ;;  %v3083_v28 = vsel %vm1861_vm5, %v10083_v33, -inf  ;;  %v10096_v6 = vpop.permute.xlu1 %4729  ;;  %v10098_v18 = vpop.permute.xlu0 %5871 }
 0x2cd   :  { %v10091_v51 = vpop.f32.mrf.mxu0  ;;  %v3084_v61 = vmax.f32 %v10077_v21, %v3083_v28  ;;  %13065 = vst [vmem:[#allocation56_spill] sm:$0xff] %v10096_v6  ;;  %13066 = vst [vmem:[#allocation57_spill] sm:$0xff] %v10098_v18 }
 0x2ce   :  { %13063 = vst [vmem:[#allocation54_spill] sm:$0xff] %v10091_v51 }
 0x2cf   :  { %3085 = vmax.xlane.f32.xlu1 %v3084_v61  ;;  %v10094_v9 = vpop.f32.mrf.mxu0 }
 0x2d0   :  { %13064 = vst [vmem:[#allocation55_spill] sm:$0xff] %v10094_v9  ;;  %v3087_v4 = vsel %vm1861_vm5, %v10094_v9, -inf  ;;  %v10112_v20 = vpop.permute.xlu1 %4733  ;;  %v10114_v18 = vpop.permute.xlu0 %5873 }
 0x2d1   :  { %v10102_v10 = vpop.f32.mrf.mxu0  ;;  %6594 = vmatmul.mubr.msk.bf16.gmra.mxu0 %vm312_vm1, %v9547_v60  ;;  %v3088_v57 = vmax.f32 %v10091_v51, %v3087_v4  ;;  %13068 = vst [vmem:[#allocation59_spill] sm:$0xff] %v10112_v20  ;;  %13069 = vst [vmem:[#allocation60_spill] sm:$0xff] %v10114_v18 }
 0x2d2   :  { %5353 = vmatprep.mubr.bf16.mxu0 %v12990_v40 }
 0x2d3   :  { %3089 = vmax.xlane.f32.xlu0 %v3088_v57  ;;  %v10108_v61 = vpop.f32.mrf.mxu0 }
 0x2d4   :  { %13067 = vst [vmem:[#allocation58_spill] sm:$0xff] %v10108_v61  ;;  %v3091_v28 = vsel %vm1861_vm5, %v10108_v61, -inf  ;;  %v10121_v4 = vpop.permute.xlu1 %4737  ;;  %v10123_v51 = vpop.permute.xlu0 %5875 }
 0x2d5   :  { %v10116_v6 = vpop.f32.mrf.mxu0  ;;  %v3092_v9 = vmax.f32 %v10102_v10, %v3091_v28  ;;  %13072 = vst [vmem:[#allocation63_spill] sm:$0xff] %v10121_v4  ;;  %13073 = vst [vmem:[#allocation64_spill] sm:$0xff] %v10123_v51 }
 0x2d6   :  { %13070 = vst [vmem:[#allocation61_spill] sm:$0xff] %v10116_v6 }
 0x2d7   :  { %3093 = vmax.xlane.f32.xlu1 %v3092_v9  ;;  %v10119_v60 = vpop.f32.mrf.mxu0 }
 0x2d8   :  { %13071 = vst [vmem:[#allocation62_spill] sm:$0xff] %v10119_v60  ;;  %v3095_v57 = vsel %vm1861_vm5, %v10119_v60, -inf  ;;  %v10137_v18 = vpop.permute.xlu1 %4741  ;;  %v10139_v51 = vpop.permute.xlu0 %5879 }
 0x2d9   :  { %v10127_v33 = vpop.f32.mrf.mxu0  ;;  %v3096_v20 = vmax.f32 %v10116_v6, %v3095_v57  ;;  %6595 = vmatmul.mubr.msk.bf16.gmra.mxu0 %vm312_vm1, %v9565_v11  ;;  %13076 = vst [vmem:[#allocation67_spill] sm:$0xff] %v10137_v18  ;;  %13077 = vst [vmem:[#allocation68_spill] sm:$0xff] %v10139_v51 }
 0x2da   :  { %13074 = vst [vmem:[#allocation65_spill] sm:$0xff] %v10127_v33  ;;  %5363 = vmatprep.mubr.bf16.mxu0 %v12990_v40 }
 0x2db   :  { %3097 = vmax.xlane.f32.xlu0 %v3096_v20  ;;  %v10133_v9 = vpop.f32.mrf.mxu0 }
 0x2dc   :  { %13075 = vst [vmem:[#allocation66_spill] sm:$0xff] %v10133_v9  ;;  %v3099_v28 = vsel %vm1861_vm5, %v10133_v9, -inf  ;;  %v10146_v11 = vpop.permute.xlu1 %5867 }
 0x2dd   :  { %v10141_v4 = vpop.f32.mrf.mxu0  ;;  %v3100_v60 = vmax.f32 %v10127_v33, %v3099_v28  ;;  %13080 = vst [vmem:[#allocation71_spill] sm:$0xff] %v10146_v11 }
 0x2de   :  { %13078 = vst [vmem:[#allocation69_spill] sm:$0xff] %v10141_v4 }
 0x2df   :  { %3101 = vmax.xlane.f32.xlu1 %v3100_v60  ;;  %v10144_v57 = vpop.f32.mrf.mxu0 }
 0x2e0   :  { %13079 = vst [vmem:[#allocation70_spill] sm:$0xff] %v10144_v57  ;;  %v1865_v6 = vpop.xlane.xlu0 %1864  ;;  %v3103_v20 = vsel %vm1861_vm5, %v10144_v57, -inf }
 0x2e1   :  { %v1965_v61 = vsub.f32 %v9723_v31, %v1865_v6  ;;  %v1966_v9 = vsub.f32 %v9732_v34, %v1865_v6  ;;  %v10152_v18 = vpop.f32.mrf.mxu0  ;;  %v3104_v51 = vmax.f32 %v10141_v4, %v3103_v20  ;;  %6596 = vmatmul.mubr.msk.bf16.gmra.mxu0 %vm312_vm1, %v9583_v19  ;;  %v10162_v31 = vpop.permute.xlu1 %5877 }
 0x2e2   :  { %5373 = vmatprep.mubr.bf16.mxu0 %v12990_v40  ;;  %13081 = vst [vmem:[#allocation72_spill] sm:$0xff] %v10162_v31 }
 0x2e3   :  { %v2015_v60 = vmul.f32 1.442695, %v1965_v61  ;;  %v2017_v28 = vmul.f32 1.442695, %v1966_v9  ;;  %3105 = vmax.xlane.f32.xlu0 %v3104_v51  ;;  %v10158_v11 = vpop.f32.mrf.mxu0 }
 0x2e4   :  { %v3107_v57 = vsel %vm1861_vm5, %v10158_v11, -inf  ;;  %v1869_v34 = vpop.xlane.xlu0 %1868 }
 0x2e5   :  { %7134 = vpow2.f32 %v2015_v60  ;;  %v1967_v6 = vsub.f32 %v9741_v29, %v1869_v34  ;;  %v1968_v20 = vsub.f32 %v9744_v50, %v1869_v34  ;;  %v10166_v4 = vpop.f32.mrf.mxu0  ;;  %v3108_v19 = vmax.f32 %v10152_v18, %v3107_v57 }
 0x2e6   :  { %7136 = vpow2.f32 %v2017_v28 }
 0x2e7   :  { %v2019_v61 = vmul.f32 1.442695, %v1967_v6  ;;  %v2021_v51 = vmul.f32 1.442695, %v1968_v20  ;;  %3109 = vmax.xlane.f32.xlu1 %v3108_v19  ;;  %v10169_v9 = vpop.f32.mrf.mxu0 }
 0x2e8   :  { %v1873_v33 = vpop.xlane.xlu1 %1872  ;;  %v3111_v31 = vsel %vm1861_vm5, %v10169_v9, -inf }
 0x2e9   :  { %7138 = vpow2.f32 %v2019_v61  ;;  %v1969_v60 = vsub.f32 %v9750_v24, %v1873_v33  ;;  %v1970_v29 = vsub.f32 %v9757_v25, %v1873_v33  ;;  %v10175_v50 = vpop.f32.mrf.mxu0  ;;  %v3112_v34 = vmax.f32 %v10166_v4, %v3111_v31  ;;  %6597 = vmatmul.mubr.msk.bf16.gmra.mxu0 %vm312_vm1, %v9601_v49 }
 0x2ea   :  { %7140 = vpow2.f32 %v2021_v51  ;;  %5383 = vmatprep.mubr.bf16.mxu0 %v12990_v40 }
 0x2eb   :  { %v2023_v57 = vmul.f32 1.442695, %v1969_v60  ;;  %v2025_v28 = vmul.f32 1.442695, %v1970_v29  ;;  %3113 = vmax.xlane.f32.xlu1 %v3112_v34  ;;  %v10181_v6 = vpop.f32.mrf.mxu0 }
 0x2ec   :  { %v3115_v24 = vsel %vm1861_vm5, %v10181_v6, -inf  ;;  %v1877_v20 = vpop.xlane.xlu1 %1876 }
 0x2ed   :  { %7142 = vpow2.f32 %v2023_v57  ;;  %v1971_v25 = vsub.f32 %v9762_v47, %v1877_v20  ;;  %v1972_v33 = vsub.f32 %v9765_v53, %v1877_v20  ;;  %v10187_v31 = vpop.f32.mrf.mxu0  ;;  %v3116_v49 = vmax.f32 %v10175_v50, %v3115_v24 }
 0x2ee   :  { %13082 = vst [vmem:[#allocation73_spill] sm:$0xff] %v10187_v31  ;;  %7144 = vpow2.f32 %v2025_v28 }
 0x2ef   :  { %v2027_v19 = vmul.f32 1.442695, %v1971_v25  ;;  %v2029_v61 = vmul.f32 1.442695, %v1972_v33  ;;  %3117 = vmax.xlane.f32.xlu1 %v3116_v49  ;;  %v10190_v51 = vpop.f32.mrf.mxu0 }
 0x2f0   :  { %13083 = vst [vmem:[#allocation74_spill] sm:$0xff] %v10190_v51  ;;  %v3119_v60 = vsel %vm1861_vm5, %v10190_v51, -inf  ;;  %v1881_v29 = vpop.xlane.xlu0 %1880 }
 0x2f1   :  { %7146 = vpow2.f32 %v2027_v19  ;;  %v1973_v34 = vsub.f32 %v9771_v54, %v1881_v29  ;;  %v1974_v47 = vsub.f32 %v9777_v52, %v1881_v29  ;;  %v10196_v53 = vpop.f32.mrf.mxu0  ;;  %v3120_v57 = vmax.f32 %v10187_v31, %v3119_v60  ;;  %6598 = vmatmul.mubr.msk.bf16.gmra.mxu0 %vm312_vm1, %v9619_v16 }
 0x2f2   :  { %v7135_v28 = vpop.eup %7134  ;;  %7148 = vpow2.f32 %v2029_v61  ;;  %5393 = vmatprep.mubr.bf16.mxu0 %v12990_v40 }
 0x2f3   :  { %v7137_v24 = vpop.eup %7136  ;;  %v2031_v20 = vmul.f32 1.442695, %v1973_v34  ;;  %v2033_v25 = vmul.f32 1.442695, %v1974_v47  ;;  %3121 = vmax.xlane.f32.xlu1 %v3120_v57  ;;  %v10202_v33 = vpop.f32.mrf.mxu0 }
 0x2f4   :  { %13084 = vst [vmem:[#allocation75_spill] sm:$0xff] %v10202_v33  ;;  %v3123_v54 = vsel %vm1861_vm5, %v10202_v33, -inf  ;;  %v1885_v52 = vpop.xlane.xlu1 %1884  ;;  %v2115_v49 = vsel %vm1861_vm5, %v7137_v24, 0.0 }
 0x2f5   :  { %7150 = vpow2.f32 %v2031_v20  ;;  %v1975_v19 = vsub.f32 %v9782_v13, %v1885_v52  ;;  %v1976_v16 = vsub.f32 %v9785_v1, %v1885_v52  ;;  %v10209_v61 = vpop.f32.mrf.mxu0  ;;  %v2116_v60 = vadd.f32 %v7135_v28, %v2115_v49 }
 0x2f6   :  { %v7139_v29 = vpop.eup %7138  ;;  %7152 = vpow2.f32 %v2033_v25  ;;  %v3124_v34 = vmax.f32 %v10196_v53, %v3123_v54 }
 0x2f7   :  { %v7141_v47 = vpop.eup %7140  ;;  %v2035_v57 = vmul.f32 1.442695, %v1975_v19  ;;  %v2037_v51 = vmul.f32 1.442695, %v1976_v16  ;;  %2117 = vadd.xlane.f32.xlu1 %v2116_v60  ;;  %v10212_v33 = vpop.f32.mrf.mxu0  ;;  %v2241_v31 = vpack.c.bf16 %v7139_v29, %v7135_v28 }
 0x2f8   :  { %3125 = vmax.xlane.f32.xlu0 %v3124_v34  ;;  %v3127_v13 = vsel %vm1861_vm5, %v10212_v33, -inf  ;;  %v1889_v20 = vpop.xlane.xlu0 %1888  ;;  %v2242_v1 = vpack.c.bf16 %v7141_v47, %v7137_v24  ;;  %v2119_v52 = vsel %vm1861_vm5, %v7141_v47, 0.0 }
 0x2f9   :  { %7154 = vpow2.f32 %v2035_v57  ;;  %v1977_v25 = vsub.f32 %v9791_v37, %v1889_v20  ;;  %v1978_v54 = vsub.f32 %v9797_v26, %v1889_v20  ;;  %v10219_v49 = vpop.f32.mrf.mxu0  ;;  %v2120_v19 = vadd.f32 %v7139_v29, %v2119_v52  ;;  %6599 = vmatmul.mubr.msk.bf16.gmra.mxu0 %vm312_vm1, %v9637_v5 }
 0x2fa   :  { %v7143_v28 = vpop.eup %7142  ;;  %7156 = vpow2.f32 %v2037_v51  ;;  %6528 = vmatprep.mubr.msk.bf16.mxu1 %vm1861_vm5, %v2242_v1  ;;  %v3128_v16 = vmax.f32 %v10209_v61, %v3127_v13  ;;  %5403 = vmatprep.mubr.bf16.mxu0 %v12990_v40 }
 0x2fb   :  { %v7145_v24 = vpop.eup %7144  ;;  %v2039_v60 = vmul.f32 1.442695, %v1977_v25  ;;  %v2041_v34 = vmul.f32 1.442695, %v1978_v54  ;;  %2394 = vmatmul.mubr.bf16.vlgmr.msra.gmra.mxu1 %v2241_v31  ;;  %v10226_v37 = vpop.f32.mrf.mxu0 }
 0x2fc   :  { %3551 = vmatpush1.bf16.msra.mxu1 %v10043_v39  ;;  %2121 = vadd.xlane.f32.xlu0 %v2120_v19  ;;  %v3131_v5 = vsel %vm1861_vm5, %v10226_v37, -inf  ;;  %v1893_v26 = vpop.xlane.xlu1 %1892  ;;  %v2123_v51 = vsel %vm1861_vm5, %v7145_v24, 0.0 }
 0x2fd   :  { %7158 = vpow2.f32 %v2039_v60  ;;  %3129 = vmax.xlane.f32.xlu1 %v3128_v16  ;;  %v1979_v29 = vsub.f32 %v9802_v62, %v1893_v26  ;;  %v1980_v47 = vsub.f32 %v9805_v7, %v1893_v26  ;;  %v10234_v57 = vpop.f32.mrf.mxu0  ;;  %3552 = vmatprep.subr.bf16.mxu1 %v12990_v40  ;;  %v2124_v31 = vadd.f32 %v7143_v28, %v2123_v51 }
 0x2fe   :  { %v7147_v13 = vpop.eup %7146  ;;  %7160 = vpow2.f32 %v2041_v34  ;;  %v3132_v39 = vmax.f32 %v10219_v49, %v3131_v5 }
 0x2ff   :  { %v7149_v20 = vpop.eup %7148  ;;  %v2043_v1 = vmul.f32 1.442695, %v1979_v29  ;;  %v2045_v52 = vmul.f32 1.442695, %v1980_v47  ;;  %v10238_v25 = vpop.f32.mrf.mxu0  ;;  %v2243_v54 = vpack.c.bf16 %v7147_v13, %v7143_v28 }
 0x300   :  { %3553 = vmatpush1.bf16.msra.mxu1 %v10034_v42  ;;  %3133 = vmax.xlane.f32.xlu0 %v3132_v39  ;;  %v3135_v62 = vsel %vm1861_vm5, %v10238_v25, -inf  ;;  %v1897_v7 = vpop.xlane.xlu0 %1896  ;;  %v2244_v19 = vpack.c.bf16 %v7149_v20, %v7145_v24  ;;  %v2127_v16 = vsel %vm1861_vm5, %v7149_v20, 0.0 }
 0x301   :  { %7162 = vpow2.f32 %v2043_v1  ;;  %2125 = vadd.xlane.f32.xlu1 %v2124_v31  ;;  %v1981_v60 = vsub.f32 %v9811_v35, %v1897_v7  ;;  %v1982_v34 = vsub.f32 %v9817_v0, %v1897_v7  ;;  %v10246_v5 = vpop.f32.mrf.mxu0  ;;  %3554 = vmatprep.subr.bf16.mxu1 %v12990_v40  ;;  %v2128_v28 = vadd.f32 %v7147_v13, %v2127_v16 }
 0x302   :  { %v7151_v42 = vpop.eup %7150  ;;  %7164 = vpow2.f32 %v2045_v52  ;;  %6529 = vmatprep.mubr.msk.bf16.mxu1 %vm1861_vm5, %v2244_v19  ;;  %v3136_v26 = vmax.f32 %v10234_v57, %v3135_v62  ;;  %6600 = vmatmul.mubr.msk.bf16.gmra.mxu0 %vm312_vm1, %v9655_v38 }
 0x303   :  { %v7153_v24 = vpop.eup %7152  ;;  %v2047_v51 = vmul.f32 1.442695, %v1981_v60  ;;  %v2049_v29 = vmul.f32 1.442695, %v1982_v34  ;;  %2402 = vmatmul.mubr.bf16.gmra.mxu1 %v2243_v54  ;;  %v10253_v35 = vpop.f32.mrf.mxu0  ;;  %5413 = vmatprep.mubr.bf16.mxu0 %v12990_v40 }
 0x304   :  { %3555 = vmatpush1.bf16.msra.mxu1 %v10018_v41  ;;  %2129 = vadd.xlane.f32.xlu0 %v2128_v28  ;;  %v3139_v0 = vsel %vm1861_vm5, %v10253_v35, -inf  ;;  %v1901_v47 = vpop.xlane.xlu1 %1900  ;;  %v2131_v31 = vsel %vm1861_vm5, %v7153_v24, 0.0 }
 0x305   :  { %7166 = vpow2.f32 %v2047_v51  ;;  %3137 = vmax.xlane.f32.xlu1 %v3136_v26  ;;  %v1983_v38 = vsub.f32 %v9822_v43, %v1901_v47  ;;  %v1984_v13 = vsub.f32 %v9825_v56, %v1901_v47  ;;  %v10262_v39 = vpop.f32.mrf.mxu0  ;;  %3556 = vmatprep.subr.bf16.mxu1 %v12990_v40  ;;  %v2132_v20 = vadd.f32 %v7151_v42, %v2131_v31 }
 0x306   :  { %v7155_v1 = vpop.eup %7154  ;;  %7168 = vpow2.f32 %v2049_v29  ;;  %v3140_v41 = vmax.f32 %v10246_v5, %v3139_v0 }
 0x307   :  { %v7157_v52 = vpop.eup %7156  ;;  %v2051_v54 = vmul.f32 1.442695, %v1983_v38  ;;  %v2053_v62 = vmul.f32 1.442695, %v1984_v13  ;;  %v10266_v7 = vpop.f32.mrf.mxu0  ;;  %v2245_v19 = vpack.c.bf16 %v7155_v1, %v7151_v42 }
 0x308   :  { %3557 = vmatpush1.bf16.msra.mxu1 %v10014_v12  ;;  %3141 = vmax.xlane.f32.xlu0 %v3140_v41  ;;  %v3143_v43 = vsel %vm1861_vm5, %v10266_v7, -inf  ;;  %v1905_v56 = vpop.xlane.xlu0 %1904  ;;  %v2246_v16 = vpack.c.bf16 %v7157_v52, %v7153_v24  ;;  %v2135_v60 = vsel %vm1861_vm5, %v7157_v52, 0.0 }
 0x309   :  { %7170 = vpow2.f32 %v2051_v54  ;;  %2133 = vadd.xlane.f32.xlu1 %v2132_v20  ;;  %v1985_v34 = vsub.f32 %v9831_v17, %v1905_v56  ;;  %v1986_v28 = vsub.f32 %v9837_v30, %v1905_v56  ;;  %v10274_v26 = vpop.f32.mrf.mxu0  ;;  %3558 = vmatprep.subr.bf16.mxu1 %v12990_v40  ;;  %v2136_v42 = vadd.f32 %v7155_v1, %v2135_v60 }
 0x30a   :  { %v7159_v12 = vpop.eup %7158  ;;  %7172 = vpow2.f32 %v2053_v62  ;;  %6530 = vmatprep.mubr.msk.bf16.mxu1 %vm1861_vm5, %v2246_v16  ;;  %v3144_v51 = vmax.f32 %v10262_v39, %v3143_v43  ;;  %6601 = vmatmul.mubr.msk.bf16.gmra.mxu0 %vm312_vm1, %v9673_v59 }
 0x30b   :  { %v7161_v24 = vpop.eup %7160  ;;  %v2055_v29 = vmul.f32 1.442695, %v1985_v34  ;;  %2410 = vmatmul.mubr.bf16.gmra.mxu1 %v2245_v19  ;;  %v10281_v17 = vpop.f32.mrf.mxu0  ;;  %5423 = vmatprep.mubr.bf16.mxu0 %v12990_v40  ;;  %v2057_v30 = vmul.f32 1.442695, %v1986_v28 }
 0x30c   :  { %3559 = vmatpush1.bf16.msra.mxu1 %v9993_v23  ;;  %2137 = vadd.xlane.f32.xlu0 %v2136_v42  ;;  %v3147_v0 = vsel %vm1861_vm5, %v10281_v17, -inf  ;;  %v1909_v47 = vpop.xlane.xlu1 %1908  ;;  %v2139_v31 = vsel %vm1861_vm5, %v7161_v24, 0.0 }
 0x30d   :  { %3145 = vmax.xlane.f32.xlu1 %v3144_v51  ;;  %v1987_v59 = vsub.f32 %v9842_v46, %v1909_v47  ;;  %v1988_v38 = vsub.f32 %v9845_v63, %v1909_v47  ;;  %v10290_v13 = vpop.f32.mrf.mxu0  ;;  %3560 = vmatprep.subr.bf16.mxu1 %v12990_v40  ;;  %v2140_v20 = vadd.f32 %v7159_v12, %v2139_v31  ;;  %7174 = vpow2.f32 %v2055_v29 }
 0x30e   :  { %v7163_v1 = vpop.eup %7162  ;;  %v3148_v23 = vmax.f32 %v10274_v26, %v3147_v0  ;;  %7176 = vpow2.f32 %v2057_v30 }
 0x30f   :  { %v7165_v41 = vpop.eup %7164  ;;  %v2059_v52 = vmul.f32 1.442695, %v1987_v59  ;;  %v2061_v54 = vmul.f32 1.442695, %v1988_v38  ;;  %v10294_v62 = vpop.f32.mrf.mxu0  ;;  %v2247_v19 = vpack.c.bf16 %v7163_v1, %v7159_v12 }
 0x310   :  { %3561 = vmatpush1.bf16.msra.mxu1 %v9984_v3  ;;  %3149 = vmax.xlane.f32.xlu0 %v3148_v23  ;;  %v3151_v63 = vsel %vm1861_vm5, %v10294_v62, -inf  ;;  %v1913_v46 = vpop.xlane.xlu0 %1912  ;;  %v2248_v43 = vpack.c.bf16 %v7165_v41, %v7161_v24  ;;  %v2143_v56 = vsel %vm1861_vm5, %v7165_v41, 0.0 }
 0x311   :  { %7178 = vpow2.f32 %v2059_v52  ;;  %2141 = vadd.xlane.f32.xlu1 %v2140_v20  ;;  %v1989_v16 = vsub.f32 %v9851_v58, %v1913_v46  ;;  %v1990_v60 = vsub.f32 %v9857_v48, %v1913_v46  ;;  %v10302_v34 = vpop.f32.mrf.mxu0  ;;  %3562 = vmatprep.subr.bf16.mxu1 %v12990_v40  ;;  %v2144_v28 = vadd.f32 %v7163_v1, %v2143_v56 }
 0x312   :  { %v7167_v3 = vpop.eup %7166  ;;  %7180 = vpow2.f32 %v2061_v54  ;;  %6531 = vmatprep.mubr.msk.bf16.mxu1 %vm1861_vm5, %v2248_v43  ;;  %v3152_v42 = vmax.f32 %v10290_v13, %v3151_v63  ;;  %6602 = vmatmul.mubr.msk.bf16.gmra.mxu0 %vm312_vm1, %v9689_v55  ;;  %v13085_v54 = vld [vmem:[#allocation11_spill] sm:$0xff] }
 0x313   :  { %v7169_v12 = vpop.eup %7168  ;;  %v2063_v51 = vmul.f32 1.442695, %v1989_v16  ;;  %2418 = vmatmul.mubr.bf16.gmra.mxu1 %v2247_v19  ;;  %v10309_v58 = vpop.f32.mrf.mxu0  ;;  %5433 = vmatprep.mubr.bf16.mxu0 %v12990_v40  ;;  %v2065_v48 = vmul.f32 1.442695, %v1990_v60  ;;  %v13086_v43 = vld [vmem:[#allocation7_spill] sm:$0xff] }
 0x314   :  { %3563 = vmatpush1.bf16.msra.mxu1 %v9965_v36  ;;  %2145 = vadd.xlane.f32.xlu0 %v2144_v28  ;;  %v1917_v24 = vpop.xlane.xlu1 %1916  ;;  %v2147_v29 = vsel %vm1861_vm5, %v7169_v12, 0.0  ;;  %v3155_v23 = vsel %vm1861_vm5, %v10309_v58, -inf }
 0x315   :  { %3153 = vmax.xlane.f32.xlu1 %v3152_v42  ;;  %v1991_v30 = vsub.f32 %v9862_v15, %v1917_v24  ;;  %v1992_v0 = vsub.f32 %v9865_v32, %v1917_v24  ;;  %v10316_v55 = vpop.f32.mrf.mxu0  ;;  %3564 = vmatprep.subr.bf16.mxu1 %v12990_v40  ;;  %v2148_v31 = vadd.f32 %v7167_v3, %v2147_v29  ;;  %7182 = vpow2.f32 %v2063_v51  ;;  %v13087_v51 = vld [vmem:[#allocation12_spill] sm:$0xff] }
 0x316   :  { %v7171_v47 = vpop.eup %7170  ;;  %7184 = vpow2.f32 %v2065_v48  ;;  %v3156_v56 = vmax.f32 %v10302_v34, %v3155_v23 }
 0x317   :  { %v7173_v59 = vpop.eup %7172  ;;  %v2067_v38 = vmul.f32 1.442695, %v1991_v30  ;;  %v2069_v20 = vmul.f32 1.442695, %v1992_v0  ;;  %v10319_v36 = vpop.f32.mrf.mxu0  ;;  %v2249_v1 = vpack.c.bf16 %v7171_v47, %v7167_v3 }
 0x318   :  { %3565 = vmatpush1.bf16.msra.mxu1 %v9951_v2  ;;  %v1921_v32 = vpop.xlane.xlu0 %1920  ;;  %v2250_v15 = vpack.c.bf16 %v7173_v59, %v7169_v12  ;;  %v2151_v41 = vsel %vm1861_vm5, %v7173_v59, 0.0  ;;  %v3548_v2 = vsel %vm2357_vm4, %v9945_v27, 0 }
 0x319   :  { %7186 = vpow2.f32 %v2067_v38  ;;  %2149 = vadd.xlane.f32.xlu1 %v2148_v31  ;;  %v1993_v52 = vsub.f32 %v9871_v45, %v1921_v32  ;;  %v1994_v19 = vsub.f32 %v13085_v54, %v1921_v32  ;;  %v10327_v63 = vpop.f32.mrf.mxu0  ;;  %3572 = vmatprep.subr.bf16.mxu1 %v12990_v40  ;;  %v2152_v46 = vadd.f32 %v7171_v47, %v2151_v41 }
 0x31a   :  { %7188 = vpow2.f32 %v2069_v20  ;;  %6532 = vmatprep.mubr.msk.bf16.mxu1 %vm1861_vm5, %v2250_v15  ;;  %6603 = vmatmul.mubr.msk.bf16.gmra.mxu0 %vm312_vm1, %v13086_v43  ;;  %v3159_v45 = vsel %vm1861_vm5, %v10319_v36, -inf  ;;  %v7175_v28 = vpop.eup %7174  ;;  %v13088_v15 = vld [vmem:[#allocation13_spill] sm:$0xff] }
 0x31b   :  { %v2071_v16 = vmul.f32 1.442695, %v1993_v52  ;;  %2426 = vmatmul.mubr.bf16.gmra.mxu1 %v2249_v1  ;;  %v10338_v60 = vpop.f32.mrf.mxu0  ;;  %5443 = vmatprep.mubr.bf16.mxu0 %v12990_v40  ;;  %v2073_v3 = vmul.f32 1.442695, %v1994_v19  ;;  %v7177_v12 = vpop.eup %7176  ;;  %v3160_v30 = vmax.f32 %v10316_v55, %v3159_v45 }
 0x31c   :  { %3573 = vmatpush2.bf16.msra.mxu1 %v3548_v2  ;;  %2153 = vadd.xlane.f32.xlu0 %v2152_v46  ;;  %v1925_v42 = vpop.xlane.xlu1 %1924  ;;  %v2155_v23 = vsel %vm1861_vm5, %v7177_v12, 0.0  ;;  %v3164_v2 = vsel %vm1960_vm6, %v10338_v60, -inf }
 0x31d   :  { %3157 = vmax.xlane.f32.xlu1 %v3156_v56  ;;  %v1995_v27 = vsub.f32 %v9882_v44, %v1925_v42  ;;  %v1996_v48 = vsub.f32 %v13087_v51, %v1925_v42  ;;  %v3064_v24 = vpop.f32.mrf.mxu0  ;;  %3574 = vmatprep.subr.bf16.mxu1 %v12990_v40  ;;  %7190 = vpow2.f32 %v2071_v16  ;;  %v2156_v46 = vadd.f32 %v7175_v28, %v2155_v23  ;;  %v13090_v42 = vld [vmem:[#allocation14_spill] sm:$0xff] }
 0x31e   :  { %v7179_v29 = vpop.eup %7178  ;;  %7192 = vpow2.f32 %v2073_v3 }
 0x31f   :  { %v7181_v0 = vpop.eup %7180  ;;  %v2075_v47 = vmul.f32 1.442695, %v1995_v27  ;;  %v2077_v31 = vmul.f32 1.442695, %v1996_v48  ;;  %v3065_v59 = vpop.f32.mrf.mxu0  ;;  %v2251_v38 = vpack.c.bf16 %v7179_v29, %v7175_v28  ;;  %v13091_v28 = vld [vmem:[#allocation15_spill] sm:$0xff] }
 0x320   :  { %3575 = vmatpush2.bf16.msra.mxu1 %v10071_v22  ;;  %v1929_v20 = vpop.xlane.xlu0 %1928  ;;  %v2252_v1 = vpack.c.bf16 %v7181_v0, %v7177_v12  ;;  %v2159_v44 = vsel %vm1861_vm5, %v7181_v0, 0.0  ;;  %v13089_v22 = vld [vmem:[#allocation10_spill] sm:$0xff] }
 0x321   :  { %7194 = vpow2.f32 %v2075_v47  ;;  %3161 = vmax.xlane.f32.xlu1 %v3160_v30  ;;  %v1997_v32 = vsub.f32 %v9891_v8, %v1929_v20  ;;  %v1998_v41 = vsub.f32 %v13088_v15, %v1929_v20  ;;  %3576 = vmatprep.subr.bf16.mxu1 %v12990_v40  ;;  %v10351_v52 = vpop.f32.mrf.mxu0  ;;  %v2160_v54 = vadd.f32 %v7179_v29, %v2159_v44 }
 0x322   :  { %7196 = vpow2.f32 %v2077_v31  ;;  %6533 = vmatprep.mubr.msk.bf16.mxu1 %vm1861_vm5, %v2252_v1  ;;  %6604 = vmatmul.mubr.msk.bf16.gmra.mxu0 %vm312_vm1, %v13089_v22  ;;  %v7183_v8 = vpop.eup %7182 }
 0x323   :  { %v2081_v19 = vmul.f32 1.442695, %v1998_v41  ;;  %2434 = vmatmul.mubr.bf16.gmra.mxu1 %v2251_v38  ;;  %2161 = vadd.xlane.f32.xlu0 %v2160_v54  ;;  %v10356_v43 = vpop.f32.mrf.mxu0  ;;  %v2079_v56 = vmul.f32 1.442695, %v1997_v32  ;;  %v7185_v3 = vpop.eup %7184  ;;  %v13092_v38 = vld [vmem:[#allocation46_spill] sm:$0xff]  ;;  %v13093_v32 = vld [vmem:[#allocation16_spill] sm:$0xff] }
 0x324   :  { %3577 = vmatpush2.bf16.msra.mxu1 %v9927_v14  ;;  %v4314_v45 = vsel %vm1861_vm5, %v10356_v43, -inf  ;;  %v1933_v16 = vpop.xlane.xlu1 %1932  ;;  %5453 = vmatprep.mubr.bf16.mxu0 %v12990_v40  ;;  %v3163_v14 = vsel %vm1958_vm3, %v10327_v63, -inf  ;;  %v2163_v44 = vsel %vm1861_vm5, %v7185_v3, 0.0  ;;  %v13094_v41 = vld [vmem:[#allocation18_spill] sm:$0xff] }
 0x325   :  { %2157 = vadd.xlane.f32.xlu1 %v2156_v46  ;;  %v1999_v12 = vsub.f32 %v13090_v42, %v1933_v16  ;;  %v2000_v27 = vsub.f32 %v13091_v28, %v1933_v16  ;;  %3578 = vmatprep.subr.bf16.mxu1 %v12990_v40  ;;  %v10367_v51 = vpop.f32.mrf.mxu0  ;;  %v4315_v48 = vmax.f32 %v10351_v52, %v4314_v45  ;;  %7198 = vpow2.f32 %v2081_v19  ;;  %v13096_v46 = vld [vmem:[#allocation9_spill] sm:$0xff] }
 0x326   :  { %v7187_v24 = vpop.eup %7186  ;;  %v3165_v30 = vmax.f32 %v3163_v14, %v3164_v2  ;;  %7200 = vpow2.f32 %v2079_v56  ;;  %v2164_v56 = vadd.f32 %v7183_v8, %v2163_v44  ;;  %v13100_v14 = vld [vmem:[#allocation21_spill] sm:$0xff] }
 0x327   :  { %v7189_v29 = vpop.eup %7188  ;;  %v2083_v0 = vmul.f32 1.442695, %v1999_v12  ;;  %v2085_v47 = vmul.f32 1.442695, %v2000_v27  ;;  %4316 = vmax.xlane.f32.xlu0 %v4315_v48  ;;  %v10372_v31 = vpop.f32.mrf.mxu0  ;;  %v2253_v59 = vpack.c.bf16 %v7187_v24, %v7183_v8  ;;  %v13098_v12 = vld [vmem:[#allocation17_spill] sm:$0xff]  ;;  %v13099_v48 = vld [vmem:[#allocation19_spill] sm:$0xff] }
 0x328   :  { %3579 = vmatpush2.bf16.msra.mxu1 %v13092_v38  ;;  %v1937_v20 = vpop.xlane.xlu0 %1936  ;;  %v2254_v1 = vpack.c.bf16 %v7189_v29, %v7185_v3  ;;  %v2167_v23 = vsel %vm1861_vm5, %v7189_v29, 0.0  ;;  %v4318_v3 = vsel %vm1861_vm5, %v10372_v31, -inf }
 0x329   :  { %7202 = vpow2.f32 %v2083_v0  ;;  %3166 = vmax.xlane.f32.xlu1 %v3165_v30  ;;  %v2001_v15 = vsub.f32 %v13093_v32, %v1937_v20  ;;  %v2002_v54 = vsub.f32 %v13094_v41, %v1937_v20  ;;  %3580 = vmatprep.subr.bf16.mxu1 %v12990_v40  ;;  %v10380_v22 = vpop.f32.mrf.mxu0  ;;  %v2168_v19 = vadd.f32 %v7187_v24, %v2167_v23  ;;  %v13101_v41 = vld [vmem:[#allocation22_spill] sm:$0xff] }
 0x32a   :  { %13095 = vst [vmem:[#allocation11_spill] sm:$0xff] %v10380_v22  ;;  %7204 = vpow2.f32 %v2085_v47  ;;  %6534 = vmatprep.mubr.msk.bf16.mxu1 %vm1861_vm5, %v2254_v1  ;;  %6605 = vmatmul.mubr.msk.bf16.gmra.mxu0 %vm312_vm1, %v13096_v46  ;;  %v7191_v16 = vpop.eup %7190  ;;  %v4319_v47 = vmax.f32 %v10367_v51, %v4318_v3 }
 0x32b   :  { %v2089_v2 = vmul.f32 1.442695, %v2002_v54  ;;  %2442 = vmatmul.mubr.bf16.gmra.mxu1 %v2253_v59  ;;  %v10385_v45 = vpop.f32.mrf.mxu0  ;;  %v2087_v42 = vmul.f32 1.442695, %v2001_v15  ;;  %2169 = vadd.xlane.f32.xlu0 %v2168_v19  ;;  %v7193_v27 = vpop.eup %7192  ;;  %v13102_v19 = vld [vmem:[#allocation23_spill] sm:$0xff] }
 0x32c   :  { %13097 = vst [vmem:[#allocation7_spill] sm:$0xff] %v10385_v45  ;;  %3581 = vmatpush2.bf16.msra.mxu1 %v13098_v12  ;;  %v1941_v28 = vpop.xlane.xlu1 %1940  ;;  %v2171_v15 = vsel %vm1861_vm5, %v7193_v27, 0.0 }
 0x32d   :  { %2165 = vadd.xlane.f32.xlu1 %v2164_v56  ;;  %v2003_v24 = vsub.f32 %v13099_v48, %v1941_v28  ;;  %v2004_v29 = vsub.f32 %v13100_v14, %v1941_v28  ;;  %v10392_v30 = vpop.f32.mrf.mxu0  ;;  %4797 = vmatprep.subr.bf16.mxu1 %v12990_v40  ;;  %7206 = vpow2.f32 %v2089_v2 }
 0x32e   :  { %v7195_v8 = vpop.eup %7194  ;;  %7208 = vpow2.f32 %v2087_v42  ;;  %v4322_v42 = vsel %vm1861_vm5, %v10385_v45, -inf }
 0x32f   :  { %v7197_v0 = vpop.eup %7196  ;;  %v2091_v59 = vmul.f32 1.442695, %v2003_v24  ;;  %v2093_v38 = vmul.f32 1.442695, %v2004_v29  ;;  %v10396_v20 = vpop.f32.mrf.mxu0  ;;  %v2255_v1 = vpack.c.bf16 %v7195_v8, %v7191_v16 }
 0x330   :  { %v1945_v44 = vpop.xlane.xlu0 %1944  ;;  %v2256_v23 = vpack.c.bf16 %v7197_v0, %v7193_v27  ;;  %v2175_v32 = vsel %vm1861_vm5, %v7197_v0, 0.0  ;;  %v4326_v12 = vsel %vm1861_vm5, %v10396_v20, -inf  ;;  %v2172_v27 = vadd.f32 %v7191_v16, %v2171_v15  ;;  %v13105_v0 = vld [vmem:[#allocation24_spill] sm:$0xff] }
 0x331   :  { %7210 = vpow2.f32 %v2091_v59  ;;  %4320 = vmax.xlane.f32.xlu1 %v4319_v47  ;;  %v2005_v54 = vsub.f32 %v13101_v41, %v1945_v44  ;;  %v2006_v46 = vsub.f32 %v13102_v19, %v1945_v44  ;;  %v10402_v2 = vpop.f32.mrf.mxu0  ;;  %v2176_v56 = vadd.f32 %v7195_v8, %v2175_v32  ;;  %v13106_v8 = vld [vmem:[#allocation26_spill] sm:$0xff] }
 0x332   :  { %13103 = vst [vmem:[#allocation12_spill] sm:$0xff] %v10402_v2  ;;  %7212 = vpow2.f32 %v2093_v38  ;;  %6535 = vmatprep.mubr.msk.bf16.mxu1 %vm1861_vm5, %v2256_v23  ;;  %v7199_v3 = vpop.eup %7198  ;;  %v4323_v23 = vmax.f32 %v10380_v22, %v4322_v42  ;;  %v4327_v32 = vmax.f32 %v10392_v30, %v4326_v12  ;;  %v13109_v42 = vld [vmem:[#allocation28_spill] sm:$0xff] }
 0x333   :  { %v2095_v28 = vmul.f32 1.442695, %v2005_v54  ;;  %2450 = vmatmul.mubr.bf16.gmra.mxu1 %v2255_v1  ;;  %v10409_v48 = vpop.f32.mrf.mxu0  ;;  %v2097_v24 = vmul.f32 1.442695, %v2006_v46  ;;  %2177 = vadd.xlane.f32.xlu0 %v2176_v56  ;;  %v7201_v29 = vpop.eup %7200  ;;  %v2179_v16 = vsel %vm1861_vm5, %v7199_v3, 0.0 }
 0x334   :  { %13104 = vst [vmem:[#allocation13_spill] sm:$0xff] %v10409_v48  ;;  %v1949_v14 = vpop.xlane.xlu1 %1948  ;;  %v4330_v46 = vsel %vm1861_vm5, %v10409_v48, -inf }
 0x335   :  { %2173 = vadd.xlane.f32.xlu1 %v2172_v27  ;;  %v2007_v47 = vsub.f32 %v13105_v0, %v1949_v14  ;;  %v2008_v59 = vsub.f32 %v13106_v8, %v1949_v14  ;;  %v10413_v38 = vpop.f32.mrf.mxu0  ;;  %7214 = vpow2.f32 %v2095_v28  ;;  %v13110_v14 = vld [vmem:[#allocation29_spill] sm:$0xff]  ;;  %v2180_v28 = vadd.f32 %v7201_v29, %v2179_v16 }
 0x336   :  { %13107 = vst [vmem:[#allocation10_spill] sm:$0xff] %v10413_v38  ;;  %v7203_v44 = vpop.eup %7202  ;;  %7216 = vpow2.f32 %v2097_v24  ;;  %v4331_v24 = vmax.f32 %v10402_v2, %v4330_v46 }
 0x337   :  { %v7205_v1 = vpop.eup %7204  ;;  %v2099_v15 = vmul.f32 1.442695, %v2007_v47  ;;  %v2101_v41 = vmul.f32 1.442695, %v2008_v59  ;;  %v10418_v54 = vpop.f32.mrf.mxu0  ;;  %v2257_v19 = vpack.c.bf16 %v7203_v44, %v7201_v29  ;;  %4328 = vmax.xlane.f32.xlu0 %v4327_v32  ;;  %v13114_v29 = vld [vmem:[#allocation32_spill] sm:$0xff] }
 0x338   :  { %13108 = vst [vmem:[#allocation14_spill] sm:$0xff] %v10418_v54  ;;  %v1953_v56 = vpop.xlane.xlu0 %1952  ;;  %v2258_v27 = vpack.c.bf16 %v7205_v1, %v7199_v3  ;;  %v4334_v59 = vsel %vm1861_vm5, %v10418_v54, -inf }
 0x339   :  { %7218 = vpow2.f32 %v2099_v15  ;;  %4324 = vmax.xlane.f32.xlu1 %v4323_v23  ;;  %v2009_v12 = vsub.f32 %v13109_v42, %v1953_v56  ;;  %v2010_v0 = vsub.f32 %v13110_v14, %v1953_v56  ;;  %v10424_v8 = vpop.f32.mrf.mxu0  ;;  %v2183_v23 = vsel %vm1861_vm5, %v7205_v1, 0.0 }
 0x33a   :  { %13111 = vst [vmem:[#allocation15_spill] sm:$0xff] %v10424_v8  ;;  %7220 = vpow2.f32 %v2101_v41  ;;  %6536 = vmatprep.mubr.msk.bf16.mxu1 %vm1861_vm5, %v2258_v27  ;;  %v7207_v47 = vpop.eup %7206  ;;  %v13113_v41 = vld [vmem:[#allocation31_spill] sm:$0xff]  ;;  %v4335_v54 = vmax.f32 %v10413_v38, %v4334_v59  ;;  %v13117_v59 = vld [vmem:[#allocation34_spill] sm:$0xff] }
 0x33b   :  { %v2103_v32 = vmul.f32 1.442695, %v2009_v12  ;;  %2458 = vmatmul.mubr.bf16.gmra.mxu1 %v2257_v19  ;;  %v10430_v3 = vpop.f32.mrf.mxu0  ;;  %v2105_v15 = vmul.f32 1.442695, %v2010_v0  ;;  %2181 = vadd.xlane.f32.xlu0 %v2180_v28  ;;  %v7209_v42 = vpop.eup %7208  ;;  %v2184_v12 = vadd.f32 %v7203_v44, %v2183_v23  ;;  %v2187_v19 = vsel %vm1861_vm5, %v7207_v47, 0.0  ;;  %v13118_v23 = vld [vmem:[#allocation35_spill] sm:$0xff] }
 0x33c   :  { %13112 = vst [vmem:[#allocation46_spill] sm:$0xff] %v10430_v3  ;;  %v1957_v56 = vpop.xlane.xlu1 %1956 }
 0x33d   :  { %4332 = vmax.xlane.f32.xlu1 %v4331_v24  ;;  %v2011_v27 = vsub.f32 %v13113_v41, %v1957_v56  ;;  %v2012_v16 = vsub.f32 %v13114_v29, %v1957_v56  ;;  %v10435_v14 = vpop.f32.mrf.mxu0  ;;  %7222 = vpow2.f32 %v2103_v32  ;;  %v4338_v24 = vsel %vm1861_vm5, %v10430_v3, -inf }
 0x33e   :  { %13115 = vst [vmem:[#allocation16_spill] sm:$0xff] %v10435_v14  ;;  %v7211_v46 = vpop.eup %7210  ;;  %7224 = vpow2.f32 %v2105_v15  ;;  %v2188_v32 = vadd.f32 %v7209_v42, %v2187_v19  ;;  %v4339_v15 = vmax.f32 %v10424_v8, %v4338_v24 }
 0x33f   :  { %v7213_v48 = vpop.eup %7212  ;;  %v2107_v1 = vmul.f32 1.442695, %v2011_v27  ;;  %v2109_v0 = vmul.f32 1.442695, %v2012_v16  ;;  %v10439_v28 = vpop.f32.mrf.mxu0  ;;  %v2259_v2 = vpack.c.bf16 %v7211_v46, %v7209_v42  ;;  %4336 = vmax.xlane.f32.xlu0 %v4335_v54 }
 0x340   :  { %13116 = vst [vmem:[#allocation18_spill] sm:$0xff] %v10439_v28  ;;  %v1964_v56 = vpop.xlane.xlu0 %1963  ;;  %v2260_v41 = vpack.c.bf16 %v7213_v48, %v7207_v47  ;;  %v2191_v54 = vsel %vm1861_vm5, %v7213_v48, 0.0  ;;  %v4342_v24 = vsel %vm1861_vm5, %v10439_v28, -inf }
 0x341   :  { %7226 = vpow2.f32 %v2107_v1  ;;  %2185 = vadd.xlane.f32.xlu1 %v2184_v12  ;;  %v2013_v44 = vsub.f32 %v13117_v59, %v1964_v56  ;;  %v2014_v29 = vsub.f32 %v13118_v23, %v1964_v56  ;;  %v10445_v38 = vpop.f32.mrf.mxu0  ;;  %v2192_v19 = vadd.f32 %v7211_v46, %v2191_v54 }
 0x342   :  { %13119 = vst [vmem:[#allocation9_spill] sm:$0xff] %v10445_v38  ;;  %7228 = vpow2.f32 %v2109_v0  ;;  %6537 = vmatprep.mubr.msk.bf16.mxu1 %vm1861_vm5, %v2260_v41  ;;  %v7215_v47 = vpop.eup %7214  ;;  %v4343_v46 = vmax.f32 %v10435_v14, %v4342_v24 }
 0x343   :  { %v2113_v27 = vmul.f32 1.442695, %v2014_v29  ;;  %2466 = vmatmul.mubr.bf16.gmra.mxu1 %v2259_v2  ;;  %v10449_v16 = vpop.f32.mrf.mxu0  ;;  %v2111_v12 = vmul.f32 1.442695, %v2013_v44  ;;  %2189 = vadd.xlane.f32.xlu0 %v2188_v32  ;;  %v7217_v56 = vpop.eup %7216  ;;  %v13123_v29 = vld [vmem:[#allocation38_spill] sm:$0xff] }
 0x344   :  { %13120 = vst [vmem:[#allocation17_spill] sm:$0xff] %v10449_v16  ;;  %v4346_v1 = vsel %vm1861_vm5, %v10449_v16, -inf }
 0x345   :  { %4340 = vmax.xlane.f32.xlu1 %v4339_v15  ;;  %v4347_v0 = vmax.f32 %v10445_v38, %v4346_v1  ;;  %v10455_v41 = vpop.f32.mrf.mxu0  ;;  %7230 = vpow2.f32 %v2113_v27  ;;  %v13124_v15 = vld [vmem:[#allocation39_spill] sm:$0xff] }
 0x346   :  { %13121 = vst [vmem:[#allocation19_spill] sm:$0xff] %v10455_v41  ;;  %v7219_v42 = vpop.eup %7218  ;;  %7232 = vpow2.f32 %v2111_v12  ;;  %v2195_v12 = vsel %vm1861_vm5, %v7217_v56, 0.0 }
 0x347   :  { %v7221_v2 = vpop.eup %7220  ;;  %v10459_v48 = vpop.f32.mrf.mxu0  ;;  %v2261_v59 = vpack.c.bf16 %v7219_v42, %v7215_v47  ;;  %2193 = vadd.xlane.f32.xlu0 %v2192_v19 }
 0x348   :  { %13122 = vst [vmem:[#allocation21_spill] sm:$0xff] %v10459_v48  ;;  %v3070_v44 = vpop.xlane.xlu1 %3069  ;;  %v2262_v23 = vpack.c.bf16 %v7221_v2, %v7217_v56 }
 0x349   :  { %4348 = vmax.xlane.f32.xlu1 %v4347_v0  ;;  %v3168_v32 = vsub.f32 %v13123_v29, %v3070_v44  ;;  %v3169_v1 = vsub.f32 %v13124_v15, %v3070_v44  ;;  %v10463_v16 = vpop.f32.mrf.mxu0  ;;  %v13126_v29 = vld [vmem:[#allocation41_spill] sm:$0xff]  ;;  %v13127_v15 = vld [vmem:[#allocation42_spill] sm:$0xff] }
 0x34a   :  { %6538 = vmatprep.mubr.msk.bf16.mxu1 %vm1861_vm5, %v2262_v23  ;;  %v7223_v19 = vpop.eup %7222  ;;  %v2196_v23 = vadd.f32 %v7215_v47, %v2195_v12 }
 0x34b   :  { %v3218_v27 = vmul.f32 1.442695, %v3168_v32  ;;  %v3220_v54 = vmul.f32 1.442695, %v3169_v1  ;;  %2474 = vmatmul.mubr.bf16.gmra.mxu1 %v2261_v59  ;;  %v10467_v28 = vpop.f32.mrf.mxu0  ;;  %4344 = vmax.xlane.f32.xlu0 %v4343_v46  ;;  %v7225_v38 = vpop.eup %7224 }
 0x34c   :  { %13125 = vst [vmem:[#allocation22_spill] sm:$0xff] %v10467_v28  ;;  %v3074_v0 = vpop.xlane.xlu1 %3073 }
 0x34d   :  { %7234 = vpow2.f32 %v3218_v27  ;;  %v3170_v44 = vsub.f32 %v13126_v29, %v3074_v0  ;;  %v3171_v3 = vsub.f32 %v13127_v15, %v3074_v0  ;;  %v10472_v8 = vpop.f32.mrf.mxu0  ;;  %v2199_v27 = vsel %vm1861_vm5, %v7221_v2, 0.0 }
 0x34e   :  { %13128 = vst [vmem:[#allocation23_spill] sm:$0xff] %v10472_v8  ;;  %v10474_v24 = vpop.eup %7226  ;;  %7236 = vpow2.f32 %v3220_v54  ;;  %v13130_v54 = vld [vmem:[#allocation44_spill] sm:$0xff]  ;;  %v2200_v2 = vadd.f32 %v7219_v42, %v2199_v27 }
 0x34f   :  { %v10476_v59 = vpop.eup %7228  ;;  %v3222_v32 = vmul.f32 1.442695, %v3170_v44  ;;  %v3224_v1 = vmul.f32 1.442695, %v3171_v3  ;;  %v10478_v56 = vpop.f32.mrf.mxu0  ;;  %v2263_v46 = vpack.c.bf16 %v10474_v24, %v7223_v19  ;;  %2197 = vadd.xlane.f32.xlu0 %v2196_v23  ;;  %v13131_v44 = vld [vmem:[#allocation45_spill] sm:$0xff]  ;;  %v13133_v42 = vld [vmem:[#allocation48_spill] sm:$0xff] }
 0x350   :  { %13129 = vst [vmem:[#allocation24_spill] sm:$0xff] %v10478_v56  ;;  %v4358_v0 = vsel %vm1861_vm5, %v10478_v56, -inf  ;;  %v3078_v29 = vpop.xlane.xlu1 %3077  ;;  %v2264_v15 = vpack.c.bf16 %v10476_v59, %v7225_v38  ;;  %v4350_v56 = vsel %vm1861_vm5, %v10459_v48, -inf }
 0x351   :  { %7238 = vpow2.f32 %v3222_v32  ;;  %v4359_v47 = vmax.f32 %v10472_v8, %v4358_v0  ;;  %v3172_v12 = vsub.f32 %v13130_v54, %v3078_v29  ;;  %v3173_v3 = vsub.f32 %v13131_v44, %v3078_v29  ;;  %v10488_v14 = vpop.f32.mrf.mxu0 }
 0x352   :  { %7240 = vpow2.f32 %v3224_v1  ;;  %6539 = vmatprep.mubr.msk.bf16.mxu1 %vm1861_vm5, %v2264_v15  ;;  %v10491_v23 = vpop.eup %7230  ;;  %v13134_v15 = vld [vmem:[#allocation49_spill] sm:$0xff] }
 0x353   :  { %v3226_v45 = vmul.f32 1.442695, %v3172_v12  ;;  %v3228_v22 = vmul.f32 1.442695, %v3173_v3  ;;  %2482 = vmatmul.mubr.bf16.gmra.mxu1 %v2263_v46  ;;  %4360 = vmax.xlane.f32.xlu1 %v4359_v47  ;;  %v10495_v32 = vpop.f32.mrf.mxu0  ;;  %v2266_v29 = vpack.c.bf16 %v10491_v23, %v10491_v23  ;;  %v10499_v1 = vpop.eup %7232  ;;  %v4351_v12 = vmax.f32 %v10455_v41, %v4350_v56 }
 0x354   :  { %13132 = vst [vmem:[#allocation26_spill] sm:$0xff] %v10495_v32  ;;  %2201 = vadd.xlane.f32.xlu0 %v2200_v2  ;;  %v3082_v0 = vpop.xlane.xlu0 %3081  ;;  %v2203_v2 = vsel %vm1861_vm5, %v7225_v38, 0.0 }
 0x355   :  { %7242 = vpow2.f32 %v3226_v45  ;;  %v3174_v27 = vsub.f32 %v13133_v42, %v3082_v0  ;;  %v3175_v54 = vsub.f32 %v13134_v15, %v3082_v0  ;;  %v10503_v44 = vpop.f32.mrf.mxu0  ;;  %6540 = vmatprep.mubr.msk.bf16.mxu1 %vm1861_vm5, %v2266_v29  ;;  %v2265_v0 = vpack.c.bf16 %v10499_v1, %v10499_v1  ;;  %v13137_v29 = vld [vmem:[#allocation51_spill] sm:$0xff] }
 0x356   :  { %13135 = vst [vmem:[#allocation28_spill] sm:$0xff] %v10503_v44  ;;  %7244 = vpow2.f32 %v3228_v22  ;;  %v2204_v38 = vadd.f32 %v7223_v19, %v2203_v2 }
 0x357   :  { %v3230_v46 = vmul.f32 1.442695, %v3174_v27  ;;  %v3232_v47 = vmul.f32 1.442695, %v3175_v54  ;;  %v10507_v3 = vpop.f32.mrf.mxu0 }
 0x358   :  { %13136 = vst [vmem:[#allocation29_spill] sm:$0xff] %v10507_v3  ;;  %4352 = vmax.xlane.f32.xlu0 %v4351_v12  ;;  %v4366_v45 = vsel %vm1861_vm5, %v10507_v3, -inf  ;;  %v3086_v42 = vpop.xlane.xlu1 %3085  ;;  %v4354_v3 = vsel %vm1861_vm5, %v10467_v28, -inf }
 0x359   :  { %7246 = vpow2.f32 %v3230_v46  ;;  %v4367_v56 = vmax.f32 %v10503_v44, %v4366_v45  ;;  %v3176_v22 = vsub.f32 %v10077_v21, %v3086_v42  ;;  %v3177_v27 = vsub.f32 %v13137_v29, %v3086_v42  ;;  %v10517_v15 = vpop.f32.mrf.mxu0  ;;  %v13139_v42 = vld [vmem:[#allocation54_spill] sm:$0xff]  ;;  %v13140_v44 = vld [vmem:[#allocation55_spill] sm:$0xff] }
 0x35a   :  { %v7235_v54 = vpop.eup %7234  ;;  %7248 = vpow2.f32 %v3232_v47  ;;  %v4355_v28 = vmax.f32 %v10463_v16, %v4354_v3 }
 0x35b   :  { %v7237_v12 = vpop.eup %7236  ;;  %v3234_v48 = vmul.f32 1.442695, %v3176_v22  ;;  %v3236_v41 = vmul.f32 1.442695, %v3177_v27  ;;  %2490 = vmatmul.mubr.bf16.gmra.mxu1 %v2265_v0  ;;  %4368 = vmax.xlane.f32.xlu1 %v4367_v56  ;;  %v10521_v46 = vpop.f32.mrf.mxu0 }
 0x35c   :  { %13138 = vst [vmem:[#allocation31_spill] sm:$0xff] %v10521_v46  ;;  %2205 = vadd.xlane.f32.xlu0 %v2204_v38  ;;  %v3090_v45 = vpop.xlane.xlu0 %3089  ;;  %v3318_v21 = vsel %vm1861_vm5, %v7237_v12, 0.0 }
 0x35d   :  { %7250 = vpow2.f32 %v3234_v48  ;;  %v3178_v29 = vsub.f32 %v13139_v42, %v3090_v45  ;;  %v3179_v47 = vsub.f32 %v13140_v44, %v3090_v45  ;;  %v10526_v19 = vpop.f32.mrf.mxu0  ;;  %v10529_v22 = vadd.f32 %v7235_v54, %v3318_v21 }
 0x35e   :  { %v7239_v2 = vpop.eup %7238  ;;  %7252 = vpow2.f32 %v3236_v41  ;;  %v2207_v48 = vsel %vm1861_vm5, %v10476_v59, 0.0 }
 0x35f   :  { %13141 = vst [vmem:[#allocation32_spill] sm:$0xff] %v10529_v22  ;;  %v7241_v0 = vpop.eup %7240  ;;  %v3238_v56 = vmul.f32 1.442695, %v3178_v29  ;;  %v3240_v27 = vmul.f32 1.442695, %v3179_v47  ;;  %v10531_v38 = vpop.f32.mrf.mxu0  ;;  %v3444_v8 = vpack.c.bf16 %v7239_v2, %v7235_v54  ;;  %v13143_v29 = vld [vmem:[#allocation58_spill] sm:$0xff] }
 0x360   :  { %13142 = vst [vmem:[#allocation34_spill] sm:$0xff] %v10531_v38  ;;  %4356 = vmax.xlane.f32.xlu0 %v4355_v28  ;;  %v4374_v44 = vsel %vm1861_vm5, %v10531_v38, -inf  ;;  %v3094_v45 = vpop.xlane.xlu1 %3093  ;;  %v3445_v42 = vpack.c.bf16 %v7241_v0, %v7237_v12  ;;  %v3322_v3 = vsel %vm1861_vm5, %v7241_v0, 0.0  ;;  %v2208_v28 = vadd.f32 %v10474_v24, %v2207_v48 }
 0x361   :  { %7254 = vpow2.f32 %v3238_v56  ;;  %v4375_v41 = vmax.f32 %v10526_v19, %v4374_v44  ;;  %v3180_v21 = vsub.f32 %v10102_v10, %v3094_v45  ;;  %v3181_v47 = vsub.f32 %v13143_v29, %v3094_v45  ;;  %v10541_v22 = vpop.f32.mrf.mxu0 }
 0x362   :  { %v7243_v54 = vpop.eup %7242  ;;  %7256 = vpow2.f32 %v3240_v27  ;;  %6554 = vmatprep.mubr.msk.bf16.mxu1 %vm1861_vm5, %v3445_v42  ;;  %v10545_v59 = vadd.f32 %v7239_v2, %v3322_v3  ;;  %v2211_v10 = vsel %vm1958_vm3, %v10499_v1, 0.0  ;;  %v2212_v44 = vsel %vm1960_vm6, %v10491_v23, 0.0  ;;  %v13145_v27 = vld [vmem:[#allocation40_spill] sm:$0xff]  ;;  %v13146_v2 = vld [vmem:[#allocation61_spill] sm:$0xff]  ;;  %v13147_v42 = vld [vmem:[#allocation62_spill] sm:$0xff] }
 0x363   :  { %v7245_v12 = vpop.eup %7244  ;;  %v3242_v38 = vmul.f32 1.442695, %v3180_v21  ;;  %v3244_v0 = vmul.f32 1.442695, %v3181_v47  ;;  %3583 = vmatmul.mubr.bf16.vlgmr.msra.gmra.mxu1 %v3444_v8  ;;  %4376 = vmax.xlane.f32.xlu1 %v4375_v41  ;;  %v10547_v56 = vpop.f32.mrf.mxu0  ;;  %v2213_v1 = vadd.f32 %v2212_v44, %v2211_v10  ;;  %v4362_v29 = vsel %vm1861_vm5, %v10495_v32, -inf }
 0x364   :  { %13144 = vst [vmem:[#allocation35_spill] sm:$0xff] %v10545_v59  ;;  %4798 = vmatpush1.bf16.msra.mxu1 %v13145_v27  ;;  %2209 = vadd.xlane.f32.xlu0 %v2208_v28  ;;  %v3098_v45 = vpop.xlane.xlu0 %3097  ;;  %v3326_v24 = vsel %vm1861_vm5, %v7245_v12, 0.0 }
 0x365   :  { %7258 = vpow2.f32 %v3242_v38  ;;  %v3182_v48 = vsub.f32 %v13146_v2, %v3098_v45  ;;  %v3183_v8 = vsub.f32 %v13147_v42, %v3098_v45  ;;  %v10557_v3 = vpop.f32.mrf.mxu0  ;;  %4799 = vmatprep.subr.bf16.mxu1 %v12990_v40  ;;  %v10560_v21 = vadd.f32 %v7243_v54, %v3326_v24  ;;  %v13149_v2 = vld [vmem:[#allocation56_spill] sm:$0xff]  ;;  %v13150_v24 = vld [vmem:[#allocation65_spill] sm:$0xff] }
 0x366   :  { %v7247_v41 = vpop.eup %7246  ;;  %7260 = vpow2.f32 %v3244_v0 }
 0x367   :  { %13148 = vst [vmem:[#allocation38_spill] sm:$0xff] %v10560_v21  ;;  %v7249_v23 = vpop.eup %7248  ;;  %v3246_v47 = vmul.f32 1.442695, %v3182_v48  ;;  %v3248_v28 = vmul.f32 1.442695, %v3183_v8  ;;  %v10564_v38 = vpop.f32.mrf.mxu0  ;;  %v3446_v27 = vpack.c.bf16 %v7247_v41, %v7243_v54  ;;  %v13151_v48 = vld [vmem:[#allocation66_spill] sm:$0xff] }
 0x368   :  { %4800 = vmatpush1.bf16.msra.mxu1 %v13149_v2  ;;  %2214 = vadd.xlane.f32.xlu0 %v2213_v1  ;;  %v4382_v45 = vsel %vm1861_vm5, %v10564_v38, -inf  ;;  %v3102_v42 = vpop.xlane.xlu1 %3101  ;;  %v3447_v0 = vpack.c.bf16 %v7249_v23, %v7245_v12  ;;  %v3330_v10 = vsel %vm1861_vm5, %v7249_v23, 0.0  ;;  %v4363_v1 = vmax.f32 %v10488_v14, %v4362_v29 }
 0x369   :  { %7262 = vpow2.f32 %v3246_v47  ;;  %v4383_v44 = vmax.f32 %v10557_v3, %v4382_v45  ;;  %v3184_v21 = vsub.f32 %v13150_v24, %v3102_v42  ;;  %v3185_v8 = vsub.f32 %v13151_v48, %v3102_v42  ;;  %v10573_v59 = vpop.f32.mrf.mxu0  ;;  %4801 = vmatprep.subr.bf16.mxu1 %v12990_v40  ;;  %v13153_v24 = vld [vmem:[#allocation37_spill] sm:$0xff] }
 0x36a   :  { %v7251_v54 = vpop.eup %7250  ;;  %7264 = vpow2.f32 %v3248_v28  ;;  %6555 = vmatprep.mubr.msk.bf16.mxu1 %vm1861_vm5, %v3447_v0  ;;  %v10578_v12 = vadd.f32 %v7247_v41, %v3330_v10  ;;  %v4370_v47 = vsel %vm1861_vm5, %v10521_v46, -inf  ;;  %v13154_v28 = vld [vmem:[#allocation69_spill] sm:$0xff]  ;;  %v13155_v0 = vld [vmem:[#allocation70_spill] sm:$0xff] }
 0x36b   :  { %v7253_v23 = vpop.eup %7252  ;;  %v3250_v2 = vmul.f32 1.442695, %v3184_v21  ;;  %v3252_v45 = vmul.f32 1.442695, %v3185_v8  ;;  %3591 = vmatmul.mubr.bf16.gmra.mxu1 %v3446_v27  ;;  %4384 = vmax.xlane.f32.xlu1 %v4383_v44  ;;  %v10582_v42 = vpop.f32.mrf.mxu0  ;;  %v4371_v27 = vmax.f32 %v10517_v15, %v4370_v47 }
 0x36c   :  { %13152 = vst [vmem:[#allocation39_spill] sm:$0xff] %v10578_v12  ;;  %4802 = vmatpush1.bf16.msra.mxu1 %v13153_v24  ;;  %4364 = vmax.xlane.f32.xlu0 %v4363_v1  ;;  %v3106_v48 = vpop.xlane.xlu0 %3105  ;;  %v3334_v29 = vsel %vm1861_vm5, %v7253_v23, 0.0  ;;  %v4378_v1 = vsel %vm1861_vm5, %v10547_v56, -inf }
 0x36d   :  { %7266 = vpow2.f32 %v3250_v2  ;;  %v3186_v41 = vsub.f32 %v13154_v28, %v3106_v48  ;;  %v3187_v10 = vsub.f32 %v13155_v0, %v3106_v48  ;;  %v10588_v12 = vpop.f32.mrf.mxu0  ;;  %4803 = vmatprep.subr.bf16.mxu1 %v12990_v40  ;;  %v10592_v44 = vadd.f32 %v7251_v54, %v3334_v29  ;;  %v13157_v48 = vld [vmem:[#allocation36_spill] sm:$0xff] }
 0x36e   :  { %v7255_v21 = vpop.eup %7254  ;;  %7268 = vpow2.f32 %v3252_v45 }
 0x36f   :  { %13156 = vst [vmem:[#allocation41_spill] sm:$0xff] %v10592_v44  ;;  %v7257_v8 = vpop.eup %7256  ;;  %v3254_v24 = vmul.f32 1.442695, %v3186_v41  ;;  %v3256_v2 = vmul.f32 1.442695, %v3187_v10  ;;  %v10596_v46 = vpop.f32.mrf.mxu0  ;;  %v3448_v28 = vpack.c.bf16 %v7255_v21, %v7251_v54 }
 0x370   :  { %4804 = vmatpush1.bf16.msra.mxu1 %v13157_v48  ;;  %4372 = vmax.xlane.f32.xlu0 %v4371_v27  ;;  %v4390_v0 = vsel %vm1861_vm5, %v10596_v46, -inf  ;;  %v3110_v32 = vpop.xlane.xlu1 %3109  ;;  %v3449_v47 = vpack.c.bf16 %v7257_v8, %v7253_v23  ;;  %v3338_v45 = vsel %vm1861_vm5, %v7257_v8, 0.0  ;;  %v4379_v27 = vmax.f32 %v10541_v22, %v4378_v1 }
 0x371   :  { %7270 = vpow2.f32 %v3254_v24  ;;  %v4391_v29 = vmax.f32 %v10588_v12, %v4390_v0  ;;  %v3188_v44 = vsub.f32 %v10152_v18, %v3110_v32  ;;  %v3189_v41 = vsub.f32 %v10158_v11, %v3110_v32  ;;  %v10605_v10 = vpop.f32.mrf.mxu0  ;;  %4805 = vmatprep.subr.bf16.mxu1 %v12990_v40  ;;  %v13159_v32 = vld [vmem:[#allocation33_spill] sm:$0xff] }
 0x372   :  { %v7259_v54 = vpop.eup %7258  ;;  %7272 = vpow2.f32 %v3256_v2  ;;  %6556 = vmatprep.mubr.msk.bf16.mxu1 %vm1861_vm5, %v3449_v47  ;;  %v10610_v23 = vadd.f32 %v7255_v21, %v3338_v45  ;;  %v4386_v24 = vsel %vm1861_vm5, %v10582_v42, -inf }
 0x373   :  { %v7261_v8 = vpop.eup %7260  ;;  %v3258_v48 = vmul.f32 1.442695, %v3188_v44  ;;  %v3260_v18 = vmul.f32 1.442695, %v3189_v41  ;;  %3599 = vmatmul.mubr.bf16.gmra.mxu1 %v3448_v28  ;;  %4392 = vmax.xlane.f32.xlu1 %v4391_v29  ;;  %v10614_v11 = vpop.f32.mrf.mxu0  ;;  %v4387_v28 = vmax.f32 %v10573_v59, %v4386_v24 }
 0x374   :  { %13158 = vst [vmem:[#allocation42_spill] sm:$0xff] %v10610_v23  ;;  %4806 = vmatpush1.bf16.msra.mxu1 %v13159_v32  ;;  %4380 = vmax.xlane.f32.xlu0 %v4379_v27  ;;  %v3114_v0 = vpop.xlane.xlu1 %3113  ;;  %v3342_v1 = vsel %vm1861_vm5, %v7261_v8, 0.0  ;;  %v4394_v41 = vsel %vm1861_vm5, %v10614_v11, -inf }
 0x375   :  { %7274 = vpow2.f32 %v3258_v48  ;;  %v3190_v21 = vsub.f32 %v10166_v4, %v3114_v0  ;;  %v3191_v2 = vsub.f32 %v10169_v9, %v3114_v0  ;;  %v10620_v47 = vpop.f32.mrf.mxu0  ;;  %4807 = vmatprep.subr.bf16.mxu1 %v12990_v40  ;;  %v10624_v45 = vadd.f32 %v7259_v54, %v3342_v1  ;;  %v13161_v9 = vld [vmem:[#allocation30_spill] sm:$0xff] }
 0x376   :  { %v7263_v44 = vpop.eup %7262  ;;  %7276 = vpow2.f32 %v3260_v18 }
 0x377   :  { %13160 = vst [vmem:[#allocation44_spill] sm:$0xff] %v10624_v45  ;;  %v7265_v29 = vpop.eup %7264  ;;  %v3262_v27 = vmul.f32 1.442695, %v3190_v21  ;;  %v3264_v48 = vmul.f32 1.442695, %v3191_v2  ;;  %v10628_v32 = vpop.f32.mrf.mxu0  ;;  %v3450_v4 = vpack.c.bf16 %v7263_v44, %v7259_v54 }
 0x378   :  { %4808 = vmatpush1.bf16.msra.mxu1 %v13161_v9  ;;  %4388 = vmax.xlane.f32.xlu0 %v4387_v28  ;;  %v4398_v0 = vsel %vm1861_vm5, %v10628_v32, -inf  ;;  %v3118_v23 = vpop.xlane.xlu1 %3117  ;;  %v3451_v24 = vpack.c.bf16 %v7265_v29, %v7261_v8  ;;  %v3346_v18 = vsel %vm1861_vm5, %v7265_v29, 0.0  ;;  %v4395_v28 = vmax.f32 %v10605_v10, %v4394_v41 }
 0x379   :  { %7278 = vpow2.f32 %v3262_v27  ;;  %v4399_v1 = vmax.f32 %v10620_v47, %v4398_v0  ;;  %v3192_v45 = vsub.f32 %v10175_v50, %v3118_v23  ;;  %v3193_v21 = vsub.f32 %v10181_v6, %v3118_v23  ;;  %v10637_v2 = vpop.f32.mrf.mxu0  ;;  %4809 = vmatprep.subr.bf16.mxu1 %v12990_v40  ;;  %v13165_v6 = vld [vmem:[#allocation52_spill] sm:$0xff] }
 0x37a   :  { %13162 = vst [vmem:[#allocation45_spill] sm:$0xff] %v10637_v2  ;;  %v7267_v54 = vpop.eup %7266  ;;  %7280 = vpow2.f32 %v3264_v48  ;;  %6557 = vmatprep.mubr.msk.bf16.mxu1 %vm1861_vm5, %v3451_v24  ;;  %v10642_v8 = vadd.f32 %v7263_v44, %v3346_v18  ;;  %v13166_v48 = vld [vmem:[#allocation73_spill] sm:$0xff] }
 0x37b   :  { %v7269_v29 = vpop.eup %7268  ;;  %v3266_v27 = vmul.f32 1.442695, %v3192_v45  ;;  %v3268_v9 = vmul.f32 1.442695, %v3193_v21  ;;  %3607 = vmatmul.mubr.bf16.gmra.mxu1 %v3450_v4  ;;  %4400 = vmax.xlane.f32.xlu1 %v4399_v1  ;;  %v10644_v50 = vpop.f32.mrf.mxu0  ;;  %v13167_v45 = vld [vmem:[#allocation74_spill] sm:$0xff] }
 0x37c   :  { %13163 = vst [vmem:[#allocation48_spill] sm:$0xff] %v10642_v8  ;;  %13164 = vst [vmem:[#allocation49_spill] sm:$0xff] %v10644_v50  ;;  %4810 = vmatpush1.bf16.msra.mxu1 %v13165_v6  ;;  %4396 = vmax.xlane.f32.xlu0 %v4395_v28  ;;  %v4402_v23 = vsel %vm1861_vm5, %v10644_v50, -inf  ;;  %v3122_v0 = vpop.xlane.xlu1 %3121  ;;  %v3350_v41 = vsel %vm1861_vm5, %v7269_v29, 0.0 }
 0x37d   :  { %7282 = vpow2.f32 %v3266_v27  ;;  %v4403_v44 = vmax.f32 %v10637_v2, %v4402_v23  ;;  %v3194_v24 = vsub.f32 %v13166_v48, %v3122_v0  ;;  %v3195_v18 = vsub.f32 %v13167_v45, %v3122_v0  ;;  %v10653_v4 = vpop.f32.mrf.mxu0  ;;  %4811 = vmatprep.subr.bf16.mxu1 %v12990_v40  ;;  %v13169_v23 = vld [vmem:[#allocation27_spill] sm:$0xff] }
 0x37e   :  { %v7271_v1 = vpop.eup %7270  ;;  %7284 = vpow2.f32 %v3268_v9  ;;  %v10656_v21 = vadd.f32 %v7267_v54, %v3350_v41 }
 0x37f   :  { %v7273_v28 = vpop.eup %7272  ;;  %v3270_v6 = vmul.f32 1.442695, %v3194_v24  ;;  %v3272_v8 = vmul.f32 1.442695, %v3195_v18  ;;  %4404 = vmax.xlane.f32.xlu1 %v4403_v44  ;;  %v10658_v50 = vpop.f32.mrf.mxu0  ;;  %v3452_v27 = vpack.c.bf16 %v7271_v1, %v7267_v54 }
 0x380   :  { %13168 = vst [vmem:[#allocation51_spill] sm:$0xff] %v10656_v21  ;;  %4812 = vmatpush1.bf16.msra.mxu1 %v13169_v23  ;;  %v4406_v0 = vsel %vm1861_vm5, %v10658_v50, -inf  ;;  %v10663_v48 = vpop.xlane.xlu1 %2117  ;;  %v3453_v45 = vpack.c.bf16 %v7273_v28, %v7269_v29  ;;  %v3354_v2 = vsel %vm1861_vm5, %v7273_v28, 0.0  ;;  %v13173_v23 = vld [vmem:[#allocation75_spill] sm:$0xff] }
 0x381   :  { %13170 = vst [vmem:[#allocation54_spill] sm:$0xff] %v10663_v48  ;;  %7286 = vpow2.f32 %v3270_v6  ;;  %v4407_v9 = vmax.f32 %v10653_v4, %v4406_v0  ;;  %v3126_v41 = vpop.xlane.xlu0 %3125  ;;  %v10667_v24 = vpop.f32.mrf.mxu0  ;;  %4819 = vmatprep.subr.bf16.mxu1 %v12990_v40  ;;  %v10670_v44 = vadd.f32 %v7271_v1, %v3354_v2  ;;  %v13174_v28 = vld [vmem:[#allocation67_spill] sm:$0xff] }
 0x382   :  { %13171 = vst [vmem:[#allocation55_spill] sm:$0xff] %v10667_v24  ;;  %v7275_v54 = vpop.eup %7274  ;;  %7288 = vpow2.f32 %v3272_v8  ;;  %v3196_v18 = vsub.f32 %v10196_v53, %v3126_v41  ;;  %v3197_v21 = vsub.f32 %v13173_v23, %v3126_v41  ;;  %6558 = vmatprep.mubr.msk.bf16.mxu1 %vm1861_vm5, %v3453_v45  ;;  %v4795_v6 = vsel %vm2357_vm4, %v13174_v28, 0 }
 0x383   :  { %13172 = vst [vmem:[#allocation58_spill] sm:$0xff] %v10670_v44  ;;  %v7277_v29 = vpop.eup %7276  ;;  %v4410_v0 = vsel %vm1958_vm3, %v10667_v24, -inf  ;;  %3615 = vmatmul.mubr.bf16.gmra.mxu1 %v3452_v27  ;;  %4408 = vmax.xlane.f32.xlu1 %v4407_v9  ;;  %v10679_v48 = vpop.f32.mrf.mxu0 }
 0x384   :  { %13175 = vst [vmem:[#allocation40_spill] sm:$0xff] %v10679_v48  ;;  %v3274_v2 = vmul.f32 1.442695, %v3196_v18  ;;  %v3276_v1 = vmul.f32 1.442695, %v3197_v21  ;;  %4820 = vmatpush2.bf16.msra.mxu1 %v4795_v6  ;;  %v4411_v53 = vsel %vm1960_vm6, %v10679_v48, -inf }
 0x385   :  { %v3358_v8 = vsel %vm1861_vm5, %v7277_v29, 0.0  ;;  %v4412_v45 = vmax.f32 %v4410_v0, %v4411_v53  ;;  %v10684_v41 = vpop.xlane.xlu0 %2121  ;;  %v4311_v23 = vpop.f32.mrf.mxu0  ;;  %4821 = vmatprep.subr.bf16.mxu1 %v12990_v40  ;;  %v13178_v0 = vld [vmem:[#allocation47_spill] sm:$0xff] }
 0x386   :  { %13176 = vst [vmem:[#allocation61_spill] sm:$0xff] %v10684_v41  ;;  %v10687_v28 = vadd.f32 %v7275_v54, %v3358_v8  ;;  %v7279_v27 = vpop.eup %7278  ;;  %7290 = vpow2.f32 %v3274_v2  ;;  %v3130_v9 = vpop.xlane.xlu1 %3129 }
 0x387   :  { %v7281_v44 = vpop.eup %7280  ;;  %7292 = vpow2.f32 %v3276_v1  ;;  %v3198_v21 = vsub.f32 %v10209_v61, %v3130_v9  ;;  %v3199_v18 = vsub.f32 %v10212_v33, %v3130_v9  ;;  %4413 = vmax.xlane.f32.xlu1 %v4412_v45  ;;  %v4312_v6 = vpop.f32.mrf.mxu0  ;;  %v3454_v48 = vpack.c.bf16 %v7279_v27, %v7275_v54 }
 0x388   :  { %13177 = vst [vmem:[#allocation62_spill] sm:$0xff] %v10687_v28  ;;  %4822 = vmatpush2.bf16.msra.mxu1 %v13178_v0  ;;  %v3455_v53 = vpack.c.bf16 %v7281_v44, %v7277_v29  ;;  %v3362_v23 = vsel %vm1861_vm5, %v7281_v44, 0.0 }
 0x389   :  { %v3278_v41 = vmul.f32 1.442695, %v3198_v21  ;;  %v3280_v8 = vmul.f32 1.442695, %v3199_v18  ;;  %v3134_v28 = vpop.xlane.xlu0 %3133  ;;  %4823 = vmatprep.subr.bf16.mxu1 %v12990_v40  ;;  %v10694_v2 = vpop.f32.mrf.mxu0  ;;  %v10696_v1 = vadd.f32 %v7279_v27, %v3362_v23  ;;  %v13181_v21 = vld [vmem:[#allocation63_spill] sm:$0xff] }
 0x38a   :  { %v7283_v61 = vpop.eup %7282  ;;  %v10698_v24 = vpop.xlane.xlu1 %2125  ;;  %v3200_v33 = vsub.f32 %v10219_v49, %v3134_v28  ;;  %v3201_v54 = vsub.f32 %v10226_v37, %v3134_v28  ;;  %6559 = vmatprep.mubr.msk.bf16.mxu1 %vm1861_vm5, %v3455_v53 }
 0x38b   :  { %13179 = vst [vmem:[#allocation56_spill] sm:$0xff] %v10696_v1  ;;  %13180 = vst [vmem:[#allocation65_spill] sm:$0xff] %v10698_v24  ;;  %v7285_v29 = vpop.eup %7284  ;;  %7294 = vpow2.f32 %v3278_v41  ;;  %3623 = vmatmul.mubr.bf16.gmra.mxu1 %v3454_v48  ;;  %v10703_v44 = vpop.f32.mrf.mxu0 }
 0x38c   :  { %7296 = vpow2.f32 %v3280_v8  ;;  %v3282_v45 = vmul.f32 1.442695, %v3200_v33  ;;  %v3284_v9 = vmul.f32 1.442695, %v3201_v54  ;;  %4824 = vmatpush2.bf16.msra.mxu1 %v13181_v21  ;;  %v5462_v27 = vsel %vm1861_vm5, %v10703_v44, -inf  ;;  %v13184_v54 = vld [vmem:[#allocation43_spill] sm:$0xff] }
 0x38d   :  { %v5463_v18 = vmax.f32 %v10694_v2, %v5462_v27  ;;  %v10709_v49 = vpop.xlane.xlu0 %2129  ;;  %4825 = vmatprep.subr.bf16.mxu1 %v12990_v40  ;;  %v10712_v37 = vpop.f32.mrf.mxu0  ;;  %v3366_v48 = vsel %vm1861_vm5, %v7285_v29, 0.0 }
 0x38e   :  { %13182 = vst [vmem:[#allocation66_spill] sm:$0xff] %v10709_v49  ;;  %v7287_v41 = vpop.eup %7286  ;;  %7298 = vpow2.f32 %v3282_v45  ;;  %v3138_v28 = vpop.xlane.xlu1 %3137  ;;  %v10715_v6 = vadd.f32 %v7283_v61, %v3366_v48 }
 0x38f   :  { %v7289_v0 = vpop.eup %7288  ;;  %7300 = vpow2.f32 %v3284_v9  ;;  %v3202_v53 = vsub.f32 %v10234_v57, %v3138_v28  ;;  %v3203_v23 = vsub.f32 %v10238_v25, %v3138_v28  ;;  %5464 = vmax.xlane.f32.xlu0 %v5463_v18  ;;  %v10719_v8 = vpop.f32.mrf.mxu0  ;;  %v3456_v33 = vpack.c.bf16 %v7287_v41, %v7283_v61 }
 0x390   :  { %13183 = vst [vmem:[#allocation37_spill] sm:$0xff] %v10715_v6  ;;  %4826 = vmatpush2.bf16.msra.mxu1 %v13184_v54  ;;  %v5466_v21 = vsel %vm1861_vm5, %v10719_v8, -inf  ;;  %v3457_v27 = vpack.c.bf16 %v7289_v0, %v7285_v29  ;;  %v3370_v45 = vsel %vm1861_vm5, %v7289_v0, 0.0 }
 0x391   :  { %v3286_v48 = vmul.f32 1.442695, %v3202_v53  ;;  %v3288_v49 = vmul.f32 1.442695, %v3203_v23  ;;  %v5467_v9 = vmax.f32 %v10712_v37, %v5466_v21  ;;  %v3142_v24 = vpop.xlane.xlu0 %3141  ;;  %4827 = vmatprep.subr.bf16.mxu1 %v12990_v40  ;;  %v10727_v57 = vpop.f32.mrf.mxu0  ;;  %v10729_v25 = vadd.f32 %v7287_v41, %v3370_v45  ;;  %v13188_v41 = vld [vmem:[#allocation59_spill] sm:$0xff] }
 0x392   :  { %v10731_v61 = vpop.xlane.xlu1 %2133  ;;  %v3204_v18 = vsub.f32 %v10246_v5, %v3142_v24  ;;  %v3205_v28 = vsub.f32 %v10253_v35, %v3142_v24  ;;  %6560 = vmatprep.mubr.msk.bf16.mxu1 %vm1861_vm5, %v3457_v27 }
 0x393   :  { %13185 = vst [vmem:[#allocation69_spill] sm:$0xff] %v10729_v25  ;;  %13186 = vst [vmem:[#allocation70_spill] sm:$0xff] %v10731_v61  ;;  %v7291_v29 = vpop.eup %7290  ;;  %7302 = vpow2.f32 %v3286_v48  ;;  %3631 = vmatmul.mubr.bf16.gmra.mxu1 %v3456_v33  ;;  %5468 = vmax.xlane.f32.xlu1 %v5467_v9  ;;  %v10736_v0 = vpop.f32.mrf.mxu0 }
 0x394   :  { %13187 = vst [vmem:[#allocation36_spill] sm:$0xff] %v10736_v0  ;;  %v7293_v53 = vpop.eup %7292  ;;  %7304 = vpow2.f32 %v3288_v49  ;;  %v3290_v23 = vmul.f32 1.442695, %v3204_v18  ;;  %v3292_v54 = vmul.f32 1.442695, %v3205_v28  ;;  %4828 = vmatpush2.bf16.msra.mxu1 %v13188_v41  ;;  %v5470_v21 = vsel %vm1861_vm5, %v10736_v0, -inf }
 0x395   :  { %v5471_v5 = vmax.f32 %v10727_v57, %v5470_v21  ;;  %v10742_v35 = vpop.xlane.xlu0 %2137  ;;  %v10744_v24 = vpop.f32.mrf.mxu0  ;;  %5945 = vmatprep.subr.bf16.mxu1 %v12990_v40  ;;  %v3374_v33 = vsel %vm1861_vm5, %v7293_v53, 0.0 }
 0x396   :  { %13189 = vst [vmem:[#allocation33_spill] sm:$0xff] %v10742_v35  ;;  %13190 = vst [vmem:[#allocation30_spill] sm:$0xff] %v10744_v24  ;;  %7306 = vpow2.f32 %v3290_v23  ;;  %v3146_v27 = vpop.xlane.xlu1 %3145  ;;  %v10748_v49 = vadd.f32 %v7291_v29, %v3374_v33 }
 0x397   :  { %7308 = vpow2.f32 %v3292_v54  ;;  %v3206_v45 = vsub.f32 %v10262_v39, %v3146_v27  ;;  %v3207_v48 = vsub.f32 %v10266_v7, %v3146_v27  ;;  %5472 = vmax.xlane.f32.xlu1 %v5471_v5  ;;  %v10752_v9 = vpop.f32.mrf.mxu0 }
 0x398   :  { %13191 = vst [vmem:[#allocation52_spill] sm:$0xff] %v10748_v49  ;;  %13192 = vst [vmem:[#allocation73_spill] sm:$0xff] %v10752_v9  ;;  %v7295_v18 = vpop.eup %7294  ;;  %v5474_v28 = vsel %vm1861_vm5, %v10752_v9, -inf }
 0x399   :  { %v7297_v41 = vpop.eup %7296  ;;  %v3294_v21 = vmul.f32 1.442695, %v3206_v45  ;;  %v3296_v35 = vmul.f32 1.442695, %v3207_v48  ;;  %v5475_v23 = vmax.f32 %v10744_v24, %v5474_v28  ;;  %v3150_v61 = vpop.xlane.xlu0 %3149  ;;  %v3458_v33 = vpack.c.bf16 %v7295_v18, %v7291_v29 }
 0x39a   :  { %v10757_v49 = vpop.f32.mrf.mxu0  ;;  %v10759_v54 = vpop.xlane.xlu1 %2141  ;;  %v3208_v39 = vsub.f32 %v10274_v26, %v3150_v61  ;;  %v3209_v7 = vsub.f32 %v10281_v17, %v3150_v61  ;;  %v3459_v5 = vpack.c.bf16 %v7297_v41, %v7293_v53  ;;  %v3378_v27 = vsel %vm1861_vm5, %v7297_v41, 0.0 }
 0x39b   :  { %13193 = vst [vmem:[#allocation74_spill] sm:$0xff] %v10757_v49  ;;  %13194 = vst [vmem:[#allocation27_spill] sm:$0xff] %v10759_v54  ;;  %v7299_v25 = vpop.eup %7298  ;;  %7310 = vpow2.f32 %v3294_v21  ;;  %5476 = vmax.xlane.f32.xlu0 %v5475_v23  ;;  %v10766_v48 = vadd.f32 %v7295_v18, %v3378_v27 }
 0x39c   :  { %v10764_v45 = vpop.f32.mrf.mxu0  ;;  %v7301_v28 = vpop.eup %7300  ;;  %7312 = vpow2.f32 %v3296_v35  ;;  %v3298_v29 = vmul.f32 1.442695, %v3208_v39  ;;  %v3300_v6 = vmul.f32 1.442695, %v3209_v7  ;;  %6561 = vmatprep.mubr.msk.bf16.mxu1 %vm1861_vm5, %v3459_v5 }
 0x39d   :  { %13195 = vst [vmem:[#allocation75_spill] sm:$0xff] %v10764_v45  ;;  %13196 = vst [vmem:[#allocation67_spill] sm:$0xff] %v10766_v48  ;;  %3639 = vmatmul.mubr.bf16.gmra.mxu1 %v3458_v33  ;;  %v3382_v17 = vsel %vm1861_vm5, %v7301_v28, 0.0 }
 0x39e   :  { %v10769_v26 = vpop.f32.mrf.mxu0  ;;  %7314 = vpow2.f32 %v3298_v29  ;;  %v3154_v61 = vpop.xlane.xlu1 %3153  ;;  %v10772_v53 = vadd.f32 %v7299_v25, %v3382_v17 }
 0x39f   :  { %13197 = vst [vmem:[#allocation47_spill] sm:$0xff] %v10769_v26  ;;  %7316 = vpow2.f32 %v3300_v6  ;;  %v3210_v41 = vsub.f32 %v10290_v13, %v3154_v61  ;;  %v3211_v18 = vsub.f32 %v10294_v62, %v3154_v61  ;;  %v10787_v61 = vpop.xlane.xlu0 %2145 }
 0x3a0   :  { %13198 = vst [vmem:[#allocation63_spill] sm:$0xff] %v10772_v53  ;;  %v10776_v21 = vpop.f32.mrf.mxu0  ;;  %v7303_v35 = vpop.eup %7302  ;;  %13202 = vst [vmem:[#allocation77_spill] sm:$0xff] %v10787_v61 }
 0x3a1   :  { %13199 = vst [vmem:[#allocation43_spill] sm:$0xff] %v10776_v21  ;;  %v7305_v23 = vpop.eup %7304  ;;  %v3302_v39 = vmul.f32 1.442695, %v3210_v41  ;;  %v3304_v7 = vmul.f32 1.442695, %v3211_v18  ;;  %v3460_v33 = vpack.c.bf16 %v7303_v35, %v7299_v25 }
 0x3a2   :  { %v10778_v5 = vpop.f32.mrf.mxu0  ;;  %v10780_v27 = vpop.xlane.xlu1 %2149  ;;  %v3461_v29 = vpack.c.bf16 %v7305_v23, %v7301_v28  ;;  %v3386_v17 = vsel %vm1861_vm5, %v7305_v23, 0.0 }
 0x3a3   :  { %13200 = vst [vmem:[#allocation59_spill] sm:$0xff] %v10780_v27  ;;  %v7307_v54 = vpop.eup %7306  ;;  %7318 = vpow2.f32 %v3302_v39  ;;  %v10785_v13 = vadd.f32 %v7303_v35, %v3386_v17 }
 0x3a4   :  { %v10783_v6 = vpop.f32.mrf.mxu0  ;;  %v7309_v62 = vpop.eup %7308  ;;  %7320 = vpow2.f32 %v3304_v7  ;;  %6562 = vmatprep.mubr.msk.bf16.mxu1 %vm1861_vm5, %v3461_v29  ;;  %v13205_v7 = vld [vmem:[#allocation20_spill] sm:$0xff] }
 0x3a5   :  { %13201 = vst [vmem:[#allocation76_spill] sm:$0xff] %v10785_v13  ;;  %3647 = vmatmul.mubr.bf16.gmra.mxu1 %v3460_v33  ;;  %v3390_v41 = vsel %vm1861_vm5, %v7309_v62, 0.0  ;;  %v10799_v27 = vpop.xlane.xlu0 %2153 }
 0x3a6   :  { %v10790_v25 = vpop.f32.mrf.mxu0  ;;  %v3158_v28 = vpop.xlane.xlu1 %3157  ;;  %v10793_v18 = vadd.f32 %v7307_v54, %v3390_v41  ;;  %13204 = vst [vmem:[#allocation79_spill] sm:$0xff] %v10799_v27 }
 0x3a7   :  { %v3212_v23 = vsub.f32 %v10302_v34, %v3158_v28  ;;  %v3213_v39 = vsub.f32 %v10309_v58, %v3158_v28 }
 0x3a8   :  { %13203 = vst [vmem:[#allocation78_spill] sm:$0xff] %v10793_v18  ;;  %v10797_v35 = vpop.f32.mrf.mxu0  ;;  %v7311_v17 = vpop.eup %7310  ;;  %5889 = vrot.lane.b32.xlu1 %v13205_v7, %s7877_s13 }
 0x3a9   :  { %v7313_v33 = vpop.eup %7312  ;;  %v3306_v29 = vmul.f32 1.442695, %v3212_v23  ;;  %v3308_v61 = vmul.f32 1.442695, %v3213_v39  ;;  %v3462_v48 = vpack.c.bf16 %v7311_v17, %v7307_v54 }
 0x3aa   :  { %v10803_v1 = vpop.f32.mrf.mxu0  ;;  %v3162_v41 = vpop.xlane.xlu1 %3161  ;;  %v3463_v18 = vpack.c.bf16 %v7313_v33, %v7309_v62  ;;  %v3394_v34 = vsel %vm1861_vm5, %v7313_v33, 0.0 }
 0x3ab   :  { %13206 = vst [vmem:[#allocation20_spill] sm:$0xff] %v10803_v1  ;;  %v7315_v13 = vpop.eup %7314  ;;  %7322 = vpow2.f32 %v3306_v29  ;;  %v3214_v58 = vsub.f32 %v10316_v55, %v3162_v41  ;;  %v3215_v28 = vsub.f32 %v10319_v36, %v3162_v41  ;;  %v10810_v53 = vadd.f32 %v7311_v17, %v3394_v34  ;;  %v13232_v1 = vld [vmem:[#allocation13_spill] sm:$0xff] }
 0x3ac   :  { %v10808_v27 = vpop.f32.mrf.mxu0  ;;  %v7317_v7 = vpop.eup %7316  ;;  %7324 = vpow2.f32 %v3308_v61  ;;  %6563 = vmatprep.mubr.msk.bf16.mxu1 %vm1861_vm5, %v3463_v18 }
 0x3ad   :  { %13207 = vst [vmem:[#allocation80_spill] sm:$0xff] %v10808_v27  ;;  %13208 = vst [vmem:[#allocation81_spill] sm:$0xff] %v10810_v53  ;;  %v10813_v54 = vpop.xlane.xlu0 %2161  ;;  %v3310_v23 = vmul.f32 1.442695, %v3214_v58  ;;  %v3312_v62 = vmul.f32 1.442695, %v3215_v28  ;;  %3655 = vmatmul.mubr.bf16.gmra.mxu1 %v3462_v48 }
 0x3ae   :  { %13209 = vst [vmem:[#allocation82_spill] sm:$0xff] %v10813_v54  ;;  %v10815_v39 = vpop.f32.mrf.mxu0  ;;  %v10817_v33 = vpop.xlane.xlu1 %2157  ;;  %v3398_v55 = vsel %vm1861_vm5, %v7317_v7, 0.0  ;;  %v13212_v48 = vld [vmem:[#allocation25_spill] sm:$0xff] }
 0x3af   :  { %13210 = vst [vmem:[#allocation83_spill] sm:$0xff] %v10817_v33  ;;  %7326 = vpow2.f32 %v3310_v23  ;;  %v10822_v17 = vadd.f32 %v7315_v13, %v3398_v55 }
 0x3b0   :  { %v10820_v36 = vpop.f32.mrf.mxu0  ;;  %v7319_v29 = vpop.eup %7318  ;;  %7328 = vpow2.f32 %v3312_v62 }
 0x3b1   :  { %13211 = vst [vmem:[#allocation84_spill] sm:$0xff] %v10822_v17  ;;  %v4317_v61 = vpop.xlane.xlu0 %4316  ;;  %v7321_v18 = vpop.eup %7320  ;;  %5887 = vrot.lane.b32.xlu0 %v13212_v48, %s7877_s13  ;;  %v3464_v58 = vpack.c.bf16 %v7319_v29, %v7315_v13 }
 0x3b2   :  { %v4415_v41 = vsub.f32 %v10351_v52, %v4317_v61  ;;  %v4416_v34 = vsub.f32 %v10356_v43, %v4317_v61  ;;  %v10828_v28 = vpop.f32.mrf.mxu0  ;;  %v3167_v54 = vpop.xlane.xlu1 %3166  ;;  %v3465_v23 = vpack.c.bf16 %v7321_v18, %v7317_v7  ;;  %v3402_v33 = vsel %vm1861_vm5, %v7321_v18, 0.0 }
 0x3b3   :  { %v3216_v55 = vsub.f32 %v10327_v63, %v3167_v54  ;;  %v3217_v62 = vsub.f32 %v10338_v60, %v3167_v54  ;;  %v10836_v52 = vadd.f32 %v7319_v29, %v3402_v33 }
 0x3b4   :  { %v4465_v17 = vmul.f32 1.442695, %v4415_v41  ;;  %v4467_v53 = vmul.f32 1.442695, %v4416_v34  ;;  %v10833_v0 = vpop.f32.mrf.mxu0  ;;  %6564 = vmatprep.mubr.msk.bf16.mxu1 %vm1861_vm5, %v3465_v23 }
 0x3b5   :  { %13213 = vst [vmem:[#allocation25_spill] sm:$0xff] %v10836_v52  ;;  %v3314_v43 = vmul.f32 1.442695, %v3216_v55  ;;  %v3316_v13 = vmul.f32 1.442695, %v3217_v62  ;;  %3663 = vmatmul.mubr.bf16.gmra.mxu1 %v3464_v58  ;;  %v10844_v18 = vpop.xlane.xlu0 %2169 }
 0x3b6   :  { %7330 = vpow2.f32 %v4465_v17  ;;  %v10838_v61 = vpop.f32.mrf.mxu0  ;;  %v10840_v7 = vpop.xlane.xlu1 %2165  ;;  %13217 = vst [vmem:[#allocation88_spill] sm:$0xff] %v10844_v18 }
 0x3b7   :  { %13214 = vst [vmem:[#allocation85_spill] sm:$0xff] %v10838_v61  ;;  %7332 = vpow2.f32 %v4467_v53  ;;  %13215 = vst [vmem:[#allocation86_spill] sm:$0xff] %v10840_v7 }
 0x3b8   :  { %7334 = vpow2.f32 %v3314_v43  ;;  %v10842_v63 = vpop.f32.mrf.mxu0  ;;  %v7323_v60 = vpop.eup %7322 }
 0x3b9   :  { %13216 = vst [vmem:[#allocation87_spill] sm:$0xff] %v10842_v63  ;;  %7336 = vpow2.f32 %v3316_v13  ;;  %v7325_v54 = vpop.eup %7324 }
 0x3ba   :  { %v10846_v41 = vpop.f32.mrf.mxu0  ;;  %v4321_v33 = vpop.xlane.xlu1 %4320  ;;  %v3406_v29 = vsel %vm1861_vm5, %v7325_v54, 0.0 }
 0x3bb   :  { %v4417_v17 = vsub.f32 %v10367_v51, %v4321_v33  ;;  %v4418_v34 = vsub.f32 %v10372_v31, %v4321_v33  ;;  %v10851_v53 = vpop.f32.mrf.mxu1  ;;  %v10855_v58 = vadd.f32 %v7323_v60, %v3406_v29 }
 0x3bc   :  { %13218 = vst [vmem:[#allocation89_spill] sm:$0xff] %v10851_v53  ;;  %v10853_v48 = vpop.f32.mrf.mxu0  ;;  %v7327_v23 = vpop.eup %7326 }
 0x3bd   :  { %13219 = vst [vmem:[#allocation90_spill] sm:$0xff] %v10855_v58  ;;  %v7329_v55 = vpop.eup %7328  ;;  %v4469_v62 = vmul.f32 1.442695, %v4417_v17  ;;  %v4471_v43 = vmul.f32 1.442695, %v4418_v34  ;;  %v10857_v13 = vpop.xlane.xlu0 %2177  ;;  %v3466_v7 = vpack.c.bf16 %v7327_v23, %v7323_v60 }
 0x3be   :  { %13220 = vst [vmem:[#allocation91_spill] sm:$0xff] %v10857_v13  ;;  %v2397_v18 = vpop.f32.mrf.mxu1  ;;  %v10859_v52 = vpop.xlane.xlu1 %2173  ;;  %v3467_v61 = vpack.c.bf16 %v7329_v55, %v7325_v54  ;;  %v3410_v31 = vsel %vm1861_vm5, %v7329_v55, 0.0 }
 0x3bf   :  { %13221 = vst [vmem:[#allocation92_spill] sm:$0xff] %v10859_v52  ;;  %v10861_v51 = vpop.f32.mrf.mxu0  ;;  %7338 = vpow2.f32 %v4469_v62  ;;  %v10866_v29 = vadd.f32 %v7327_v23, %v3410_v31  ;;  %v13226_v23 = vld [vmem:[#allocation11_spill] sm:$0xff] }
 0x3c0   :  { %13222 = vst [vmem:[#allocation93_spill] sm:$0xff] %v10861_v51  ;;  %v10864_v33 = vpop.f32.mrf.mxu1  ;;  %7340 = vpow2.f32 %v4471_v43  ;;  %6565 = vmatprep.mubr.msk.bf16.mxu1 %vm1861_vm5, %v3467_v61  ;;  %v13227_v31 = vld [vmem:[#allocation7_spill] sm:$0xff] }
 0x3c1   :  { %13223 = vst [vmem:[#allocation94_spill] sm:$0xff] %v10864_v33  ;;  %13224 = vst [vmem:[#allocation95_spill] sm:$0xff] %v10866_v29  ;;  %v10869_v17 = vpop.f32.mrf.mxu0  ;;  %3671 = vmatmul.mubr.bf16.gmra.mxu1 %v3466_v7  ;;  %v4329_v18 = vpop.xlane.xlu0 %4328 }
 0x3c2   :  { %13225 = vst [vmem:[#allocation96_spill] sm:$0xff] %v10869_v17  ;;  %v2400_v60 = vpop.f32.mrf.mxu1  ;;  %v4421_v54 = vsub.f32 %v10392_v30, %v4329_v18  ;;  %v4422_v13 = vsub.f32 %v10396_v20, %v4329_v18  ;;  %v4325_v55 = vpop.xlane.xlu1 %4324 }
 0x3c3   :  { %v10871_v34 = vpop.eup %7330  ;;  %v10875_v62 = vpop.f32.mrf.mxu0  ;;  %v4419_v43 = vsub.f32 %v13226_v23, %v4325_v55  ;;  %v4420_v61 = vsub.f32 %v13227_v31, %v4325_v55  ;;  %v5478_v55 = vsel %vm1861_vm5, %v10764_v45, -inf  ;;  %v13237_v45 = vld [vmem:[#allocation14_spill] sm:$0xff] }
 0x3c4   :  { %v10877_v52 = vpop.eup %7332  ;;  %v10881_v33 = vpop.f32.mrf.mxu1  ;;  %v4477_v53 = vmul.f32 1.442695, %v4421_v54  ;;  %v4479_v60 = vmul.f32 1.442695, %v4422_v13  ;;  %v13231_v13 = vld [vmem:[#allocation12_spill] sm:$0xff] }
 0x3c5   :  { %13228 = vst [vmem:[#allocation11_spill] sm:$0xff] %v10881_v33  ;;  %v7335_v7 = vpop.eup %7334  ;;  %v10883_v29 = vpop.f32.mrf.mxu0  ;;  %v4565_v30 = vsel %vm1861_vm5, %v10877_v52, 0.0  ;;  %v4473_v18 = vmul.f32 1.442695, %v4419_v43  ;;  %v4475_v58 = vmul.f32 1.442695, %v4420_v61 }
 0x3c6   :  { %v7337_v20 = vpop.eup %7336  ;;  %v10887_v51 = vpop.xlane.xlu0 %2181  ;;  %v3468_v63 = vpack.c.bf16 %v7335_v7, %v7335_v7  ;;  %7342 = vpow2.f32 %v4477_v53  ;;  %v10898_v43 = vadd.f32 %v10871_v34, %v4565_v30  ;;  %v3414_v53 = vsel %vm1958_vm3, %v7335_v7, 0.0 }
 0x3c7   :  { %13229 = vst [vmem:[#allocation7_spill] sm:$0xff] %v10887_v51  ;;  %v2405_v17 = vpop.f32.mrf.mxu1  ;;  %v4333_v23 = vpop.xlane.xlu1 %4332  ;;  %v3469_v31 = vpack.c.bf16 %v7337_v20, %v7337_v20  ;;  %7344 = vpow2.f32 %v4479_v60  ;;  %v3415_v61 = vsel %vm1960_vm6, %v7337_v20, 0.0  ;;  %v5482_v7 = vsel %vm1861_vm5, %v10776_v21, -inf  ;;  %v13253_v21 = vld [vmem:[#allocation72_spill] sm:$0xff] }
 0x3c8   :  { %v10891_v54 = vpop.f32.mrf.mxu0  ;;  %v4423_v33 = vsub.f32 %v13231_v13, %v4333_v23  ;;  %v4424_v27 = vsub.f32 %v13232_v1, %v4333_v23  ;;  %13234 = vst [vmem:[#allocation13_spill] sm:$0xff] %v10898_v43  ;;  %7346 = vpow2.f32 %v4473_v18  ;;  %v5479_v23 = vmax.f32 %v10757_v49, %v5478_v55 }
 0x3c9   :  { %13230 = vst [vmem:[#allocation97_spill] sm:$0xff] %v10891_v54  ;;  %v10895_v9 = vpop.f32.mrf.mxu1  ;;  %6566 = vmatprep.mubr.msk.bf16.mxu1 %vm1861_vm5, %v3469_v31  ;;  %7348 = vpow2.f32 %v4475_v58 }
 0x3ca   :  { %13233 = vst [vmem:[#allocation12_spill] sm:$0xff] %v10895_v9  ;;  %v10901_v17 = vpop.f32.mrf.mxu0  ;;  %v4481_v60 = vmul.f32 1.442695, %v4423_v33  ;;  %v4483_v51 = vmul.f32 1.442695, %v4424_v27  ;;  %3679 = vmatmul.mubr.bf16.gmra.mxu1 %v3468_v63  ;;  %v4337_v13 = vpop.xlane.xlu0 %4336  ;;  %v13236_v9 = vld [vmem:[#allocation10_spill] sm:$0xff]  ;;  %v10916_v27 = vadd.f32 %v3415_v61, %v3414_v53 }
 0x3cb   :  { %13235 = vst [vmem:[#allocation98_spill] sm:$0xff] %v10901_v17  ;;  %v2408_v1 = vpop.f32.mrf.mxu1  ;;  %v4425_v30 = vsub.f32 %v13236_v9, %v4337_v13  ;;  %v4426_v18 = vsub.f32 %v13237_v45, %v4337_v13  ;;  %v10908_v54 = vpop.xlane.xlu1 %2185 }
 0x3cc   :  { %13238 = vst [vmem:[#allocation10_spill] sm:$0xff] %v10908_v54  ;;  %v10910_v31 = vpop.f32.mrf.mxu0  ;;  %7350 = vpow2.f32 %v4481_v60  ;;  %13240 = vst [vmem:[#allocation99_spill] sm:$0xff] %v10916_v27  ;;  %v7339_v63 = vpop.eup %7338  ;;  %5480 = vmax.xlane.f32.xlu1 %v5479_v23  ;;  %v5483_v54 = vmax.f32 %v10769_v26, %v5482_v7  ;;  %v13244_v23 = vld [vmem:[#allocation46_spill] sm:$0xff] }
 0x3cd   :  { %v10914_v58 = vpop.f32.mrf.mxu1  ;;  %7352 = vpow2.f32 %v4483_v51  ;;  %v4485_v33 = vmul.f32 1.442695, %v4425_v30  ;;  %v4487_v20 = vmul.f32 1.442695, %v4426_v18  ;;  %v7341_v45 = vpop.eup %7340  ;;  %v4691_v1 = vpack.c.bf16 %v7339_v63, %v10871_v34  ;;  %v13243_v51 = vld [vmem:[#allocation15_spill] sm:$0xff]  ;;  %v13255_v26 = vld [vmem:[#allocation18_spill] sm:$0xff] }
 0x3ce   :  { %13239 = vst [vmem:[#allocation14_spill] sm:$0xff] %v10914_v58  ;;  %v10918_v9 = vpop.f32.mrf.mxu0  ;;  %v10920_v55 = vpop.xlane.xlu0 %2189  ;;  %v4692_v53 = vpack.c.bf16 %v7341_v45, %v10877_v52 }
 0x3cf   :  { %13241 = vst [vmem:[#allocation100_spill] sm:$0xff] %v10920_v55  ;;  %v2413_v13 = vpop.f32.mrf.mxu1  ;;  %7354 = vpow2.f32 %v4485_v33  ;;  %v4341_v60 = vpop.xlane.xlu1 %4340  ;;  %v4569_v55 = vsel %vm1861_vm5, %v7341_v45, 0.0  ;;  %v13250_v45 = vld [vmem:[#allocation9_spill] sm:$0xff] }
 0x3d0   :  { %v10925_v61 = vpop.f32.mrf.mxu0  ;;  %7356 = vpow2.f32 %v4487_v20  ;;  %v4427_v30 = vsub.f32 %v13243_v51, %v4341_v60  ;;  %v4428_v18 = vsub.f32 %v13244_v23, %v4341_v60  ;;  %6580 = vmatprep.mubr.msk.bf16.mxu1 %vm1861_vm5, %v4692_v53  ;;  %5484 = vmax.xlane.f32.xlu0 %v5483_v54  ;;  %v10935_v7 = vadd.f32 %v7339_v63, %v4569_v55  ;;  %v13249_v51 = vld [vmem:[#allocation68_spill] sm:$0xff]  ;;  %v13251_v54 = vld [vmem:[#allocation17_spill] sm:$0xff] }
 0x3d1   :  { %13242 = vst [vmem:[#allocation101_spill] sm:$0xff] %v10925_v61  ;;  %v10929_v58 = vpop.f32.mrf.mxu1 }
 0x3d2   :  { %13245 = vst [vmem:[#allocation15_spill] sm:$0xff] %v10929_v58  ;;  %v10933_v34 = vpop.f32.mrf.mxu0  ;;  %13247 = vst [vmem:[#allocation102_spill] sm:$0xff] %v10935_v7  ;;  %v4489_v33 = vmul.f32 1.442695, %v4427_v30  ;;  %v4491_v52 = vmul.f32 1.442695, %v4428_v18  ;;  %4830 = vmatmul.mubr.bf16.vlgmr.msra.gmra.mxu1 %v4691_v1  ;;  %v10937_v13 = vpop.xlane.xlu0 %2193 }
 0x3d3   :  { %13246 = vst [vmem:[#allocation46_spill] sm:$0xff] %v10933_v34  ;;  %13248 = vst [vmem:[#allocation103_spill] sm:$0xff] %v10937_v13  ;;  %v2416_v20 = vpop.f32.mrf.mxu1  ;;  %5946 = vmatpush1.bf16.msra.mxu1 %v13249_v51  ;;  %v4349_v60 = vpop.xlane.xlu1 %4348 }
 0x3d4   :  { %v10940_v23 = vpop.f32.mrf.mxu0  ;;  %v7343_v58 = vpop.eup %7342  ;;  %7358 = vpow2.f32 %v4489_v33  ;;  %v4431_v53 = vsub.f32 %v13250_v45, %v4349_v60  ;;  %v4432_v27 = vsub.f32 %v13251_v54, %v4349_v60  ;;  %5947 = vmatprep.subr.bf16.mxu1 %v12990_v40  ;;  %v13254_v33 = vld [vmem:[#allocation16_spill] sm:$0xff] }
 0x3d5   :  { %v10945_v63 = vpop.f32.mrf.mxu1  ;;  %v7345_v55 = vpop.eup %7344  ;;  %7360 = vpow2.f32 %v4491_v52 }
 0x3d6   :  { %13252 = vst [vmem:[#allocation68_spill] sm:$0xff] %v10945_v63  ;;  %v10947_v1 = vpop.f32.mrf.mxu0  ;;  %v7347_v30 = vpop.eup %7346  ;;  %v4497_v18 = vmul.f32 1.442695, %v4431_v53  ;;  %v4499_v20 = vmul.f32 1.442695, %v4432_v27  ;;  %v4577_v63 = vsel %vm1861_vm5, %v7345_v55, 0.0 }
 0x3d7   :  { %v4345_v51 = vpop.xlane.xlu0 %4344  ;;  %v2421_v13 = vpop.f32.mrf.mxu1  ;;  %5948 = vmatpush1.bf16.msra.mxu1 %v13253_v21  ;;  %v4693_v54 = vpack.c.bf16 %v7343_v58, %v7347_v30 }
 0x3d8   :  { %v7349_v7 = vpop.eup %7348  ;;  %v4429_v45 = vsub.f32 %v13254_v33, %v4345_v51  ;;  %v4430_v60 = vsub.f32 %v13255_v26, %v4345_v51  ;;  %v10952_v49 = vpop.f32.mrf.mxu0  ;;  %7362 = vpow2.f32 %v4497_v18  ;;  %5949 = vmatprep.subr.bf16.mxu1 %v12990_v40 }
 0x3d9   :  { %13256 = vst [vmem:[#allocation9_spill] sm:$0xff] %v10952_v49  ;;  %v4694_v52 = vpack.c.bf16 %v7345_v55, %v7349_v7  ;;  %v10956_v53 = vpop.f32.mrf.mxu1  ;;  %v4573_v27 = vsel %vm1861_vm5, %v7349_v7, 0.0  ;;  %v7351_v13 = vpop.eup %7350  ;;  %7364 = vpow2.f32 %v4499_v20  ;;  %v10966_v55 = vadd.f32 %v7343_v58, %v4577_v63 }
 0x3da   :  { %13257 = vst [vmem:[#allocation17_spill] sm:$0xff] %v10956_v53  ;;  %v4493_v21 = vmul.f32 1.442695, %v4429_v45  ;;  %v4495_v61 = vmul.f32 1.442695, %v4430_v60  ;;  %v10959_v33 = vpop.f32.mrf.mxu0  ;;  %v7353_v26 = vpop.eup %7352  ;;  %v10964_v18 = vadd.f32 %v7347_v30, %v4573_v27  ;;  %v13262_v45 = vld [vmem:[#allocation64_spill] sm:$0xff] }
 0x3db   :  { %13258 = vst [vmem:[#allocation72_spill] sm:$0xff] %v10959_v33  ;;  %6581 = vmatprep.mubr.msk.bf16.mxu1 %vm1861_vm5, %v4694_v52  ;;  %v10962_v51 = vpop.xlane.xlu0 %2197  ;;  %v2424_v49 = vpop.f32.mrf.mxu1  ;;  %13261 = vst [vmem:[#allocation104_spill] sm:$0xff] %v10966_v55  ;;  %v4581_v7 = vsel %vm1861_vm5, %v7353_v26, 0.0  ;;  %5950 = vmatpush1.bf16.msra.mxu1 %v13262_v45  ;;  %v13266_v27 = vld [vmem:[#allocation23_spill] sm:$0xff]  ;;  %v13267_v55 = vld [vmem:[#allocation24_spill] sm:$0xff] }
 0x3dc   :  { %13259 = vst [vmem:[#allocation16_spill] sm:$0xff] %v10962_v51  ;;  %13260 = vst [vmem:[#allocation18_spill] sm:$0xff] %v10964_v18  ;;  %7366 = vpow2.f32 %v4493_v21  ;;  %4838 = vmatmul.mubr.bf16.gmra.mxu1 %v4693_v54  ;;  %v10968_v53 = vpop.f32.mrf.mxu0  ;;  %v7355_v20 = vpop.eup %7354  ;;  %v10974_v52 = vadd.f32 %v7351_v13, %v4581_v7  ;;  %5951 = vmatprep.subr.bf16.mxu1 %v12990_v40  ;;  %v13268_v45 = vld [vmem:[#allocation8_spill] sm:$0xff] }
 0x3dd   :  { %7368 = vpow2.f32 %v4495_v61  ;;  %v10972_v60 = vpop.f32.mrf.mxu1  ;;  %v7357_v51 = vpop.eup %7356  ;;  %5885 = vrot.lane.b32.xlu1 %v13268_v45, %s7877_s13  ;;  %v13270_v33 = vld [vmem:[#allocation60_spill] sm:$0xff] }
 0x3de   :  { %13263 = vst [vmem:[#allocation64_spill] sm:$0xff] %v10972_v60  ;;  %13264 = vst [vmem:[#allocation105_spill] sm:$0xff] %v10974_v52  ;;  %v4361_v49 = vpop.xlane.xlu1 %4360  ;;  %v10977_v58 = vpop.f32.mrf.mxu0  ;;  %v4696_v54 = vpack.c.bf16 %v7357_v51, %v7353_v26  ;;  %v4585_v7 = vsel %vm1861_vm5, %v7357_v51, 0.0 }
 0x3df   :  { %v10979_v63 = vpop.xlane.xlu0 %2201  ;;  %v2429_v30 = vpop.f32.mrf.mxu1  ;;  %v4437_v21 = vsub.f32 %v13266_v27, %v4361_v49  ;;  %v4438_v61 = vsub.f32 %v13267_v55, %v4361_v49  ;;  %5952 = vmatpush1.bf16.msra.mxu1 %v13270_v33  ;;  %v10992_v26 = vadd.f32 %v7355_v20, %v4585_v7  ;;  %v4695_v55 = vpack.c.bf16 %v7355_v20, %v7351_v13  ;;  %v13274_v33 = vld [vmem:[#allocation19_spill] sm:$0xff]  ;;  %v13277_v7 = vld [vmem:[#allocation57_spill] sm:$0xff] }
 0x3e0   :  { %13265 = vst [vmem:[#allocation106_spill] sm:$0xff] %v10979_v63  ;;  %v10985_v60 = vpop.f32.mrf.mxu0  ;;  %6582 = vmatprep.mubr.msk.bf16.mxu1 %vm1861_vm5, %v4696_v54  ;;  %5953 = vmatprep.subr.bf16.mxu1 %v12990_v40 }
 0x3e1   :  { %13269 = vst [vmem:[#allocation23_spill] sm:$0xff] %v10985_v60  ;;  %v4509_v52 = vmul.f32 1.442695, %v4437_v21  ;;  %v4511_v34 = vmul.f32 1.442695, %v4438_v61  ;;  %v10990_v63 = vpop.f32.mrf.mxu1  ;;  %13272 = vst [vmem:[#allocation8_spill] sm:$0xff] %v10992_v26  ;;  %v7359_v30 = vpop.eup %7358 }
 0x3e2   :  { %13271 = vst [vmem:[#allocation24_spill] sm:$0xff] %v10990_v63  ;;  %v10995_v49 = vpop.f32.mrf.mxu0  ;;  %v7361_v27 = vpop.eup %7360  ;;  %v13275_v21 = vld [vmem:[#allocation21_spill] sm:$0xff] }
 0x3e3   :  { %13273 = vst [vmem:[#allocation60_spill] sm:$0xff] %v10995_v49  ;;  %7370 = vpow2.f32 %v4509_v52  ;;  %v4353_v45 = vpop.xlane.xlu0 %4352  ;;  %v2432_v51 = vpop.f32.mrf.mxu1  ;;  %5954 = vmatpush1.bf16.msra.mxu1 %v13277_v7  ;;  %v4589_v13 = vsel %vm1861_vm5, %v7361_v27, 0.0  ;;  %v13282_v7 = vld [vmem:[#allocation28_spill] sm:$0xff]  ;;  %v13283_v49 = vld [vmem:[#allocation29_spill] sm:$0xff] }
 0x3e4   :  { %7372 = vpow2.f32 %v4511_v34  ;;  %4846 = vmatmul.mubr.bf16.gmra.mxu1 %v4695_v55  ;;  %v4433_v54 = vsub.f32 %v13274_v33, %v4353_v45  ;;  %v4434_v61 = vsub.f32 %v13275_v21, %v4353_v45  ;;  %v10999_v60 = vpop.f32.mrf.mxu0  ;;  %5955 = vmatprep.subr.bf16.mxu1 %v12990_v40  ;;  %v4369_v34 = vpop.xlane.xlu1 %4368  ;;  %v11010_v51 = vadd.f32 %v7359_v30, %v4589_v13 }
 0x3e5   :  { %13276 = vst [vmem:[#allocation19_spill] sm:$0xff] %v10999_v60  ;;  %v11002_v63 = vpop.f32.mrf.mxu1  ;;  %v11005_v20 = vpop.eup %7362  ;;  %v4442_v17 = vsub.f32 %v13283_v49, %v4369_v34 }
 0x3e6   :  { %13278 = vst [vmem:[#allocation21_spill] sm:$0xff] %v11002_v63  ;;  %v4501_v26 = vmul.f32 1.442695, %v4433_v54  ;;  %v4503_v52 = vmul.f32 1.442695, %v4434_v61  ;;  %v11008_v55 = vpop.f32.mrf.mxu0  ;;  %13280 = vst [vmem:[#allocation107_spill] sm:$0xff] %v11010_v51  ;;  %v11012_v45 = vpop.eup %7364  ;;  %v4441_v63 = vsub.f32 %v13282_v7, %v4369_v34 }
 0x3e7   :  { %13279 = vst [vmem:[#allocation57_spill] sm:$0xff] %v11008_v55  ;;  %v11014_v33 = vpop.xlane.xlu0 %2205  ;;  %v2437_v21 = vpop.f32.mrf.mxu1  ;;  %v13284_v54 = vld [vmem:[#allocation6_spill] sm:$0xff]  ;;  %v4597_v18 = vsel %vm1861_vm5, %v11012_v45, 0.0  ;;  %v13286_v51 = vld [vmem:[#allocation53_spill] sm:$0xff] }
 0x3e8   :  { %13281 = vst [vmem:[#allocation108_spill] sm:$0xff] %v11014_v33  ;;  %7374 = vpow2.f32 %v4501_v26  ;;  %5883 = vrot.lane.b32.xlu0 %v13284_v54, %s7877_s13  ;;  %v11020_v61 = vpop.f32.mrf.mxu0  ;;  %5956 = vmatpush1.bf16.msra.mxu1 %v13286_v51  ;;  %v4517_v43 = vmul.f32 1.442695, %v4441_v63  ;;  %v4519_v33 = vmul.f32 1.442695, %v4442_v17  ;;  %v11028_v7 = vadd.f32 %v11005_v20, %v4597_v18  ;;  %v13290_v63 = vld [vmem:[#allocation22_spill] sm:$0xff] }
 0x3e9   :  { %13285 = vst [vmem:[#allocation28_spill] sm:$0xff] %v11020_v61  ;;  %v7367_v13 = vpop.eup %7366  ;;  %7376 = vpow2.f32 %v4503_v52  ;;  %v11025_v21 = vpop.f32.mrf.mxu1  ;;  %5957 = vmatprep.subr.bf16.mxu1 %v12990_v40  ;;  %v13292_v18 = vld [vmem:[#allocation71_spill] sm:$0xff] }
 0x3ea   :  { %13287 = vst [vmem:[#allocation29_spill] sm:$0xff] %v11025_v21  ;;  %13288 = vst [vmem:[#allocation6_spill] sm:$0xff] %v11028_v7  ;;  %v7369_v26 = vpop.eup %7368  ;;  %v4697_v49 = vpack.c.bf16 %v7367_v13, %v7359_v30  ;;  %v11031_v34 = vpop.f32.mrf.mxu0  ;;  %7378 = vpow2.f32 %v4517_v43 }
 0x3eb   :  { %13289 = vst [vmem:[#allocation53_spill] sm:$0xff] %v11031_v34  ;;  %v4357_v54 = vpop.xlane.xlu0 %4356  ;;  %v2440_v61 = vpop.f32.mrf.mxu1  ;;  %v4698_v24 = vpack.c.bf16 %v7369_v26, %v7361_v27  ;;  %v4593_v52 = vsel %vm1861_vm5, %v7369_v26, 0.0  ;;  %7380 = vpow2.f32 %v4519_v33 }
 0x3ec   :  { %v4435_v17 = vsub.f32 %v10463_v16, %v4357_v54  ;;  %v4436_v51 = vsub.f32 %v13290_v63, %v4357_v54  ;;  %v11036_v21 = vpop.f32.mrf.mxu0  ;;  %5958 = vmatpush1.bf16.msra.mxu1 %v13292_v18  ;;  %v11042_v7 = vadd.f32 %v7367_v13, %v4593_v52  ;;  %v4377_v27 = vpop.xlane.xlu1 %4376  ;;  %v13297_v63 = vld [vmem:[#allocation34_spill] sm:$0xff] }
 0x3ed   :  { %13291 = vst [vmem:[#allocation22_spill] sm:$0xff] %v11036_v21  ;;  %6583 = vmatprep.mubr.msk.bf16.mxu1 %vm1861_vm5, %v4698_v24  ;;  %v11040_v30 = vpop.f32.mrf.mxu1  ;;  %5959 = vmatprep.subr.bf16.mxu1 %v12990_v40  ;;  %v4445_v54 = vsub.f32 %v10526_v19, %v4377_v27  ;;  %v4446_v18 = vsub.f32 %v13297_v63, %v4377_v27 }
 0x3ee   :  { %13293 = vst [vmem:[#allocation71_spill] sm:$0xff] %v11040_v30  ;;  %13294 = vst [vmem:[#allocation109_spill] sm:$0xff] %v11042_v7  ;;  %v4505_v43 = vmul.f32 1.442695, %v4435_v17  ;;  %v4507_v61 = vmul.f32 1.442695, %v4436_v51  ;;  %4854 = vmatmul.mubr.bf16.gmra.mxu1 %v4697_v49  ;;  %v11045_v33 = vpop.f32.mrf.mxu0 }
 0x3ef   :  { %13295 = vst [vmem:[#allocation110_spill] sm:$0xff] %v11045_v33  ;;  %v11047_v16 = vpop.xlane.xlu0 %2209  ;;  %v2445_v26 = vpop.f32.mrf.mxu1  ;;  %v13298_v49 = vld [vmem:[#allocation50_spill] sm:$0xff]  ;;  %v4525_v17 = vmul.f32 1.442695, %v4445_v54  ;;  %v4527_v51 = vmul.f32 1.442695, %v4446_v18 }
 0x3f0   :  { %13296 = vst [vmem:[#allocation111_spill] sm:$0xff] %v11047_v16  ;;  %v11051_v24 = vpop.eup %7370  ;;  %7382 = vpow2.f32 %v4505_v43  ;;  %v5459_v13 = vpop.f32.mrf.mxu0  ;;  %5960 = vmatpush1.bf16.msra.mxu1 %v13298_v49 }
 0x3f1   :  { %v11053_v52 = vpop.eup %7372  ;;  %7384 = vpow2.f32 %v4507_v61  ;;  %v11056_v30 = vpop.f32.mrf.mxu1  ;;  %5967 = vmatprep.subr.bf16.mxu1 %v12990_v40 }
 0x3f2   :  { %13299 = vst [vmem:[#allocation34_spill] sm:$0xff] %v11056_v30  ;;  %v5460_v7 = vpop.f32.mrf.mxu0  ;;  %v4609_v19 = vsel %vm1861_vm5, %v11053_v52, 0.0  ;;  %7386 = vpow2.f32 %v4525_v17  ;;  %v13303_v30 = vld [vmem:[#allocation26_spill] sm:$0xff] }
 0x3f3   :  { %v11061_v27 = vpop.xlane.xlu0 %2214  ;;  %v2448_v43 = vpop.f32.mrf.mxu1  ;;  %v11064_v26 = vadd.f32 %v11051_v24, %v4609_v19  ;;  %7388 = vpow2.f32 %v4527_v51 }
 0x3f4   :  { %13300 = vst [vmem:[#allocation50_spill] sm:$0xff] %v11061_v27  ;;  %v4385_v18 = vpop.xlane.xlu1 %4384 }
 0x3f5   :  { %13301 = vst [vmem:[#allocation112_spill] sm:$0xff] %v11064_v26  ;;  %v7375_v61 = vpop.eup %7374  ;;  %v11066_v63 = vpop.f32.mrf.mxu1  ;;  %v4449_v17 = vsub.f32 %v10557_v3, %v4385_v18  ;;  %v4450_v27 = vsub.f32 %v10564_v38, %v4385_v18 }
 0x3f6   :  { %13302 = vst [vmem:[#allocation113_spill] sm:$0xff] %v11066_v63  ;;  %v7377_v54 = vpop.eup %7376  ;;  %v4699_v7 = vpack.c.bf16 %v7375_v61, %v11005_v20 }
 0x3f7   :  { %v4365_v13 = vpop.xlane.xlu0 %4364  ;;  %v2453_v49 = vpop.f32.mrf.mxu1  ;;  %v4700_v16 = vpack.c.bf16 %v7377_v54, %v11012_v45  ;;  %v4601_v43 = vsel %vm1861_vm5, %v7377_v54, 0.0  ;;  %v4533_v20 = vmul.f32 1.442695, %v4449_v17  ;;  %v4535_v45 = vmul.f32 1.442695, %v4450_v27 }
 0x3f8   :  { %v11073_v19 = vpop.eup %7378  ;;  %v4439_v51 = vsub.f32 %v10488_v14, %v4365_v13  ;;  %v4440_v63 = vsub.f32 %v13303_v30, %v4365_v13  ;;  %v11077_v26 = vadd.f32 %v7375_v61, %v4601_v43  ;;  %v5486_v17 = vsel %vm1861_vm5, %v10783_v6, -inf }
 0x3f9   :  { %v11079_v34 = vpop.eup %7380  ;;  %6584 = vmatprep.mubr.msk.bf16.mxu1 %vm1861_vm5, %v4700_v16  ;;  %v11082_v49 = vpop.f32.mrf.mxu1  ;;  %7390 = vpow2.f32 %v4533_v20  ;;  %v13307_v16 = vld [vmem:[#allocation31_spill] sm:$0xff] }
 0x3fa   :  { %13304 = vst [vmem:[#allocation26_spill] sm:$0xff] %v11077_v26  ;;  %13305 = vst [vmem:[#allocation114_spill] sm:$0xff] %v11082_v49  ;;  %v4513_v3 = vmul.f32 1.442695, %v4439_v51  ;;  %v4515_v38 = vmul.f32 1.442695, %v4440_v63  ;;  %4862 = vmatmul.mubr.bf16.gmra.mxu1 %v4699_v7 }
 0x3fb   :  { %v4617_v54 = vsel %vm1861_vm5, %v11079_v34, 0.0  ;;  %v4373_v14 = vpop.xlane.xlu0 %4372  ;;  %v2456_v18 = vpop.f32.mrf.mxu1 }
 0x3fc   :  { %v11087_v30 = vadd.f32 %v11073_v19, %v4617_v54  ;;  %7392 = vpow2.f32 %v4513_v3  ;;  %v4443_v61 = vsub.f32 %v10517_v15, %v4373_v14  ;;  %v4444_v13 = vsub.f32 %v13307_v16, %v4373_v14  ;;  %v4393_v20 = vpop.xlane.xlu1 %4392 }
 0x3fd   :  { %v7383_v27 = vpop.eup %7382  ;;  %7394 = vpow2.f32 %v4515_v38  ;;  %v11093_v63 = vpop.f32.mrf.mxu1  ;;  %v4453_v15 = vsub.f32 %v10588_v12, %v4393_v20  ;;  %v4454_v14 = vsub.f32 %v10596_v46, %v4393_v20  ;;  %v5487_v38 = vmax.f32 %v10778_v5, %v5486_v17 }
 0x3fe   :  { %13306 = vst [vmem:[#allocation115_spill] sm:$0xff] %v11087_v30  ;;  %13308 = vst [vmem:[#allocation31_spill] sm:$0xff] %v11093_v63  ;;  %v7385_v7 = vpop.eup %7384  ;;  %7396 = vpow2.f32 %v4535_v45  ;;  %v4521_v43 = vmul.f32 1.442695, %v4443_v61  ;;  %v4523_v51 = vmul.f32 1.442695, %v4444_v13  ;;  %v4701_v16 = vpack.c.bf16 %v11051_v24, %v7383_v27 }
 0x3ff   :  { %v4381_v18 = vpop.xlane.xlu0 %4380  ;;  %v2461_v54 = vpop.f32.mrf.mxu1  ;;  %v4702_v3 = vpack.c.bf16 %v11053_v52, %v7385_v7  ;;  %v4541_v52 = vmul.f32 1.442695, %v4453_v15  ;;  %v4543_v12 = vmul.f32 1.442695, %v4454_v14  ;;  %v4605_v46 = vsel %vm1861_vm5, %v7385_v7, 0.0 }
 0x400   :  { %v11099_v49 = vpop.eup %7386  ;;  %7398 = vpow2.f32 %v4521_v43  ;;  %v4447_v45 = vsub.f32 %v10541_v22, %v4381_v18  ;;  %v4448_v61 = vsub.f32 %v10547_v56, %v4381_v18  ;;  %v5490_v24 = vsel %vm1861_vm5, %v10797_v35, -inf }
 0x401   :  { %v11104_v13 = vpop.eup %7388  ;;  %7400 = vpow2.f32 %v4523_v51  ;;  %6585 = vmatprep.mubr.msk.bf16.mxu1 %vm1861_vm5, %v4702_v3  ;;  %v11107_v54 = vpop.f32.mrf.mxu1  ;;  %5488 = vmax.xlane.f32.xlu1 %v5487_v38  ;;  %v11117_v18 = vadd.f32 %v7383_v27, %v4605_v46  ;;  %v5491_v15 = vmax.f32 %v10790_v25, %v5490_v24  ;;  %v5550_v63 = vsel %vm1861_vm5, %v11008_v55, -inf }
 0x402   :  { %13309 = vst [vmem:[#allocation116_spill] sm:$0xff] %v11107_v54  ;;  %v4529_v17 = vmul.f32 1.442695, %v4447_v45  ;;  %v4531_v43 = vmul.f32 1.442695, %v4448_v61  ;;  %4870 = vmatmul.mubr.bf16.gmra.mxu1 %v4701_v16  ;;  %v4625_v22 = vsel %vm1861_vm5, %v11104_v13, 0.0  ;;  %7402 = vpow2.f32 %v4541_v52 }
 0x403   :  { %v4389_v56 = vpop.xlane.xlu0 %4388  ;;  %v2464_v51 = vpop.f32.mrf.mxu1  ;;  %v11115_v20 = vadd.f32 %v11099_v49, %v4625_v22  ;;  %13310 = vst [vmem:[#allocation117_spill] sm:$0xff] %v11117_v18  ;;  %v5498_v16 = vsel %vm1861_vm5, %v10820_v36, -inf  ;;  %v5502_v22 = vsel %vm1861_vm5, %v10833_v0, -inf  ;;  %v13353_v18 = vld [vmem:[#allocation9_spill] sm:$0xff] }
 0x404   :  { %7404 = vpow2.f32 %v4529_v17  ;;  %v4451_v7 = vsub.f32 %v10573_v59, %v4389_v56  ;;  %v4452_v3 = vsub.f32 %v10582_v42, %v4389_v56  ;;  %v4401_v61 = vpop.xlane.xlu1 %4400 }
 0x405   :  { %7406 = vpow2.f32 %v4531_v43  ;;  %v11122_v14 = vpop.f32.mrf.mxu1  ;;  %v4457_v46 = vsub.f32 %v10620_v47, %v4401_v61  ;;  %v4458_v59 = vsub.f32 %v10628_v32, %v4401_v61  ;;  %v13313_v61 = vld [vmem:[#allocation45_spill] sm:$0xff] }
 0x406   :  { %13311 = vst [vmem:[#allocation118_spill] sm:$0xff] %v11122_v14  ;;  %7408 = vpow2.f32 %v4543_v12  ;;  %v4537_v38 = vmul.f32 1.442695, %v4451_v7  ;;  %v4539_v45 = vmul.f32 1.442695, %v4452_v3  ;;  %v11128_v42 = vpop.eup %7390  ;;  %v5499_v12 = vmax.f32 %v10815_v39, %v5498_v16 }
 0x407   :  { %v4397_v52 = vpop.xlane.xlu0 %4396  ;;  %v2469_v27 = vpop.f32.mrf.mxu1  ;;  %5492 = vmax.xlane.f32.xlu0 %v5491_v15  ;;  %v4549_v56 = vmul.f32 1.442695, %v4457_v46  ;;  %v4551_v3 = vmul.f32 1.442695, %v4458_v59  ;;  %v5503_v46 = vmax.f32 %v10828_v28, %v5502_v22  ;;  %v5510_v22 = vsel %vm1861_vm5, %v10853_v48, -inf }
 0x408   :  { %7410 = vpow2.f32 %v4537_v38  ;;  %v4455_v24 = vsub.f32 %v10605_v10, %v4397_v52  ;;  %v4456_v17 = vsub.f32 %v10614_v11, %v4397_v52  ;;  %v4405_v15 = vpop.xlane.xlu1 %4404  ;;  %v13314_v27 = vld [vmem:[#allocation49_spill] sm:$0xff] }
 0x409   :  { %v7393_v43 = vpop.eup %7392  ;;  %7412 = vpow2.f32 %v4539_v45  ;;  %v11135_v51 = vpop.f32.mrf.mxu1  ;;  %v4459_v52 = vsub.f32 %v13313_v61, %v4405_v15  ;;  %v4460_v45 = vsub.f32 %v13314_v27, %v4405_v15 }
 0x40a   :  { %13312 = vst [vmem:[#allocation119_spill] sm:$0xff] %v11135_v51  ;;  %v7395_v47 = vpop.eup %7394  ;;  %v4545_v32 = vmul.f32 1.442695, %v4455_v24  ;;  %v4547_v7 = vmul.f32 1.442695, %v4456_v17  ;;  %v4703_v38 = vpack.c.bf16 %v11073_v19, %v7393_v43  ;;  %7414 = vpow2.f32 %v4549_v56 }
 0x40b   :  { %v11138_v10 = vpop.eup %7396  ;;  %v2472_v11 = vpop.f32.mrf.mxu1  ;;  %v4704_v16 = vpack.c.bf16 %v11079_v34, %v7395_v47  ;;  %5500 = vmax.xlane.f32.xlu0 %v5499_v12  ;;  %v4613_v24 = vsel %vm1861_vm5, %v7395_v47, 0.0  ;;  %v4553_v17 = vmul.f32 1.442695, %v4459_v52  ;;  %v4555_v56 = vmul.f32 1.442695, %v4460_v45 }
 0x40c   :  { %7416 = vpow2.f32 %v4545_v32  ;;  %v4633_v59 = vsel %vm1861_vm5, %v11138_v10, 0.0  ;;  %v5518_v32 = vsel %vm1861_vm5, %v10883_v29, -inf  ;;  %v4409_v47 = vpop.xlane.xlu1 %4408 }
 0x40d   :  { %v7399_v19 = vpop.eup %7398  ;;  %7418 = vpow2.f32 %v4547_v7  ;;  %6586 = vmatprep.mubr.msk.bf16.mxu1 %vm1861_vm5, %v4704_v16  ;;  %v11148_v34 = vpop.f32.mrf.mxu1  ;;  %v11151_v11 = vadd.f32 %v11128_v42, %v4633_v59  ;;  %v11157_v7 = vadd.f32 %v7393_v43, %v4613_v24  ;;  %v4461_v61 = vsub.f32 %v10653_v4, %v4409_v47 }
 0x40e   :  { %13315 = vst [vmem:[#allocation45_spill] sm:$0xff] %v11148_v34  ;;  %v7401_v12 = vpop.eup %7400  ;;  %7420 = vpow2.f32 %v4551_v3  ;;  %4878 = vmatmul.mubr.bf16.gmra.mxu1 %v4703_v38  ;;  %v4462_v52 = vsub.f32 %v10658_v50, %v4409_v47  ;;  %v5511_v3 = vmax.f32 %v10846_v41, %v5510_v22  ;;  %v5519_v50 = vmax.f32 %v10875_v62, %v5518_v32  ;;  %v13319_v47 = vld [vmem:[#allocation55_spill] sm:$0xff] }
 0x40f   :  { %13316 = vst [vmem:[#allocation49_spill] sm:$0xff] %v11157_v7  ;;  %7422 = vpow2.f32 %v4553_v17  ;;  %v2477_v15 = vpop.f32.mrf.mxu1  ;;  %v4706_v16 = vpack.c.bf16 %v11104_v13, %v7401_v12  ;;  %5504 = vmax.xlane.f32.xlu0 %v5503_v46  ;;  %v11162_v27 = vpop.eup %7402  ;;  %v4621_v45 = vsel %vm1861_vm5, %v7401_v12, 0.0  ;;  %v4557_v43 = vmul.f32 1.442695, %v4461_v61  ;;  %v13321_v61 = vld [vmem:[#allocation5_spill] sm:$0xff] }
 0x410   :  { %7424 = vpow2.f32 %v4555_v56  ;;  %v4559_v38 = vmul.f32 1.442695, %v4462_v52  ;;  %v11169_v13 = vadd.f32 %v7399_v19, %v4621_v45  ;;  %v4414_v46 = vpop.xlane.xlu1 %4413  ;;  %v13320_v15 = vld [vmem:[#allocation40_spill] sm:$0xff]  ;;  %v4705_v22 = vpack.c.bf16 %v11099_v49, %v7399_v19 }
 0x411   :  { %v7405_v59 = vpop.eup %7404  ;;  %6587 = vmatprep.mubr.msk.bf16.mxu1 %vm1861_vm5, %v4706_v16  ;;  %v11167_v24 = vpop.f32.mrf.mxu1  ;;  %7426 = vpow2.f32 %v4557_v43  ;;  %v4463_v12 = vsub.f32 %v13319_v47, %v4414_v46  ;;  %v4464_v34 = vsub.f32 %v13320_v15, %v4414_v46 }
 0x412   :  { %13317 = vst [vmem:[#allocation120_spill] sm:$0xff] %v11167_v24  ;;  %13318 = vst [vmem:[#allocation121_spill] sm:$0xff] %v11169_v13  ;;  %v7407_v4 = vpop.eup %7406  ;;  %7428 = vpow2.f32 %v4559_v38  ;;  %5881 = vrot.lane.b32.xlu1 %v13321_v61, %s7877_s13 }
 0x413   :  { %v7409_v17 = vpop.eup %7408  ;;  %v2480_v56 = vpop.f32.mrf.mxu1  ;;  %5512 = vmax.xlane.f32.xlu0 %v5511_v3  ;;  %v4708_v16 = vpack.c.bf16 %v11138_v10, %v7407_v4  ;;  %v4629_v52 = vsel %vm1861_vm5, %v7407_v4, 0.0  ;;  %v4561_v43 = vmul.f32 1.442695, %v4463_v12  ;;  %v5526_v10 = vsel %vm1861_vm5, %v10918_v9, -inf }
 0x414   :  { %v4641_v32 = vsel %vm1861_vm5, %v7409_v17, 0.0  ;;  %v4563_v56 = vmul.f32 1.442695, %v4464_v34  ;;  %v11184_v46 = vadd.f32 %v7405_v59, %v4629_v52  ;;  %v5527_v15 = vmax.f32 %v10910_v31, %v5526_v10 }
 0x415   :  { %v11180_v45 = vpop.eup %7410  ;;  %v11182_v47 = vpop.f32.mrf.mxu1  ;;  %v11187_v49 = vadd.f32 %v11162_v27, %v4641_v32  ;;  %7430 = vpow2.f32 %v4561_v43  ;;  %v4707_v10 = vpack.c.bf16 %v11128_v42, %v7405_v59 }
 0x416   :  { %13322 = vst [vmem:[#allocation55_spill] sm:$0xff] %v11182_v47  ;;  %v7413_v19 = vpop.eup %7412  ;;  %4886 = vmatmul.mubr.bf16.gmra.mxu1 %v4705_v22  ;;  %7432 = vpow2.f32 %v4563_v56 }
 0x417   :  { %6588 = vmatprep.mubr.msk.bf16.mxu1 %vm1861_vm5, %v4708_v16  ;;  %v2485_v3 = vpop.f32.mrf.mxu1  ;;  %5520 = vmax.xlane.f32.xlu0 %v5519_v50  ;;  %v4637_v38 = vsel %vm1861_vm5, %v7413_v19, 0.0  ;;  %v11193_v34 = vpop.eup %7414  ;;  %v5534_v16 = vsel %vm1861_vm5, %v10947_v1, -inf  ;;  %v4710_v51 = vpack.c.bf16 %v7409_v17, %v7413_v19 }
 0x418   :  { %v11196_v4 = vadd.f32 %v11180_v45, %v4637_v38  ;;  %v11205_v52 = vpop.xlane.xlu0 %5464  ;;  %v5535_v24 = vmax.f32 %v10940_v23, %v5534_v16 }
 0x419   :  { %v11198_v12 = vpop.eup %7416  ;;  %v11201_v61 = vpop.f32.mrf.mxu1  ;;  %v5563_v43 = vsub.f32 %v10694_v2, %v11205_v52  ;;  %v5564_v13 = vsub.f32 %v10703_v44, %v11205_v52  ;;  %v13328_v44 = vld [vmem:[#allocation73_spill] sm:$0xff] }
 0x41a   :  { %13323 = vst [vmem:[#allocation40_spill] sm:$0xff] %v11201_v61  ;;  %v7419_v22 = vpop.eup %7418 }
 0x41b   :  { %v7421_v50 = vpop.eup %7420  ;;  %v2488_v32 = vpop.f32.mrf.mxu1  ;;  %5528 = vmax.xlane.f32.xlu0 %v5527_v15  ;;  %v4645_v56 = vsel %vm1861_vm5, %v7419_v22, 0.0  ;;  %v5542_v15 = vsel %vm1861_vm5, %v10977_v58, -inf  ;;  %v5613_v14 = vmul.f32 1.442695, %v5563_v43 }
 0x41c   :  { %v11210_v3 = vpop.eup %7422  ;;  %v11214_v38 = vadd.f32 %v11198_v12, %v4645_v56  ;;  %v4649_v61 = vsel %vm1861_vm5, %v7421_v50, 0.0  ;;  %v5469_v42 = vpop.xlane.xlu1 %5468  ;;  %v5543_v43 = vmax.f32 %v10968_v53, %v5542_v15 }
 0x41d   :  { %v11217_v47 = vpop.eup %7424  ;;  %v11220_v32 = vpop.f32.mrf.mxu1  ;;  %v11223_v2 = vadd.f32 %v11193_v34, %v4649_v61  ;;  %v5565_v16 = vsub.f32 %v10712_v37, %v5469_v42  ;;  %7434 = vpow2.f32 %v5613_v14 }
 0x41e   :  { %13324 = vst [vmem:[#allocation5_spill] sm:$0xff] %v11220_v32  ;;  %4894 = vmatmul.mubr.bf16.gmra.mxu1 %v4707_v10  ;;  %v4653_v59 = vsel %vm1861_vm5, %v11217_v47, 0.0  ;;  %v5566_v32 = vsub.f32 %v10719_v8, %v5469_v42  ;;  %v11235_v19 = vpop.eup %7426 }
 0x41f   :  { %6589 = vmatprep.mubr.msk.bf16.mxu1 %vm1861_vm5, %v4710_v51  ;;  %v2493_v56 = vpop.f32.mrf.mxu1  ;;  %5536 = vmax.xlane.f32.xlu0 %v5535_v24  ;;  %v11233_v17 = vadd.f32 %v11210_v3, %v4653_v59  ;;  %v7429_v61 = vpop.eup %7428  ;;  %v5617_v10 = vmul.f32 1.442695, %v5565_v16  ;;  %v4712_v16 = vpack.c.bf16 %v7421_v50, %v7419_v22 }
 0x420   :  { %v5619_v51 = vmul.f32 1.442695, %v5566_v32  ;;  %v11240_v56 = vpop.xlane.xlu1 %5472  ;;  %v4657_v37 = vsel %vm1861_vm5, %v7429_v61, 0.0  ;;  %v5551_v32 = vmax.f32 %v10999_v60, %v5550_v63  ;;  %v13358_v60 = vld [vmem:[#allocation23_spill] sm:$0xff] }
 0x421   :  { %v2494_v54 = vpop.f32.mrf.mxu1  ;;  %7436 = vpow2.f32 %v5617_v10  ;;  %v5567_v24 = vsub.f32 %v10727_v57, %v11240_v56  ;;  %v11246_v42 = vadd.f32 %v11235_v19, %v4657_v37 }
 0x422   :  { %v11248_v15 = vpop.eup %7430  ;;  %v4709_v54 = vpack.c.bf16 %v11162_v27, %v11180_v45  ;;  %7438 = vpow2.f32 %v5619_v51  ;;  %v13326_v45 = vld [vmem:[#allocation30_spill] sm:$0xff] }
 0x423   :  { %v2495_v8 = vpop.f32.mrf.mxu1  ;;  %5544 = vmax.xlane.f32.xlu0 %v5543_v43  ;;  %v7433_v14 = vpop.eup %7432  ;;  %v4661_v10 = vsel %vm1958_vm3, %v11248_v15, 0.0  ;;  %v5621_v57 = vmul.f32 1.442695, %v5567_v24 }
 0x424   :  { %v5890_v43 = vpop.permute.xlu1 %5889  ;;  %v5477_v37 = vpop.xlane.xlu0 %5476  ;;  %v4662_v8 = vsel %vm1960_vm6, %v7433_v14, 0.0 }
 0x425   :  { %v11253_v59 = vpop.f32.mrf.mxu1  ;;  %v5943_v63 = vsel %vm2357_vm4, %v5890_v43, 0  ;;  %v5569_v22 = vsub.f32 %v13326_v45, %v5477_v37  ;;  %v11263_v50 = vadd.f32 %v4662_v8, %v4661_v10  ;;  %7440 = vpow2.f32 %v5621_v57  ;;  %v13329_v45 = vld [vmem:[#allocation13_spill] sm:$0xff] }
 0x426   :  { %13325 = vst [vmem:[#allocation122_spill] sm:$0xff] %v11253_v59  ;;  %4902 = vmatmul.mubr.bf16.gmra.mxu1 %v4709_v54  ;;  %v5559_v54 = vsel %vm1960_vm6, %v11045_v33, -inf  ;;  %v5570_v52 = vsub.f32 %v13328_v44, %v5477_v37  ;;  %v4711_v10 = vpack.c.bf16 %v11193_v34, %v11198_v12  ;;  %v4714_v57 = vpack.c.bf16 %v7429_v61, %v11217_v47  ;;  %v13332_v61 = vld [vmem:[#allocation80_spill] sm:$0xff]  ;;  %v13348_v59 = vld [vmem:[#allocation105_spill] sm:$0xff] }
 0x427   :  { %6590 = vmatprep.mubr.msk.bf16.mxu1 %vm1861_vm5, %v4712_v16  ;;  %v3586_v27 = vpop.f32.mrf.mxu1  ;;  %5552 = vmax.xlane.f32.xlu0 %v5551_v32  ;;  %v5625_v51 = vmul.f32 1.442695, %v5569_v22  ;;  %v5558_v32 = vsel %vm1958_vm3, %v11036_v21, -inf  ;;  %v13340_v12 = vld [vmem:[#allocation96_spill] sm:$0xff] }
 0x428   :  { %5968 = vmatpush2.bf16.msra.mxu1 %v5943_v63  ;;  %v5888_v16 = vpop.permute.xlu0 %5887  ;;  %v5615_v27 = vmul.f32 1.442695, %v5564_v13  ;;  %v5560_v8 = vmax.f32 %v5558_v32, %v5559_v54  ;;  %v5627_v37 = vmul.f32 1.442695, %v5570_v52  ;;  %v5494_v54 = vsel %vm1861_vm5, %v13332_v61, -inf  ;;  %v13333_v52 = vld [vmem:[#allocation35_spill] sm:$0xff] }
 0x429   :  { %v11265_v24 = vpop.f32.mrf.mxu1  ;;  %5969 = vmatprep.subr.bf16.mxu1 %v12990_v40  ;;  %7442 = vpow2.f32 %v5625_v51 }
 0x42a   :  { %13327 = vst [vmem:[#allocation30_spill] sm:$0xff] %v11265_v24  ;;  %v11280_v13 = vpop.eup %7434  ;;  %7444 = vpow2.f32 %v5615_v27 }
 0x42b   :  { %v3589_v43 = vpop.f32.mrf.mxu1  ;;  %4567 = vadd.xlane.f32.xlu0 %v13329_v45  ;;  %7446 = vpow2.f32 %v5627_v37  ;;  %v13335_v45 = vld [vmem:[#allocation20_spill] sm:$0xff] }
 0x42c   :  { %5970 = vmatpush2.bf16.msra.mxu1 %v5888_v16  ;;  %v4713_v16 = vpack.c.bf16 %v11235_v19, %v11210_v3  ;;  %v4716_v43 = vpack.c.bf16 %v7433_v14, %v7433_v14  ;;  %v5495_v32 = vmax.f32 %v13335_v45, %v5494_v54  ;;  %v13339_v54 = vld [vmem:[#allocation85_spill] sm:$0xff]  ;;  %v13343_v14 = vld [vmem:[#allocation98_spill] sm:$0xff] }
 0x42d   :  { %v11276_v63 = vpop.f32.mrf.mxu1  ;;  %5971 = vmatprep.subr.bf16.mxu1 %v12990_v40 }
 0x42e   :  { %13330 = vst [vmem:[#allocation73_spill] sm:$0xff] %v11276_v63  ;;  %4910 = vmatmul.mubr.bf16.gmra.mxu1 %v4711_v10  ;;  %v11283_v51 = vpop.eup %7436 }
 0x42f   :  { %6591 = vmatprep.mubr.msk.bf16.mxu1 %vm1861_vm5, %v4714_v57  ;;  %v3594_v22 = vpop.f32.mrf.mxu1  ;;  %5561 = vmax.xlane.f32.xlu0 %v5560_v8  ;;  %v7439_v47 = vpop.eup %7438  ;;  %v13336_v57 = vld [vmem:[#allocation87_spill] sm:$0xff] }
 0x430   :  { %v5717_v10 = vsel %vm1861_vm5, %v7439_v47, 0.0  ;;  %v5506_v37 = vsel %vm1861_vm5, %v13336_v57, -inf }
 0x431   :  { %v11285_v34 = vpop.f32.mrf.mxu1  ;;  %v5718_v19 = vadd.f32 %v11283_v51, %v5717_v10 }
 0x432   :  { %13331 = vst [vmem:[#allocation13_spill] sm:$0xff] %v11285_v34  ;;  %v11298_v8 = vpop.eup %7440 }
 0x433   :  { %v3597_v44 = vpop.f32.mrf.mxu1  ;;  %3324 = vadd.xlane.f32.xlu0 %v13333_v52 }
 0x434   :  { %v13337_v44 = vld [vmem:[#allocation18_spill] sm:$0xff] }
 0x435   :  { %v11294_v27 = vpop.f32.mrf.mxu1 }
 0x436   :  { %13334 = vst [vmem:[#allocation80_spill] sm:$0xff] %v11294_v27  ;;  %4918 = vmatmul.mubr.bf16.gmra.mxu1 %v4713_v16  ;;  %v11304_v52 = vpop.eup %7442  ;;  %5496 = vmax.xlane.f32.xlu1 %v5495_v32  ;;  %v5507_v16 = vmax.f32 %v13339_v54, %v5506_v37  ;;  %v5514_v27 = vsel %vm1861_vm5, %v13340_v12, -inf  ;;  %v5522_v37 = vsel %vm1861_vm5, %v13343_v14, -inf }
 0x437   :  { %6592 = vmatprep.mubr.msk.bf16.mxu1 %vm1861_vm5, %v4716_v43  ;;  %v3602_v22 = vpop.f32.mrf.mxu1  ;;  %4575 = vadd.xlane.f32.xlu0 %v13337_v44  ;;  %v7445_v43 = vpop.eup %7444 }
 0x438   :  { %v4715_v22 = vpack.c.bf16 %v11248_v15, %v11248_v15  ;;  %v5840_v44 = vpack.c.bf16 %v7439_v47, %v7445_v43  ;;  %v11319_v63 = vpop.eup %7446  ;;  %v13346_v15 = vld [vmem:[#allocation97_spill] sm:$0xff] }
 0x439   :  { %v11306_v3 = vpop.f32.mrf.mxu1  ;;  %v5725_v47 = vsel %vm1861_vm5, %v11319_v63, 0.0 }
 0x43a   :  { %13338 = vst [vmem:[#allocation35_spill] sm:$0xff] %v11306_v3  ;;  %5508 = vmax.xlane.f32.xlu1 %v5507_v16  ;;  %v13342_v3 = vld [vmem:[#allocation93_spill] sm:$0xff]  ;;  %v5523_v16 = vmax.f32 %v13346_v15, %v5522_v37 }
 0x43b   :  { %v3605_v34 = vpop.f32.mrf.mxu1  ;;  %5719 = vadd.xlane.f32.xlu0 %v5718_v19  ;;  %v5515_v10 = vmax.f32 %v13342_v3, %v5514_v27  ;;  %v13344_v19 = vld [vmem:[#allocation39_spill] sm:$0xff]  ;;  %v13347_v27 = vld [vmem:[#allocation46_spill] sm:$0xff] }
 0x43d   :  { %v11316_v32 = vpop.f32.mrf.mxu1 }
 0x43e   :  { %13341 = vst [vmem:[#allocation20_spill] sm:$0xff] %v11316_v32  ;;  %4926 = vmatmul.mubr.bf16.gmra.mxu1 %v4715_v22  ;;  %5516 = vmax.xlane.f32.xlu1 %v5515_v10  ;;  %v5530_v22 = vsel %vm1861_vm5, %v13347_v27, -inf }
 0x43f   :  { %6606 = vmatprep.mubr.msk.bf16.mxu1 %vm1861_vm5, %v5840_v44  ;;  %v3610_v34 = vpop.f32.mrf.mxu1  ;;  %3332 = vadd.xlane.f32.xlu0 %v13344_v19  ;;  %v5726_v44 = vadd.f32 %v11304_v52, %v5725_v47  ;;  %v13351_v19 = vld [vmem:[#allocation72_spill] sm:$0xff]  ;;  %v13356_v47 = vld [vmem:[#allocation42_spill] sm:$0xff] }
 0x440   :  { %v13350_v34 = vld [vmem:[#allocation101_spill] sm:$0xff] }
 0x441   :  { %v11325_v24 = vpop.f32.mrf.mxu1  ;;  %v5531_v10 = vmax.f32 %v13350_v34, %v5530_v22 }
 0x442   :  { %13345 = vst [vmem:[#allocation87_spill] sm:$0xff] %v11325_v24  ;;  %5524 = vmax.xlane.f32.xlu1 %v5523_v16  ;;  %v5538_v24 = vsel %vm1861_vm5, %v13351_v19, -inf  ;;  %v13355_v16 = vld [vmem:[#allocation36_spill] sm:$0xff] }
 0x443   :  { %v3613_v32 = vpop.f32.mrf.mxu1  ;;  %4583 = vadd.xlane.f32.xlu0 %v13348_v59  ;;  %v5539_v33 = vmax.f32 %v13353_v18, %v5538_v24  ;;  %v13360_v24 = vld [vmem:[#allocation63_spill] sm:$0xff] }
 0x444   :  { %v13354_v32 = vld [vmem:[#allocation60_spill] sm:$0xff] }
 0x445   :  { %v11333_v30 = vpop.f32.mrf.mxu1  ;;  %v5546_v59 = vsel %vm1861_vm5, %v13354_v32, -inf  ;;  %v13362_v32 = vld [vmem:[#allocation28_spill] sm:$0xff] }
 0x446   :  { %13349 = vst [vmem:[#allocation18_spill] sm:$0xff] %v11333_v30  ;;  %5532 = vmax.xlane.f32.xlu1 %v5531_v10  ;;  %v5568_v30 = vsub.f32 %v13355_v16, %v11240_v56 }
 0x447   :  { %v3618_v37 = vpop.f32.mrf.mxu1  ;;  %5727 = vadd.xlane.f32.xlu0 %v5726_v44  ;;  %v13359_v44 = vld [vmem:[#allocation53_spill] sm:$0xff] }
 0x448   :  { %v5547_v37 = vmax.f32 %v13358_v60, %v5546_v59  ;;  %v5554_v10 = vsel %vm1861_vm5, %v13359_v44, -inf }
 0x449   :  { %v11339_v7 = vpop.f32.mrf.mxu1  ;;  %v5555_v56 = vmax.f32 %v13362_v32, %v5554_v10 }
 0x44a   :  { %13352 = vst [vmem:[#allocation85_spill] sm:$0xff] %v11339_v7  ;;  %5540 = vmax.xlane.f32.xlu1 %v5539_v33  ;;  %v5623_v7 = vmul.f32 1.442695, %v5568_v30  ;;  %v13364_v30 = vld [vmem:[#allocation74_spill] sm:$0xff] }
 0x44b   :  { %v3621_v21 = vpop.f32.mrf.mxu1  ;;  %3340 = vadd.xlane.f32.xlu0 %v13356_v47  ;;  %v5713_v47 = vsel %vm1861_vm5, %v7445_v43, 0.0  ;;  %v13369_v43 = vld [vmem:[#allocation43_spill] sm:$0xff] }
 0x44c   :  { %7448 = vpow2.f32 %v5623_v7  ;;  %v5714_v7 = vadd.f32 %v11280_v13, %v5713_v47 }
 0x44d   :  { %v11347_v22 = vpop.f32.mrf.mxu1 }
 0x44e   :  { %13357 = vst [vmem:[#allocation96_spill] sm:$0xff] %v11347_v22  ;;  %5548 = vmax.xlane.f32.xlu1 %v5547_v37  ;;  %v13365_v22 = vld [vmem:[#allocation75_spill] sm:$0xff]  ;;  %v13366_v37 = vld [vmem:[#allocation32_spill] sm:$0xff] }
 0x44f   :  { %v3626_v26 = vpop.f32.mrf.mxu1  ;;  %3384 = vadd.xlane.f32.xlu0 %v13360_v24 }
 0x451   :  { %v11353_v55 = vpop.f32.mrf.mxu1 }
 0x452   :  { %13361 = vst [vmem:[#allocation93_spill] sm:$0xff] %v11353_v55  ;;  %5556 = vmax.xlane.f32.xlu1 %v5555_v56 }
 0x453   :  { %v3629_v21 = vpop.f32.mrf.mxu1  ;;  %4631 = vadd.xlane.f32.xlu0 %v11184_v46 }
 0x455   :  { %v11357_v33 = vpop.f32.mrf.mxu1  ;;  %v5481_v16 = vpop.xlane.xlu1 %5480 }
 0x456   :  { %13363 = vst [vmem:[#allocation98_spill] sm:$0xff] %v11357_v33  ;;  %v5571_v26 = vsub.f32 %v13364_v30, %v5481_v16  ;;  %v5572_v24 = vsub.f32 %v13365_v22, %v5481_v16  ;;  %3320 = vadd.xlane.f32.xlu1 %v13366_v37 }
 0x457   :  { %v3634_v59 = vpop.f32.mrf.mxu1 }
 0x458   :  { %v5631_v10 = vmul.f32 1.442695, %v5572_v24  ;;  %v5629_v56 = vmul.f32 1.442695, %v5571_v26  ;;  %v13368_v59 = vld [vmem:[#allocation47_spill] sm:$0xff]  ;;  %v13371_v24 = vld [vmem:[#allocation102_spill] sm:$0xff] }
 0x459   :  { %v11363_v55 = vpop.f32.mrf.mxu1  ;;  %v5886_v46 = vpop.permute.xlu1 %5885 }
 0x45a   :  { %13367 = vst [vmem:[#allocation39_spill] sm:$0xff] %v11363_v55  ;;  %v5485_v32 = vpop.xlane.xlu0 %5484  ;;  %5972 = vmatpush2.bf16.msra.mxu1 %v5886_v46  ;;  %5715 = vadd.xlane.f32.xlu1 %v5714_v7  ;;  %7450 = vpow2.f32 %v5631_v10  ;;  %v11371_v37 = vpop.eup %7448  ;;  %v13379_v55 = vld [vmem:[#allocation8_spill] sm:$0xff] }
 0x45b   :  { %v3637_v21 = vpop.f32.mrf.mxu1  ;;  %v5573_v33 = vsub.f32 %v13368_v59, %v5485_v32  ;;  %v5574_v44 = vsub.f32 %v13369_v43, %v5485_v32  ;;  %5973 = vmatprep.subr.bf16.mxu1 %v12990_v40  ;;  %7452 = vpow2.f32 %v5629_v56  ;;  %v13374_v43 = vld [vmem:[#allocation104_spill] sm:$0xff] }
 0x45d   :  { %v5633_v22 = vmul.f32 1.442695, %v5573_v33  ;;  %v5635_v16 = vmul.f32 1.442695, %v5574_v44  ;;  %v11369_v30 = vpop.f32.mrf.mxu1  ;;  %v5721_v33 = vsel %vm1861_vm5, %v11371_v37, 0.0  ;;  %v13373_v44 = vld [vmem:[#allocation38_spill] sm:$0xff] }
 0x45e   :  { %13370 = vst [vmem:[#allocation97_spill] sm:$0xff] %v11369_v30  ;;  %v5884_v47 = vpop.permute.xlu0 %5883  ;;  %4571 = vadd.xlane.f32.xlu1 %v13371_v24  ;;  %v5722_v10 = vadd.f32 %v11298_v8, %v5721_v33  ;;  %v13378_v30 = vld [vmem:[#allocation76_spill] sm:$0xff] }
 0x45f   :  { %7454 = vpow2.f32 %v5633_v22  ;;  %v3642_v26 = vpop.f32.mrf.mxu1  ;;  %5974 = vmatpush2.bf16.msra.mxu1 %v5884_v47 }
 0x460   :  { %7456 = vpow2.f32 %v5635_v16  ;;  %5975 = vmatprep.subr.bf16.mxu1 %v12990_v40 }
 0x461   :  { %v11375_v32 = vpop.f32.mrf.mxu1 }
 0x462   :  { %13372 = vst [vmem:[#allocation46_spill] sm:$0xff] %v11375_v32  ;;  %3328 = vadd.xlane.f32.xlu1 %v13373_v44  ;;  %v13376_v44 = vld [vmem:[#allocation41_spill] sm:$0xff] }
 0x463   :  { %v3645_v7 = vpop.f32.mrf.mxu1 }
 0x465   :  { %v11381_v21 = vpop.f32.mrf.mxu1 }
 0x466   :  { %5723 = vadd.xlane.f32.xlu1 %v5722_v10 }
 0x467   :  { %v3650_v46 = vpop.f32.mrf.mxu1  ;;  %v11385_v59 = vpop.eup %7450 }
 0x468   :  { %v11388_v22 = vpop.eup %7452  ;;  %v5729_v33 = vsel %vm1861_vm5, %v11385_v59, 0.0 }
 0x469   :  { %v11383_v56 = vpop.f32.mrf.mxu1 }
 0x46a   :  { %4579 = vadd.xlane.f32.xlu1 %v13374_v43  ;;  %v5730_v43 = vadd.f32 %v11388_v22, %v5729_v33  ;;  %v13382_v33 = vld [vmem:[#allocation78_spill] sm:$0xff] }
 0x46b   :  { %v3653_v16 = vpop.f32.mrf.mxu1 }
 0x46c   :  { %v11390_v47 = vpop.eup %7454 }
 0x46d   :  { %v11392_v24 = vpop.eup %7456  ;;  %v11394_v26 = vpop.f32.mrf.mxu1 }
 0x46e   :  { %13375 = vst [vmem:[#allocation105_spill] sm:$0xff] %v11394_v26  ;;  %3336 = vadd.xlane.f32.xlu1 %v13376_v44  ;;  %v5733_v7 = vsel %vm1861_vm5, %v11392_v24, 0.0 }
 0x46f   :  { %v3658_v10 = vpop.f32.mrf.mxu1  ;;  %v5734_v46 = vadd.f32 %v11390_v47, %v5733_v7 }
 0x470   :  { %v13381_v10 = vld [vmem:[#allocation44_spill] sm:$0xff] }
 0x471   :  { %v11403_v16 = vpop.f32.mrf.mxu1  ;;  %5735 = vadd.xlane.f32.xlu0 %v5734_v46 }
 0x472   :  { %13377 = vst [vmem:[#allocation101_spill] sm:$0xff] %v11403_v16  ;;  %5731 = vadd.xlane.f32.xlu1 %v5730_v43  ;;  %v13383_v16 = vld [vmem:[#allocation107_spill] sm:$0xff] }
 0x473   :  { %v3661_v40 = vpop.f32.mrf.mxu1 }
 0x475   :  { %v11405_v32 = vpop.f32.mrf.mxu1  ;;  %3388 = vadd.xlane.f32.xlu0 %v13378_v30 }
 0x476   :  { %4587 = vadd.xlane.f32.xlu1 %v13379_v55  ;;  %v13386_v55 = vld [vmem:[#allocation81_spill] sm:$0xff] }
 0x477   :  { %v3666_v44 = vpop.f32.mrf.mxu1 }
 0x479   :  { %v11409_v26 = vpop.f32.mrf.mxu1  ;;  %4635 = vadd.xlane.f32.xlu0 %v11151_v11 }
 0x47a   :  { %13380 = vst [vmem:[#allocation72_spill] sm:$0xff] %v11409_v26  ;;  %3344 = vadd.xlane.f32.xlu1 %v13381_v10 }
 0x47b   :  { %v3669_v7 = vpop.f32.mrf.mxu1 }
 0x47d   :  { %3392 = vadd.xlane.f32.xlu0 %v13382_v33 }
 0x47e   :  { %4591 = vadd.xlane.f32.xlu1 %v13383_v16 }
 0x481   :  { %v11415_v46 = vpop.f32.mrf.mxu1  ;;  %4639 = vadd.xlane.f32.xlu0 %v11196_v4  ;;  %v13387_v4 = vld [vmem:[#allocation84_spill] sm:$0xff] }
 0x482   :  { %13384 = vst [vmem:[#allocation9_spill] sm:$0xff] %v11415_v46 }
 0x483   :  { %v3674_v40 = vpop.f32.mrf.mxu1 }
 0x485   :  { %v11418_v30 = vpop.f32.mrf.mxu1  ;;  %3396 = vadd.xlane.f32.xlu0 %v13386_v55 }
 0x486   :  { %13385 = vst [vmem:[#allocation36_spill] sm:$0xff] %v11418_v30 }
 0x487   :  { %v3677_v43 = vpop.f32.mrf.mxu1 }
 0x489   :  { %4643 = vadd.xlane.f32.xlu0 %v11187_v49 }
 0x48a   :  { %v11421_v44 = vpop.f32.mrf.mxu1  ;;  %v5489_v11 = vpop.xlane.xlu1 %5488 }
 0x48b   :  { %v5575_v7 = vsub.f32 %v10778_v5, %v5489_v11  ;;  %v5576_v16 = vsub.f32 %v10783_v6, %v5489_v11  ;;  %v5842_v6 = vpack.c.bf16 %v11319_v63, %v11371_v37  ;;  %v13388_v11 = vpack.c.bf16 %v11283_v51, %v11280_v13 }
 0x48c   :  { %v3682_v10 = vpop.f32.mrf.mxu1  ;;  %v5844_v63 = vpack.c.bf16 %v11392_v24, %v11385_v59  ;;  %v13390_v51 = vpack.c.bf16 %v11304_v52, %v11298_v8  ;;  %v5843_v8 = vpack.c.bf16 %v11390_v47, %v11388_v22  ;;  %v13392_v22 = vld [vmem:[#allocation95_spill] sm:$0xff]  ;;  %v13393_v47 = vld [vmem:[#allocation48_spill] sm:$0xff] }
 0x48d   :  { %v5637_v46 = vmul.f32 1.442695, %v5575_v7  ;;  %v5639_v26 = vmul.f32 1.442695, %v5576_v16  ;;  %3400 = vadd.xlane.f32.xlu0 %v13387_v4 }
 0x48e   :  { %v3683_v33 = vpop.f32.mrf.mxu1  ;;  %v5882_v40 = vpop.permute.xlu1 %5881 }
 0x48f   :  { %7458 = vpow2.f32 %v5637_v46  ;;  %5976 = vmatpush2.bf16.msra.mxu1 %v5882_v40  ;;  %v13391_v40 = vld [vmem:[#allocation90_spill] sm:$0xff] }
 0x490   :  { %v5493_v30 = vpop.xlane.xlu0 %5492  ;;  %v3684_v55 = vpop.f32.mrf.mxu1  ;;  %7460 = vpow2.f32 %v5639_v26  ;;  %v13389_v26 = vld [vmem:[#allocation25_spill] sm:$0xff] }
 0x491   :  { %v5578_v43 = vsub.f32 %v10797_v35, %v5493_v30  ;;  %v5577_v49 = vsub.f32 %v10790_v25, %v5493_v30  ;;  %4647 = vadd.xlane.f32.xlu0 %v11214_v38 }
 0x492   :  { %v11429_v10 = vpop.f32.mrf.mxu1  ;;  %5978 = vmatmul.mubr.bf16.vlgmr.msra.gmra.mxu1 %v13388_v11 }
 0x493   :  { %v5643_v5 = vmul.f32 1.442695, %v5578_v43  ;;  %6607 = vmatprep.mubr.msk.bf16.mxu1 %vm1861_vm5, %v5842_v6  ;;  %v5641_v35 = vmul.f32 1.442695, %v5577_v49 }
 0x494   :  { %v11437_v46 = vpop.xlane.xlu0 %5500  ;;  %v4833_v7 = vpop.f32.mrf.mxu1 }
 0x495   :  { %7462 = vpow2.f32 %v5643_v5  ;;  %3404 = vadd.xlane.f32.xlu0 %v13389_v26 }
 0x496   :  { %v11440_v25 = vpop.f32.mrf.mxu1  ;;  %7464 = vpow2.f32 %v5641_v35 }
 0x498   :  { %v11443_v30 = vpop.xlane.xlu0 %5504  ;;  %v4836_v38 = vpop.f32.mrf.mxu1 }
 0x499   :  { %4651 = vadd.xlane.f32.xlu0 %v11223_v2 }
 0x49a   :  { %5986 = vmatmul.mubr.bf16.gmra.mxu1 %v13390_v51 }
 0x49b   :  { %6608 = vmatprep.mubr.msk.bf16.mxu1 %vm1861_vm5, %v5844_v63 }
 0x49c   :  { %v11448_v13 = vpop.f32.mrf.mxu1  ;;  %v11453_v37 = vpop.xlane.xlu0 %5512 }
 0x49d   :  { %v7459_v16 = vpop.eup %7458  ;;  %3408 = vadd.xlane.f32.xlu0 %v13391_v40 }
 0x49e   :  { %v4841_v33 = vpop.f32.mrf.mxu1  ;;  %v7461_v4 = vpop.eup %7460 }
 0x49f   :  { %v5737_v59 = vsel %vm1861_vm5, %v7461_v4, 0.0 }
 0x4a0   :  { %v11457_v55 = vpop.f32.mrf.mxu1  ;;  %v11459_v2 = vpop.xlane.xlu0 %5520  ;;  %v5738_v24 = vadd.f32 %v7459_v16, %v5737_v59 }
 0x4a1   :  { %4655 = vadd.xlane.f32.xlu0 %v11233_v17 }
 0x4a2   :  { %v4844_v43 = vpop.f32.mrf.mxu1  ;;  %v7463_v52 = vpop.eup %7462  ;;  %5739 = vadd.xlane.f32.xlu1 %v5738_v24  ;;  %5994 = vmatmul.mubr.bf16.gmra.mxu1 %v5843_v8 }
 0x4a3   :  { %v5846_v6 = vpack.c.bf16 %v7463_v52, %v7461_v4  ;;  %v7465_v26 = vpop.eup %7464  ;;  %v13394_v4 = vld [vmem:[#allocation109_spill] sm:$0xff]  ;;  %v13396_v43 = vld [vmem:[#allocation99_spill] sm:$0xff] }
 0x4a4   :  { %v11465_v49 = vpop.f32.mrf.mxu1  ;;  %v5529_v5 = vpop.xlane.xlu0 %5528 }
 0x4a5   :  { %v5595_v11 = vsub.f32 %v10910_v31, %v5529_v5  ;;  %v5596_v7 = vsub.f32 %v10918_v9, %v5529_v5  ;;  %6609 = vmatprep.mubr.msk.bf16.mxu1 %vm1861_vm5, %v5846_v6  ;;  %3412 = vadd.xlane.f32.xlu0 %v13392_v22  ;;  %v5845_v31 = vpack.c.bf16 %v7465_v26, %v7459_v16  ;;  %v5741_v9 = vsel %vm1861_vm5, %v7463_v52, 0.0  ;;  %v13398_v16 = vld [vmem:[#allocation51_spill] sm:$0xff] }
 0x4a6   :  { %v4849_v35 = vpop.f32.mrf.mxu1  ;;  %3348 = vadd.xlane.f32.xlu1 %v13393_v47  ;;  %v5742_v59 = vadd.f32 %v7465_v26, %v5741_v9  ;;  %v5581_v22 = vsub.f32 %v10815_v39, %v11437_v46 }
 0x4a7   :  { %v5677_v38 = vmul.f32 1.442695, %v5595_v11  ;;  %v5679_v63 = vmul.f32 1.442695, %v5596_v7  ;;  %v13399_v35 = vld [vmem:[#allocation6_spill] sm:$0xff] }
 0x4a8   :  { %v11472_v17 = vpop.f32.mrf.mxu1  ;;  %v11474_v51 = vpop.xlane.xlu0 %5536  ;;  %v5649_v9 = vmul.f32 1.442695, %v5581_v22 }
 0x4a9   :  { %7466 = vpow2.f32 %v5677_v38  ;;  %4659 = vadd.xlane.f32.xlu0 %v11246_v42 }
 0x4aa   :  { %7468 = vpow2.f32 %v5679_v63  ;;  %v4852_v33 = vpop.f32.mrf.mxu1  ;;  %4595 = vadd.xlane.f32.xlu1 %v13394_v4  ;;  %6002 = vmatmul.mubr.bf16.gmra.mxu1 %v5845_v31 }
 0x4ac   :  { %v11479_v40 = vpop.xlane.xlu0 %5544 }
 0x4ad   :  { %3417 = vadd.xlane.f32.xlu0 %v13396_v43 }
 0x4ae   :  { %v11481_v24 = vpop.f32.mrf.mxu1  ;;  %5743 = vadd.xlane.f32.xlu1 %v5742_v59 }
 0x4af   :  { %13395 = vst [vmem:[#allocation42_spill] sm:$0xff] %v11481_v24 }
 0x4b0   :  { %v4857_v8 = vpop.f32.mrf.mxu1  ;;  %v11484_v5 = vpop.xlane.xlu0 %5552 }
 0x4b1   :  { %4664 = vadd.xlane.f32.xlu0 %v11263_v50 }
 0x4b2   :  { %v11486_v6 = vpop.f32.mrf.mxu1  ;;  %3352 = vadd.xlane.f32.xlu1 %v13398_v16  ;;  %v5584_v16 = vsub.f32 %v10833_v0, %v11443_v30 }
 0x4b3   :  { %13397 = vst [vmem:[#allocation23_spill] sm:$0xff] %v11486_v6  ;;  %v13460_v6 = vld [vmem:[#allocation91_spill] sm:$0xff] }
 0x4b4   :  { %v4860_v42 = vpop.f32.mrf.mxu1  ;;  %v11490_v52 = vpop.xlane.xlu0 %4567 }
 0x4b5   :  { %4627 = vadd.xlane.f32.xlu0 %v11115_v20  ;;  %v5582_v20 = vsub.f32 %v10820_v36, %v11437_v46  ;;  %v5583_v36 = vsub.f32 %v10828_v28, %v11443_v30  ;;  %v5587_v28 = vsub.f32 %v10846_v41, %v11453_v37 }
 0x4b6   :  { %v11492_v11 = vpop.eup %7466  ;;  %4599 = vadd.xlane.f32.xlu1 %v13399_v35 }
 0x4b7   :  { %v11494_v7 = vpop.eup %7468  ;;  %v5651_v43 = vmul.f32 1.442695, %v5582_v20  ;;  %v5655_v20 = vmul.f32 1.442695, %v5584_v16 }
 0x4b8   :  { %v11498_v26 = vpop.xlane.xlu0 %5561  ;;  %v5777_v38 = vsel %vm1861_vm5, %v11494_v7, 0.0 }
 0x4b9   :  { %v5778_v50 = vadd.f32 %v11492_v11, %v5777_v38 }
 0x4ba   :  { %v11503_v63 = vpop.f32.mrf.mxu1 }
 0x4bb   :  { %13400 = vst [vmem:[#allocation63_spill] sm:$0xff] %v11503_v63  ;;  %5779 = vadd.xlane.f32.xlu0 %v5778_v50 }
 0x4bc   :  { %v4865_v47 = vpop.f32.mrf.mxu1  ;;  %v11507_v33 = vpop.xlane.xlu0 %3324 }
 0x4be   :  { %v11511_v31 = vpop.f32.mrf.mxu1 }
 0x4bf   :  { %13401 = vst [vmem:[#allocation74_spill] sm:$0xff] %v11511_v31  ;;  %v5497_v8 = vpop.xlane.xlu1 %5496 }
 0x4c0   :  { %v4868_v4 = vpop.f32.mrf.mxu1  ;;  %v4576_v59 = vpop.xlane.xlu0 %4575  ;;  %v5579_v39 = vsub.f32 %v13335_v45, %v5497_v8  ;;  %v5580_v35 = vsub.f32 %v13332_v61, %v5497_v8  ;;  %v5653_v61 = vmul.f32 1.442695, %v5583_v36 }
 0x4c1   :  { %7470 = vrcp.f32 %v4576_v59 }
 0x4c2   :  { %v11515_v42 = vpop.f32.mrf.mxu1  ;;  %7472 = vpow2.f32 %v5649_v9  ;;  %v5645_v38 = vmul.f32 1.442695, %v5579_v39  ;;  %v5647_v50 = vmul.f32 1.442695, %v5580_v35 }
 0x4c3   :  { %13402 = vst [vmem:[#allocation75_spill] sm:$0xff] %v11515_v42  ;;  %7474 = vpow2.f32 %v5651_v43  ;;  %v5509_v47 = vpop.xlane.xlu1 %5508  ;;  %v5588_v43 = vsub.f32 %v10853_v48, %v11453_v37 }
 0x4c4   :  { %v4873_v46 = vpop.f32.mrf.mxu1  ;;  %v11521_v22 = vpop.xlane.xlu0 %5719  ;;  %7476 = vpow2.f32 %v5645_v38  ;;  %v5585_v4 = vsub.f32 %v13339_v54, %v5509_v47  ;;  %v5586_v45 = vsub.f32 %v13336_v57, %v5509_v47  ;;  %v5661_v57 = vmul.f32 1.442695, %v5587_v28 }
 0x4c5   :  { %7478 = vpow2.f32 %v5647_v50  ;;  %v5663_v36 = vmul.f32 1.442695, %v5588_v43  ;;  %v5600_v47 = vsub.f32 %v10947_v1, %v11474_v51 }
 0x4c6   :  { %v11523_v0 = vpop.f32.mrf.mxu1  ;;  %v5659_v9 = vmul.f32 1.442695, %v5586_v45  ;;  %7480 = vpow2.f32 %v5655_v20  ;;  %v5657_v16 = vmul.f32 1.442695, %v5585_v4 }
 0x4c7   :  { %13403 = vst [vmem:[#allocation32_spill] sm:$0xff] %v11523_v0  ;;  %v5517_v8 = vpop.xlane.xlu1 %5516  ;;  %v13456_v0 = vld [vmem:[#allocation92_spill] sm:$0xff] }
 0x4c8   :  { %v4876_v30 = vpop.f32.mrf.mxu1  ;;  %v11529_v59 = vpop.xlane.xlu0 %3332  ;;  %v5590_v39 = vsub.f32 %v13340_v12, %v5517_v8  ;;  %7482 = vpow2.f32 %v5659_v9  ;;  %v5589_v41 = vsub.f32 %v13342_v3, %v5517_v8  ;;  %v5599_v8 = vsub.f32 %v10940_v23, %v11474_v51 }
 0x4c9   :  { %7484 = vpow2.f32 %v5653_v61  ;;  %v5591_v23 = vsub.f32 %v10875_v62, %v11459_v2  ;;  %v5604_v62 = vsub.f32 %v10977_v58, %v11479_v40  ;;  %v5603_v58 = vsub.f32 %v10968_v53, %v11479_v40 }
 0x4ca   :  { %v5667_v54 = vmul.f32 1.442695, %v5590_v39  ;;  %v5687_v39 = vmul.f32 1.442695, %v5600_v47  ;;  %v5685_v47 = vmul.f32 1.442695, %v5599_v8 }
 0x4cb   :  { %v5525_v46 = vpop.xlane.xlu1 %5524 }
 0x4cc   :  { %v4584_v35 = vpop.xlane.xlu0 %4583  ;;  %v5593_v48 = vsub.f32 %v13346_v15, %v5525_v46  ;;  %v5594_v37 = vsub.f32 %v13343_v14, %v5525_v46  ;;  %v5592_v15 = vsub.f32 %v10883_v29, %v11459_v2  ;;  %v5665_v14 = vmul.f32 1.442695, %v5589_v41 }
 0x4cd   :  { %7486 = vrcp.f32 %v4584_v35 }
 0x4ce   :  { %v7471_v38 = vpop.eup %7470  ;;  %7488 = vpow2.f32 %v5657_v16  ;;  %v11535_v50 = vpop.f32.mrf.mxu1  ;;  %v5673_v3 = vmul.f32 1.442695, %v5593_v48  ;;  %v5675_v4 = vmul.f32 1.442695, %v5594_v37  ;;  %v5671_v41 = vmul.f32 1.442695, %v5592_v15 }
 0x4cf   :  { %13404 = vst [vmem:[#allocation47_spill] sm:$0xff] %v11535_v50  ;;  %7490 = vpow2.f32 %v5667_v54  ;;  %v11540_v12 = vmul.f32 %v7471_v38, %v11448_v13  ;;  %v11546_v61 = vpop.eup %7472  ;;  %v5533_v28 = vpop.xlane.xlu1 %5532 }
 0x4d0   :  { %7492 = vpow2.f32 %v5661_v57  ;;  %v4881_v20 = vpop.f32.mrf.mxu1  ;;  %v11544_v45 = vpop.xlane.xlu0 %5727  ;;  %v5597_v1 = vsub.f32 %v13350_v34, %v5533_v28  ;;  %v5598_v9 = vsub.f32 %v13347_v27, %v5533_v28 }
 0x4d1   :  { %7494 = vpow2.f32 %v5663_v36  ;;  %v11550_v30 = vpop.eup %7474 }
 0x4d2   :  { %7496 = vpow2.f32 %v5673_v3  ;;  %v11552_v13 = vpop.f32.mrf.mxu1  ;;  %v7477_v43 = vpop.eup %7476  ;;  %v5681_v29 = vmul.f32 1.442695, %v5597_v1  ;;  %v5683_v54 = vmul.f32 1.442695, %v5598_v9  ;;  %v5669_v1 = vmul.f32 1.442695, %v5591_v23 }
 0x4d3   :  { %13405 = vst [vmem:[#allocation43_spill] sm:$0xff] %v11552_v13  ;;  %7498 = vpow2.f32 %v5675_v4  ;;  %v7479_v16 = vpop.eup %7478  ;;  %v5847_v36 = vpack.c.bf16 %v11546_v61, %v7477_v43  ;;  %v5541_v46 = vpop.xlane.xlu1 %5540  ;;  %v13417_v13 = vld [vmem:[#allocation62_spill] sm:$0xff] }
 0x4d4   :  { %v4884_v57 = vpop.f32.mrf.mxu1  ;;  %v11558_v35 = vpop.xlane.xlu0 %3340  ;;  %7500 = vpow2.f32 %v5665_v14  ;;  %v5848_v34 = vpack.c.bf16 %v11550_v30, %v7479_v16  ;;  %v5745_v27 = vsel %vm1861_vm5, %v7479_v16, 0.0  ;;  %v5602_v38 = vsub.f32 %v13351_v19, %v5541_v46 }
 0x4d5   :  { %7502 = vpow2.f32 %v5681_v29  ;;  %v5746_v48 = vadd.f32 %v7477_v43, %v5745_v27  ;;  %v11568_v37 = vpop.eup %7480  ;;  %v5601_v20 = vsub.f32 %v13353_v18, %v5541_v46  ;;  %v5695_v57 = vmul.f32 1.442695, %v5604_v62  ;;  %v13410_v62 = vld [vmem:[#allocation57_spill] sm:$0xff] }
 0x4d6   :  { %v11565_v51 = vpop.f32.mrf.mxu1  ;;  %7504 = vpow2.f32 %v5683_v54  ;;  %6610 = vmatprep.mubr.msk.bf16.mxu1 %vm1861_vm5, %v5848_v34  ;;  %v11572_v3 = vpop.eup %7482  ;;  %v5691_v4 = vmul.f32 1.442695, %v5602_v38  ;;  %v13408_v54 = vld [vmem:[#allocation60_spill] sm:$0xff]  ;;  %v5749_v27 = vsel %vm1861_vm5, %v11550_v30, 0.0  ;;  %v5693_v38 = vmul.f32 1.442695, %v5603_v58 }
 0x4d7   :  { %13406 = vst [vmem:[#allocation102_spill] sm:$0xff] %v11565_v51  ;;  %7506 = vpow2.f32 %v5687_v39  ;;  %6010 = vmatmul.mubr.bf16.gmra.mxu1 %v5847_v36  ;;  %5747 = vadd.xlane.f32.xlu1 %v5746_v48  ;;  %v11578_v15 = vpop.eup %7484  ;;  %v5549_v14 = vpop.xlane.xlu1 %5548  ;;  %v5850_v18 = vpack.c.bf16 %v11572_v3, %v11568_v37  ;;  %v5689_v8 = vmul.f32 1.442695, %v5601_v20 }
 0x4d8   :  { %v4889_v2 = vpop.f32.mrf.mxu1  ;;  %v11576_v19 = vpop.xlane.xlu0 %3384  ;;  %7508 = vpow2.f32 %v5671_v41  ;;  %v5606_v36 = vsub.f32 %v13408_v54, %v5549_v14  ;;  %v13409_v41 = vld [vmem:[#allocation58_spill] sm:$0xff]  ;;  %v5605_v48 = vsub.f32 %v13358_v60, %v5549_v14  ;;  %v5750_v14 = vadd.f32 %v11546_v61, %v5749_v27 }
 0x4d9   :  { %7510 = vpow2.f32 %v5685_v47  ;;  %6611 = vmatprep.mubr.msk.bf16.mxu1 %vm1861_vm5, %v5850_v18  ;;  %v5608_v2 = vsub.f32 %v13410_v62, %v11484_v5 }
 0x4da   :  { %v7487_v28 = vpop.eup %7486  ;;  %v11582_v9 = vpop.f32.mrf.mxu1  ;;  %7512 = vpow2.f32 %v5691_v4  ;;  %v5699_v4 = vmul.f32 1.442695, %v5606_v36  ;;  %v5697_v36 = vmul.f32 1.442695, %v5605_v48 }
 0x4db   :  { %13407 = vst [vmem:[#allocation38_spill] sm:$0xff] %v11582_v9  ;;  %v11584_v43 = vpop.eup %7488  ;;  %v11590_v16 = vmul.f32 %v7487_v28, %v11465_v49  ;;  %3356 = vadd.xlane.f32.xlu1 %v13409_v41  ;;  %v13411_v28 = vld [vmem:[#allocation26_spill] sm:$0xff]  ;;  %v5557_v30 = vpop.xlane.xlu1 %5556 }
 0x4dc   :  { %v11592_v39 = vpop.eup %7490  ;;  %v4892_v29 = vpop.f32.mrf.mxu1  ;;  %v5849_v49 = vpack.c.bf16 %v11584_v43, %v11578_v15 }
 0x4dd   :  { %v4632_v46 = vpop.xlane.xlu0 %4631  ;;  %v11596_v34 = vpop.eup %7492  ;;  %v13412_v29 = vld [vmem:[#allocation19_spill] sm:$0xff] }
 0x4de   :  { %7514 = vrcp.f32 %v4632_v46  ;;  %v11598_v53 = vpop.eup %7494  ;;  %v4895_v40 = vpop.f32.mrf.mxu1  ;;  %v5607_v54 = vsub.f32 %v13412_v29, %v11484_v5  ;;  %v5703_v46 = vmul.f32 1.442695, %v5608_v2 }
 0x4df   :  { %7516 = vpow2.f32 %v5669_v1  ;;  %v11604_v23 = vpop.eup %7496  ;;  %v5852_v47 = vpack.c.bf16 %v11592_v39, %v11598_v53  ;;  %6018 = vmatmul.mubr.bf16.gmra.mxu1 %v5849_v49  ;;  %4603 = vadd.xlane.f32.xlu1 %v13411_v28  ;;  %v13413_v49 = vld [vmem:[#allocation53_spill] sm:$0xff]  ;;  %v13414_v28 = vld [vmem:[#allocation22_spill] sm:$0xff] }
 0x4e0   :  { %7518 = vpow2.f32 %v5689_v8  ;;  %v7499_v20 = vpop.eup %7498  ;;  %v4897_v18 = vpop.f32.mrf.mxu1  ;;  %v5701_v2 = vmul.f32 1.442695, %v5607_v54 }
 0x4e1   :  { %7520 = vpow2.f32 %v5695_v57  ;;  %6612 = vmatprep.mubr.msk.bf16.mxu1 %vm1861_vm5, %v5852_v47  ;;  %v5773_v1 = vsel %vm1861_vm5, %v7499_v20, 0.0  ;;  %v11614_v58 = vpop.eup %7500  ;;  %v5610_v47 = vsub.f32 %v13413_v49, %v5557_v30 }
 0x4e2   :  { %v11616_v60 = vpop.f32.mrf.mxu1  ;;  %v11620_v8 = vadd.f32 %v11604_v23, %v5773_v1  ;;  %v11622_v57 = vpop.eup %7502  ;;  %7522 = vpow2.f32 %v5693_v38  ;;  %v5611_v38 = vsub.f32 %v13414_v28, %v11498_v26  ;;  %v5851_v5 = vpack.c.bf16 %v11614_v58, %v11596_v34 }
 0x4e3   :  { %v7505_v41 = vpop.eup %7504  ;;  %7524 = vpow2.f32 %v5699_v4  ;;  %5751 = vadd.xlane.f32.xlu1 %v5750_v14  ;;  %v13415_v4 = vld [vmem:[#allocation28_spill] sm:$0xff]  ;;  %v5707_v28 = vmul.f32 1.442695, %v5610_v47 }
 0x4e4   :  { %v4900_v62 = vpop.f32.mrf.mxu1  ;;  %v11627_v18 = vpop.eup %7506  ;;  %v5781_v61 = vsel %vm1861_vm5, %v7505_v41, 0.0  ;;  %7526 = vpow2.f32 %v5697_v36  ;;  %v5609_v14 = vsub.f32 %v13415_v4, %v5557_v30 }
 0x4e5   :  { %v11630_v27 = vpop.eup %7508  ;;  %v5782_v48 = vadd.f32 %v11622_v57, %v5781_v61  ;;  %7528 = vpow2.f32 %v5703_v46  ;;  %v13416_v62 = vld [vmem:[#allocation110_spill] sm:$0xff]  ;;  %v5785_v61 = vsel %vm1861_vm5, %v11627_v18, 0.0  ;;  %v5753_v46 = vsel %vm1861_vm5, %v11568_v37, 0.0 }
 0x4e6   :  { %v11634_v1 = vpop.f32.mrf.mxu1  ;;  %v5854_v29 = vpack.c.bf16 %v7499_v20, %v11630_v27  ;;  %v11641_v49 = vpop.eup %7510  ;;  %v5612_v9 = vsub.f32 %v13416_v62, %v11498_v26  ;;  %v5709_v20 = vmul.f32 1.442695, %v5611_v38  ;;  %7530 = vpow2.f32 %v5701_v2 }
 0x4e7   :  { %6026 = vmatmul.mubr.bf16.gmra.mxu1 %v5851_v5  ;;  %3360 = vadd.xlane.f32.xlu1 %v13417_v13  ;;  %v7513_v54 = vpop.eup %7512  ;;  %v5786_v13 = vadd.f32 %v11641_v49, %v5785_v61  ;;  %7532 = vpow2.f32 %v5707_v28 }
 0x4e8   :  { %v4905_v51 = vpop.f32.mrf.mxu1  ;;  %5783 = vadd.xlane.f32.xlu0 %v5782_v48  ;;  %6613 = vmatprep.mubr.msk.bf16.mxu1 %vm1861_vm5, %v5854_v29  ;;  %v5711_v48 = vmul.f32 1.442695, %v5612_v9  ;;  %v13418_v29 = vld [vmem:[#allocation117_spill] sm:$0xff]  ;;  %v5789_v38 = vsel %vm1861_vm5, %v7513_v54, 0.0  ;;  %7534 = vpow2.f32 %v5709_v20 }
 0x4e9   :  { %v5705_v51 = vmul.f32 1.442695, %v5609_v14  ;;  %v5856_v14 = vpack.c.bf16 %v7505_v41, %v11494_v7  ;;  %v13419_v7 = vld [vmem:[#allocation56_spill] sm:$0xff] }
 0x4ea   :  { %v11649_v36 = vpop.f32.mrf.mxu1 }
 0x4eb   :  { %v7515_v30 = vpop.eup %7514  ;;  %4607 = vadd.xlane.f32.xlu1 %v13418_v29  ;;  %7536 = vpow2.f32 %v5705_v51 }
 0x4ec   :  { %v11653_v26 = vpop.eup %7516  ;;  %v11656_v47 = vmul.f32 %v7515_v30, %v4895_v40  ;;  %v4908_v4 = vpop.f32.mrf.mxu1  ;;  %5787 = vadd.xlane.f32.xlu0 %v5786_v13  ;;  %v5754_v40 = vadd.f32 %v11578_v15, %v5753_v46  ;;  %7538 = vpow2.f32 %v5711_v48 }
 0x4ed   :  { %v11658_v5 = vpop.eup %7518  ;;  %v5853_v2 = vpack.c.bf16 %v11604_v23, %v11653_v26  ;;  %v5855_v4 = vpack.c.bf16 %v11622_v57, %v11492_v11 }
 0x4ee   :  { %v11662_v62 = vpop.eup %7520  ;;  %v11664_v37 = vpop.f32.mrf.mxu1  ;;  %v5790_v9 = vadd.f32 %v11658_v5, %v5789_v38  ;;  %v5858_v38 = vpack.c.bf16 %v7513_v54, %v11627_v18 }
 0x4ef   :  { %v11671_v28 = vpop.eup %7522  ;;  %6034 = vmatmul.mubr.bf16.gmra.mxu1 %v5853_v2  ;;  %5755 = vadd.xlane.f32.xlu1 %v5754_v40  ;;  %v5793_v30 = vsel %vm1861_vm5, %v11662_v62, 0.0  ;;  %v5757_v2 = vsel %vm1861_vm5, %v11572_v3, 0.0 }
 0x4f0   :  { %v4913_v61 = vpop.f32.mrf.mxu1  ;;  %v7525_v20 = vpop.eup %7524  ;;  %5791 = vadd.xlane.f32.xlu0 %v5790_v9  ;;  %6614 = vmatprep.mubr.msk.bf16.mxu1 %vm1861_vm5, %v5856_v14  ;;  %v5794_v15 = vadd.f32 %v11671_v28, %v5793_v30  ;;  %v13420_v14 = vld [vmem:[#allocation112_spill] sm:$0xff]  ;;  %v5758_v11 = vadd.f32 %v11584_v43, %v5757_v2 }
 0x4f1   :  { %v7527_v46 = vpop.eup %7526  ;;  %v5797_v41 = vsel %vm1861_vm5, %v7525_v20, 0.0  ;;  %v5860_v43 = vpack.c.bf16 %v7525_v20, %v11662_v62  ;;  %v13422_v20 = vld [vmem:[#allocation49_spill] sm:$0xff] }
 0x4f2   :  { %v11676_v23 = vpop.f32.mrf.mxu1  ;;  %v7529_v13 = vpop.eup %7528  ;;  %v5798_v29 = vadd.f32 %v7527_v46, %v5797_v41 }
 0x4f3   :  { %3364 = vadd.xlane.f32.xlu1 %v13419_v7  ;;  %v7531_v40 = vpop.eup %7530  ;;  %v5801_v61 = vsel %vm1861_vm5, %v7529_v13, 0.0 }
 0x4f4   :  { %v4916_v51 = vpop.f32.mrf.mxu1  ;;  %5795 = vadd.xlane.f32.xlu0 %v5794_v15  ;;  %v7533_v30 = vpop.eup %7532  ;;  %v5802_v18 = vadd.f32 %v7531_v40, %v5801_v61  ;;  %v13421_v61 = vld [vmem:[#allocation37_spill] sm:$0xff] }
 0x4f5   :  { %v7535_v57 = vpop.eup %7534  ;;  %v5805_v7 = vsel %vm1861_vm5, %v7533_v30, 0.0 }
 0x4f6   :  { %v11681_v48 = vpop.f32.mrf.mxu1 }
 0x4f7   :  { %6042 = vmatmul.mubr.bf16.gmra.mxu1 %v5855_v4  ;;  %4611 = vadd.xlane.f32.xlu1 %v13420_v14 }
 0x4f8   :  { %v4921_v9 = vpop.f32.mrf.mxu1  ;;  %5799 = vadd.xlane.f32.xlu0 %v5798_v29  ;;  %6615 = vmatprep.mubr.msk.bf16.mxu1 %vm1861_vm5, %v5858_v38  ;;  %v7537_v54 = vpop.eup %7536  ;;  %v5857_v29 = vpack.c.bf16 %v11658_v5, %v11641_v49  ;;  %v5761_v5 = vsel %vm1861_vm5, %v11598_v53, 0.0 }
 0x4f9   :  { %v7539_v41 = vpop.eup %7538  ;;  %v11701_v38 = vpop.xlane.xlu1 %3320  ;;  %v5806_v9 = vadd.f32 %v7537_v54, %v5805_v7 }
 0x4fa   :  { %v11691_v15 = vpop.f32.mrf.mxu1  ;;  %v11694_v3 = vpop.xlane.xlu0 %5735 }
 0x4fb   :  { %5759 = vadd.xlane.f32.xlu1 %v5758_v11  ;;  %v5809_v11 = vsel %vm1958_vm3, %v7535_v57, 0.0 }
 0x4fc   :  { %v4924_v51 = vpop.f32.mrf.mxu1  ;;  %5803 = vadd.xlane.f32.xlu0 %v5802_v18  ;;  %v5810_v18 = vsel %vm1960_vm6, %v7539_v41, 0.0 }
 0x4fd   :  { %v5811_v49 = vadd.f32 %v5810_v18, %v5809_v11  ;;  %v13423_v11 = vld [vmem:[#allocation69_spill] sm:$0xff]  ;;  %v5861_v18 = vpack.c.bf16 %v7537_v54, %v7531_v40  ;;  %v5863_v54 = vpack.c.bf16 %v7535_v57, %v7535_v57  ;;  %v13427_v57 = vld [vmem:[#allocation54_spill] sm:$0xff] }
 0x4fe   :  { %v11697_v4 = vpop.f32.mrf.mxu1  ;;  %v11704_v14 = vpop.xlane.xlu0 %3388 }
 0x4ff   :  { %6050 = vmatmul.mubr.bf16.gmra.mxu1 %v5857_v29  ;;  %3368 = vadd.xlane.f32.xlu1 %v13421_v61  ;;  %v5859_v29 = vpack.c.bf16 %v7527_v46, %v11671_v28  ;;  %v5762_v61 = vadd.f32 %v11596_v34, %v5761_v5  ;;  %v5765_v28 = vsel %vm1861_vm5, %v11592_v39, 0.0  ;;  %v13424_v34 = vld [vmem:[#allocation115_spill] sm:$0xff] }
 0x500   :  { %v4929_v2 = vpop.f32.mrf.mxu1  ;;  %5807 = vadd.xlane.f32.xlu0 %v5806_v9  ;;  %6616 = vmatprep.mubr.msk.bf16.mxu1 %vm1861_vm5, %v5860_v43  ;;  %v5862_v9 = vpack.c.bf16 %v7533_v30, %v7529_v13 }
 0x501   :  { %v11713_v2 = vpop.xlane.xlu1 %5715 }
 0x502   :  { %v4930_v51 = vpop.f32.mrf.mxu1  ;;  %v4636_v62 = vpop.xlane.xlu0 %4635 }
 0x503   :  { %4615 = vadd.xlane.f32.xlu1 %v13422_v20  ;;  %7540 = vrcp.f32 %v4636_v62  ;;  %v5864_v51 = vpack.c.bf16 %v7539_v41, %v7539_v41  ;;  %v5769_v20 = vsel %vm1861_vm5, %v11630_v27, 0.0 }
 0x504   :  { %v4931_v7 = vpop.f32.mrf.mxu1  ;;  %5812 = vadd.xlane.f32.xlu0 %v5811_v49  ;;  %v5766_v49 = vadd.f32 %v11614_v58, %v5765_v28  ;;  %v13429_v28 = vld [vmem:[#allocation67_spill] sm:$0xff] }
 0x505   :  { %v11720_v53 = vpop.xlane.xlu1 %4571  ;;  %v13425_v7 = vld [vmem:[#allocation52_spill] sm:$0xff] }
 0x506   :  { %v11717_v50 = vpop.xlane.xlu0 %3392 }
 0x507   :  { %6058 = vmatmul.mubr.bf16.gmra.mxu1 %v5859_v29  ;;  %5763 = vadd.xlane.f32.xlu1 %v5762_v61  ;;  %v13426_v29 = vld [vmem:[#allocation121_spill] sm:$0xff] }
 0x508   :  { %6617 = vmatprep.mubr.msk.bf16.mxu1 %vm1861_vm5, %v5862_v9  ;;  %v5770_v9 = vadd.f32 %v11653_v26, %v5769_v20 }
 0x509   :  { %v11728_v13 = vpop.xlane.xlu1 %3328 }
 0x50a   :  { %v4640_v43 = vpop.xlane.xlu0 %4639 }
 0x50b   :  { %3372 = vadd.xlane.f32.xlu1 %v13423_v11  ;;  %7542 = vrcp.f32 %v4640_v43 }
 0x50d   :  { %v11735_v39 = vpop.xlane.xlu1 %5723 }
 0x50e   :  { %v11725_v46 = vpop.xlane.xlu0 %3396 }
 0x50f   :  { %4619 = vadd.xlane.f32.xlu1 %v13424_v34  ;;  %6066 = vmatmul.mubr.bf16.gmra.mxu1 %v5861_v18  ;;  %v13428_v18 = vld [vmem:[#allocation61_spill] sm:$0xff] }
 0x510   :  { %6618 = vmatprep.mubr.msk.bf16.mxu1 %vm1861_vm5, %v5864_v51  ;;  %v7541_v30 = vpop.eup %7540  ;;  %v13430_v34 = vld [vmem:[#allocation65_spill] sm:$0xff] }
 0x511   :  { %v11733_v5 = vmul.f32 %v7541_v30, %v11616_v60  ;;  %v11746_v61 = vpop.xlane.xlu1 %4579 }
 0x512   :  { %v4644_v40 = vpop.xlane.xlu0 %4643 }
 0x513   :  { %5767 = vadd.xlane.f32.xlu1 %v5766_v49  ;;  %7544 = vrcp.f32 %v4644_v40  ;;  %v13432_v49 = vld [vmem:[#allocation66_spill] sm:$0xff] }
 0x515   :  { %v11753_v27 = vpop.xlane.xlu1 %3336 }
 0x516   :  { %v11737_v41 = vpop.xlane.xlu0 %3400 }
 0x517   :  { %3376 = vadd.xlane.f32.xlu1 %v13425_v7  ;;  %6074 = vmatmul.mubr.bf16.gmra.mxu1 %v5863_v54  ;;  %v13433_v7 = vld [vmem:[#allocation89_spill] sm:$0xff] }
 0x518   :  { %v7543_v62 = vpop.eup %7542 }
 0x519   :  { %v11743_v58 = vmul.f32 %v7543_v62, %v11634_v1  ;;  %v11761_v26 = vpop.xlane.xlu1 %5731  ;;  %v13434_v62 = vld [vmem:[#allocation70_spill] sm:$0xff] }
 0x51a   :  { %v4648_v60 = vpop.xlane.xlu0 %4647  ;;  %13431 = vst [vmem:[#allocation104_spill] sm:$0xff] %v11761_v26 }
 0x51b   :  { %4623 = vadd.xlane.f32.xlu1 %v13426_v29  ;;  %7546 = vrcp.f32 %v4648_v60 }
 0x51c   :  { %7548 = vrcp.f32 %v13427_v57  ;;  %v13435_v57 = vld [vmem:[#allocation94_spill] sm:$0xff] }
 0x51d   :  { %7550 = vrcp.f32 %v13428_v18  ;;  %v11769_v60 = vpop.xlane.xlu1 %4587  ;;  %v13436_v18 = vld [vmem:[#allocation33_spill] sm:$0xff] }
 0x51e   :  { %v11750_v43 = vpop.xlane.xlu0 %3404 }
 0x51f   :  { %5771 = vadd.xlane.f32.xlu1 %v5770_v9 }
 0x520   :  { %v7545_v11 = vpop.eup %7544 }
 0x521   :  { %v11756_v1 = vmul.f32 %v7545_v11, %v11649_v36 }
 0x522   :  { %v4652_v51 = vpop.xlane.xlu0 %4651 }
 0x523   :  { %3380 = vadd.xlane.f32.xlu1 %v13429_v28  ;;  %7552 = vrcp.f32 %v4652_v51  ;;  %v7755_v28 = vld [vmem:[%s12865_s0 + $0x8] sm:$0xff] }
 0x524   :  { %7554 = vrcp.f32 %v13430_v34 }
 0x525   :  { %7556 = vrcp.f32 %v13432_v49 }
 0x526   :  { %7558 = vrcp.f32 %v13434_v62  ;;  %v7756_v62 = vld [vmem:[%s12865_s0 + $0x10] sm:$0xff] }
 0x527   :  { %5775 = vadd.xlane.f32.xlu1 %v11620_v8  ;;  %v7754_v8 = vld [vmem:[%s12865_s0] sm:$0xff]  ;;  %7560 = vrcp.f32 %v13436_v18 }
 0x528   :  { %v7547_v30 = vpop.eup %7546 }
 0x529   :  { %v7549_v40 = vpop.eup %7548  ;;  %v11765_v54 = vmul.f32 %v7547_v30, %v11664_v37  ;;  %v13437_v30 = vld [vmem:[#allocation11_spill] sm:$0xff] }
 0x52a   :  { %v2497_v36 = vmul.f32 %v7549_v40, %v13433_v7  ;;  %v7551_v20 = vpop.eup %7550  ;;  %v11783_v40 = vpop.xlane.xlu1 %3344  ;;  %v13438_v7 = vld [vmem:[#allocation27_spill] sm:$0xff] }
 0x52b   :  { %v2498_v9 = vmul.f32 %v7551_v20, %v13435_v57  ;;  %7562 = vrcp.f32 %v13438_v7  ;;  %v7758_v7 = vld [vmem:[%s12865_s0 + $0x20] sm:$0xff] }
 0x52c   :  { %v2522_v29 = vadd.f32 %v7754_v8, %v2497_v36 }
 0x52d   :  { %v2523_v34 = vadd.f32 %v7755_v28, %v2498_v9 }
 0x52e   :  { %v11791_v9 = vpop.xlane.xlu1 %4591 }
 0x530   :  { %v7553_v11 = vpop.eup %7552 }
 0x531   :  { %2547 = vxpose.xlu0.b32.start [1/16] (narrow) %v2522_v29, 32  ;;  %v7555_v37 = vpop.eup %7554  ;;  %v11777_v51 = vmul.f32 %v7553_v11, %v11676_v23  ;;  %v13439_v23 = vld [vmem:[#allocation12_spill] sm:$0xff]  ;;  %v13440_v29 = vld [vmem:[#allocation77_spill] sm:$0xff] }
 0x532   :  { %v2499_v49 = vmul.f32 %v7555_v37, %v13437_v30  ;;  %v7557_v36 = vpop.eup %7556  ;;  %7564 = vrcp.f32 %v13440_v29  ;;  %v7757_v11 = vld [vmem:[%s12865_s0 + $0x18] sm:$0xff]  ;;  %v13441_v37 = vld [vmem:[#allocation14_spill] sm:$0xff] }
 0x533   :  { %v2500_v8 = vmul.f32 %v7557_v36, %v13439_v23  ;;  %v7559_v57 = vpop.eup %7558  ;;  %v13444_v23 = vld [vmem:[#allocation79_spill] sm:$0xff] }
 0x534   :  { %v2524_v20 = vadd.f32 %v7756_v62, %v2499_v49  ;;  %v2501_v28 = vmul.f32 %v7559_v57, %v13441_v37  ;;  %v7561_v30 = vpop.eup %7560  ;;  %v11798_v49 = vpop.xlane.xlu1 %5739  ;;  %v13443_v62 = vld [vmem:[#allocation15_spill] sm:$0xff] }
 0x535   :  { %2548 = vxpose.xlu0.b32.cont [2/16] (narrow) %v2523_v34, 32  ;;  %v2525_v18 = vadd.f32 %v7757_v11, %v2500_v8  ;;  %v13442_v34 = vld [vmem:[#allocation59_spill] sm:$0xff]  ;;  %v7759_v8 = vld [vmem:[%s12865_s0 + $0x28] sm:$0xff]  ;;  %v13445_v11 = vld [vmem:[#allocation68_spill] sm:$0xff] }
 0x536   :  { %7566 = vrcp.f32 %v13442_v34  ;;  %v2526_v36 = vadd.f32 %v7758_v7, %v2501_v28  ;;  %v13446_v34 = vld [vmem:[#allocation83_spill] sm:$0xff] }
 0x537   :  { %7568 = vrcp.f32 %v13444_v23  ;;  %v11819_v23 = vpop.xlane.xlu0 %3408 }
 0x538   :  { %v7563_v29 = vpop.eup %7562  ;;  %7570 = vrcp.f32 %v11576_v19  ;;  %v11810_v37 = vpop.xlane.xlu1 %3348 }
 0x539   :  { %2549 = vxpose.xlu0.b32.cont [3/16] (narrow) %v2524_v20, 32  ;;  %v2502_v20 = vmul.f32 %v7561_v30, %v13443_v62  ;;  %7572 = vrcp.f32 %v13446_v34  ;;  %v7760_v30 = vld [vmem:[%s12865_s0 + $0x30] sm:$0xff] }
 0x53a   :  { %7574 = vrcp.f32 %v11704_v14 }
 0x53b   :  { %v2527_v57 = vadd.f32 %v7759_v8, %v2502_v20  ;;  %v13448_v20 = vld [vmem:[#allocation82_spill] sm:$0xff]  ;;  %v7761_v8 = vld [vmem:[%s12865_s0 + $0x38] sm:$0xff] }
 0x53c   :  { %7576 = vrcp.f32 %v13448_v20  ;;  %v11833_v20 = vpop.xlane.xlu0 %4655 }
 0x53d   :  { %2550 = vxpose.xlu0.b32.cont [4/16] (narrow) %v2525_v18, 32  ;;  %v2503_v18 = vmul.f32 %v7563_v29, %v13445_v11  ;;  %v11821_v29 = vpop.xlane.xlu1 %4595  ;;  %v13449_v11 = vld [vmem:[#allocation64_spill] sm:$0xff]  ;;  %7578 = vrcp.f32 %v11717_v50  ;;  %v11842_v50 = vld [vmem:[%s12865_s0 + $0x140] sm:$0xff] }
 0x53e   :  { %13453 = vst [vmem:[#allocation41_spill] sm:$0xff] %v11842_v50 }
 0x53f   :  { %v7565_v28 = vpop.eup %7564  ;;  %v2528_v7 = vadd.f32 %v7760_v30, %v2503_v18  ;;  %v13450_v18 = vld [vmem:[#allocation86_spill] sm:$0xff] }
 0x540   :  { %7580 = vrcp.f32 %v13450_v18 }
 0x541   :  { %2551 = vxpose.xlu0.b32.cont [5/16] (narrow) %v2526_v36, 32  ;;  %v13447_v36 = vld [vmem:[#allocation17_spill] sm:$0xff]  ;;  %7582 = vrcp.f32 %v11725_v46  ;;  %v7765_v46 = vld [vmem:[%s12865_s0 + $0x48] sm:$0xff] }
 0x542   :  { %v2504_v62 = vmul.f32 %v7565_v28, %v13447_v36  ;;  %v7762_v28 = vld [vmem:[%s12865_s0 + $0x40] sm:$0xff] }
 0x543   :  { %v7567_v19 = vpop.eup %7566 }
 0x544   :  { %v2505_v34 = vmul.f32 %v7567_v19, %v13449_v11  ;;  %v7569_v14 = vpop.eup %7568  ;;  %v7764_v11 = vld [vmem:[%s12865_s0 + $0x148] sm:$0xff] }
 0x545   :  { %2552 = vxpose.xlu0.b32.cont [6/16] (narrow) %v2527_v57, 32  ;;  %v2529_v57 = vadd.f32 %v7761_v8, %v2504_v62  ;;  %v11836_v62 = vpop.xlane.xlu1 %5743  ;;  %v7571_v19 = vpop.eup %7570  ;;  %v13452_v8 = vld [vmem:[#allocation88_spill] sm:$0xff] }
 0x546   :  { %v2530_v30 = vadd.f32 %v7762_v28, %v2505_v34  ;;  %7584 = vrcp.f32 %v13452_v8  ;;  %v3769_v34 = vrot.slane %v7764_v11, 4  ;;  %v7573_v18 = vpop.eup %7572  ;;  %v13454_v28 = vld [vmem:[#allocation21_spill] sm:$0xff]  ;;  %v3702_v8 = vmul.f32 %v7571_v19, %v11381_v21  ;;  %v3413_v11 = vpop.xlane.xlu0 %3412  ;;  %v7767_v21 = vld [vmem:[%s12865_s0 + $0x50] sm:$0xff] }
 0x547   :  { %7586 = vrcp.f32 %v11544_v45  ;;  %v13457_v45 = vrot.slane %v11842_v50, 4 }
 0x548   :  { %7588 = vrcp.f32 %v11737_v41  ;;  %v13458_v41 = vld [vmem:[#allocation29_spill] sm:$0xff] }
 0x549   :  { %2553 = vxpose.xlu0.b32.cont [7/16] (narrow) %v2528_v7, 32  ;;  %v13451_v7 = vld [vmem:[#allocation24_spill] sm:$0xff]  ;;  %7590 = vrcp.f32 %v13456_v0  ;;  %v3770_v31 = vsel %vm1958_vm3, %v13457_v45, %v3769_v34 }
 0x54a   :  { %v2506_v36 = vmul.f32 %v7569_v14, %v13451_v7  ;;  %7592 = vrcp.f32 %v11750_v43  ;;  %v13461_v43 = vld [vmem:[#allocation71_spill] sm:$0xff] }
 0x54b   :  { %7594 = vrcp.f32 %v13460_v6 }
 0x54c   :  { %v2531_v14 = vadd.f32 %v7765_v46, %v2506_v36  ;;  %v7766_v36 = vld [vmem:[%s12865_s0 + $0x150] sm:$0xff]  ;;  %7596 = vrcp.f32 %v11694_v3 }
 0x54d   :  { %2554 = vxpose.xlu0.b32.cont [8/16] (narrow) %v2529_v57, 32  ;;  %v7575_v57 = vpop.eup %7574  ;;  %7598 = vrcp.f32 %v11819_v23 }
 0x54e   :  { %v7577_v46 = vpop.eup %7576  ;;  %v3703_v45 = vmul.f32 %v7575_v57, %v11383_v56  ;;  %v7769_v56 = vld [vmem:[%s12865_s0 + $0x58] sm:$0xff]  ;;  %v11884_v57 = vpop.xlane.xlu0 %4659 }
 0x54f   :  { %v2508_v19 = vmul.f32 %v7577_v46, %v13458_v41  ;;  %v7579_v63 = vpop.eup %7578  ;;  %v13463_v41 = vld [vmem:[#allocation105_spill] sm:$0xff] }
 0x550   :  { %v7581_v46 = vpop.eup %7580 }
 0x551   :  { %2555 = vxpose.xlu0.b32.cont [9/16] (narrow) %v2530_v30, 32  ;;  %v2507_v30 = vmul.f32 %v7573_v18, %v13454_v28  ;;  %v3771_v18 = vrot.slane %v7766_v36, 4  ;;  %v11864_v28 = vpop.xlane.xlu1 %3352  ;;  %v2509_v6 = vmul.f32 %v7581_v46, %v13461_v43  ;;  %v7583_v3 = vpop.eup %7582  ;;  %v7770_v46 = vld [vmem:[%s12865_s0 + $0x160] sm:$0xff] }
 0x552   :  { %v11853_v7 = vpop.f32.mrf.mxu1 }
 0x553   :  { %13455 = vst [vmem:[#allocation76_spill] sm:$0xff] %v11853_v7  ;;  %v2532_v0 = vadd.f32 %v7767_v21, %v2507_v30  ;;  %v3772_v26 = vsel %vm1958_vm3, %v3769_v34, %v3771_v18  ;;  %v7768_v30 = vld [vmem:[%s12865_s0 + $0x158] sm:$0xff]  ;;  %v7585_v43 = vpop.eup %7584 }
 0x554   :  { %v5981_v42 = vpop.f32.mrf.mxu1  ;;  %v3773_v21 = vrot.slane %v7768_v30, 4  ;;  %v7587_v23 = vpop.eup %7586 }
 0x555   :  { %2556 = vxpose.xlu0.b32.cont [10/16] (narrow) %v2531_v14, 32  ;;  %v3826_v14 = vadd.f32 %v3770_v31, %v3702_v8  ;;  %v2533_v31 = vadd.f32 %v7769_v56, %v2508_v19  ;;  %v11889_v34 = vpop.xlane.xlu1 %4599  ;;  %v3775_v56 = vrot.slane %v7770_v46, 4  ;;  %v13467_v46 = vld [vmem:[#allocation101_spill] sm:$0xff] }
 0x556   :  { %v11870_v42 = vpop.f32.mrf.mxu1  ;;  %v3774_v19 = vsel %vm1958_vm3, %v3771_v18, %v3773_v21 }
 0x557   :  { %13459 = vst [vmem:[#allocation8_spill] sm:$0xff] %v11870_v42  ;;  %v7589_v42 = vpop.eup %7588  ;;  %v3776_v24 = vsel %vm1958_vm3, %v3773_v21, %v3775_v56 }
 0x558   :  { %v5984_v36 = vpop.f32.mrf.mxu1 }
 0x559   :  { %2557 = vxpose.xlu0.b32.cont [11/16] (narrow) %v2532_v0, 32  ;;  %v3827_v0 = vadd.f32 %v3772_v26, %v3703_v45  ;;  %v3704_v36 = vmul.f32 %v7579_v63, %v13463_v41  ;;  %v7771_v63 = vld [vmem:[%s12865_s0 + $0x60] sm:$0xff]  ;;  %v13465_v45 = vld [vmem:[#allocation34_spill] sm:$0xff] }
 0x55a   :  { %3867 = vxpose.xlu1.b32.start [1/9] (short) (narrow) %v3826_v14, 32  ;;  %v11886_v8 = vpop.f32.mrf.mxu1  ;;  %v13464_v14 = vld [vmem:[#allocation7_spill] sm:$0xff]  ;;  %v2534_v26 = vadd.f32 %v7771_v63, %v2509_v6  ;;  %v7772_v6 = vld [vmem:[%s12865_s0 + $0x168] sm:$0xff] }
 0x55b   :  { %13462 = vst [vmem:[#allocation44_spill] sm:$0xff] %v11886_v8  ;;  %7600 = vrcp.f32 %v13464_v14  ;;  %v3705_v8 = vmul.f32 %v7583_v3, %v13467_v46 }
 0x55c   :  { %v5989_v30 = vpop.f32.mrf.mxu1  ;;  %7602 = vrcp.f32 %v11798_v49  ;;  %v13468_v49 = vld [vmem:[#allocation10_spill] sm:$0xff] }
 0x55d   :  { %2558 = vxpose.xlu0.b32.cont [12/16] (narrow) %v2533_v31, 32  ;;  %v2510_v31 = vmul.f32 %v7585_v43, %v13465_v45  ;;  %7604 = vrcp.f32 %v3413_v11  ;;  %v3828_v30 = vadd.f32 %v3774_v19, %v3704_v36  ;;  %v3777_v11 = vrot.slane %v7772_v6, 4  ;;  %v7591_v43 = vpop.eup %7590  ;;  %v7773_v36 = vld [vmem:[%s12865_s0 + $0x68] sm:$0xff]  ;;  %v13469_v19 = vld [vmem:[#allocation113_spill] sm:$0xff] }
 0x55e   :  { %3868 = vxpose.xlu1.b32.cont [2/9] (short) (narrow) %v3827_v0, 32  ;;  %v5990_v41 = vpop.f32.mrf.mxu1  ;;  %7606 = vrcp.f32 %v13468_v49  ;;  %v3418_v0 = vpop.xlane.xlu0 %3417  ;;  %v3829_v21 = vadd.f32 %v3776_v24, %v3705_v8  ;;  %v7775_v24 = vld [vmem:[%s12865_s0 + $0x70] sm:$0xff] }
 0x55f   :  { %v11902_v18 = vmul.f32 %v7587_v23, %v5990_v41  ;;  %7608 = vrcp.f32 %v11836_v62  ;;  %v2535_v3 = vadd.f32 %v7773_v36, %v2510_v31  ;;  %v2511_v23 = vmul.f32 %v7591_v43, %v13469_v19  ;;  %v7593_v45 = vpop.eup %7592  ;;  %v13471_v41 = vld [vmem:[#allocation100_spill] sm:$0xff]  ;;  %v7774_v31 = vld [vmem:[%s12865_s0 + $0x170] sm:$0xff] }
 0x560   :  { %v11904_v14 = vpop.xlane.xlu1 %5747  ;;  %v5992_v7 = vpop.f32.mrf.mxu1  ;;  %7610 = vrcp.f32 %v3418_v0  ;;  %v3779_v46 = vrot.slane %v7774_v31, 4 }
 0x561   :  { %13466 = vst [vmem:[#allocation78_spill] sm:$0xff] %v11902_v18  ;;  %2559 = vxpose.xlu0.b32.cont [13/16] (narrow) %v2534_v26, 32  ;;  %v3706_v26 = vmul.f32 %v7589_v42, %v11405_v32  ;;  %7612 = vrcp.f32 %v13471_v41  ;;  %v7595_v49 = vpop.eup %7594  ;;  %v2536_v32 = vadd.f32 %v7775_v24, %v2511_v23  ;;  %v13472_v42 = vld [vmem:[#allocation114_spill] sm:$0xff]  ;;  %v7776_v23 = vld [vmem:[%s12865_s0 + $0x178] sm:$0xff] }
 0x562   :  { %3869 = vxpose.xlu1.b32.cont [3/9] (short) (narrow) %v3828_v30, 32  ;;  %v11917_v63 = vpop.f32.mrf.mxu1  ;;  %v3778_v30 = vsel %vm1958_vm3, %v3775_v56, %v3777_v11  ;;  %v7597_v0 = vpop.eup %7596  ;;  %v2512_v8 = vmul.f32 %v7595_v49, %v13472_v42  ;;  %v3780_v31 = vsel %vm1958_vm3, %v3777_v11, %v3779_v46  ;;  %v3781_v49 = vrot.slane %v7776_v23, 4  ;;  %v13479_v23 = vld [vmem:[#allocation16_spill] sm:$0xff] }
 0x563   :  { %13470 = vst [vmem:[#allocation107_spill] sm:$0xff] %v11917_v63  ;;  %v3830_v56 = vadd.f32 %v3778_v30, %v3706_v26  ;;  %v7599_v41 = vpop.eup %7598  ;;  %v7777_v26 = vld [vmem:[%s12865_s0 + $0x78] sm:$0xff]  ;;  %v13476_v30 = vld [vmem:[#allocation31_spill] sm:$0xff] }
 0x564   :  { %v11919_v7 = vpop.xlane.xlu1 %3356  ;;  %v5997_v62 = vpop.f32.mrf.mxu1  ;;  %v3782_v63 = vsel %vm1958_vm3, %v3779_v46, %v3781_v49 }
 0x565   :  { %2560 = vxpose.xlu0.b32.cont [14/16] (narrow) %v2535_v3, 32  ;;  %v13474_v3 = vld [vmem:[#allocation72_spill] sm:$0xff]  ;;  %v13475_v62 = vld [vmem:[#allocation103_spill] sm:$0xff] }
 0x566   :  { %3870 = vxpose.xlu1.b32.cont [4/9] (short) (narrow) %v3829_v21, 32  ;;  %v5998_v6 = vpop.f32.mrf.mxu1  ;;  %v3707_v19 = vmul.f32 %v7593_v45, %v13474_v3  ;;  %7614 = vrcp.f32 %v13475_v62  ;;  %v2537_v45 = vadd.f32 %v7777_v26, %v2512_v8  ;;  %v13478_v62 = vld [vmem:[#allocation9_spill] sm:$0xff] }
 0x567   :  { %v11931_v43 = vmul.f32 %v7597_v0, %v5998_v6  ;;  %7616 = vrcp.f32 %v13479_v23  ;;  %v7778_v8 = vld [vmem:[%s12865_s0 + $0x180] sm:$0xff] }
 0x568   :  { %v11933_v36 = vpop.xlane.xlu1 %4603  ;;  %v6000_v21 = vpop.f32.mrf.mxu1  ;;  %v3831_v11 = vadd.f32 %v3780_v31, %v3707_v19  ;;  %v7779_v19 = vld [vmem:[%s12865_s0 + $0x80] sm:$0xff]  ;;  %v13480_v31 = vld [vmem:[#allocation116_spill] sm:$0xff] }
 0x569   :  { %13473 = vst [vmem:[#allocation81_spill] sm:$0xff] %v11931_v43  ;;  %2561 = vxpose.xlu0.b32.cont [15/16] (narrow) %v2536_v32, 32  ;;  %v7601_v24 = vpop.eup %7600  ;;  %v3708_v21 = vmul.f32 %v7599_v41, %v13478_v62 }
 0x56a   :  { %3871 = vxpose.xlu1.b32.cont [5/9] (short) (narrow) %v3830_v56, 32  ;;  %v7603_v0 = vpop.eup %7602  ;;  %v2513_v42 = vmul.f32 %v7601_v24, %v13476_v30  ;;  %v6003_v6 = vpop.f32.mrf.mxu1  ;;  %v3783_v24 = vrot.slane %v7778_v8, 4 }
 0x56b   :  { %v11945_v32 = vmul.f32 %v7603_v0, %v6003_v6  ;;  %v7605_v43 = vpop.eup %7604  ;;  %v11959_v6 = vpop.xlane.xlu0 %4664  ;;  %v3832_v23 = vadd.f32 %v3782_v63, %v3708_v21  ;;  %v13486_v21 = vld [vmem:[#allocation108_spill] sm:$0xff] }
 0x56c   :  { %v11947_v3 = vpop.xlane.xlu1 %5751  ;;  %v6005_v56 = vpop.f32.mrf.mxu1  ;;  %v2538_v41 = vadd.f32 %v7779_v19, %v2513_v42  ;;  %v3784_v50 = vsel %vm1958_vm3, %v3781_v49, %v3783_v24  ;;  %v13484_v19 = vld [vmem:[#allocation118_spill] sm:$0xff]  ;;  %v7781_v49 = vld [vmem:[%s12865_s0 + $0x90] sm:$0xff] }
 0x56d   :  { %13477 = vst [vmem:[#allocation84_spill] sm:$0xff] %v11945_v32  ;;  %2562 = vxpose.xlu0.b32.end [16/16] (narrow) %v2537_v45, 32  ;;  %v7607_v26 = vpop.eup %7606  ;;  %v13482_v56 = vld [vmem:[#allocation36_spill] sm:$0xff] }
 0x56e   :  { %3872 = vxpose.xlu1.b32.cont [6/9] (short) (narrow) %v3831_v11, 32  ;;  %v7609_v0 = vpop.eup %7608  ;;  %v2514_v30 = vmul.f32 %v7607_v26, %v13480_v31  ;;  %v6006_v45 = vpop.f32.mrf.mxu1  ;;  %v3709_v8 = vmul.f32 %v7605_v43, %v13482_v56  ;;  %v13483_v11 = vld [vmem:[#allocation106_spill] sm:$0xff] }
 0x56f   :  { %v11961_v62 = vmul.f32 %v7609_v0, %v6006_v45  ;;  %v7611_v32 = vpop.eup %7610  ;;  %7618 = vrcp.f32 %v13483_v11  ;;  %v7780_v26 = vld [vmem:[%s12865_s0 + $0x88] sm:$0xff] }
 0x570   :  { %v11963_v46 = vpop.xlane.xlu1 %3360  ;;  %v6008_v18 = vpop.f32.mrf.mxu1  ;;  %v2539_v0 = vadd.f32 %v7780_v26, %v2514_v30  ;;  %v3833_v63 = vadd.f32 %v3784_v50, %v3709_v8  ;;  %v3710_v43 = vmul.f32 %v7611_v32, %v11421_v44  ;;  %7620 = vrcp.f32 %v13486_v21  ;;  %v13488_v30 = vld [vmem:[#allocation119_spill] sm:$0xff]  ;;  %v7782_v50 = vld [vmem:[%s12865_s0 + $0x98] sm:$0xff]  ;;  %v13490_v8 = vld [vmem:[#allocation45_spill] sm:$0xff] }
 0x571   :  { %13481 = vst [vmem:[#allocation25_spill] sm:$0xff] %v11961_v62  ;;  %2579 = vxpose.xlu0.b32.start [1/9] (short) (narrow) %v2538_v41, 32  ;;  %v7613_v42 = vpop.eup %7612  ;;  %v11976_v41 = vpop.xlane.xlu0 %4627  ;;  %v13489_v26 = vld [vmem:[#allocation111_spill] sm:$0xff] }
 0x572   :  { %3873 = vxpose.xlu1.b32.cont [7/9] (short) (narrow) %v3832_v23, 32  ;;  %v2515_v31 = vmul.f32 %v7613_v42, %v13484_v19  ;;  %13487 = vst [vmem:[#allocation95_spill] sm:$0xff] %v11976_v41  ;;  %v3834_v42 = vadd.f32 %v3783_v24, %v3710_v43  ;;  %7622 = vrcp.f32 %v13489_v26  ;;  %v7783_v43 = vld [vmem:[%s12865_s0 + $0xa0] sm:$0xff] }
 0x573   :  { %v7615_v18 = vpop.eup %7614 }
 0x574   :  { %v11972_v45 = vpop.xlane.xlu1 %4607  ;;  %v2540_v23 = vadd.f32 %v7781_v49, %v2515_v31  ;;  %v2516_v56 = vmul.f32 %v7615_v18, %v13488_v30  ;;  %v7617_v44 = vpop.eup %7616  ;;  %v13491_v31 = vld [vmem:[#allocation50_spill] sm:$0xff]  ;;  %v13492_v18 = vld [vmem:[#allocation120_spill] sm:$0xff] }
 0x575   :  { %13485 = vst [vmem:[#allocation90_spill] sm:$0xff] %v11972_v45  ;;  %2580 = vxpose.xlu0.b32.cont [2/9] (short) (narrow) %v2539_v0, 32  ;;  %v2517_v0 = vmul.f32 %v7617_v44, %v13490_v8  ;;  %v11987_v19 = vpop.xlane.xlu0 %5779  ;;  %7624 = vrcp.f32 %v13491_v31  ;;  %v13494_v44 = vld [vmem:[#allocation55_spill] sm:$0xff] }
 0x576   :  { %3874 = vxpose.xlu1.b32.cont [8/9] (short) (narrow) %v3833_v63, 32  ;;  %v2541_v32 = vadd.f32 %v7782_v50, %v2516_v56  ;;  %v7785_v31 = vld [vmem:[%s12865_s0 + $0xb0] sm:$0xff]  ;;  %7626 = vrcp.f32 %v11904_v14 }
 0x577   :  { %v2542_v21 = vadd.f32 %v7783_v43, %v2517_v0  ;;  %v13495_v43 = vld [vmem:[#allocation40_spill] sm:$0xff]  ;;  %7628 = vrcp.f32 %v11947_v3 }
 0x578   :  { %v5756_v11 = vpop.xlane.xlu1 %5755 }
 0x579   :  { %2581 = vxpose.xlu0.b32.cont [3/9] (short) (narrow) %v2540_v23, 32  ;;  %v11996_v23 = vpop.xlane.xlu0 %5783  ;;  %7630 = vrcp.f32 %v5756_v11  ;;  %v7789_v11 = vld [vmem:[%s12865_s0 + $0x210] sm:$0xff] }
 0x57a   :  { %3875 = vxpose.xlu1.b32.end [9/9] (short) (narrow) %v3834_v42, 32  ;;  %v7784_v42 = vld [vmem:[%s12865_s0 + $0xa8] sm:$0xff] }
 0x57c   :  { %v11989_v63 = vpop.xlane.xlu1 %3364  ;;  %v7619_v24 = vpop.eup %7618 }
 0x57d   :  { %2582 = vxpose.xlu0.b32.cont [4/9] (short) (narrow) %v2541_v32, 32  ;;  %v2518_v49 = vmul.f32 %v7619_v24, %v13492_v18  ;;  %v7621_v56 = vpop.eup %7620  ;;  %v12004_v8 = vpop.xlane.xlu0 %5787 }
 0x57e   :  { %v2519_v50 = vmul.f32 %v7621_v56, %v13494_v44 }
 0x57f   :  { %v2543_v26 = vadd.f32 %v7784_v42, %v2518_v49  ;;  %v7623_v0 = vpop.eup %7622  ;;  %v7786_v49 = vld [vmem:[%s12865_s0 + $0xb8] sm:$0xff]  ;;  %v13496_v42 = vld [vmem:[#allocation5_spill] sm:$0xff] }
 0x580   :  { %v11998_v30 = vpop.xlane.xlu1 %4611  ;;  %v2544_v24 = vadd.f32 %v7785_v31, %v2519_v50  ;;  %v12025_v50 = vld [vmem:[%s12865_s0 + $0xc0] sm:$0xff] }
 0x581   :  { %13493 = vst [vmem:[#allocation48_spill] sm:$0xff] %v11998_v30  ;;  %2583 = vxpose.xlu0.b32.cont [5/9] (short) (narrow) %v2542_v21, 32  ;;  %v2520_v21 = vmul.f32 %v7623_v0, %v13495_v43  ;;  %v12017_v44 = vpop.xlane.xlu0 %5791 }
 0x582   :  { %v7625_v62 = vpop.eup %7624 }
 0x583   :  { %v2545_v56 = vadd.f32 %v7786_v49, %v2520_v21  ;;  %v7627_v3 = vpop.eup %7626 }
 0x584   :  { %v5760_v32 = vpop.xlane.xlu1 %5759 }
 0x585   :  { %2584 = vxpose.xlu0.b32.cont [6/9] (short) (narrow) %v2543_v26, 32  ;;  %v2521_v26 = vmul.f32 %v7625_v62, %v13496_v42  ;;  %v12028_v31 = vpop.xlane.xlu0 %5795  ;;  %v7788_v62 = vld [vmem:[%s12865_s0 + $0x208] sm:$0xff]  ;;  %7632 = vrcp.f32 %v5760_v32  ;;  %v7629_v32 = vpop.eup %7628 }
 0x586   :  { %7634 = vrcp.f32 %v11833_v20 }
 0x587   :  { %v2546_v14 = vadd.f32 %v12025_v50, %v2521_v26 }
 0x588   :  { %v12010_v18 = vpop.xlane.xlu1 %3368 }
 0x589   :  { %2585 = vxpose.xlu0.b32.cont [7/9] (short) (narrow) %v2544_v24, 32  ;;  %v4974_v24 = vadd.f32 %v7788_v62, %v11656_v47  ;;  %v12037_v21 = vpop.xlane.xlu0 %5799 }
 0x58c   :  { %v12019_v41 = vpop.xlane.xlu1 %4615 }
 0x58d   :  { %13497 = vst [vmem:[#allocation109_spill] sm:$0xff] %v12019_v41  ;;  %2586 = vxpose.xlu0.b32.cont [8/9] (short) (narrow) %v2545_v56, 32  ;;  %v4975_v56 = vadd.f32 %v7789_v11, %v11733_v5  ;;  %v7631_v11 = vpop.eup %7630 }
 0x590   :  { %v5764_v0 = vpop.xlane.xlu1 %5763 }
 0x591   :  { %2587 = vxpose.xlu0.b32.end [9/9] (short) (narrow) %v2546_v14, 32  ;;  %7636 = vrcp.f32 %v5764_v0  ;;  %v7790_v14 = vld [vmem:[%s12865_s0 + $0x218] sm:$0xff] }
 0x592   :  { %7638 = vrcp.f32 %v11884_v57  ;;  %v4976_v62 = vadd.f32 %v7790_v14, %v11743_v58  ;;  %v7791_v57 = vld [vmem:[%s12865_s0 + $0x220] sm:$0xff] }
 0x594   :  { %v12034_v43 = vpop.xlane.xlu1 %3372 }
 0x595   :  { %5015 = vxpose.xlu0.b32.start [1/9] (short) (narrow) %v4974_v24, 32 }
 0x597   :  { %v6011_v49 = vpop.f32.mrf.mxu1 }
 0x598   :  { %v12043_v42 = vmul.f32 %v7627_v3, %v6011_v49  ;;  %v12045_v26 = vpop.xlane.xlu1 %4619  ;;  %v12054_v3 = vpop.xlane.xlu0 %5803 }
 0x599   :  { %13499 = vst [vmem:[#allocation51_spill] sm:$0xff] %v12045_v26  ;;  %5016 = vxpose.xlu0.b32.cont [2/9] (short) (narrow) %v4975_v56, 32  ;;  %v6013_v47 = vpop.f32.mrf.mxu1  ;;  %v4977_v56 = vadd.f32 %v7791_v57, %v11756_v1 }
 0x59a   :  { %13498 = vst [vmem:[#allocation99_spill] sm:$0xff] %v12043_v42 }
 0x59b   :  { %v6014_v20 = vpop.f32.mrf.mxu1 }
 0x59c   :  { %v12052_v24 = vmul.f32 %v7629_v32, %v6014_v20  ;;  %v5768_v5 = vpop.xlane.xlu1 %5767  ;;  %v7633_v20 = vpop.eup %7632 }
 0x59d   :  { %7640 = vrcp.f32 %v5768_v5  ;;  %5017 = vxpose.xlu0.b32.cont [3/9] (short) (narrow) %v4976_v62, 32  ;;  %v6016_v49 = vpop.f32.mrf.mxu1  ;;  %v12066_v14 = vpop.xlane.xlu0 %5807 }
 0x59e   :  { %13500 = vst [vmem:[#allocation6_spill] sm:$0xff] %v12052_v24  ;;  %7642 = vrcp.f32 %v11959_v6  ;;  %v7792_v6 = vld [vmem:[%s12865_s0 + $0x228] sm:$0xff]  ;;  %v7635_v49 = vpop.eup %7634 }
 0x59f   :  { %v6019_v0 = vpop.f32.mrf.mxu1  ;;  %7644 = vrcp.f32 %v11701_v38  ;;  %v4978_v5 = vadd.f32 %v7792_v6, %v11765_v54  ;;  %v7637_v38 = vpop.eup %7636 }
 0x5a0   :  { %v12061_v47 = vmul.f32 %v7631_v11, %v6019_v0  ;;  %v12063_v58 = vpop.xlane.xlu1 %3376  ;;  %7646 = vrcp.f32 %v11507_v33  ;;  %v7639_v54 = vpop.eup %7638 }
 0x5a1   :  { %5018 = vxpose.xlu0.b32.cont [4/9] (short) (narrow) %v4977_v56, 32  ;;  %v6021_v32 = vpop.f32.mrf.mxu1  ;;  %v7793_v56 = vld [vmem:[%s12865_s0 + $0x230] sm:$0xff]  ;;  %7648 = vrcp.f32 %v11728_v13  ;;  %v12085_v6 = vpop.xlane.xlu0 %5812 }
 0x5a2   :  { %13501 = vst [vmem:[#allocation60_spill] sm:$0xff] %v12061_v47  ;;  %v4979_v32 = vadd.f32 %v7793_v56, %v11777_v51  ;;  %v4955_v47 = vmul.f32 %v7635_v49, %v11681_v48  ;;  %v7794_v51 = vld [vmem:[%s12865_s0 + $0x238] sm:$0xff]  ;;  %v4956_v49 = vmul.f32 %v7639_v54, %v11691_v15 }
 0x5a3   :  { %v6022_v62 = vpop.f32.mrf.mxu1 }
 0x5a4   :  { %v12072_v1 = vmul.f32 %v7633_v20, %v6022_v62  ;;  %v12074_v11 = vpop.xlane.xlu1 %4623  ;;  %v4980_v48 = vadd.f32 %v7794_v51, %v4955_v47  ;;  %v7795_v47 = vld [vmem:[%s12865_s0 + $0x240] sm:$0xff] }
 0x5a5   :  { %13503 = vst [vmem:[#allocation57_spill] sm:$0xff] %v12074_v11  ;;  %5019 = vxpose.xlu0.b32.cont [5/9] (short) (narrow) %v4978_v5, 32  ;;  %v6024_v0 = vpop.f32.mrf.mxu1  ;;  %v4981_v15 = vadd.f32 %v7795_v47, %v4956_v49 }
 0x5a6   :  { %13502 = vst [vmem:[#allocation58_spill] sm:$0xff] %v12072_v1 }
 0x5a7   :  { %v6027_v57 = vpop.f32.mrf.mxu1 }
 0x5a8   :  { %v12083_v20 = vmul.f32 %v7637_v38, %v6027_v57  ;;  %v5772_v62 = vpop.xlane.xlu1 %5771 }
 0x5a9   :  { %7650 = vrcp.f32 %v5772_v62  ;;  %5020 = vxpose.xlu0.b32.cont [6/9] (short) (narrow) %v4979_v32, 32  ;;  %v6029_v33 = vpop.f32.mrf.mxu1 }
 0x5aa   :  { %13504 = vst [vmem:[#allocation26_spill] sm:$0xff] %v12083_v20  ;;  %v7641_v5 = vpop.eup %7640  ;;  %7652 = vrcp.f32 %v11987_v19  ;;  %v13507_v20 = vld [vmem:[#allocation30_spill] sm:$0xff] }
 0x5ab   :  { %v6030_v0 = vpop.f32.mrf.mxu1  ;;  %v7643_v13 = vpop.eup %7642  ;;  %7654 = vrcp.f32 %v11529_v59 }
 0x5ac   :  { %v12092_v38 = vmul.f32 %v7641_v5, %v6030_v0  ;;  %v12094_v57 = vpop.xlane.xlu1 %3380  ;;  %7656 = vrcp.f32 %v11996_v23  ;;  %v7645_v19 = vpop.eup %7644  ;;  %v4957_v54 = vmul.f32 %v7643_v13, %v11697_v4  ;;  %v3736_v5 = vrot.slane %v12025_v50, 4  ;;  %v13506_v23 = vld [vmem:[#allocation122_spill] sm:$0xff] }
 0x5ad   :  { %5021 = vxpose.xlu0.b32.cont [7/9] (short) (narrow) %v4980_v48, 32  ;;  %v6032_v56 = vpop.f32.mrf.mxu1  ;;  %v12097_v32 = vpop.trf.xlu0  ;;  %v3686_v51 = vmul.f32 %v7645_v19, %v13506_v23  ;;  %v7796_v48 = vld [vmem:[%s12865_s0 + $0xc8] sm:$0xff] }
 0x5ae   :  { %13505 = vst [vmem:[#allocation19_spill] sm:$0xff] %v12092_v38  ;;  %v3737_v56 = vrot.slane %v7796_v48, 4  ;;  %v7647_v49 = vpop.eup %7646  ;;  %v7797_v13 = vld [vmem:[%s12865_s0 + $0x2c8] sm:$0xff] }
 0x5af   :  { %v6035_v62 = vpop.f32.mrf.mxu1  ;;  %v12123_v19 = vld [vmem:[%s12865_s0 + $0x248] sm:$0xff]  ;;  %v7649_v48 = vpop.eup %7648  ;;  %v3687_v1 = vmul.f32 %v7647_v49, %v13507_v20 }
 0x5b0   :  { %v5776_v33 = vpop.xlane.xlu1 %5775  ;;  %v4982_v47 = vadd.f32 %v12123_v19, %v4957_v54 }
 0x5b1   :  { %7658 = vrcp.f32 %v5776_v33  ;;  %5022 = vxpose.xlu0.b32.cont [8/9] (short) (narrow) %v4981_v15, 32  ;;  %v6037_v59 = vpop.f32.mrf.mxu1  ;;  %v12105_v0 = vpop.trf.xlu0  ;;  %v7799_v15 = vld [vmem:[%s12865_s0 + $0x2d0] sm:$0xff] }
 0x5b2   :  { %7660 = vrcp.f32 %v12004_v8  ;;  %v2611_v4 = vadd.f32 %v12105_v0, %v12097_v32  ;;  %v6162_v8 = vrot.slane %v7797_v13, 4  ;;  %v6164_v33 = vrot.slane %v7799_v15, 4  ;;  %v7800_v59 = vld [vmem:[%s12865_s0 + $0xd0] sm:$0xff] }
 0x5b3   :  { %7662 = vrcp.f32 %v11753_v27  ;;  %v12115_v50 = vpop.f32.mrf.mxu1  ;;  %v3738_v27 = vsel %vm1958_vm3, %v3736_v5, %v3737_v56  ;;  %v3739_v23 = vrot.slane %v7800_v59, 4 }
 0x5b4   :  { %7664 = vrcp.f32 %v11558_v35  ;;  %v6165_v59 = vsel %vm1958_vm3, %v6162_v8, %v6164_v33  ;;  %v3810_v11 = vadd.f32 %v3738_v27, %v3686_v51  ;;  %v7801_v35 = vld [vmem:[%s12865_s0 + $0x2d8] sm:$0xff]  ;;  %v12154_v51 = vld [vmem:[%s12865_s0 + $0xe0] sm:$0xff] }
 0x5b5   :  { %5023 = vxpose.xlu0.b32.end [9/9] (short) (narrow) %v4982_v47, 32  ;;  %v6040_v13 = vpop.f32.mrf.mxu1  ;;  %v12134_v38 = vpop.trf.xlu0  ;;  %7666 = vrcp.f32 %v12017_v44  ;;  %v6166_v47 = vrot.slane %v7801_v35, 4  ;;  %v3740_v26 = vsel %vm1958_vm3, %v3737_v56, %v3739_v23  ;;  %v7802_v44 = vld [vmem:[%s12865_s0 + $0xd8] sm:$0xff] }
 0x5b6   :  { %v7651_v54 = vpop.eup %7650  ;;  %v2612_v15 = vadd.f32 %v2611_v4, %v12134_v38  ;;  %v3741_v20 = vrot.slane %v7802_v44, 4  ;;  %7668 = vrcp.f32 %v11783_v40  ;;  %v13509_v4 = vld [vmem:[#allocation73_spill] sm:$0xff]  ;;  %v3811_v44 = vadd.f32 %v3740_v26, %v3687_v1 }
 0x5b7   :  { %v7653_v5 = vpop.eup %7652  ;;  %v12139_v24 = vmul.f32 %v7651_v54, %v6035_v62  ;;  %v6043_v42 = vpop.f32.mrf.mxu1  ;;  %v3688_v49 = vmul.f32 %v7649_v48, %v13509_v4  ;;  %7670 = vrcp.f32 %v12028_v31  ;;  %v6167_v48 = vsel %vm1958_vm3, %v6164_v33, %v6166_v47  ;;  %v13510_v33 = vld [vmem:[#allocation13_spill] sm:$0xff] }
 0x5b8   :  { %v6097_v13 = vmul.f32 %v7653_v5, %v6043_v42  ;;  %v3743_v42 = vrot.slane %v12154_v51, 4  ;;  %v7655_v56 = vpop.eup %7654  ;;  %v3742_v5 = vsel %vm1958_vm3, %v3739_v23, %v3741_v20  ;;  %v12169_v51 = vld [vmem:[%s12865_s0 + $0x2c0] sm:$0xff]  ;;  %7672 = vrcp.f32 %v12037_v21 }
 0x5b9   :  { %13508 = vst [vmem:[#allocation53_spill] sm:$0xff] %v12139_v24  ;;  %3835 = vxpose.xlu0.b32.start [1/16] (narrow) %v3810_v11, 32  ;;  %v6045_v62 = vpop.f32.mrf.mxu1  ;;  %v12157_v27 = vpop.trf.xlu0  ;;  %v6160_v31 = vrot.slane %v12169_v51, 4  ;;  %v3689_v26 = vmul.f32 %v7655_v56, %v13510_v33  ;;  %7674 = vrcp.f32 %v11810_v37  ;;  %v7807_v37 = vld [vmem:[%s12865_s0 + $0xe8] sm:$0xff] }
 0x5ba   :  { %v6221_v54 = vadd.f32 %v6165_v59, %v6097_v13  ;;  %v2613_v40 = vadd.f32 %v2612_v15, %v12157_v27  ;;  %v7657_v11 = vpop.eup %7656  ;;  %v7804_v62 = vld [vmem:[%s12865_s0 + $0x2e0] sm:$0xff]  ;;  %v3812_v13 = vadd.f32 %v3742_v5, %v3688_v49  ;;  %v3744_v1 = vsel %vm1958_vm3, %v3741_v20, %v3743_v42  ;;  %v7806_v20 = vld [vmem:[%s12865_s0 + $0x2e8] sm:$0xff] }
 0x5bb   :  { %v6046_v35 = vpop.f32.mrf.mxu1  ;;  %v6168_v4 = vrot.slane %v7804_v62, 4  ;;  %v6163_v62 = vsel %vm1958_vm3, %v6160_v31, %v6162_v8  ;;  %v6170_v56 = vrot.slane %v7806_v20, 4  ;;  %7676 = vrcp.f32 %v12054_v3 }
 0x5bc   :  { %v6098_v23 = vmul.f32 %v7657_v11, %v6046_v35  ;;  %6262 = vxpose.xlu1.b32.start [1/9] (short) (narrow) %v6221_v54, 32  ;;  %v2614_v15 = vrot.slane %v2613_v40, 4  ;;  %7678 = vrcp.f32 %v11864_v28 }
 0x5bd   :  { %3836 = vxpose.xlu0.b32.cont [2/16] (narrow) %v3811_v44, 32  ;;  %v6048_v59 = vpop.f32.mrf.mxu1  ;;  %v6169_v49 = vsel %vm1958_vm3, %v6166_v47, %v6168_v4  ;;  %7680 = vrcp.f32 %v12066_v14 }
 0x5be   :  { %v7659_v24 = vpop.eup %7658  ;;  %v6222_v41 = vadd.f32 %v6167_v48, %v6098_v23  ;;  %v2615_v30 = vadd.f32 %v2614_v15, %v2613_v40  ;;  %v6171_v59 = vsel %vm1958_vm3, %v6168_v4, %v6170_v56  ;;  %7682 = vrcp.f32 %v11919_v7 }
 0x5bf   :  { %v7661_v45 = vpop.eup %7660  ;;  %v6096_v54 = vmul.f32 %v7659_v24, %v12115_v50  ;;  %v6051_v11 = vpop.f32.mrf.mxu1  ;;  %v3745_v24 = vrot.slane %v7807_v37, 4  ;;  %v7808_v50 = vld [vmem:[%s12865_s0 + $0xf0] sm:$0xff]  ;;  %7684 = vrcp.f32 %v11490_v52 }
 0x5c0   :  { %v7663_v21 = vpop.eup %7662  ;;  %v6099_v5 = vmul.f32 %v7661_v45, %v6051_v11  ;;  %6263 = vxpose.xlu1.b32.cont [2/9] (short) (narrow) %v6222_v41, 32  ;;  %v2616_v35 = vrot.slane %v2615_v30, 2  ;;  %v3747_v47 = vrot.slane %v7808_v50, 4  ;;  %v3813_v41 = vadd.f32 %v3744_v1, %v3689_v26  ;;  %v13512_v1 = vld [vmem:[#allocation35_spill] sm:$0xff] }
 0x5c1   :  { %v12184_v8 = vadd.f32 %v6163_v62, %v6096_v54  ;;  %3837 = vxpose.xlu0.b32.cont [3/16] (narrow) %v3812_v13, 32  ;;  %v6053_v40 = vpop.f32.mrf.mxu1  ;;  %v7665_v48 = vpop.eup %7664  ;;  %v7809_v13 = vld [vmem:[%s12865_s0 + $0x2f0] sm:$0xff]  ;;  %v13511_v62 = vld [vmem:[#allocation80_spill] sm:$0xff]  ;;  %v3746_v3 = vsel %vm1958_vm3, %v3743_v42, %v3745_v24  ;;  %7686 = vrcp.f32 %v12085_v6 }
 0x5c2   :  { %v6223_v45 = vadd.f32 %v6169_v49, %v6099_v5  ;;  %v2617_v44 = vadd.f32 %v2616_v35, %v2615_v30  ;;  %v7667_v23 = vpop.eup %7666  ;;  %v6172_v33 = vrot.slane %v7809_v13, 4  ;;  %v3690_v54 = vmul.f32 %v7663_v21, %v13511_v62  ;;  %v12203_v30 = vld [vmem:[%s12865_s0 + $0xf8] sm:$0xff] }
 0x5c3   :  { %v6054_v15 = vpop.f32.mrf.mxu1  ;;  %v3749_v28 = vrot.slane %v12203_v30, 4  ;;  %v3691_v49 = vmul.f32 %v7665_v48, %v13512_v1  ;;  %v7669_v20 = vpop.eup %7668  ;;  %v3748_v5 = vsel %vm1958_vm3, %v3745_v24, %v3747_v47  ;;  %7688 = vrcp.f32 %v11963_v46  ;;  %v13515_v30 = vld [vmem:[#allocation18_spill] sm:$0xff] }
 0x5c4   :  { %v6100_v11 = vmul.f32 %v7667_v23, %v6054_v15  ;;  %6264 = vxpose.xlu1.b32.cont [3/9] (short) (narrow) %v6223_v45, 32  ;;  %v2618_v26 = vrot.slane %v2617_v44, 1  ;;  %v7671_v42 = vpop.eup %7670  ;;  %v6173_v37 = vsel %vm1958_vm3, %v6170_v56, %v6172_v33  ;;  %v3814_v50 = vadd.f32 %v3746_v3, %v3690_v54  ;;  %v7811_v45 = vld [vmem:[%s12865_s0 + $0x2f8] sm:$0xff]  ;;  %v7812_v15 = vld [vmem:[%s12865_s0 + $0x100] sm:$0xff] }
 0x5c5   :  { %3838 = vxpose.xlu0.b32.cont [4/16] (narrow) %v3813_v41, 32  ;;  %v6056_v4 = vpop.f32.mrf.mxu1  ;;  %v6174_v41 = vrot.slane %v7811_v45, 4  ;;  %v3750_v14 = vsel %vm1958_vm3, %v3747_v47, %v3749_v28  ;;  %v3815_v56 = vadd.f32 %v3748_v5, %v3691_v49  ;;  %v7673_v6 = vpop.eup %7672  ;;  %v7813_v3 = vld [vmem:[%s12865_s0 + $0x300] sm:$0xff]  ;;  %7690 = vrcp.f32 %v11720_v53  ;;  %v13514_v53 = vld [vmem:[#allocation87_spill] sm:$0xff] }
 0x5c6   :  { %v6224_v21 = vadd.f32 %v6171_v59, %v6100_v11  ;;  %v2619_v35 = vadd.f32 %v2618_v26, %v2617_v44  ;;  %v13513_v44 = vld [vmem:[#allocation20_spill] sm:$0xff]  ;;  %v3751_v59 = vrot.slane %v7812_v15, 4  ;;  %v6176_v26 = vrot.slane %v7813_v3, 4  ;;  %v7675_v4 = vpop.eup %7674 }
 0x5c7   :  { %v6059_v40 = vpop.f32.mrf.mxu1  ;;  %v3692_v23 = vmul.f32 %v7669_v20, %v13513_v44  ;;  %v6175_v11 = vsel %vm1958_vm3, %v6172_v33, %v6174_v41  ;;  %7692 = vrcp.f32 %v11989_v63  ;;  %v7815_v63 = vld [vmem:[%s12865_s0 + $0x108] sm:$0xff] }
 0x5c8   :  { %v6101_v48 = vmul.f32 %v7671_v42, %v6059_v40  ;;  %6265 = vxpose.xlu1.b32.cont [4/9] (short) (narrow) %v6224_v21, 32  ;;  %v2634_v24 = vmul.f32 0.03125, %v2619_v35  ;;  %v7677_v5 = vpop.eup %7676  ;;  %v6177_v42 = vsel %vm1958_vm3, %v6174_v41, %v6176_v26  ;;  %v7814_v40 = vld [vmem:[%s12865_s0 + $0x308] sm:$0xff]  ;;  %7694 = vrcp.f32 %v12010_v18 }
 0x5c9   :  { %3839 = vxpose.xlu0.b32.cont [5/16] (narrow) %v3814_v50, 32  ;;  %v6061_v7 = vpop.f32.mrf.mxu1  ;;  %v3816_v20 = vadd.f32 %v3750_v14, %v3692_v23  ;;  %v3693_v50 = vmul.f32 %v7675_v4, %v13514_v53  ;;  %v7679_v45 = vpop.eup %7678  ;;  %v3752_v14 = vsel %vm1958_vm3, %v3749_v28, %v3751_v59  ;;  %v7816_v4 = vld [vmem:[%s12865_s0 + $0x110] sm:$0xff]  ;;  %7696 = vrcp.f32 %v11746_v61 }
 0x5ca   :  { %v6225_v52 = vadd.f32 %v6173_v37, %v6101_v48  ;;  %v12224_v13 = vsub.f32 %v12097_v32, %v2634_v24  ;;  %v12227_v62 = vsub.f32 %v12105_v0, %v2634_v24  ;;  %v12230_v47 = vsub.f32 %v12134_v38, %v2634_v24  ;;  %v7681_v23 = vpop.eup %7680 }
 0x5cb   :  { %v6062_v54 = vpop.f32.mrf.mxu1  ;;  %v12238_v32 = vsub.f32 %v12157_v27, %v2634_v24  ;;  %v6178_v37 = vrot.slane %v7814_v40, 4  ;;  %v3753_v24 = vrot.slane %v7815_v63, 4  ;;  %v7683_v28 = vpop.eup %7682  ;;  %7698 = vrcp.f32 %v12034_v43 }
 0x5cc   :  { %v6102_v0 = vmul.f32 %v7673_v6, %v6062_v54  ;;  %6266 = vxpose.xlu1.b32.cont [5/9] (short) (narrow) %v6225_v52, 32  ;;  %v2644_v38 = vmul.f32 %v12224_v13, %v12224_v13  ;;  %v2646_v46 = vmul.f32 %v12227_v62, %v12227_v62  ;;  %v2648_v33 = vmul.f32 %v12230_v47, %v12230_v47 }
 0x5cd   :  { %3840 = vxpose.xlu0.b32.cont [6/16] (narrow) %v3815_v56, 32  ;;  %v6064_v1 = vpop.f32.mrf.mxu1  ;;  %v2650_v27 = vmul.f32 %v12238_v32, %v12238_v32  ;;  %v6179_v52 = vsel %vm1958_vm3, %v6176_v26, %v6178_v37  ;;  %v3817_v6 = vadd.f32 %v3752_v14, %v3693_v50  ;;  %v3694_v54 = vmul.f32 %v7679_v45, %v13515_v30 }
 0x5ce   :  { %v6226_v49 = vadd.f32 %v6175_v11, %v6102_v0  ;;  %v2652_v21 = vadd.f32 %v2646_v46, %v2644_v38  ;;  %v3754_v3 = vsel %vm1958_vm3, %v3751_v59, %v3753_v24  ;;  %v3755_v0 = vrot.slane %v7816_v4, 4  ;;  %v7685_v46 = vpop.eup %7684 }
 0x5cf   :  { %v6067_v35 = vpop.f32.mrf.mxu1  ;;  %v4933_v43 = vmul.f32 %v7685_v46, %v11429_v10  ;;  %7700 = vrcp.f32 %v12063_v58  ;;  %v7819_v58 = vld [vmem:[%s12865_s0 + $0x188] sm:$0xff] }
 0x5d0   :  { %v6103_v48 = vmul.f32 %v7677_v5, %v6067_v35  ;;  %6267 = vxpose.xlu1.b32.cont [6/9] (short) (narrow) %v6226_v49, 32  ;;  %v2653_v41 = vadd.f32 %v2652_v21, %v2648_v33  ;;  %v7687_v33 = vpop.eup %7686  ;;  %v3756_v35 = vsel %vm1958_vm3, %v3753_v24, %v3755_v0  ;;  %7702 = vrcp.f32 %v11769_v60  ;;  %v7820_v60 = vld [vmem:[%s12865_s0 + $0x128] sm:$0xff] }
 0x5d1   :  { %3841 = vxpose.xlu0.b32.cont [7/16] (narrow) %v3816_v20, 32  ;;  %v6069_v7 = vpop.f32.mrf.mxu1  ;;  %v3818_v20 = vadd.f32 %v3754_v3, %v3694_v54  ;;  %v7689_v21 = vpop.eup %7688  ;;  %7704 = vrcp.f32 %v12094_v57  ;;  %v13518_v54 = vld [vmem:[#allocation93_spill] sm:$0xff]  ;;  %v3761_v4 = vrot.slane %v7820_v60, 4 }
 0x5d2   :  { %v6227_v56 = vadd.f32 %v6177_v42, %v6103_v48  ;;  %v2654_v44 = vadd.f32 %v2653_v41, %v2650_v27  ;;  %v13516_v27 = vld [vmem:[#allocation85_spill] sm:$0xff]  ;;  %v7817_v42 = vld [vmem:[%s12865_s0 + $0x118] sm:$0xff]  ;;  %v7691_v50 = vpop.eup %7690  ;;  %7706 = vrcp.f32 %v11791_v9 }
 0x5d3   :  { %v6070_v15 = vpop.f32.mrf.mxu1  ;;  %v3695_v59 = vmul.f32 %v7683_v28, %v13516_v27  ;;  %v3757_v40 = vrot.slane %v7817_v42, 4  ;;  %v13517_v41 = vld [vmem:[#allocation96_spill] sm:$0xff] }
 0x5d4   :  { %v6104_v11 = vmul.f32 %v7681_v23, %v6070_v15  ;;  %6268 = vxpose.xlu1.b32.cont [7/9] (short) (narrow) %v6227_v56, 32  ;;  %v2655_v38 = vrot.slane %v2654_v44, 4  ;;  %v3696_v7 = vmul.f32 %v7689_v21, %v13517_v41  ;;  %v7693_v24 = vpop.eup %7692  ;;  %v7823_v27 = vld [vmem:[%s12865_s0 + $0x198] sm:$0xff]  ;;  %v7826_v41 = vld [vmem:[%s12865_s0 + $0x1a8] sm:$0xff] }
 0x5d5   :  { %3842 = vxpose.xlu0.b32.cont [8/16] (narrow) %v3817_v6, 32  ;;  %v6072_v18 = vpop.f32.mrf.mxu1  ;;  %v3819_v63 = vadd.f32 %v3756_v35, %v3695_v59  ;;  %v3758_v56 = vsel %vm1958_vm3, %v3755_v0, %v3757_v40  ;;  %v3697_v28 = vmul.f32 %v7693_v24, %v13518_v54  ;;  %v4960_v59 = vadd.f32 %v7823_v27, %v11540_v12  ;;  %v13520_v35 = vld [vmem:[#allocation39_spill] sm:$0xff] }
 0x5d6   :  { %v6228_v26 = vadd.f32 %v6179_v52, %v6104_v11  ;;  %v2656_v1 = vadd.f32 %v2655_v38, %v2654_v44  ;;  %v7818_v44 = vld [vmem:[%s12865_s0 + $0x120] sm:$0xff]  ;;  %v4934_v52 = vmul.f32 %v7691_v50, %v11440_v25  ;;  %v3820_v30 = vadd.f32 %v3758_v56, %v3696_v7  ;;  %v7695_v11 = vpop.eup %7694  ;;  %v7821_v25 = vld [vmem:[%s12865_s0 + $0x190] sm:$0xff]  ;;  %v13522_v56 = vld [vmem:[#allocation46_spill] sm:$0xff] }
 0x5d7   :  { %v6075_v49 = vpop.f32.mrf.mxu1  ;;  %v3759_v23 = vrot.slane %v7818_v44, 4  ;;  %v7697_v46 = vpop.eup %7696  ;;  %v4962_v7 = vadd.f32 %v7826_v41, %v11590_v16  ;;  %v7828_v16 = vld [vmem:[%s12865_s0 + $0x1b0] sm:$0xff]  ;;  %v13534_v41 = vld [vmem:[#allocation44_spill] sm:$0xff] }
 0x5d8   :  { %v6105_v5 = vmul.f32 %v7687_v33, %v6075_v49  ;;  %6269 = vxpose.xlu1.b32.cont [8/9] (short) (narrow) %v6228_v26, 32  ;;  %v2657_v53 = vrot.slane %v2656_v1, 2  ;;  %v4959_v57 = vadd.f32 %v7821_v25, %v4934_v52  ;;  %v13519_v33 = vld [vmem:[#allocation98_spill] sm:$0xff]  ;;  %v4936_v21 = vmul.f32 %v7697_v46, %v11457_v55  ;;  %v7825_v55 = vld [vmem:[%s12865_s0 + $0x1a0] sm:$0xff]  ;;  %v13527_v25 = vld [vmem:[#allocation76_spill] sm:$0xff] }
 0x5d9   :  { %3843 = vxpose.xlu0.b32.cont [9/16] (narrow) %v3818_v20, 32  ;;  %v6077_v61 = vpop.f32.mrf.mxu1  ;;  %v3760_v3 = vsel %vm1958_vm3, %v3757_v40, %v3759_v23  ;;  %v3698_v26 = vmul.f32 %v7695_v11, %v13519_v33  ;;  %v3762_v49 = vsel %vm1958_vm3, %v3759_v23, %v3761_v4  ;;  %v7822_v20 = vld [vmem:[%s12865_s0 + $0x130] sm:$0xff]  ;;  %v6131_v23 = vrot.slane %v12123_v19, 4  ;;  %v13526_v19 = vld [vmem:[#allocation42_spill] sm:$0xff]  ;;  %v13528_v33 = vld [vmem:[#allocation104_spill] sm:$0xff] }
 0x5da   :  { %v6229_v45 = vadd.f32 %v6178_v37, %v6105_v5  ;;  %v2658_v48 = vadd.f32 %v2657_v53, %v2656_v1  ;;  %v4958_v37 = vadd.f32 %v7819_v58, %v4933_v43  ;;  %v3821_v18 = vadd.f32 %v3760_v3, %v3697_v28  ;;  %v7699_v1 = vpop.eup %7698 }
 0x5db   :  { %v6078_v14 = vpop.f32.mrf.mxu1  ;;  %v3763_v9 = vrot.slane %v7822_v20, 4  ;;  %v3822_v5 = vadd.f32 %v3762_v49, %v3698_v26  ;;  %v3699_v42 = vmul.f32 %v7699_v1, %v13520_v35  ;;  %v4961_v12 = vadd.f32 %v7825_v55, %v4936_v21  ;;  %v13529_v1 = vld [vmem:[#allocation48_spill] sm:$0xff] }
 0x5dc   :  { %6270 = vxpose.xlu1.b32.end [9/9] (short) (narrow) %v6229_v45, 32  ;;  %v2659_v15 = vrot.slane %v2658_v48, 1  ;;  %v7701_v40 = vpop.eup %7700  ;;  %v13521_v45 = vld [vmem:[#allocation97_spill] sm:$0xff]  ;;  %v7830_v49 = vld [vmem:[%s12865_s0 + $0x1b8] sm:$0xff] }
 0x5dd   :  { %3844 = vxpose.xlu0.b32.cont [10/16] (narrow) %v3819_v63, 32  ;;  %v6079_v10 = vpop.f32.mrf.mxu1  ;;  %v3764_v53 = vsel %vm1958_vm3, %v3761_v4, %v3763_v9  ;;  %v7703_v61 = vpop.eup %7702  ;;  %v3700_v43 = vmul.f32 %v7701_v40, %v13521_v45  ;;  %v13531_v35 = vld [vmem:[#allocation8_spill] sm:$0xff] }
 0x5de   :  { %v2660_v6 = vadd.f32 %v2659_v15, %v2658_v48  ;;  %v3823_v50 = vadd.f32 %v3764_v53, %v3699_v42  ;;  %v7705_v48 = vpop.eup %7704  ;;  %v13523_v15 = vld [vmem:[#allocation41_spill] sm:$0xff] }
 0x5df   :  { %v3701_v44 = vmul.f32 %v7705_v48, %v13522_v56  ;;  %v13524_v10 = vrot.slane %v13523_v15, 4  ;;  %v7831_v53 = vld [vmem:[%s12865_s0 + $0x260] sm:$0xff]  ;;  %v13535_v15 = vld [vmem:[#allocation51_spill] sm:$0xff] }
 0x5e0   :  { %4983 = vxpose.xlu1.b32.start [1/16] (narrow) %v4958_v37, 32  ;;  %v2674_v0 = vmul.f32 0.03125, %v2660_v6  ;;  %v13525_v37 = vld [vmem:[#allocation90_spill] sm:$0xff] }
 0x5e1   :  { %3845 = vxpose.xlu0.b32.cont [11/16] (narrow) %v3820_v30, 32 }
 0x5e2   :  { %v2676_v38 = vadd.f32 1e-05, %v2674_v0 }
 0x5e4   :  { %4984 = vxpose.xlu1.b32.cont [2/16] (narrow) %v4959_v57, 32  ;;  %7708 = vrsqrt.f32 %v2676_v38 }
 0x5e5   :  { %7710 = vrcp.f32 %v11713_v2  ;;  %3846 = vxpose.xlu0.b32.cont [12/16] (narrow) %v3821_v18, 32  ;;  %v7824_v2 = vld [vmem:[%s12865_s0 + $0x138] sm:$0xff] }
 0x5e6   :  { %7712 = vrcp.f32 %v11821_v29  ;;  %v3765_v29 = vrot.slane %v7824_v2, 4  ;;  %v6136_v2 = vrot.slane %v7831_v53, 4 }
 0x5e7   :  { %7714 = vrcp.f32 %v11521_v22  ;;  %v4938_v22 = vmul.f32 %v7703_v61, %v11472_v17  ;;  %v7827_v17 = vld [vmem:[%s12865_s0 + $0x250] sm:$0xff] }
 0x5e8   :  { %4985 = vxpose.xlu1.b32.cont [3/16] (narrow) %v4960_v59, 32  ;;  %7716 = vrcp.f32 %v11889_v34  ;;  %v3766_v14 = vsel %vm1958_vm3, %v3763_v9, %v3765_v29  ;;  %v7707_v34 = vpop.eup %7706  ;;  %v13530_v9 = vld [vmem:[#allocation23_spill] sm:$0xff] }
 0x5e9   :  { %3847 = vxpose.xlu0.b32.cont [13/16] (narrow) %v3822_v5, 32  ;;  %7718 = vrcp.f32 %v11735_v39  ;;  %v3824_v24 = vadd.f32 %v3766_v14, %v3700_v43  ;;  %v6132_v39 = vrot.slane %v7827_v17, 4  ;;  %v4963_v52 = vadd.f32 %v7828_v16, %v4938_v22  ;;  %v13533_v43 = vld [vmem:[#allocation63_spill] sm:$0xff] }
 0x5ea   :  { %7720 = vrcp.f32 %v11933_v36  ;;  %v3768_v36 = vsel %vm1958_vm3, %v3765_v29, %v13524_v10  ;;  %v4939_v6 = vmul.f32 %v7707_v34, %v13526_v19  ;;  %v7834_v10 = vld [vmem:[%s12865_s0 + $0x1c8] sm:$0xff] }
 0x5eb   :  { %7722 = vrcp.f32 %v13525_v37  ;;  %v3825_v38 = vadd.f32 %v3768_v36, %v3701_v44  ;;  %v6133_v18 = vsel %vm1958_vm3, %v6131_v23, %v6132_v39  ;;  %v7833_v44 = vld [vmem:[%s12865_s0 + $0x268] sm:$0xff] }
 0x5ec   :  { %4986 = vxpose.xlu1.b32.cont [4/16] (narrow) %v4961_v12, 32  ;;  %7724 = vrcp.f32 %v13528_v33  ;;  %v4964_v20 = vadd.f32 %v7830_v49, %v4939_v6  ;;  %v13532_v12 = vld [vmem:[#allocation109_spill] sm:$0xff]  ;;  %v6138_v23 = vrot.slane %v7833_v44, 4  ;;  %v7835_v6 = vld [vmem:[%s12865_s0 + $0x270] sm:$0xff] }
 0x5ed   :  { %3848 = vxpose.xlu0.b32.cont [14/16] (narrow) %v3823_v50, 32  ;;  %v12323_v63 = vpop.trf.xlu0  ;;  %7726 = vrcp.f32 %v13529_v1  ;;  %v7832_v50 = vld [vmem:[%s12865_s0 + $0x1c0] sm:$0xff]  ;;  %v13540_v33 = vld [vmem:[#allocation107_spill] sm:$0xff]  ;;  %v7837_v1 = vld [vmem:[%s12865_s0 + $0x278] sm:$0xff] }
 0x5ee   :  { %v2620_v30 = vsel %vm1861_vm5, %v12323_v63, 0.0  ;;  %7728 = vrcp.f32 %v13532_v12  ;;  %v6139_v19 = vsel %vm1958_vm3, %v6136_v2, %v6138_v23  ;;  %v6142_v49 = vrot.slane %v7837_v1, 4 }
 0x5ef   :  { %7730 = vrcp.f32 %v13535_v15  ;;  %v7842_v15 = vld [vmem:[%s12865_s0 + $0x1e8] sm:$0xff] }
 0x5f0   :  { %4987 = vxpose.xlu1.b32.cont [5/16] (narrow) %v4962_v7, 32 }
 0x5f1   :  { %v7709_v58 = vpop.eup %7708  ;;  %3849 = vxpose.xlu0.b32.cont [15/16] (narrow) %v3824_v24, 32  ;;  %v12345_v54 = vpop.trf.xlu0 }
 0x5f2   :  { %v7711_v28 = vpop.eup %7710  ;;  %v12348_v11 = vmul.f32 %v7709_v58, %v12224_v13  ;;  %v12351_v3 = vmul.f32 %v7709_v58, %v12227_v62  ;;  %v12354_v60 = vmul.f32 %v7709_v58, %v12230_v47  ;;  %v12357_v4 = vmul.f32 %v7709_v58, %v12238_v32  ;;  %v7829_v13 = vld [vmem:[%s12865_s0 + $0x258] sm:$0xff]  ;;  %v13536_v58 = vld [vmem:[#allocation74_spill] sm:$0xff] }
 0x5f3   :  { %v7713_v0 = vpop.eup %7712  ;;  %v6081_v57 = vmul.f32 %v7711_v28, %v13527_v25  ;;  %v2621_v46 = vsel %vm1861_vm5, %v12345_v54, 0.0  ;;  %v6134_v62 = vrot.slane %v7829_v13, 4  ;;  %v13537_v25 = vld [vmem:[#allocation57_spill] sm:$0xff] }
 0x5f4   :  { %4988 = vxpose.xlu1.b32.cont [6/16] (narrow) %v4963_v52, 32  ;;  %v2622_v47 = vadd.f32 %v2621_v46, %v2620_v30  ;;  %v7715_v26 = vpop.eup %7714  ;;  %v4940_v27 = vmul.f32 %v7713_v0, %v13530_v9  ;;  %v6140_v30 = vrot.slane %v7835_v6, 4  ;;  %7732 = vrcp.f32 %v13537_v25  ;;  %v13538_v46 = vld [vmem:[#allocation75_spill] sm:$0xff] }
 0x5f5   :  { %3850 = vxpose.xlu0.b32.end [16/16] (narrow) %v3825_v38, 32  ;;  %v12367_v32 = vpop.trf.xlu0  ;;  %v7717_v21 = vpop.eup %7716  ;;  %v6205_v5 = vadd.f32 %v6133_v18, %v6081_v57  ;;  %v6082_v42 = vmul.f32 %v7715_v26, %v13531_v35  ;;  %v6135_v40 = vsel %vm1958_vm3, %v6132_v39, %v6134_v62  ;;  %v6137_v56 = vsel %vm1958_vm3, %v6134_v62, %v6136_v2  ;;  %v7836_v57 = vld [vmem:[%s12865_s0 + $0x1d0] sm:$0xff]  ;;  %v13539_v62 = vld [vmem:[#allocation78_spill] sm:$0xff]  ;;  %v13542_v35 = vld [vmem:[#allocation32_spill] sm:$0xff] }
 0x5f6   :  { %v2623_v59 = vsel %vm1861_vm5, %v12367_v32, 0.0  ;;  %v7719_v55 = vpop.eup %7718  ;;  %v4965_v45 = vadd.f32 %v7832_v50, %v4940_v27  ;;  %v4941_v48 = vmul.f32 %v7717_v21, %v13533_v43  ;;  %v6141_v9 = vsel %vm1958_vm3, %v6138_v23, %v6140_v30  ;;  %v7838_v21 = vld [vmem:[%s12865_s0 + $0x1d8] sm:$0xff] }
 0x5f7   :  { %v2624_v29 = vadd.f32 %v2623_v59, %v2622_v47  ;;  %v7721_v22 = vpop.eup %7720  ;;  %v6206_v34 = vadd.f32 %v6135_v40, %v6082_v42  ;;  %v6083_v7 = vmul.f32 %v7719_v55, %v13534_v41  ;;  %v6208_v47 = vadd.f32 %v6139_v19, %v13539_v62  ;;  %v13541_v59 = vld [vmem:[#allocation95_spill] sm:$0xff]  ;;  %v7839_v55 = vld [vmem:[%s12865_s0 + $0x280] sm:$0xff] }
 0x5f8   :  { %4989 = vxpose.xlu1.b32.cont [7/16] (narrow) %v4964_v20, 32  ;;  %v7723_v39 = vpop.eup %7722  ;;  %v4966_v36 = vadd.f32 %v7834_v10, %v4941_v48  ;;  %v4942_v37 = vmul.f32 %v7721_v22, %v13536_v58  ;;  %7734 = vrcp.f32 %v13541_v59  ;;  %v6143_v2 = vsel %vm1958_vm3, %v6140_v30, %v6142_v49  ;;  %v7840_v48 = vld [vmem:[%s12865_s0 + $0x1e0] sm:$0xff]  ;;  %v13544_v22 = vld [vmem:[#allocation47_spill] sm:$0xff]  ;;  %v7846_v59 = vld [vmem:[%s12865_s0 + $0x1f8] sm:$0xff] }
 0x5f9   :  { %6230 = vxpose.xlu0.b32.start [1/16] (narrow) %v6205_v5, 32  ;;  %v12381_v61 = vpop.trf.xlu0  ;;  %v6207_v16 = vadd.f32 %v6137_v56, %v6083_v7  ;;  %v7725_v0 = vpop.eup %7724  ;;  %v4943_v18 = vmul.f32 %v7723_v39, %v13538_v46  ;;  %v6144_v12 = vrot.slane %v7839_v55, 4  ;;  %v7844_v46 = vld [vmem:[%s12865_s0 + $0x1f0] sm:$0xff] }
 0x5fa   :  { %v2625_v14 = vsel %vm1861_vm5, %v12381_v61, 0.0  ;;  %v4967_v38 = vadd.f32 %v7836_v57, %v4942_v37  ;;  %v7727_v13 = vpop.eup %7726  ;;  %v6085_v26 = vmul.f32 %v7725_v0, %v13540_v33  ;;  %v7843_v0 = vld [vmem:[%s12865_s0 + $0x290] sm:$0xff] }
 0x5fb   :  { %v2626_v24 = vadd.f32 %v2625_v14, %v2624_v29  ;;  %v4968_v5 = vadd.f32 %v7838_v21, %v4943_v18  ;;  %v4944_v42 = vmul.f32 %v7727_v13, %v13542_v35  ;;  %v7729_v40 = vpop.eup %7728  ;;  %v6145_v23 = vsel %vm1958_vm3, %v6142_v49, %v6144_v12  ;;  %v13547_v13 = vld [vmem:[#allocation102_spill] sm:$0xff] }
 0x5fc   :  { %4990 = vxpose.xlu1.b32.cont [8/16] (narrow) %v4965_v45, 32  ;;  %v6209_v53 = vadd.f32 %v6141_v9, %v6085_v26  ;;  %v13543_v45 = vld [vmem:[#allocation81_spill] sm:$0xff]  ;;  %v7731_v41 = vpop.eup %7730  ;;  %v6148_v25 = vrot.slane %v7843_v0, 4  ;;  %v13555_v0 = vld [vmem:[#allocation19_spill] sm:$0xff] }
 0x5fd   :  { %6231 = vxpose.xlu0.b32.cont [2/16] (narrow) %v6206_v34, 32  ;;  %v2627_v17 = vrot.slane %v2626_v24, 4  ;;  %v6210_v43 = vadd.f32 %v6143_v2, %v13543_v45  ;;  %v4969_v14 = vadd.f32 %v7840_v48, %v4944_v42  ;;  %v4945_v34 = vmul.f32 %v7729_v40, %v13544_v22  ;;  %v13548_v26 = vld [vmem:[#allocation25_spill] sm:$0xff]  ;;  %v13550_v40 = vld [vmem:[#allocation99_spill] sm:$0xff]  ;;  %v13551_v48 = vld [vmem:[#allocation6_spill] sm:$0xff] }
 0x5ff   :  { %v2628_v52 = vadd.f32 %v2627_v17, %v2626_v24  ;;  %v7841_v17 = vld [vmem:[%s12865_s0 + $0x288] sm:$0xff]  ;;  %v4970_v10 = vadd.f32 %v7842_v15, %v4945_v34 }
 0x600   :  { %4991 = vxpose.xlu1.b32.cont [9/16] (narrow) %v4966_v36, 32  ;;  %v6146_v39 = vrot.slane %v7841_v17, 4  ;;  %v13545_v36 = vld [vmem:[#allocation43_spill] sm:$0xff]  ;;  %v7849_v34 = vld [vmem:[%s12865_s0 + $0x2a8] sm:$0xff]  ;;  %v13552_v17 = vld [vmem:[#allocation60_spill] sm:$0xff] }
 0x601   :  { %6232 = vxpose.xlu0.b32.cont [3/16] (narrow) %v6207_v16, 32  ;;  %v2629_v28 = vrot.slane %v2628_v52, 2  ;;  %v4946_v58 = vmul.f32 %v7731_v41, %v13545_v36  ;;  %v7733_v37 = vpop.eup %7732  ;;  %v13546_v16 = vld [vmem:[#allocation84_spill] sm:$0xff]  ;;  %v6154_v41 = vrot.slane %v7849_v34, 4 }
 0x602   :  { %v4947_v62 = vmul.f32 %v7733_v37, %v13547_v13  ;;  %v6149_v49 = vsel %vm1958_vm3, %v6146_v39, %v6148_v25 }
 0x603   :  { %v2630_v20 = vadd.f32 %v2629_v28, %v2628_v52  ;;  %v6211_v52 = vadd.f32 %v6145_v23, %v13546_v16  ;;  %v6147_v28 = vsel %vm1958_vm3, %v6144_v12, %v6146_v39  ;;  %v4971_v18 = vadd.f32 %v7844_v46, %v4946_v58  ;;  %v7851_v16 = vld [vmem:[%s12865_s0 + $0x2b8] sm:$0xff]  ;;  %v13556_v46 = vld [vmem:[#allocation53_spill] sm:$0xff] }
 0x604   :  { %4992 = vxpose.xlu1.b32.cont [10/16] (narrow) %v4967_v38, 32  ;;  %v6212_v1 = vadd.f32 %v6147_v28, %v13548_v26  ;;  %v4972_v21 = vadd.f32 %v7846_v59, %v4947_v62  ;;  %v44_v59 = vld [vmem:[%s12871_s6 + $0x18] sm:$0xff] }
 0x605   :  { %6233 = vxpose.xlu0.b32.cont [4/16] (narrow) %v6208_v47, 32  ;;  %v2631_v27 = vrot.slane %v2630_v20, 1  ;;  %v7735_v33 = vpop.eup %7734 }
 0x607   :  { %v2632_v29 = vadd.f32 %v2631_v27, %v2630_v20  ;;  %v7845_v20 = vld [vmem:[%s12865_s0 + $0x298] sm:$0xff] }
 0x608   :  { %4993 = vxpose.xlu1.b32.cont [11/16] (narrow) %v4968_v5, 32  ;;  %v6150_v9 = vrot.slane %v7845_v20, 4  ;;  %v13549_v5 = vld [vmem:[#allocation38_spill] sm:$0xff] }
 0x609   :  { %6234 = vxpose.xlu0.b32.cont [5/16] (narrow) %v6209_v53, 32  ;;  %v2635_v50 = vmul.f32 0.03125, %v2632_v29  ;;  %v4948_v35 = vmul.f32 %v7735_v33, %v13549_v5  ;;  %v6213_v53 = vadd.f32 %v6149_v49, %v13550_v40  ;;  %v7847_v29 = vld [vmem:[%s12865_s0 + $0x2a0] sm:$0xff] }
 0x60a   :  { %v6151_v2 = vsel %vm1958_vm3, %v6148_v25, %v6150_v9  ;;  %v6152_v55 = vrot.slane %v7847_v29, 4  ;;  %v41_v49 = vld [vmem:[%s12871_s6] sm:$0xff] }
 0x60b   :  { %v12430_v7 = vsub.f32 %v12323_v63, %v2635_v50  ;;  %v12433_v24 = vsub.f32 %v12345_v54, %v2635_v50  ;;  %v12436_v56 = vsub.f32 %v12367_v32, %v2635_v50  ;;  %v12439_v44 = vsub.f32 %v12381_v61, %v2635_v50  ;;  %v7848_v50 = vld [vmem:[%s12865_s0 + $0x200] sm:$0xff] }
 0x60c   :  { %4994 = vxpose.xlu1.b32.cont [12/16] (narrow) %v4969_v14, 32  ;;  %v4973_v45 = vadd.f32 %v7848_v50, %v4948_v35  ;;  %v6214_v14 = vadd.f32 %v6151_v2, %v13551_v48  ;;  %v6153_v22 = vsel %vm1958_vm3, %v6150_v9, %v6152_v55  ;;  %v45_v5 = vld [vmem:[%s12872_s7] sm:$0xff] }
 0x60d   :  { %6235 = vxpose.xlu0.b32.cont [6/16] (narrow) %v6210_v43, 32  ;;  %v2645_v63 = vmul.f32 %v12430_v7, %v12430_v7  ;;  %v2647_v54 = vmul.f32 %v12433_v24, %v12433_v24  ;;  %v2649_v32 = vmul.f32 %v12436_v56, %v12436_v56  ;;  %v2651_v61 = vmul.f32 %v12439_v44, %v12439_v44 }
 0x60e   :  { %v6215_v39 = vadd.f32 %v6153_v22, %v13552_v17  ;;  %v47_v22 = vld [vmem:[%s12872_s7 + $0x10] sm:$0xff] }
 0x60f   :  { %v2661_v19 = vsel %vm1861_vm5, %v2645_v63, 0.0  ;;  %v2662_v6 = vsel %vm1861_vm5, %v2647_v54, 0.0  ;;  %v2664_v30 = vsel %vm1861_vm5, %v2649_v32, 0.0  ;;  %v2666_v38 = vsel %vm1861_vm5, %v2651_v61, 0.0  ;;  %v7850_v32 = vld [vmem:[%s12865_s0 + $0x2b0] sm:$0xff] }
 0x610   :  { %4995 = vxpose.xlu1.b32.cont [13/16] (narrow) %v4970_v10, 32  ;;  %v2663_v57 = vadd.f32 %v2662_v6, %v2661_v19  ;;  %v6155_v54 = vsel %vm1958_vm3, %v6152_v55, %v6154_v41  ;;  %v6156_v61 = vrot.slane %v7850_v32, 4  ;;  %v13553_v10 = vld [vmem:[#allocation58_spill] sm:$0xff]  ;;  %v48_v32 = vld [vmem:[%s12872_s7 + $0x18] sm:$0xff] }
 0x611   :  { %6236 = vxpose.xlu0.b32.cont [7/16] (narrow) %v6211_v52, 32  ;;  %v6216_v36 = vadd.f32 %v6155_v54, %v13553_v10  ;;  %v6158_v52 = vrot.slane %v7851_v16, 4  ;;  %v13554_v6 = vld [vmem:[#allocation26_spill] sm:$0xff]  ;;  %v12511_v13 = vpop.trf.xlu0 }
 0x612   :  { %v2665_v47 = vadd.f32 %v2664_v30, %v2663_v57  ;;  %v6157_v37 = vsel %vm1958_vm3, %v6154_v41, %v6156_v61  ;;  %v5056_v2 = vsel %vm1861_vm5, %v12511_v13, 0.0 }
 0x613   :  { %v6217_v30 = vadd.f32 %v6157_v37, %v13554_v6  ;;  %v6159_v28 = vsel %vm1958_vm3, %v6156_v61, %v6158_v52  ;;  %v6161_v57 = vsel %vm1958_vm3, %v6158_v52, %v6160_v31 }
 0x614   :  { %4996 = vxpose.xlu1.b32.cont [14/16] (narrow) %v4971_v18, 32  ;;  %v2667_v27 = vadd.f32 %v2666_v38, %v2665_v47  ;;  %v6218_v25 = vadd.f32 %v6159_v28, %v13555_v0  ;;  %v12508_v38 = vpop.trf.xlu1  ;;  %v6219_v18 = vadd.f32 %v6161_v57, %v13556_v46 }
 0x615   :  { %6237 = vxpose.xlu0.b32.cont [8/16] (narrow) %v6212_v1, 32  ;;  %v12528_v1 = vpop.trf.xlu0 }
 0x616   :  { %v2668_v42 = vrot.slane %v2667_v27, 4  ;;  %v5057_v29 = vsel %vm1861_vm5, %v12528_v1, 0.0 }
 0x618   :  { %4997 = vxpose.xlu1.b32.cont [15/16] (narrow) %v4972_v21, 32  ;;  %v2669_v12 = vadd.f32 %v2668_v42, %v2667_v27  ;;  %v12513_v62 = vpop.trf.xlu1  ;;  %v3908_v42 = vsel %vm1861_vm5, %v12508_v38, 0.0 }
 0x619   :  { %6238 = vxpose.xlu0.b32.cont [9/16] (narrow) %v6213_v53, 32  ;;  %v3909_v40 = vsel %vm1861_vm5, %v12513_v62, 0.0  ;;  %v46_v53 = vld [vmem:[%s12872_s7 + $0x8] sm:$0xff]  ;;  %s7878_s7 = smov [#allocation2]  }
 0x61a   :  { %v2670_v43 = vrot.slane %v2669_v12, 2  ;;  %v3910_v55 = vadd.f32 %v3909_v40, %v3908_v42  ;;  %s6400_s11 = sshll.u32 %s7878_s7, 4  ;;  %s6401_s11 = int_to_ptr.vmem [resolvable:$true] %s6400_s11 }
 0x61b   :  { %s7852_s12 = scalar_lea.vmem %s6401_s11, 4096  ;;  %p7857_p1 = scmp.lt.s32.totalorder %s6401_s11, %s6401_s11 }
 0x61c   :  { %4998 = vxpose.xlu1.b32.end [16/16] (narrow) %v4973_v45, 32  ;;  %v2671_v23 = vadd.f32 %v2670_v43, %v2669_v12  ;;  %v12533_v20 = vpop.trf.xlu1  ;;  %p7853_p0 = scmp.ne.s32.totalorder %s6401_s11, %s7852_s12  ;;  %p7858_p2 = scmp.lt.s32.totalorder %s7852_s12, %s7852_s12 }
 0x61d   :  { %6239 = vxpose.xlu0.b32.cont [10/16] (narrow) %v6214_v14, 32  ;;  %v3911_v50 = vsel %vm1861_vm5, %v12533_v20, 0.0  ;;  %v5058_v14 = vadd.f32 %v5057_v29, %v5056_v2 }
 0x61e   :  { %v2672_v63 = vrot.slane %v2671_v23, 1  ;;  %v3912_v41 = vadd.f32 %v3911_v50, %v3910_v55  ;;  %p7859_p3 = por %p7858_p2, %p7857_p1 }
 0x620   :  { %v2673_v15 = vadd.f32 %v2672_v63, %v2671_v23  ;;  %p7860_p4 = pnand %p7859_p3, %p7853_p0 }
 0x621   :  { %6240 = vxpose.xlu0.b32.cont [11/16] (narrow) %v6215_v39, 32 }
 0x622   :  { %v2675_v58 = vmul.f32 0.03125, %v2673_v15 }
 0x624   :  { %v2677_v19 = vadd.f32 1e-05, %v2675_v58 }
 0x625   :  { %6241 = vxpose.xlu0.b32.cont [12/16] (narrow) %v6216_v36, 32 }
 0x626   :  { %7736 = vrsqrt.f32 %v2677_v19 }
 0x629   :  { %6242 = vxpose.xlu0.b32.cont [13/16] (narrow) %v6217_v30, 32 }
 0x62d   :  { %6243 = vxpose.xlu0.b32.cont [14/16] (narrow) %v6218_v25, 32 }
 0x631   :  { %6244 = vxpose.xlu0.b32.cont [15/16] (narrow) %v6219_v18, 32 }
 0x633   :  { %v7737_v47 = vpop.eup %7736 }
 0x634   :  { %v12517_v33 = vmul.f32 %v7737_v47, %v12430_v7  ;;  %v12520_v51 = vmul.f32 %v7737_v47, %v12433_v24  ;;  %v12523_v31 = vmul.f32 %v7737_v47, %v12436_v56  ;;  %v12526_v26 = vmul.f32 %v7737_v47, %v12439_v44  ;;  %v42_v7 = vld [vmem:[%s12871_s6 + $0x8] sm:$0xff]  ;;  %v12539_v24 = vpop.trf.xlu0  ;;  %v12541_v56 = vpop.trf.xlu1  ;;  %v43_v44 = vld [vmem:[%s12871_s6 + $0x10] sm:$0xff] }
 0x635   :  { %6245 = vxpose.xlu0.b32.end [16/16] (narrow) %v12184_v8, 32  ;;  %v13557_v8 = vmov 0   ;;  %v5059_v34 = vsel %vm1861_vm5, %v12539_v24, 0.0  ;;  %v3913_v23 = vsel %vm1861_vm5, %v12541_v56, 0.0 }
 0x636   :  { %v5060_v63 = vadd.f32 %v5059_v34, %v5058_v14  ;;  %v3914_v36 = vadd.f32 %v3913_v23, %v3912_v41 }
 0x638   :  { %v12546_v9 = vpop.trf.xlu1  ;;  %v12548_v27 = vpop.trf.xlu0  ;;  %v3915_v19 = vrot.slane %v3914_v36, 4 }
 0x639   :  { %v6303_v43 = vsel %vm1861_vm5, %v12546_v9, 0.0  ;;  %v5061_v15 = vsel %vm1861_vm5, %v12548_v27, 0.0 }
 0x63a   :  { %7128 = vset.pattern.permute.xlu1 %v13557_v8  ;;  %v5062_v16 = vadd.f32 %v5061_v15, %v5060_v63  ;;  %v3916_v57 = vadd.f32 %v3915_v19, %v3914_v36 }
 0x63b   :  { %2690 = vperm.xlu1 %7128, %v41_v49  }
 0x63c   :  { %v12553_v21 = vpop.trf.xlu0  ;;  %v12558_v35 = vpop.trf.xlu1  ;;  %v5063_v28 = vrot.slane %v5062_v16, 4 }
 0x63d   :  { %v6304_v48 = vsel %vm1861_vm5, %v12558_v35, 0.0 }
 0x63e   :  { %v6305_v17 = vadd.f32 %v6304_v48, %v6303_v43  ;;  %v5064_v18 = vadd.f32 %v5063_v28, %v5062_v16 }
 0x63f   :  { %2695 = vperm.xlu1 %7128, %v42_v7   ;;  %v3917_v7 = vrot.slane %v3916_v57, 2 }
 0x640   :  { %v12571_v12 = vpop.trf.xlu0  ;;  %v12575_v45 = vpop.trf.xlu1 }
 0x641   :  { %v6306_v39 = vsel %vm1861_vm5, %v12575_v45, 0.0  ;;  %v3899_v10 = vadd.f32 %v12571_v12, %v12553_v21 }
 0x642   :  { %v6307_v58 = vadd.f32 %v6306_v39, %v6305_v17 }
 0x643   :  { %2700 = vperm.xlu1 %7128, %v43_v44  }
 0x644   :  { %v12590_v54 = vpop.trf.xlu0  ;;  %v12595_v61 = vpop.trf.xlu1 }
 0x645   :  { %v6308_v37 = vsel %vm1861_vm5, %v12595_v61, 0.0  ;;  %v3900_v52 = vadd.f32 %v3899_v10, %v12590_v54 }
 0x646   :  { %v6309_v30 = vadd.f32 %v6308_v37, %v6307_v58 }
 0x647   :  { %2705 = vperm.xlu1 %7128, %v44_v59  }
 0x648   :  { %v12604_v6 = vpop.trf.xlu0  ;;  %v6310_v46 = vrot.slane %v6309_v30, 4 }
 0x649   :  { %v3901_v25 = vadd.f32 %v3900_v52, %v12604_v6 }
 0x64a   :  { %v6311_v59 = vadd.f32 %v6310_v46, %v6309_v30 }
 0x64b   :  { %2718 = vperm.xlu1 %7128, %v45_v5   ;;  %v3902_v49 = vrot.slane %v3901_v25, 4  ;;  %v5065_v5 = vrot.slane %v5064_v18, 2 }
 0x64c   :  { %v6312_v29 = vrot.slane %v6311_v59, 2 }
 0x64d   :  { %v3903_v40 = vadd.f32 %v3902_v49, %v3901_v25  ;;  %v5066_v55 = vadd.f32 %v5065_v5, %v5064_v18 }
 0x64e   :  { %v6313_v14 = vadd.f32 %v6312_v29, %v6311_v59 }
 0x64f   :  { %2723 = vperm.xlu1 %7128, %v46_v53   ;;  %v3918_v53 = vadd.f32 %v3917_v7, %v3916_v57 }
 0x650   :  { %v6314_v39 = vrot.slane %v6313_v14, 1 }
 0x651   :  { %v3919_v43 = vrot.slane %v3918_v53, 1 }
 0x652   :  { %v6315_v58 = vadd.f32 %v6314_v39, %v6313_v14 }
 0x653   :  { %2728 = vperm.xlu1 %7128, %v47_v22   ;;  %v5067_v22 = vrot.slane %v5066_v55, 1  ;;  %v3920_v23 = vadd.f32 %v3919_v43, %v3918_v53 }
 0x654   :  { %v6317_v25 = vmul.f32 0.03125, %v6315_v58 }
 0x655   :  { %v5068_v63 = vadd.f32 %v5067_v22, %v5066_v55  ;;  %v3922_v10 = vmul.f32 0.03125, %v3920_v23 }
 0x656   :  { %v12681_v14 = vsub.f32 %v12575_v45, %v6317_v25 }
 0x657   :  { %2733 = vperm.xlu1 %7128, %v48_v32   ;;  %v5070_v37 = vmul.f32 0.03125, %v5068_v63  ;;  %v12621_v19 = vsub.f32 %v12508_v38, %v3922_v10  ;;  %v12624_v30 = vsub.f32 %v12513_v62, %v3922_v10  ;;  %v12629_v57 = vsub.f32 %v12533_v20, %v3922_v10 }
 0x658   :  { %v12635_v49 = vsub.f32 %v12541_v56, %v3922_v10  ;;  %v12653_v56 = vsub.f32 %v12558_v35, %v6317_v25 }
 0x659   :  { %v12632_v46 = vsub.f32 %v12511_v13, %v5070_v37  ;;  %v12638_v7 = vsub.f32 %v12528_v1, %v5070_v37  ;;  %v3932_v62 = vmul.f32 %v12621_v19, %v12621_v19  ;;  %v12645_v20 = vsub.f32 %v12539_v24, %v5070_v37 }
 0x65a   :  { %v12650_v13 = vsub.f32 %v12546_v9, %v6317_v25  ;;  %v3936_v5 = vmul.f32 %v12629_v57, %v12629_v57  ;;  %v3938_v24 = vmul.f32 %v12635_v49, %v12635_v49 }
 0x65b   :  { %v5082_v9 = vmul.f32 %v12638_v7, %v12638_v7  ;;  %v3948_v29 = vsel %vm1861_vm5, %v3932_v62, 0.0  ;;  %v5084_v43 = vmul.f32 %v12645_v20, %v12645_v20 }
 0x65c   :  { %v12606_v0 = vpop.trf.xlu1 }
 0x65d   :  { %v5097_v45 = vsel %vm1861_vm5, %v5082_v9, 0.0 }
 0x65e   :  { %7129 = vset.pattern.permute.xlu0 %v13557_v8  ;;  %v3904_v8 = vrot.slane %v3903_v40, 2 }
 0x660   :  { %v12610_v47 = vpop.trf.xlu1  ;;  %v3905_v41 = vadd.f32 %v3904_v8, %v3903_v40  ;;  %v5080_v40 = vmul.f32 %v12632_v46, %v12632_v46  ;;  %v12674_v8 = vsub.f32 %v12548_v27, %v5070_v37 }
 0x661   :  { %v5047_v44 = vadd.f32 %v12610_v47, %v12606_v0 }
 0x662   :  { %v3906_v15 = vrot.slane %v3905_v41, 1  ;;  %v5096_v27 = vsel %vm1861_vm5, %v5080_v40, 0.0 }
 0x664   :  { %v12614_v42 = vpop.trf.xlu1  ;;  %v3907_v52 = vadd.f32 %v3906_v15, %v3905_v41  ;;  %v12705_v15 = vsub.f32 %v12595_v61, %v6317_v25 }
 0x665   :  { %v5048_v2 = vadd.f32 %v5047_v44, %v12614_v42  ;;  %v3934_v44 = vmul.f32 %v12624_v30, %v12624_v30 }
 0x666   :  { %v3921_v38 = vmul.f32 0.03125, %v3907_v52 }
 0x667   :  { %v3949_v55 = vsel %vm1861_vm5, %v3934_v44, 0.0 }
 0x668   :  { %v12617_v50 = vpop.trf.xlu1  ;;  %v12669_v35 = vsub.f32 %v12571_v12, %v3921_v38  ;;  %v6329_v12 = vmul.f32 %v12653_v56, %v12653_v56 }
 0x669   :  { %v5049_v48 = vadd.f32 %v5048_v2, %v12617_v50  ;;  %v12666_v2 = vsub.f32 %v12553_v21, %v3921_v38  ;;  %v6327_v21 = vmul.f32 %v12650_v13, %v12650_v13 }
 0x66a   :  { %v3933_v63 = vmul.f32 %v12669_v35, %v12669_v35  ;;  %v6344_v58 = vsel %vm1861_vm5, %v6329_v12, 0.0 }
 0x66b   :  { %v5050_v34 = vrot.slane %v5049_v48, 4  ;;  %v3931_v39 = vmul.f32 %v12666_v2, %v12666_v2 }
 0x66d   :  { %v5051_v17 = vadd.f32 %v5050_v34, %v5049_v48  ;;  %v3951_v34 = vsel %vm1861_vm5, %v3936_v5, 0.0  ;;  %v3939_v44 = vadd.f32 %v3933_v63, %v3931_v39  ;;  %v3953_v5 = vsel %vm1861_vm5, %v3938_v24, 0.0 }
 0x66f   :  { %v5052_v32 = vrot.slane %v5051_v17, 2 }
 0x671   :  { %v5053_v36 = vadd.f32 %v5052_v32, %v5051_v17  ;;  %v12698_v17 = vsub.f32 %v12590_v54, %v3921_v38  ;;  %v3950_v32 = vadd.f32 %v3949_v55, %v3948_v29  ;;  %v6331_v54 = vmul.f32 %v12681_v14, %v12681_v14 }
 0x673   :  { %v5054_v16 = vrot.slane %v5053_v36, 1  ;;  %v3935_v62 = vmul.f32 %v12698_v17, %v12698_v17  ;;  %v3952_v9 = vadd.f32 %v3951_v34, %v3950_v32  ;;  %v6346_v29 = vsel %vm1861_vm5, %v6331_v54, 0.0 }
 0x675   :  { %v12626_v28 = vpop.trf.xlu0  ;;  %v5055_v18 = vadd.f32 %v5054_v16, %v5053_v36  ;;  %v6343_v36 = vsel %vm1861_vm5, %v6327_v21, 0.0  ;;  %v5098_v16 = vadd.f32 %v5097_v45, %v5096_v27  ;;  %v3954_v45 = vadd.f32 %v3953_v5, %v3952_v9 }
 0x676   :  { %v6345_v40 = vadd.f32 %v6344_v58, %v6343_v36 }
 0x677   :  { %v5069_v53 = vmul.f32 0.03125, %v5055_v18  ;;  %v12722_v18 = vsub.f32 %v12604_v6, %v3921_v38  ;;  %v3955_v58 = vrot.slane %v3954_v45, 4 }
 0x678   :  { %v6347_v27 = vadd.f32 %v6346_v29, %v6345_v40 }
 0x679   :  { %v12647_v59 = vpop.trf.xlu0  ;;  %v12691_v41 = vsub.f32 %v12606_v0, %v5069_v53  ;;  %v12694_v23 = vsub.f32 %v12610_v47, %v5069_v53  ;;  %v5086_v0 = vmul.f32 %v12674_v8, %v12674_v8  ;;  %v5099_v47 = vsel %vm1861_vm5, %v5084_v43, 0.0 }
 0x67a   :  { %v6294_v1 = vadd.f32 %v12647_v59, %v12626_v28  ;;  %v12715_v52 = vsub.f32 %v12614_v42, %v5069_v53  ;;  %v6333_v42 = vmul.f32 %v12705_v15, %v12705_v15  ;;  %v5100_v43 = vadd.f32 %v5099_v47, %v5098_v16 }
 0x67b   :  { %v5079_v61 = vmul.f32 %v12691_v41, %v12691_v41  ;;  %v5081_v25 = vmul.f32 %v12694_v23, %v12694_v23  ;;  %v12731_v21 = vsub.f32 %v12617_v50, %v5069_v53  ;;  %v5101_v12 = vsel %vm1861_vm5, %v5086_v0, 0.0 }
 0x67c   :  { %v5083_v6 = vmul.f32 %v12715_v52, %v12715_v52  ;;  %v3937_v24 = vmul.f32 %v12722_v18, %v12722_v18  ;;  %v6348_v39 = vsel %vm1861_vm5, %v6333_v42, 0.0  ;;  %v5102_v32 = vadd.f32 %v5101_v12, %v5100_v43 }
 0x67d   :  { %v12678_v48 = vpop.trf.xlu0  ;;  %v5087_v38 = vadd.f32 %v5081_v25, %v5079_v61  ;;  %v5085_v50 = vmul.f32 %v12731_v21, %v12731_v21  ;;  %v6349_v36 = vadd.f32 %v6348_v39, %v6347_v27 }
 0x67e   :  { %v6295_v22 = vadd.f32 %v6294_v1, %v12678_v48 }
 0x67f   :  { %v5088_v53 = vadd.f32 %v5087_v38, %v5083_v6 }
 0x681   :  { %v6249_v10 = vpop.trf.xlu0  ;;  %v5089_v16 = vadd.f32 %v5088_v53, %v5085_v50 }
 0x682   :  { %v6296_v37 = vadd.f32 %v6295_v22, %v6249_v10  ;;  %v3940_v22 = vadd.f32 %v3939_v44, %v3935_v62  ;;  %v6350_v62 = vrot.slane %v6349_v36, 4  ;;  %v3956_v44 = vadd.f32 %v3955_v58, %v3954_v45 }
 0x683   :  { %v5090_v42 = vrot.slane %v5089_v16, 4 }
 0x684   :  { %v6297_v1 = vrot.slane %v6296_v37, 4  ;;  %v3941_v47 = vadd.f32 %v3940_v22, %v3937_v24  ;;  %v6351_v38 = vadd.f32 %v6350_v62, %v6349_v36 }
 0x685   :  { %v5091_v22 = vadd.f32 %v5090_v42, %v5089_v16 }
 0x686   :  { %v6298_v55 = vadd.f32 %v6297_v1, %v6296_v37  ;;  %v5103_v37 = vrot.slane %v5102_v32, 4  ;;  %v3942_v61 = vrot.slane %v3941_v47, 4  ;;  %v6352_v27 = vrot.slane %v6351_v38, 2 }
 0x688   :  { %v6299_v34 = vrot.slane %v6298_v55, 2  ;;  %v5104_v9 = vadd.f32 %v5103_v37, %v5102_v32  ;;  %v5092_v32 = vrot.slane %v5091_v22, 2 }
 0x68a   :  { %v6300_v63 = vadd.f32 %v6299_v34, %v6298_v55  ;;  %v3943_v55 = vadd.f32 %v3942_v61, %v3941_v47  ;;  %v5105_v24 = vrot.slane %v5104_v9, 2  ;;  %v6353_v47 = vadd.f32 %v6352_v27, %v6351_v38 }
 0x68c   :  { %v6301_v54 = vrot.slane %v6300_v63, 1 }
 0x68e   :  { %v6302_v0 = vadd.f32 %v6301_v54, %v6300_v63  ;;  %v5106_v63 = vadd.f32 %v5105_v24, %v5104_v9 }
 0x690   :  { %v6316_v25 = vmul.f32 0.03125, %v6302_v0  ;;  %v5107_v36 = vrot.slane %v5106_v63, 1  ;;  %v5093_v0 = vadd.f32 %v5092_v32, %v5091_v22 }
 0x692   :  { %v12742_v1 = vsub.f32 %v12626_v28, %v6316_v25  ;;  %v12745_v5 = vsub.f32 %v12647_v59, %v6316_v25  ;;  %v12748_v40 = vsub.f32 %v12678_v48, %v6316_v25  ;;  %v12750_v29 = vsub.f32 %v6249_v10, %v6316_v25 }
 0x693   :  { %v3957_v59 = vrot.slane %v3956_v44, 2  ;;  %v3944_v10 = vrot.slane %v3943_v55, 2  ;;  %v6354_v25 = vrot.slane %v6353_v47, 1  ;;  %v5094_v16 = vrot.slane %v5093_v0, 1 }
 0x694   :  { %v6326_v43 = vmul.f32 %v12742_v1, %v12742_v1  ;;  %v6328_v6 = vmul.f32 %v12745_v5, %v12745_v5  ;;  %v6330_v28 = vmul.f32 %v12748_v40, %v12748_v40  ;;  %v6332_v48 = vmul.f32 %v12750_v29, %v12750_v29 }
 0x695   :  { %v3958_v45 = vadd.f32 %v3957_v59, %v3956_v44  ;;  %v3945_v50 = vadd.f32 %v3944_v10, %v3943_v55 }
 0x696   :  { %v6334_v12 = vadd.f32 %v6328_v6, %v6326_v43  ;;  %v5108_v43 = vadd.f32 %v5107_v36, %v5106_v63 }
 0x697   :  { %v3959_v54 = vrot.slane %v3958_v45, 1  ;;  %v3946_v37 = vrot.slane %v3945_v50, 1 }
 0x698   :  { %v6335_v34 = vadd.f32 %v6334_v12, %v6330_v28  ;;  %v6355_v28 = vadd.f32 %v6354_v25, %v6353_v47  ;;  %v5110_v9 = vmul.f32 0.03125, %v5108_v43 }
 0x699   :  { %v3960_v62 = vadd.f32 %v3959_v54, %v3958_v45  ;;  %v3947_v6 = vadd.f32 %v3946_v37, %v3945_v50 }
 0x69a   :  { %v6336_v39 = vadd.f32 %v6335_v34, %v6332_v48  ;;  %v5095_v48 = vadd.f32 %v5094_v16, %v5093_v0  ;;  %v6357_v38 = vmul.f32 0.03125, %v6355_v28  ;;  %v5112_v34 = vadd.f32 1e-05, %v5110_v9 }
 0x69b   :  { %v3962_v59 = vmul.f32 0.03125, %v3960_v62  ;;  %v3961_v12 = vmul.f32 0.03125, %v3947_v6 }
 0x69c   :  { %v6337_v53 = vrot.slane %v6336_v39, 4  ;;  %v5109_v22 = vmul.f32 0.03125, %v5095_v48 }
 0x69d   :  { %v3964_v24 = vadd.f32 1e-05, %v3962_v59  ;;  %v3963_v27 = vadd.f32 1e-05, %v3961_v12 }
 0x69e   :  { %v6338_v58 = vadd.f32 %v6337_v53, %v6336_v39  ;;  %v6359_v39 = vadd.f32 1e-05, %v6357_v38  ;;  %v5111_v63 = vadd.f32 1e-05, %v5109_v22 }
 0x69f   :  { %7738 = vrsqrt.f32 %v3964_v24 }
 0x6a0   :  { %v6339_v61 = vrot.slane %v6338_v58, 2  ;;  %7740 = vrsqrt.f32 %v5112_v34 }
 0x6a1   :  { %7742 = vrsqrt.f32 %v3963_v27 }
 0x6a2   :  { %v6340_v42 = vadd.f32 %v6339_v61, %v6338_v58  ;;  %7744 = vrsqrt.f32 %v6359_v39 }
 0x6a4   :  { %v6341_v44 = vrot.slane %v6340_v42, 1 }
 0x6a6   :  { %v6342_v55 = vadd.f32 %v6341_v44, %v6340_v42 }
 0x6a8   :  { %v6356_v10 = vmul.f32 0.03125, %v6342_v55 }
 0x6aa   :  { %v6358_v45 = vadd.f32 1e-05, %v6356_v10 }
 0x6ac   :  { %7746 = vrsqrt.f32 %v6358_v45  ;;  %v7739_v53 = vpop.eup %7738 }
 0x6ad   :  { %7748 = vrsqrt.f32 %v5111_v63  ;;  %v7741_v47 = vpop.eup %7740  ;;  %v3968_v37 = vmul.f32 %v7739_v53, %v12621_v19  ;;  %v3970_v61 = vmul.f32 %v7739_v53, %v12624_v30  ;;  %v12767_v25 = vmul.f32 %v7739_v53, %v12629_v57 }
 0x6ae   :  { %v7743_v54 = vpop.eup %7742  ;;  %v12770_v62 = vmul.f32 %v7739_v53, %v12635_v49  ;;  %v5116_v16 = vmul.f32 %v7741_v47, %v12632_v46  ;;  %v5118_v42 = vmul.f32 %v7741_v47, %v12638_v7  ;;  %v12775_v6 = vmul.f32 %v7741_v47, %v12645_v20 }
 0x6af   :  { %v7745_v58 = vpop.eup %7744  ;;  %v12778_v28 = vmul.f32 %v7741_v47, %v12674_v8  ;;  %v3967_v19 = vmul.f32 %v7743_v54, %v12666_v2  ;;  %v3969_v30 = vmul.f32 %v7743_v54, %v12669_v35  ;;  %v3971_v57 = vmul.f32 %v7743_v54, %v12698_v17 }
 0x6b0   :  { %v12784_v49 = vmul.f32 %v7743_v54, %v12722_v18  ;;  %v6363_v44 = vmul.f32 %v7745_v58, %v12650_v13  ;;  %v6365_v46 = vmul.f32 %v7745_v58, %v12653_v56  ;;  %v12789_v7 = vmul.f32 %v7745_v58, %v12681_v14 }
 0x6b1   :  { %v12795_v2 = vmul.f32 %v7745_v58, %v12705_v15 }
 0x6b6   :  { %v2691_v32 = vpop.permute.xlu1 %2690 }
 0x6b7   :  { %v2708_v56 = vmul.f32 %v2691_v32, %v12348_v11  ;;  %v2709_v14 = vmul.f32 %v2691_v32, %v12517_v33  ;;  %v3976_v59 = vmul.f32 %v3968_v37, %v2691_v32  ;;  %v5124_v48 = vmul.f32 %v5116_v16, %v2691_v32 }
 0x6b8   :  { %v3975_v55 = vmul.f32 %v3967_v19, %v2691_v32 }
 0x6b9   :  { %v7747_v0 = vpop.eup %7746 }
 0x6ba   :  { %v12760_v50 = vpop.permute.xlu1 %2695  ;;  %v7749_v43 = vpop.eup %7748  ;;  %v6362_v8 = vmul.f32 %v7747_v0, %v12742_v1  ;;  %v6371_v1 = vmul.f32 %v6363_v44, %v2691_v32  ;;  %v6366_v63 = vmul.f32 %v7747_v0, %v12748_v40 }
 0x6bb   :  { %v5115_v35 = vmul.f32 %v7749_v43, %v12691_v41  ;;  %v5117_v17 = vmul.f32 %v7749_v43, %v12694_v23  ;;  %v5119_v18 = vmul.f32 %v7749_v43, %v12715_v52  ;;  %v12801_v13 = vmul.f32 %v7749_v43, %v12731_v21 }
 0x6bc   :  { %v2710_v15 = vmul.f32 %v12760_v50, %v12351_v3  ;;  %v2711_v41 = vmul.f32 %v12760_v50, %v12520_v51  ;;  %v6364_v52 = vmul.f32 %v7747_v0, %v12745_v5  ;;  %v6370_v21 = vmul.f32 %v6362_v8, %v2691_v32 }
 0x6bd   :  { %v5123_v9 = vmul.f32 %v5115_v35, %v2691_v32  ;;  %v3978_v27 = vmul.f32 %v3970_v61, %v12760_v50  ;;  %v5125_v39 = vmul.f32 %v5117_v17, %v12760_v50  ;;  %v5126_v3 = vmul.f32 %v5118_v42, %v12760_v50 }
 0x6be   :  { %v12762_v36 = vpop.permute.xlu1 %2700  ;;  %v3977_v51 = vmul.f32 %v3969_v30, %v12760_v50  ;;  %v6373_v5 = vmul.f32 %v6365_v46, %v12760_v50  ;;  %v6368_v32 = vmul.f32 %v7747_v0, %v12750_v29  ;;  %v6372_v53 = vmul.f32 %v6364_v52, %v12760_v50 }
 0x6bf   :  { %v2712_v19 = vmul.f32 %v12762_v36, %v12354_v60  ;;  %v2713_v30 = vmul.f32 %v12762_v36, %v12523_v31  ;;  %v3979_v40 = vmul.f32 %v3971_v57, %v12762_v36  ;;  %v3980_v29 = vmul.f32 %v12767_v25, %v12762_v36 }
 0x6c0   :  { %v5127_v50 = vmul.f32 %v5119_v18, %v12762_v36  ;;  %v5128_v0 = vmul.f32 %v12775_v6, %v12762_v36  ;;  %v6375_v60 = vmul.f32 %v12789_v7, %v12762_v36  ;;  %v6374_v31 = vmul.f32 %v6366_v63, %v12762_v36 }
 0x6c2   :  { %v12791_v20 = vpop.permute.xlu1 %2705 }
 0x6c3   :  { %v3982_v7 = vmul.f32 %v12770_v62, %v12791_v20  ;;  %v2714_v36 = vmul.f32 %v12791_v20, %v12357_v4  ;;  %v5129_v62 = vmul.f32 %v12801_v13, %v12791_v20  ;;  %v6377_v4 = vmul.f32 %v12795_v2, %v12791_v20 }
 0x6c6   :  { %v2719_v23 = vpop.permute.xlu1 %2718 }
 0x6c7   :  { %v2736_v12 = vadd.f32 %v2719_v23, %v2708_v56  ;;  %v2737_v38 = vadd.f32 %v2719_v23, %v2709_v14  ;;  %v3983_v11 = vadd.f32 %v3975_v55, %v2719_v23  ;;  %v3984_v24 = vadd.f32 %v3976_v59, %v2719_v23 }
 0x6c8   :  { %v5131_v33 = vadd.f32 %v5123_v9, %v2719_v23  ;;  %v5132_v10 = vadd.f32 %v5124_v48, %v2719_v23  ;;  %v6379_v34 = vadd.f32 %v6371_v1, %v2719_v23  ;;  %v6378_v22 = vadd.f32 %v6370_v21, %v2719_v23 }
 0x6c9   :  { %2744 = vst [vmem:[#allocation2] sm:$0xff] %v2736_v12  ;;  %2745 = vst.msk [vmem:[#allocation2 + $0x8] sm:$0xff] %vm1861_vm5, %v2737_v38  ;;  %v2715_v56 = vmul.f32 %v12791_v20, %v12526_v26  ;;  %v3981_v14 = vmul.f32 %v12784_v49, %v12791_v20  ;;  %v6376_v59 = vmul.f32 %v6368_v32, %v12791_v20 }
 0x6ca   :  { %3992 = vst [vmem:[#allocation2 + $0x40] sm:$0xff] %v3983_v11  ;;  %3993 = vst.msk [vmem:[#allocation2 + $0x48] sm:$0xff] %vm1861_vm5, %v3984_v24  ;;  %v2724_v45 = vpop.permute.xlu1 %2723  ;;  %v5130_v49 = vmul.f32 %v12778_v28, %v12791_v20 }
 0x6cb   :  { %5140 = vst [vmem:[#allocation2 + $0x80] sm:$0xff] %v5131_v33  ;;  %5141 = vst.msk [vmem:[#allocation2 + $0x88] sm:$0xff] %vm1861_vm5, %v5132_v10  ;;  %v2738_v47 = vadd.f32 %v2724_v45, %v2710_v15  ;;  %v2739_v54 = vadd.f32 %v2724_v45, %v2711_v41  ;;  %v3985_v58 = vadd.f32 %v3977_v51, %v2724_v45 }
 0x6cc   :  { %6388 = vst.msk [vmem:[#allocation2 + $0xc8] sm:$0xff] %vm1861_vm5, %v6379_v34  ;;  %6387 = vst [vmem:[#allocation2 + $0xc0] sm:$0xff] %v6378_v22  ;;  %v3986_v37 = vadd.f32 %v3978_v27, %v2724_v45  ;;  %v5133_v61 = vadd.f32 %v5125_v39, %v2724_v45  ;;  %v5134_v43 = vadd.f32 %v5126_v3, %v2724_v45 }
 0x6cd   :  { %v6381_v16 = vadd.f32 %v6373_v5, %v2724_v45  ;;  %v6380_v42 = vadd.f32 %v6372_v53, %v2724_v45  ;;  %2746 = vst [vmem:[#allocation2 + $0x10] sm:$0xff] %v2738_v47  ;;  %2747 = vst.msk [vmem:[#allocation2 + $0x18] sm:$0xff] %vm1861_vm5, %v2739_v54 }
 0x6ce   :  { %3994 = vst [vmem:[#allocation2 + $0x50] sm:$0xff] %v3985_v58  ;;  %3995 = vst.msk [vmem:[#allocation2 + $0x58] sm:$0xff] %vm1861_vm5, %v3986_v37  ;;  %v2729_v25 = vpop.permute.xlu1 %2728 }
 0x6cf   :  { %5142 = vst [vmem:[#allocation2 + $0x90] sm:$0xff] %v5133_v61  ;;  %5143 = vst.msk [vmem:[#allocation2 + $0x98] sm:$0xff] %vm1861_vm5, %v5134_v43  ;;  %v2740_v57 = vadd.f32 %v2729_v25, %v2712_v19  ;;  %v2741_v44 = vadd.f32 %v2729_v25, %v2713_v30  ;;  %v3987_v46 = vadd.f32 %v3979_v40, %v2729_v25 }
 0x6d0   :  { %6390 = vst.msk [vmem:[#allocation2 + $0xd8] sm:$0xff] %vm1861_vm5, %v6381_v16  ;;  %6389 = vst [vmem:[#allocation2 + $0xd0] sm:$0xff] %v6380_v42  ;;  %v3988_v8 = vadd.f32 %v3980_v29, %v2729_v25  ;;  %v5135_v35 = vadd.f32 %v5127_v50, %v2729_v25  ;;  %v5136_v17 = vadd.f32 %v5128_v0, %v2729_v25 }
 0x6d1   :  { %v6382_v18 = vadd.f32 %v6374_v31, %v2729_v25  ;;  %v6383_v6 = vadd.f32 %v6375_v60, %v2729_v25  ;;  %2748 = vst [vmem:[#allocation2 + $0x20] sm:$0xff] %v2740_v57  ;;  %2749 = vst.msk [vmem:[#allocation2 + $0x28] sm:$0xff] %vm1861_vm5, %v2741_v44 }
 0x6d2   :  { %3996 = vst [vmem:[#allocation2 + $0x60] sm:$0xff] %v3987_v46  ;;  %3997 = vst.msk [vmem:[#allocation2 + $0x68] sm:$0xff] %vm1861_vm5, %v3988_v8  ;;  %v2734_v26 = vpop.permute.xlu1 %2733 }
 0x6d3   :  { %5144 = vst [vmem:[#allocation2 + $0xa0] sm:$0xff] %v5135_v35  ;;  %5145 = vst.msk [vmem:[#allocation2 + $0xa8] sm:$0xff] %vm1861_vm5, %v5136_v17  ;;  %v2742_v9 = vadd.f32 %v2734_v26, %v2714_v36  ;;  %v2743_v48 = vadd.f32 %v2734_v26, %v2715_v56  ;;  %v3989_v1 = vadd.f32 %v3981_v14, %v2734_v26 }
 0x6d4   :  { %6391 = vst [vmem:[#allocation2 + $0xe0] sm:$0xff] %v6382_v18  ;;  %6392 = vst.msk [vmem:[#allocation2 + $0xe8] sm:$0xff] %vm1861_vm5, %v6383_v6  ;;  %v3990_v55 = vadd.f32 %v3982_v7, %v2734_v26  ;;  %v5137_v15 = vadd.f32 %v5129_v62, %v2734_v26  ;;  %v5138_v41 = vadd.f32 %v5130_v49, %v2734_v26 }
 0x6d5   :  { %v6384_v23 = vadd.f32 %v6376_v59, %v2734_v26  ;;  %v6385_v52 = vadd.f32 %v6377_v4, %v2734_v26  ;;  %2750 = vst [vmem:[#allocation2 + $0x30] sm:$0xff] %v2742_v9  ;;  %2751 = vst.msk [vmem:[#allocation2 + $0x38] sm:$0xff] %vm1861_vm5, %v2743_v48 }
 0x6d6   :  { %3998 = vst [vmem:[#allocation2 + $0x70] sm:$0xff] %v3989_v1  ;;  %3999 = vst.msk [vmem:[#allocation2 + $0x78] sm:$0xff] %vm1861_vm5, %v3990_v55 }
 0x6d7   :  { %5146 = vst [vmem:[#allocation2 + $0xb0] sm:$0xff] %v5137_v15  ;;  %5147 = vst.msk [vmem:[#allocation2 + $0xb8] sm:$0xff] %vm1861_vm5, %v5138_v41 }
 0x6d8   :  { %6393 = vst [vmem:[#allocation2 + $0xf0] sm:$0xff] %v6384_v23  ;;  %6394 = vst.msk [vmem:[#allocation2 + $0xf8] sm:$0xff] %vm1861_vm5, %v6385_v52 }
 0x6d9   :  { %7863 = shalt.err (!%p7860_p4)
}
 0x6da   :  { %s7879_s1 = smov 256   ;;  %s7880_s14 = smov 16  }
 0x6db   :  { %6406 = dma.vmem_to_hbm [thread:$0]  %s6401_s11, 4096, %s12873_s8, [#allocation3], %s7879_s1, %s7879_s1, %s7880_s14  }
 0x6dc   :  { %7872 = dma.done.wait [#allocation3], 4096  }
 0x6dd   :  { %7873 = vsyncadd [#allocation3], 4294963200 }
 0x6de   :  { %6410 = vsyncpa [#allocation3], 1 }

</bundles_post_ra>
